<compile_context>
chip_gen: v6e
topology: v6e:2x2x1
jax: 0.10.0
libtpu: 0.0.40
codegen_flags: <defaults>
</compile_context>

<pallas_src>
import jax
import jax.numpy as jnp
from jax import lax
from jax.experimental import pallas as pl
from jax.experimental.pallas import tpu as pltpu

BN_EPS = 1e-5
K = 5           # conv kernel size
S = 2           # conv stride

# Geometry implied by Linear(512, 2): 54 -> 25 -> 11 -> 4, and 32*4*4 = 512.
H0 = 54
C0, C1, C2, C3 = 4, 16, 32, 32
H1, H2, H3 = 25, 11, 4
NUM_ACTIONS = 2


def _osz(n):
    return (n - K) // S + 1


# ------------------------------ Pallas kernel ------------------------------ #
def _conv_bn_relu(a_bf16, gh_ref, r_ref, fold_ref, bcast_ref, gamma_ref, beta_ref, acc_ref):
    """One conv(5x5, stride 2) + BatchNorm(batch stats) + ReLU, fully in VMEM.

    a_bf16:    (B*hin, win*cin) bf16 value; rows = (b, h), lanes = (w, c).
    gh_ref:    (K, B*ho, B*hin) bf16 0/1 row-gather matrices (precomputed, block-diag in batch).
    r_ref:     (K, win*cin, wout*cout) bf16 stride-packed conv weights (precomputed).
    fold_ref:  (wout*cout, cout) f32 0/1: sums the wout lane blocks per channel.
    bcast_ref: (cout, wout*cout) f32 0/1: broadcasts per-channel values across lane blocks.
    acc_ref:   (B*ho, wout*cout) f32 VMEM scratch accumulator.
    Returns (B*ho, wout*cout) f32 activation with the same (rows, lanes) convention.
    """
    # Conv: 5 row-gather matmuls + 5 accumulating weight matmuls, acc kept in VMEM scratch.
    for i in range(K):
        xi = jnp.dot(gh_ref[i], a_bf16,
                     preferred_element_type=jnp.float32).astype(jnp.bfloat16)
        upd = jnp.dot(xi, r_ref[i], preferred_element_type=jnp.float32)
        if i == 0:
            acc_ref[...] = upd
        else:
            acc_ref[...] += upd
    acc = acc_ref[...]

    # BatchNorm2d, training mode: per-channel batch statistics, single pass (sum & sum-sq),
    # wout-fold and lane-broadcast done with tiny MXU matmuls against precomputed 0/1 maps.
    wo = fold_ref.shape[0] // fold_ref.shape[1]
    m = float(acc.shape[0] * wo)                              # B * ho * wo
    s1 = jnp.sum(acc, axis=0, keepdims=True)                  # (1, wo*cout)
    s2 = jnp.sum(acc * acc, axis=0, keepdims=True)
    mean = jnp.dot(s1, fold_ref[...], preferred_element_type=jnp.float32) / m   # (1, cout)
    ex2 = jnp.dot(s2, fold_ref[...], preferred_element_type=jnp.float32) / m
    var = jnp.maximum(ex2 - mean * mean, 0.0)                 # biased var, clamped >= 0
    scale = gamma_ref[...] * lax.rsqrt(var + BN_EPS)          # (1, cout)
    shift = beta_ref[...] - mean * scale
    scale_t = jnp.dot(scale, bcast_ref[...], preferred_element_type=jnp.float32)
    shift_t = jnp.dot(shift, bcast_ref[...], preferred_element_type=jnp.float32)
    return jnp.maximum(acc * scale_t + shift_t, 0.0)          # fused BN + ReLU


def _dqn_kernel(a0_ref,
                gh1_ref, r1_ref, fold1_ref, bc1_ref, g1_ref, be1_ref,
                gh2_ref, r2_ref, fold2_ref, bc2_ref, g2_ref, be2_ref,
                gh3_ref, r3_ref, fold3_ref, bc3_ref, g3_ref, be3_ref,
                wlt_ref, hmask_ref, afold_ref, rowfold_ref, bl_ref,
                out_ref,
                acc1_ref, acc2_ref, acc3_ref):
    a1 = _conv_bn_relu(a0_ref[...], gh1_ref, r1_ref, fold1_ref, bc1_ref,
                       g1_ref, be1_ref, acc1_ref).astype(jnp.bfloat16)   # (B*25, 400)
    a2 = _conv_bn_relu(a1, gh2_ref, r2_ref, fold2_ref, bc2_ref,
                       g2_ref, be2_ref, acc2_ref).astype(jnp.bfloat16)   # (B*11, 352)
    a3 = _conv_bn_relu(a2, gh3_ref, r3_ref, fold3_ref, bc3_ref,
                       g3_ref, be3_ref, acc3_ref)                        # (B*4, 128) f32

    # Linear(512, 2): one matmul against the (128, 4*2) permuted weight, then a 0/1
    # h-diagonal mask and two tiny fold matmuls (lanes -> actions, rows -> batch).
    z = jnp.dot(a3, wlt_ref[...], preferred_element_type=jnp.float32)    # (B*4, 8)
    z = z * hmask_ref[...]                                               # keep h' == h
    za = jnp.dot(z, afold_ref[...], preferred_element_type=jnp.float32)  # (B*4, 2)
    out_ref[...] = jnp.dot(rowfold_ref[...], za,
                           preferred_element_type=jnp.float32) + bl_ref[...]


# ------------------- constant 0/1 maps (built outside the kernel) ----------------- #
def _make_row_gather(batch, hin):
    """(K, batch*ho, batch*hin) bf16 0/1: row (b, o), tap i selects input row b*hin + 2*o + i."""
    ho = _osz(hin)
    i = jnp.arange(K)[:, None, None]
    r = jnp.arange(batch * ho)[None, :, None]
    c = jnp.arange(batch * hin)[None, None, :]
    tgt = (r // ho) * hin + S * (r % ho) + i
    return (c == tgt).astype(jnp.bfloat16)


def _make_bn_maps(wo, cout):
    """fold (wo*cout, cout) sums lane blocks per channel; bcast = fold.T broadcasts back."""
    r = jnp.arange(wo * cout)[:, None] % cout
    c = jnp.arange(cout)[None, :]
    fold = (r == c).astype(jnp.float32)
    return fold, fold.T


def _make_head_maps(batch):
    hmask = ((jnp.arange(batch * H3)[:, None] % H3) ==
             (jnp.arange(H3 * NUM_ACTIONS)[None, :] // NUM_ACTIONS)).astype(jnp.float32)
    afold = ((jnp.arange(H3 * NUM_ACTIONS)[:, None] % NUM_ACTIONS) ==
             jnp.arange(NUM_ACTIONS)[None, :]).astype(jnp.float32)
    rowfold = (jnp.arange(batch)[:, None] ==
               (jnp.arange(batch * H3)[None, :] // H3)).astype(jnp.float32)
    return hmask, afold, rowfold


# ------------------------------- wrapper ----------------------------------- #
def dqn_forward(params, x_nchw):
    B, C, H, W = x_nchw.shape
    assert (C, H, W) == (C0, H0, H0)
    # NCHW -> rows (b, h), lanes (w, c); bf16 for the MXU.
    a0 = jnp.transpose(x_nchw, (0, 2, 3, 1)).reshape(B * H0, H0 * C0).astype(jnp.bfloat16)

    # Data-independent 0/1 maps (constant-folded under jit; DMA'd once per call, <~100 KB).
    gh1 = _make_row_gather(B, H0)
    gh2 = _make_row_gather(B, H1)
    gh3 = _make_row_gather(B, H2)
    fold1, bc1 = _make_bn_maps(H1, C1)
    fold2, bc2 = _make_bn_maps(H2, C2)
    fold3, bc3 = _make_bn_maps(H3, C3)
    hmask, afold, rowfold = _make_head_maps(B)

    vmem = pl.BlockSpec(memory_space=pltpu.MemorySpace.VMEM)
    return pl.pallas_call(
        _dqn_kernel,
        out_shape=jax.ShapeDtypeStruct((B, NUM_ACTIONS), jnp.float32),
        in_specs=[vmem] * 24,
        out_specs=vmem,
        scratch_shapes=[
            pltpu.VMEM((B * H1, H1 * C1), jnp.float32),   # conv1 accumulator
            pltpu.VMEM((B * H2, H2 * C2), jnp.float32),   # conv2 accumulator
            pltpu.VMEM((B * H3, H3 * C3), jnp.float32),   # conv3 accumulator
        ],
    )(a0,
      gh1, params["r1"], fold1, bc1, params["g1"], params["be1"],
      gh2, params["r2"], fold2, bc2, params["g2"], params["be2"],
      gh3, params["r3"], fold3, bc3, params["g3"], params["be3"],
      params["wlt"], hmask, afold, rowfold, params["bl"])


# -------------------------- parameter construction ------------------------- #
def _pack_conv(w_oihw, win):
    """(Cout, Cin, 5, 5) conv weight -> (5, win*Cin, wout*Cout) stride-2 'R' matrices.

    R[i, w*Cin + c, wo*Cout + co] = W[co, c, i, w - 2*wo]  (0 if w - 2*wo not in [0, 5))
    so that  sum_i (rows_{2ho+i} of activation) @ R[i]  is exactly the stride-2 conv.
    """
    cout, cin, _, _ = w_oihw.shape
    wout = _osz(win)
    wt = jnp.transpose(w_oihw, (2, 3, 1, 0))                          # (i, j, cin, cout)
    w_idx = jnp.arange(win)[:, None, None]
    o_idx = jnp.arange(wout)[None, :, None]
    j_idx = jnp.arange(K)[None, None, :]
    sel = (w_idx == S * o_idx + j_idx).astype(jnp.float32)            # (win, wout, 5)
    r = jnp.einsum('woj,ijcd->iwcod', sel, wt)                        # (5, win, cin, wout, cout)
    return r.reshape(K, win * cin, wout * cout).astype(jnp.bfloat16)


def _uniform(key, shape, bound):
    return jax.random.uniform(key, shape, jnp.float32, minval=-bound, maxval=bound)


def init_params(key):
    ks = jax.random.split(key, 8)

    def conv_w(kw, c_out, c_in):
        bound = 1.0 / (c_in * K * K) ** 0.5
        return _uniform(kw, (c_out, c_in, K, K), bound)

    # Conv biases are intentionally omitted: a per-channel constant added before
    # training-mode BatchNorm is exactly cancelled by the batch-mean subtraction.
    w1 = conv_w(ks[0], C1, C0)
    w2 = conv_w(ks[2], C2, C1)
    w3 = conv_w(ks[4], C3, C2)

    lbound = 1.0 / (C3 * H3 * H3) ** 0.5
    wl = _uniform(ks[6], (NUM_ACTIONS, C3 * H3 * H3), lbound)         # torch (2, 512) layout
    bl = _uniform(ks[7], (NUM_ACTIONS,), lbound)
    # Permute linear weight from torch's NCHW flatten (c*16 + h*4 + w) to the kernel's
    # conv3-output layout: rows = (w*C3 + c), cols = (h*NUM_ACTIONS + a).
    wlt = (wl.reshape(NUM_ACTIONS, C3, H3, H3)
             .transpose(3, 1, 2, 0)
             .reshape(H3 * C3, H3 * NUM_ACTIONS)).astype(jnp.float32)

    def bn(c):
        return jnp.ones((1, c), jnp.float32), jnp.zeros((1, c), jnp.float32)

    g1, be1 = bn(C1)
    g2, be2 = bn(C2)
    g3, be3 = bn(C3)
    return {
        "r1": _pack_conv(w1, H0), "r2": _pack_conv(w2, H1), "r3": _pack_conv(w3, H2),
        "g1": g1, "be1": be1,
        "g2": g2, "be2": be2,
        "g3": g3, "be3": be3,
        "wlt": wlt, "bl": bl.reshape(1, NUM_ACTIONS),
    }


# TODO(synk): sample_action's epsilon-greedy host-side randomness is policy glue, not a kernel;
# only the forward pass is implemented here.  BatchNorm running-stats updates (training-mode
# module-state side effect) are likewise not modeled.

if __name__ == "__main__":
    key = jax.random.PRNGKey(0)
    pkey, xkey = jax.random.split(key)
    params = init_params(pkey)
    # Batch=2; spatial 54x54 is the input size implied by Linear(512, 2).
    x = jax.random.normal(xkey, (2, C0, H0, H0), dtype=jnp.float32)

    out = jax.jit(dqn_forward)(params, x)
    out = jax.block_until_ready(out)
    assert out.shape == (2, NUM_ACTIONS) and out.dtype == jnp.float32
    print("KERNEL_OK")
</pallas_src>

<mosaic_0001>
module attributes {stable_mosaic.version = 11 : i64} {
  func.func @_dqn_kernel(%arg0: memref<108x216xbf16, #tpu.memory_space<vmem>>, %arg1: memref<5x50x108xbf16, #tpu.memory_space<vmem>>, %arg2: memref<5x216x400xbf16, #tpu.memory_space<vmem>>, %arg3: memref<400x16xf32, #tpu.memory_space<vmem>>, %arg4: memref<16x400xf32, #tpu.memory_space<vmem>>, %arg5: memref<1x16xf32, #tpu.memory_space<vmem>>, %arg6: memref<1x16xf32, #tpu.memory_space<vmem>>, %arg7: memref<5x22x50xbf16, #tpu.memory_space<vmem>>, %arg8: memref<5x400x352xbf16, #tpu.memory_space<vmem>>, %arg9: memref<352x32xf32, #tpu.memory_space<vmem>>, %arg10: memref<32x352xf32, #tpu.memory_space<vmem>>, %arg11: memref<1x32xf32, #tpu.memory_space<vmem>>, %arg12: memref<1x32xf32, #tpu.memory_space<vmem>>, %arg13: memref<5x8x22xbf16, #tpu.memory_space<vmem>>, %arg14: memref<5x352x128xbf16, #tpu.memory_space<vmem>>, %arg15: memref<128x32xf32, #tpu.memory_space<vmem>>, %arg16: memref<32x128xf32, #tpu.memory_space<vmem>>, %arg17: memref<1x32xf32, #tpu.memory_space<vmem>>, %arg18: memref<1x32xf32, #tpu.memory_space<vmem>>, %arg19: memref<128x8xf32, #tpu.memory_space<vmem>>, %arg20: memref<8x8xf32, #tpu.memory_space<vmem>>, %arg21: memref<8x2xf32, #tpu.memory_space<vmem>>, %arg22: memref<2x8xf32, #tpu.memory_space<vmem>>, %arg23: memref<1x2xf32, #tpu.memory_space<vmem>>, %arg24: memref<2x2xf32, #tpu.memory_space<vmem>>, %arg25: memref<50x400xf32, #tpu.memory_space<vmem>>, %arg26: memref<22x352xf32, #tpu.memory_space<vmem>>, %arg27: memref<8x128xf32, #tpu.memory_space<vmem>>) attributes {dimension_semantics = [], scalar_prefetch = 0 : i64, scratch_operands = 3 : i64, tpu.core_type = #tpu.core_type<tc>} {
    %c0 = arith.constant 0 : index
    %c0_0 = arith.constant 0 : index
    %0 = vector.load %arg0[%c0, %c0_0] : memref<108x216xbf16, #tpu.memory_space<vmem>>, vector<108x216xbf16>
    %c0_1 = arith.constant 0 : index
    %c0_2 = arith.constant 0 : index
    %c0_3 = arith.constant 0 : index
    %1 = vector.load %arg1[%c0_1, %c0_2, %c0_3] : memref<5x50x108xbf16, #tpu.memory_space<vmem>>, vector<1x50x108xbf16>
    %2 = vector.shape_cast %1 : vector<1x50x108xbf16> to vector<50x108xbf16>
    %cst = arith.constant dense<0.000000e+00> : vector<50x216xf32>
    %3 = tpu.matmul %2, %0, %cst {dimension_numbers = #tpu.dot_dimension_numbers<[1], [0], [0], [1], [0, 0, 1, 1], [], []>} : vector<50x108xbf16>, vector<108x216xbf16>, vector<50x216xf32> -> vector<50x216xf32>
    %4 = arith.truncf %3 : vector<50x216xf32> to vector<50x216xbf16>
    %c0_4 = arith.constant 0 : index
    %c0_5 = arith.constant 0 : index
    %c0_6 = arith.constant 0 : index
    %5 = vector.load %arg2[%c0_4, %c0_5, %c0_6] : memref<5x216x400xbf16, #tpu.memory_space<vmem>>, vector<1x216x400xbf16>
    %6 = vector.shape_cast %5 : vector<1x216x400xbf16> to vector<216x400xbf16>
    %cst_7 = arith.constant dense<0.000000e+00> : vector<50x400xf32>
    %7 = tpu.matmul %4, %6, %cst_7 {dimension_numbers = #tpu.dot_dimension_numbers<[1], [0], [0], [1], [0, 0, 1, 1], [], []>} : vector<50x216xbf16>, vector<216x400xbf16>, vector<50x400xf32> -> vector<50x400xf32>
    %c0_8 = arith.constant 0 : index
    %c0_9 = arith.constant 0 : index
    %8 = vector.load %arg25[%c0_8, %c0_9] : memref<50x400xf32, #tpu.memory_space<vmem>>, vector<50x400xf32>
    tpu.vector_store %arg25[%c0_8, %c0_9], %7 {strides = array<i32>} : memref<50x400xf32, #tpu.memory_space<vmem>>, vector<50x400xf32>,
    %c1 = arith.constant 1 : index
    %c0_10 = arith.constant 0 : index
    %c0_11 = arith.constant 0 : index
    %9 = vector.load %arg1[%c1, %c0_10, %c0_11] : memref<5x50x108xbf16, #tpu.memory_space<vmem>>, vector<1x50x108xbf16>
    %10 = vector.shape_cast %9 : vector<1x50x108xbf16> to vector<50x108xbf16>
    %cst_12 = arith.constant dense<0.000000e+00> : vector<50x216xf32>
    %11 = tpu.matmul %10, %0, %cst_12 {dimension_numbers = #tpu.dot_dimension_numbers<[1], [0], [0], [1], [0, 0, 1, 1], [], []>} : vector<50x108xbf16>, vector<108x216xbf16>, vector<50x216xf32> -> vector<50x216xf32>
    %12 = arith.truncf %11 : vector<50x216xf32> to vector<50x216xbf16>
    %c1_13 = arith.constant 1 : index
    %c0_14 = arith.constant 0 : index
    %c0_15 = arith.constant 0 : index
    %13 = vector.load %arg2[%c1_13, %c0_14, %c0_15] : memref<5x216x400xbf16, #tpu.memory_space<vmem>>, vector<1x216x400xbf16>
    %14 = vector.shape_cast %13 : vector<1x216x400xbf16> to vector<216x400xbf16>
    %cst_16 = arith.constant dense<0.000000e+00> : vector<50x400xf32>
    %15 = tpu.matmul %12, %14, %cst_16 {dimension_numbers = #tpu.dot_dimension_numbers<[1], [0], [0], [1], [0, 0, 1, 1], [], []>} : vector<50x216xbf16>, vector<216x400xbf16>, vector<50x400xf32> -> vector<50x400xf32>
    %c0_17 = arith.constant 0 : index
    %c0_18 = arith.constant 0 : index
    %16 = vector.load %arg25[%c0_17, %c0_18] : memref<50x400xf32, #tpu.memory_space<vmem>>, vector<50x400xf32>
    %17 = arith.addf %16, %15 : vector<50x400xf32>
    %c0_19 = arith.constant 0 : index
    %c0_20 = arith.constant 0 : index
    %18 = vector.load %arg25[%c0_19, %c0_20] : memref<50x400xf32, #tpu.memory_space<vmem>>, vector<50x400xf32>
    tpu.vector_store %arg25[%c0_19, %c0_20], %17 {strides = array<i32>} : memref<50x400xf32, #tpu.memory_space<vmem>>, vector<50x400xf32>,
    %c2 = arith.constant 2 : index
    %c0_21 = arith.constant 0 : index
    %c0_22 = arith.constant 0 : index
    %19 = vector.load %arg1[%c2, %c0_21, %c0_22] : memref<5x50x108xbf16, #tpu.memory_space<vmem>>, vector<1x50x108xbf16>
    %20 = vector.shape_cast %19 : vector<1x50x108xbf16> to vector<50x108xbf16>
    %cst_23 = arith.constant dense<0.000000e+00> : vector<50x216xf32>
    %21 = tpu.matmul %20, %0, %cst_23 {dimension_numbers = #tpu.dot_dimension_numbers<[1], [0], [0], [1], [0, 0, 1, 1], [], []>} : vector<50x108xbf16>, vector<108x216xbf16>, vector<50x216xf32> -> vector<50x216xf32>
    %22 = arith.truncf %21 : vector<50x216xf32> to vector<50x216xbf16>
    %c2_24 = arith.constant 2 : index
    %c0_25 = arith.constant 0 : index
    %c0_26 = arith.constant 0 : index
    %23 = vector.load %arg2[%c2_24, %c0_25, %c0_26] : memref<5x216x400xbf16, #tpu.memory_space<vmem>>, vector<1x216x400xbf16>
    %24 = vector.shape_cast %23 : vector<1x216x400xbf16> to vector<216x400xbf16>
    %cst_27 = arith.constant dense<0.000000e+00> : vector<50x400xf32>
    %25 = tpu.matmul %22, %24, %cst_27 {dimension_numbers = #tpu.dot_dimension_numbers<[1], [0], [0], [1], [0, 0, 1, 1], [], []>} : vector<50x216xbf16>, vector<216x400xbf16>, vector<50x400xf32> -> vector<50x400xf32>
    %c0_28 = arith.constant 0 : index
    %c0_29 = arith.constant 0 : index
    %26 = vector.load %arg25[%c0_28, %c0_29] : memref<50x400xf32, #tpu.memory_space<vmem>>, vector<50x400xf32>
    %27 = arith.addf %26, %25 : vector<50x400xf32>
    %c0_30 = arith.constant 0 : index
    %c0_31 = arith.constant 0 : index
    %28 = vector.load %arg25[%c0_30, %c0_31] : memref<50x400xf32, #tpu.memory_space<vmem>>, vector<50x400xf32>
    tpu.vector_store %arg25[%c0_30, %c0_31], %27 {strides = array<i32>} : memref<50x400xf32, #tpu.memory_space<vmem>>, vector<50x400xf32>,
    %c3 = arith.constant 3 : index
    %c0_32 = arith.constant 0 : index
    %c0_33 = arith.constant 0 : index
    %29 = vector.load %arg1[%c3, %c0_32, %c0_33] : memref<5x50x108xbf16, #tpu.memory_space<vmem>>, vector<1x50x108xbf16>
    %30 = vector.shape_cast %29 : vector<1x50x108xbf16> to vector<50x108xbf16>
    %cst_34 = arith.constant dense<0.000000e+00> : vector<50x216xf32>
    %31 = tpu.matmul %30, %0, %cst_34 {dimension_numbers = #tpu.dot_dimension_numbers<[1], [0], [0], [1], [0, 0, 1, 1], [], []>} : vector<50x108xbf16>, vector<108x216xbf16>, vector<50x216xf32> -> vector<50x216xf32>
    %32 = arith.truncf %31 : vector<50x216xf32> to vector<50x216xbf16>
    %c3_35 = arith.constant 3 : index
    %c0_36 = arith.constant 0 : index
    %c0_37 = arith.constant 0 : index
    %33 = vector.load %arg2[%c3_35, %c0_36, %c0_37] : memref<5x216x400xbf16, #tpu.memory_space<vmem>>, vector<1x216x400xbf16>
    %34 = vector.shape_cast %33 : vector<1x216x400xbf16> to vector<216x400xbf16>
    %cst_38 = arith.constant dense<0.000000e+00> : vector<50x400xf32>
    %35 = tpu.matmul %32, %34, %cst_38 {dimension_numbers = #tpu.dot_dimension_numbers<[1], [0], [0], [1], [0, 0, 1, 1], [], []>} : vector<50x216xbf16>, vector<216x400xbf16>, vector<50x400xf32> -> vector<50x400xf32>
    %c0_39 = arith.constant 0 : index
    %c0_40 = arith.constant 0 : index
    %36 = vector.load %arg25[%c0_39, %c0_40] : memref<50x400xf32, #tpu.memory_space<vmem>>, vector<50x400xf32>
    %37 = arith.addf %36, %35 : vector<50x400xf32>
    %c0_41 = arith.constant 0 : index
    %c0_42 = arith.constant 0 : index
    %38 = vector.load %arg25[%c0_41, %c0_42] : memref<50x400xf32, #tpu.memory_space<vmem>>, vector<50x400xf32>
    tpu.vector_store %arg25[%c0_41, %c0_42], %37 {strides = array<i32>} : memref<50x400xf32, #tpu.memory_space<vmem>>, vector<50x400xf32>,
    %c4 = arith.constant 4 : index
    %c0_43 = arith.constant 0 : index
    %c0_44 = arith.constant 0 : index
    %39 = vector.load %arg1[%c4, %c0_43, %c0_44] : memref<5x50x108xbf16, #tpu.memory_space<vmem>>, vector<1x50x108xbf16>
    %40 = vector.shape_cast %39 : vector<1x50x108xbf16> to vector<50x108xbf16>
    %cst_45 = arith.constant dense<0.000000e+00> : vector<50x216xf32>
    %41 = tpu.matmul %40, %0, %cst_45 {dimension_numbers = #tpu.dot_dimension_numbers<[1], [0], [0], [1], [0, 0, 1, 1], [], []>} : vector<50x108xbf16>, vector<108x216xbf16>, vector<50x216xf32> -> vector<50x216xf32>
    %42 = arith.truncf %41 : vector<50x216xf32> to vector<50x216xbf16>
    %c4_46 = arith.constant 4 : index
    %c0_47 = arith.constant 0 : index
    %c0_48 = arith.constant 0 : index
    %43 = vector.load %arg2[%c4_46, %c0_47, %c0_48] : memref<5x216x400xbf16, #tpu.memory_space<vmem>>, vector<1x216x400xbf16>
    %44 = vector.shape_cast %43 : vector<1x216x400xbf16> to vector<216x400xbf16>
    %cst_49 = arith.constant dense<0.000000e+00> : vector<50x400xf32>
    %45 = tpu.matmul %42, %44, %cst_49 {dimension_numbers = #tpu.dot_dimension_numbers<[1], [0], [0], [1], [0, 0, 1, 1], [], []>} : vector<50x216xbf16>, vector<216x400xbf16>, vector<50x400xf32> -> vector<50x400xf32>
    %c0_50 = arith.constant 0 : index
    %c0_51 = arith.constant 0 : index
    %46 = vector.load %arg25[%c0_50, %c0_51] : memref<50x400xf32, #tpu.memory_space<vmem>>, vector<50x400xf32>
    %47 = arith.addf %46, %45 : vector<50x400xf32>
    %c0_52 = arith.constant 0 : index
    %c0_53 = arith.constant 0 : index
    %48 = vector.load %arg25[%c0_52, %c0_53] : memref<50x400xf32, #tpu.memory_space<vmem>>, vector<50x400xf32>
    tpu.vector_store %arg25[%c0_52, %c0_53], %47 {strides = array<i32>} : memref<50x400xf32, #tpu.memory_space<vmem>>, vector<50x400xf32>,
    %c0_54 = arith.constant 0 : index
    %c0_55 = arith.constant 0 : index
    %49 = vector.load %arg25[%c0_54, %c0_55] : memref<50x400xf32, #tpu.memory_space<vmem>>, vector<50x400xf32>
    %cst_56 = arith.constant dense<0.000000e+00> : vector<400xf32>
    %50 = vector.multi_reduction <add>, %49, %cst_56 [0] : vector<50x400xf32> to vector<400xf32>
    %51 = vector.shape_cast %50 : vector<400xf32> to vector<1x400xf32>
    %52 = arith.mulf %49, %49 : vector<50x400xf32>
    %cst_57 = arith.constant dense<0.000000e+00> : vector<400xf32>
    %53 = vector.multi_reduction <add>, %52, %cst_57 [0] : vector<50x400xf32> to vector<400xf32>
    %54 = vector.shape_cast %53 : vector<400xf32> to vector<1x400xf32>
    %c0_58 = arith.constant 0 : index
    %c0_59 = arith.constant 0 : index
    %55 = vector.load %arg3[%c0_58, %c0_59] : memref<400x16xf32, #tpu.memory_space<vmem>>, vector<400x16xf32>
    %cst_60 = arith.constant dense<0.000000e+00> : vector<1x16xf32>
    %56 = tpu.matmul %51, %55, %cst_60 {dimension_numbers = #tpu.dot_dimension_numbers<[1], [0], [0], [1], [0, 0, 1, 1], [], []>} : vector<1x400xf32>, vector<400x16xf32>, vector<1x16xf32> -> vector<1x16xf32>
    %cst_61 = arith.constant 1.250000e+03 : f32
    %57 = vector.broadcast %cst_61 : f32 to vector<1x16xf32>
    %58 = arith.divf %56, %57 : vector<1x16xf32>
    %c0_62 = arith.constant 0 : index
    %c0_63 = arith.constant 0 : index
    %59 = vector.load %arg3[%c0_62, %c0_63] : memref<400x16xf32, #tpu.memory_space<vmem>>, vector<400x16xf32>
    %cst_64 = arith.constant dense<0.000000e+00> : vector<1x16xf32>
    %60 = tpu.matmul %54, %59, %cst_64 {dimension_numbers = #tpu.dot_dimension_numbers<[1], [0], [0], [1], [0, 0, 1, 1], [], []>} : vector<1x400xf32>, vector<400x16xf32>, vector<1x16xf32> -> vector<1x16xf32>
    %cst_65 = arith.constant 1.250000e+03 : f32
    %61 = vector.broadcast %cst_65 : f32 to vector<1x16xf32>
    %62 = arith.divf %60, %61 : vector<1x16xf32>
    %63 = arith.mulf %58, %58 : vector<1x16xf32>
    %64 = arith.subf %62, %63 : vector<1x16xf32>
    %cst_66 = arith.constant 0.000000e+00 : f32
    %65 = vector.broadcast %cst_66 : f32 to vector<1x16xf32>
    %66 = arith.maximumf %64, %65 : vector<1x16xf32>
    %c0_67 = arith.constant 0 : index
    %c0_68 = arith.constant 0 : index
    %67 = vector.load %arg5[%c0_67, %c0_68] : memref<1x16xf32, #tpu.memory_space<vmem>>, vector<1x16xf32>
    %cst_69 = arith.constant 9.99999974E-6 : f32
    %68 = vector.broadcast %cst_69 : f32 to vector<1x16xf32>
    %69 = arith.addf %66, %68 : vector<1x16xf32>
    %70 = math.rsqrt %69 : vector<1x16xf32>
    %71 = arith.mulf %67, %70 : vector<1x16xf32>
    %c0_70 = arith.constant 0 : index
    %c0_71 = arith.constant 0 : index
    %72 = vector.load %arg6[%c0_70, %c0_71] : memref<1x16xf32, #tpu.memory_space<vmem>>, vector<1x16xf32>
    %73 = arith.mulf %58, %71 : vector<1x16xf32>
    %74 = arith.subf %72, %73 : vector<1x16xf32>
    %c0_72 = arith.constant 0 : index
    %c0_73 = arith.constant 0 : index
    %75 = vector.load %arg4[%c0_72, %c0_73] : memref<16x400xf32, #tpu.memory_space<vmem>>, vector<16x400xf32>
    %cst_74 = arith.constant dense<0.000000e+00> : vector<1x400xf32>
    %76 = tpu.matmul %71, %75, %cst_74 {dimension_numbers = #tpu.dot_dimension_numbers<[1], [0], [0], [1], [0, 0, 1, 1], [], []>} : vector<1x16xf32>, vector<16x400xf32>, vector<1x400xf32> -> vector<1x400xf32>
    %c0_75 = arith.constant 0 : index
    %c0_76 = arith.constant 0 : index
    %77 = vector.load %arg4[%c0_75, %c0_76] : memref<16x400xf32, #tpu.memory_space<vmem>>, vector<16x400xf32>
    %cst_77 = arith.constant dense<0.000000e+00> : vector<1x400xf32>
    %78 = tpu.matmul %74, %77, %cst_77 {dimension_numbers = #tpu.dot_dimension_numbers<[1], [0], [0], [1], [0, 0, 1, 1], [], []>} : vector<1x16xf32>, vector<16x400xf32>, vector<1x400xf32> -> vector<1x400xf32>
    %79 = vector.broadcast %76 : vector<1x400xf32> to vector<50x400xf32>
    %80 = arith.mulf %49, %79 : vector<50x400xf32>
    %81 = vector.broadcast %78 : vector<1x400xf32> to vector<50x400xf32>
    %82 = arith.addf %80, %81 : vector<50x400xf32>
    %cst_78 = arith.constant 0.000000e+00 : f32
    %83 = vector.broadcast %cst_78 : f32 to vector<50x400xf32>
    %84 = arith.maximumf %82, %83 : vector<50x400xf32>
    %85 = arith.truncf %84 : vector<50x400xf32> to vector<50x400xbf16>
    %c0_79 = arith.constant 0 : index
    %c0_80 = arith.constant 0 : index
    %c0_81 = arith.constant 0 : index
    %86 = vector.load %arg7[%c0_79, %c0_80, %c0_81] : memref<5x22x50xbf16, #tpu.memory_space<vmem>>, vector<1x22x50xbf16>
    %87 = vector.shape_cast %86 : vector<1x22x50xbf16> to vector<22x50xbf16>
    %cst_82 = arith.constant dense<0.000000e+00> : vector<22x400xf32>
    %88 = tpu.matmul %87, %85, %cst_82 {dimension_numbers = #tpu.dot_dimension_numbers<[1], [0], [0], [1], [0, 0, 1, 1], [], []>} : vector<22x50xbf16>, vector<50x400xbf16>, vector<22x400xf32> -> vector<22x400xf32>
    %89 = arith.truncf %88 : vector<22x400xf32> to vector<22x400xbf16>
    %c0_83 = arith.constant 0 : index
    %c0_84 = arith.constant 0 : index
    %c0_85 = arith.constant 0 : index
    %90 = vector.load %arg8[%c0_83, %c0_84, %c0_85] : memref<5x400x352xbf16, #tpu.memory_space<vmem>>, vector<1x400x352xbf16>
    %91 = vector.shape_cast %90 : vector<1x400x352xbf16> to vector<400x352xbf16>
    %cst_86 = arith.constant dense<0.000000e+00> : vector<22x352xf32>
    %92 = tpu.matmul %89, %91, %cst_86 {dimension_numbers = #tpu.dot_dimension_numbers<[1], [0], [0], [1], [0, 0, 1, 1], [], []>} : vector<22x400xbf16>, vector<400x352xbf16>, vector<22x352xf32> -> vector<22x352xf32>
    %c0_87 = arith.constant 0 : index
    %c0_88 = arith.constant 0 : index
    %93 = vector.load %arg26[%c0_87, %c0_88] : memref<22x352xf32, #tpu.memory_space<vmem>>, vector<22x352xf32>
    tpu.vector_store %arg26[%c0_87, %c0_88], %92 {strides = array<i32>} : memref<22x352xf32, #tpu.memory_space<vmem>>, vector<22x352xf32>,
    %c1_89 = arith.constant 1 : index
    %c0_90 = arith.constant 0 : index
    %c0_91 = arith.constant 0 : index
    %94 = vector.load %arg7[%c1_89, %c0_90, %c0_91] : memref<5x22x50xbf16, #tpu.memory_space<vmem>>, vector<1x22x50xbf16>
    %95 = vector.shape_cast %94 : vector<1x22x50xbf16> to vector<22x50xbf16>
    %cst_92 = arith.constant dense<0.000000e+00> : vector<22x400xf32>
    %96 = tpu.matmul %95, %85, %cst_92 {dimension_numbers = #tpu.dot_dimension_numbers<[1], [0], [0], [1], [0, 0, 1, 1], [], []>} : vector<22x50xbf16>, vector<50x400xbf16>, vector<22x400xf32> -> vector<22x400xf32>
    %97 = arith.truncf %96 : vector<22x400xf32> to vector<22x400xbf16>
    %c1_93 = arith.constant 1 : index
    %c0_94 = arith.constant 0 : index
    %c0_95 = arith.constant 0 : index
    %98 = vector.load %arg8[%c1_93, %c0_94, %c0_95] : memref<5x400x352xbf16, #tpu.memory_space<vmem>>, vector<1x400x352xbf16>
    %99 = vector.shape_cast %98 : vector<1x400x352xbf16> to vector<400x352xbf16>
    %cst_96 = arith.constant dense<0.000000e+00> : vector<22x352xf32>
    %100 = tpu.matmul %97, %99, %cst_96 {dimension_numbers = #tpu.dot_dimension_numbers<[1], [0], [0], [1], [0, 0, 1, 1], [], []>} : vector<22x400xbf16>, vector<400x352xbf16>, vector<22x352xf32> -> vector<22x352xf32>
    %c0_97 = arith.constant 0 : index
    %c0_98 = arith.constant 0 : index
    %101 = vector.load %arg26[%c0_97, %c0_98] : memref<22x352xf32, #tpu.memory_space<vmem>>, vector<22x352xf32>
    %102 = arith.addf %101, %100 : vector<22x352xf32>
    %c0_99 = arith.constant 0 : index
    %c0_100 = arith.constant 0 : index
    %103 = vector.load %arg26[%c0_99, %c0_100] : memref<22x352xf32, #tpu.memory_space<vmem>>, vector<22x352xf32>
    tpu.vector_store %arg26[%c0_99, %c0_100], %102 {strides = array<i32>} : memref<22x352xf32, #tpu.memory_space<vmem>>, vector<22x352xf32>,
    %c2_101 = arith.constant 2 : index
    %c0_102 = arith.constant 0 : index
    %c0_103 = arith.constant 0 : index
    %104 = vector.load %arg7[%c2_101, %c0_102, %c0_103] : memref<5x22x50xbf16, #tpu.memory_space<vmem>>, vector<1x22x50xbf16>
    %105 = vector.shape_cast %104 : vector<1x22x50xbf16> to vector<22x50xbf16>
    %cst_104 = arith.constant dense<0.000000e+00> : vector<22x400xf32>
    %106 = tpu.matmul %105, %85, %cst_104 {dimension_numbers = #tpu.dot_dimension_numbers<[1], [0], [0], [1], [0, 0, 1, 1], [], []>} : vector<22x50xbf16>, vector<50x400xbf16>, vector<22x400xf32> -> vector<22x400xf32>
    %107 = arith.truncf %106 : vector<22x400xf32> to vector<22x400xbf16>
    %c2_105 = arith.constant 2 : index
    %c0_106 = arith.constant 0 : index
    %c0_107 = arith.constant 0 : index
    %108 = vector.load %arg8[%c2_105, %c0_106, %c0_107] : memref<5x400x352xbf16, #tpu.memory_space<vmem>>, vector<1x400x352xbf16>
    %109 = vector.shape_cast %108 : vector<1x400x352xbf16> to vector<400x352xbf16>
    %cst_108 = arith.constant dense<0.000000e+00> : vector<22x352xf32>
    %110 = tpu.matmul %107, %109, %cst_108 {dimension_numbers = #tpu.dot_dimension_numbers<[1], [0], [0], [1], [0, 0, 1, 1], [], []>} : vector<22x400xbf16>, vector<400x352xbf16>, vector<22x352xf32> -> vector<22x352xf32>
    %c0_109 = arith.constant 0 : index
    %c0_110 = arith.constant 0 : index
    %111 = vector.load %arg26[%c0_109, %c0_110] : memref<22x352xf32, #tpu.memory_space<vmem>>, vector<22x352xf32>
    %112 = arith.addf %111, %110 : vector<22x352xf32>
    %c0_111 = arith.constant 0 : index
    %c0_112 = arith.constant 0 : index
    %113 = vector.load %arg26[%c0_111, %c0_112] : memref<22x352xf32, #tpu.memory_space<vmem>>, vector<22x352xf32>
    tpu.vector_store %arg26[%c0_111, %c0_112], %112 {strides = array<i32>} : memref<22x352xf32, #tpu.memory_space<vmem>>, vector<22x352xf32>,
    %c3_113 = arith.constant 3 : index
    %c0_114 = arith.constant 0 : index
    %c0_115 = arith.constant 0 : index
    %114 = vector.load %arg7[%c3_113, %c0_114, %c0_115] : memref<5x22x50xbf16, #tpu.memory_space<vmem>>, vector<1x22x50xbf16>
    %115 = vector.shape_cast %114 : vector<1x22x50xbf16> to vector<22x50xbf16>
    %cst_116 = arith.constant dense<0.000000e+00> : vector<22x400xf32>
    %116 = tpu.matmul %115, %85, %cst_116 {dimension_numbers = #tpu.dot_dimension_numbers<[1], [0], [0], [1], [0, 0, 1, 1], [], []>} : vector<22x50xbf16>, vector<50x400xbf16>, vector<22x400xf32> -> vector<22x400xf32>
    %117 = arith.truncf %116 : vector<22x400xf32> to vector<22x400xbf16>
    %c3_117 = arith.constant 3 : index
    %c0_118 = arith.constant 0 : index
    %c0_119 = arith.constant 0 : index
    %118 = vector.load %arg8[%c3_117, %c0_118, %c0_119] : memref<5x400x352xbf16, #tpu.memory_space<vmem>>, vector<1x400x352xbf16>
    %119 = vector.shape_cast %118 : vector<1x400x352xbf16> to vector<400x352xbf16>
    %cst_120 = arith.constant dense<0.000000e+00> : vector<22x352xf32>
    %120 = tpu.matmul %117, %119, %cst_120 {dimension_numbers = #tpu.dot_dimension_numbers<[1], [0], [0], [1], [0, 0, 1, 1], [], []>} : vector<22x400xbf16>, vector<400x352xbf16>, vector<22x352xf32> -> vector<22x352xf32>
    %c0_121 = arith.constant 0 : index
    %c0_122 = arith.constant 0 : index
    %121 = vector.load %arg26[%c0_121, %c0_122] : memref<22x352xf32, #tpu.memory_space<vmem>>, vector<22x352xf32>
    %122 = arith.addf %121, %120 : vector<22x352xf32>
    %c0_123 = arith.constant 0 : index
    %c0_124 = arith.constant 0 : index
    %123 = vector.load %arg26[%c0_123, %c0_124] : memref<22x352xf32, #tpu.memory_space<vmem>>, vector<22x352xf32>
    tpu.vector_store %arg26[%c0_123, %c0_124], %122 {strides = array<i32>} : memref<22x352xf32, #tpu.memory_space<vmem>>, vector<22x352xf32>,
    %c4_125 = arith.constant 4 : index
    %c0_126 = arith.constant 0 : index
    %c0_127 = arith.constant 0 : index
    %124 = vector.load %arg7[%c4_125, %c0_126, %c0_127] : memref<5x22x50xbf16, #tpu.memory_space<vmem>>, vector<1x22x50xbf16>
    %125 = vector.shape_cast %124 : vector<1x22x50xbf16> to vector<22x50xbf16>
    %cst_128 = arith.constant dense<0.000000e+00> : vector<22x400xf32>
    %126 = tpu.matmul %125, %85, %cst_128 {dimension_numbers = #tpu.dot_dimension_numbers<[1], [0], [0], [1], [0, 0, 1, 1], [], []>} : vector<22x50xbf16>, vector<50x400xbf16>, vector<22x400xf32> -> vector<22x400xf32>
    %127 = arith.truncf %126 : vector<22x400xf32> to vector<22x400xbf16>
    %c4_129 = arith.constant 4 : index
    %c0_130 = arith.constant 0 : index
    %c0_131 = arith.constant 0 : index
    %128 = vector.load %arg8[%c4_129, %c0_130, %c0_131] : memref<5x400x352xbf16, #tpu.memory_space<vmem>>, vector<1x400x352xbf16>
    %129 = vector.shape_cast %128 : vector<1x400x352xbf16> to vector<400x352xbf16>
    %cst_132 = arith.constant dense<0.000000e+00> : vector<22x352xf32>
    %130 = tpu.matmul %127, %129, %cst_132 {dimension_numbers = #tpu.dot_dimension_numbers<[1], [0], [0], [1], [0, 0, 1, 1], [], []>} : vector<22x400xbf16>, vector<400x352xbf16>, vector<22x352xf32> -> vector<22x352xf32>
    %c0_133 = arith.constant 0 : index
    %c0_134 = arith.constant 0 : index
    %131 = vector.load %arg26[%c0_133, %c0_134] : memref<22x352xf32, #tpu.memory_space<vmem>>, vector<22x352xf32>
    %132 = arith.addf %131, %130 : vector<22x352xf32>
    %c0_135 = arith.constant 0 : index
    %c0_136 = arith.constant 0 : index
    %133 = vector.load %arg26[%c0_135, %c0_136] : memref<22x352xf32, #tpu.memory_space<vmem>>, vector<22x352xf32>
    tpu.vector_store %arg26[%c0_135, %c0_136], %132 {strides = array<i32>} : memref<22x352xf32, #tpu.memory_space<vmem>>, vector<22x352xf32>,
    %c0_137 = arith.constant 0 : index
    %c0_138 = arith.constant 0 : index
    %134 = vector.load %arg26[%c0_137, %c0_138] : memref<22x352xf32, #tpu.memory_space<vmem>>, vector<22x352xf32>
    %cst_139 = arith.constant dense<0.000000e+00> : vector<352xf32>
    %135 = vector.multi_reduction <add>, %134, %cst_139 [0] : vector<22x352xf32> to vector<352xf32>
    %136 = vector.shape_cast %135 : vector<352xf32> to vector<1x352xf32>
    %137 = arith.mulf %134, %134 : vector<22x352xf32>
    %cst_140 = arith.constant dense<0.000000e+00> : vector<352xf32>
    %138 = vector.multi_reduction <add>, %137, %cst_140 [0] : vector<22x352xf32> to vector<352xf32>
    %139 = vector.shape_cast %138 : vector<352xf32> to vector<1x352xf32>
    %c0_141 = arith.constant 0 : index
    %c0_142 = arith.constant 0 : index
    %140 = vector.load %arg9[%c0_141, %c0_142] : memref<352x32xf32, #tpu.memory_space<vmem>>, vector<352x32xf32>
    %cst_143 = arith.constant dense<0.000000e+00> : vector<1x32xf32>
    %141 = tpu.matmul %136, %140, %cst_143 {dimension_numbers = #tpu.dot_dimension_numbers<[1], [0], [0], [1], [0, 0, 1, 1], [], []>} : vector<1x352xf32>, vector<352x32xf32>, vector<1x32xf32> -> vector<1x32xf32>
    %cst_144 = arith.constant 2.420000e+02 : f32
    %142 = vector.broadcast %cst_144 : f32 to vector<1x32xf32>
    %143 = arith.divf %141, %142 : vector<1x32xf32>
    %c0_145 = arith.constant 0 : index
    %c0_146 = arith.constant 0 : index
    %144 = vector.load %arg9[%c0_145, %c0_146] : memref<352x32xf32, #tpu.memory_space<vmem>>, vector<352x32xf32>
    %cst_147 = arith.constant dense<0.000000e+00> : vector<1x32xf32>
    %145 = tpu.matmul %139, %144, %cst_147 {dimension_numbers = #tpu.dot_dimension_numbers<[1], [0], [0], [1], [0, 0, 1, 1], [], []>} : vector<1x352xf32>, vector<352x32xf32>, vector<1x32xf32> -> vector<1x32xf32>
    %cst_148 = arith.constant 2.420000e+02 : f32
    %146 = vector.broadcast %cst_148 : f32 to vector<1x32xf32>
    %147 = arith.divf %145, %146 : vector<1x32xf32>
    %148 = arith.mulf %143, %143 : vector<1x32xf32>
    %149 = arith.subf %147, %148 : vector<1x32xf32>
    %cst_149 = arith.constant 0.000000e+00 : f32
    %150 = vector.broadcast %cst_149 : f32 to vector<1x32xf32>
    %151 = arith.maximumf %149, %150 : vector<1x32xf32>
    %c0_150 = arith.constant 0 : index
    %c0_151 = arith.constant 0 : index
    %152 = vector.load %arg11[%c0_150, %c0_151] : memref<1x32xf32, #tpu.memory_space<vmem>>, vector<1x32xf32>
    %cst_152 = arith.constant 9.99999974E-6 : f32
    %153 = vector.broadcast %cst_152 : f32 to vector<1x32xf32>
    %154 = arith.addf %151, %153 : vector<1x32xf32>
    %155 = math.rsqrt %154 : vector<1x32xf32>
    %156 = arith.mulf %152, %155 : vector<1x32xf32>
    %c0_153 = arith.constant 0 : index
    %c0_154 = arith.constant 0 : index
    %157 = vector.load %arg12[%c0_153, %c0_154] : memref<1x32xf32, #tpu.memory_space<vmem>>, vector<1x32xf32>
    %158 = arith.mulf %143, %156 : vector<1x32xf32>
    %159 = arith.subf %157, %158 : vector<1x32xf32>
    %c0_155 = arith.constant 0 : index
    %c0_156 = arith.constant 0 : index
    %160 = vector.load %arg10[%c0_155, %c0_156] : memref<32x352xf32, #tpu.memory_space<vmem>>, vector<32x352xf32>
    %cst_157 = arith.constant dense<0.000000e+00> : vector<1x352xf32>
    %161 = tpu.matmul %156, %160, %cst_157 {dimension_numbers = #tpu.dot_dimension_numbers<[1], [0], [0], [1], [0, 0, 1, 1], [], []>} : vector<1x32xf32>, vector<32x352xf32>, vector<1x352xf32> -> vector<1x352xf32>
    %c0_158 = arith.constant 0 : index
    %c0_159 = arith.constant 0 : index
    %162 = vector.load %arg10[%c0_158, %c0_159] : memref<32x352xf32, #tpu.memory_space<vmem>>, vector<32x352xf32>
    %cst_160 = arith.constant dense<0.000000e+00> : vector<1x352xf32>
    %163 = tpu.matmul %159, %162, %cst_160 {dimension_numbers = #tpu.dot_dimension_numbers<[1], [0], [0], [1], [0, 0, 1, 1], [], []>} : vector<1x32xf32>, vector<32x352xf32>, vector<1x352xf32> -> vector<1x352xf32>
    %164 = vector.broadcast %161 : vector<1x352xf32> to vector<22x352xf32>
    %165 = arith.mulf %134, %164 : vector<22x352xf32>
    %166 = vector.broadcast %163 : vector<1x352xf32> to vector<22x352xf32>
    %167 = arith.addf %165, %166 : vector<22x352xf32>
    %cst_161 = arith.constant 0.000000e+00 : f32
    %168 = vector.broadcast %cst_161 : f32 to vector<22x352xf32>
    %169 = arith.maximumf %167, %168 : vector<22x352xf32>
    %170 = arith.truncf %169 : vector<22x352xf32> to vector<22x352xbf16>
    %c0_162 = arith.constant 0 : index
    %c0_163 = arith.constant 0 : index
    %c0_164 = arith.constant 0 : index
    %171 = vector.load %arg13[%c0_162, %c0_163, %c0_164] : memref<5x8x22xbf16, #tpu.memory_space<vmem>>, vector<1x8x22xbf16>
    %172 = vector.shape_cast %171 : vector<1x8x22xbf16> to vector<8x22xbf16>
    %cst_165 = arith.constant dense<0.000000e+00> : vector<8x352xf32>
    %173 = tpu.matmul %172, %170, %cst_165 {dimension_numbers = #tpu.dot_dimension_numbers<[1], [0], [0], [1], [0, 0, 1, 1], [], []>} : vector<8x22xbf16>, vector<22x352xbf16>, vector<8x352xf32> -> vector<8x352xf32>
    %174 = arith.truncf %173 : vector<8x352xf32> to vector<8x352xbf16>
    %c0_166 = arith.constant 0 : index
    %c0_167 = arith.constant 0 : index
    %c0_168 = arith.constant 0 : index
    %175 = vector.load %arg14[%c0_166, %c0_167, %c0_168] : memref<5x352x128xbf16, #tpu.memory_space<vmem>>, vector<1x352x128xbf16>
    %176 = vector.shape_cast %175 : vector<1x352x128xbf16> to vector<352x128xbf16>
    %cst_169 = arith.constant dense<0.000000e+00> : vector<8x128xf32>
    %177 = tpu.matmul %174, %176, %cst_169 {dimension_numbers = #tpu.dot_dimension_numbers<[1], [0], [0], [1], [0, 0, 1, 1], [], []>} : vector<8x352xbf16>, vector<352x128xbf16>, vector<8x128xf32> -> vector<8x128xf32>
    %c0_170 = arith.constant 0 : index
    %c0_171 = arith.constant 0 : index
    %178 = vector.load %arg27[%c0_170, %c0_171] : memref<8x128xf32, #tpu.memory_space<vmem>>, vector<8x128xf32>
    tpu.vector_store %arg27[%c0_170, %c0_171], %177 {strides = array<i32>} : memref<8x128xf32, #tpu.memory_space<vmem>>, vector<8x128xf32>,
    %c1_172 = arith.constant 1 : index
    %c0_173 = arith.constant 0 : index
    %c0_174 = arith.constant 0 : index
    %179 = vector.load %arg13[%c1_172, %c0_173, %c0_174] : memref<5x8x22xbf16, #tpu.memory_space<vmem>>, vector<1x8x22xbf16>
    %180 = vector.shape_cast %179 : vector<1x8x22xbf16> to vector<8x22xbf16>
    %cst_175 = arith.constant dense<0.000000e+00> : vector<8x352xf32>
    %181 = tpu.matmul %180, %170, %cst_175 {dimension_numbers = #tpu.dot_dimension_numbers<[1], [0], [0], [1], [0, 0, 1, 1], [], []>} : vector<8x22xbf16>, vector<22x352xbf16>, vector<8x352xf32> -> vector<8x352xf32>
    %182 = arith.truncf %181 : vector<8x352xf32> to vector<8x352xbf16>
    %c1_176 = arith.constant 1 : index
    %c0_177 = arith.constant 0 : index
    %c0_178 = arith.constant 0 : index
    %183 = vector.load %arg14[%c1_176, %c0_177, %c0_178] : memref<5x352x128xbf16, #tpu.memory_space<vmem>>, vector<1x352x128xbf16>
    %184 = vector.shape_cast %183 : vector<1x352x128xbf16> to vector<352x128xbf16>
    %cst_179 = arith.constant dense<0.000000e+00> : vector<8x128xf32>
    %185 = tpu.matmul %182, %184, %cst_179 {dimension_numbers = #tpu.dot_dimension_numbers<[1], [0], [0], [1], [0, 0, 1, 1], [], []>} : vector<8x352xbf16>, vector<352x128xbf16>, vector<8x128xf32> -> vector<8x128xf32>
    %c0_180 = arith.constant 0 : index
    %c0_181 = arith.constant 0 : index
    %186 = vector.load %arg27[%c0_180, %c0_181] : memref<8x128xf32, #tpu.memory_space<vmem>>, vector<8x128xf32>
    %187 = arith.addf %186, %185 : vector<8x128xf32>
    %c0_182 = arith.constant 0 : index
    %c0_183 = arith.constant 0 : index
    %188 = vector.load %arg27[%c0_182, %c0_183] : memref<8x128xf32, #tpu.memory_space<vmem>>, vector<8x128xf32>
    tpu.vector_store %arg27[%c0_182, %c0_183], %187 {strides = array<i32>} : memref<8x128xf32, #tpu.memory_space<vmem>>, vector<8x128xf32>,
    %c2_184 = arith.constant 2 : index
    %c0_185 = arith.constant 0 : index
    %c0_186 = arith.constant 0 : index
    %189 = vector.load %arg13[%c2_184, %c0_185, %c0_186] : memref<5x8x22xbf16, #tpu.memory_space<vmem>>, vector<1x8x22xbf16>
    %190 = vector.shape_cast %189 : vector<1x8x22xbf16> to vector<8x22xbf16>
    %cst_187 = arith.constant dense<0.000000e+00> : vector<8x352xf32>
    %191 = tpu.matmul %190, %170, %cst_187 {dimension_numbers = #tpu.dot_dimension_numbers<[1], [0], [0], [1], [0, 0, 1, 1], [], []>} : vector<8x22xbf16>, vector<22x352xbf16>, vector<8x352xf32> -> vector<8x352xf32>
    %192 = arith.truncf %191 : vector<8x352xf32> to vector<8x352xbf16>
    %c2_188 = arith.constant 2 : index
    %c0_189 = arith.constant 0 : index
    %c0_190 = arith.constant 0 : index
    %193 = vector.load %arg14[%c2_188, %c0_189, %c0_190] : memref<5x352x128xbf16, #tpu.memory_space<vmem>>, vector<1x352x128xbf16>
    %194 = vector.shape_cast %193 : vector<1x352x128xbf16> to vector<352x128xbf16>
    %cst_191 = arith.constant dense<0.000000e+00> : vector<8x128xf32>
    %195 = tpu.matmul %192, %194, %cst_191 {dimension_numbers = #tpu.dot_dimension_numbers<[1], [0], [0], [1], [0, 0, 1, 1], [], []>} : vector<8x352xbf16>, vector<352x128xbf16>, vector<8x128xf32> -> vector<8x128xf32>
    %c0_192 = arith.constant 0 : index
    %c0_193 = arith.constant 0 : index
    %196 = vector.load %arg27[%c0_192, %c0_193] : memref<8x128xf32, #tpu.memory_space<vmem>>, vector<8x128xf32>
    %197 = arith.addf %196, %195 : vector<8x128xf32>
    %c0_194 = arith.constant 0 : index
    %c0_195 = arith.constant 0 : index
    %198 = vector.load %arg27[%c0_194, %c0_195] : memref<8x128xf32, #tpu.memory_space<vmem>>, vector<8x128xf32>
    tpu.vector_store %arg27[%c0_194, %c0_195], %197 {strides = array<i32>} : memref<8x128xf32, #tpu.memory_space<vmem>>, vector<8x128xf32>,
    %c3_196 = arith.constant 3 : index
    %c0_197 = arith.constant 0 : index
    %c0_198 = arith.constant 0 : index
    %199 = vector.load %arg13[%c3_196, %c0_197, %c0_198] : memref<5x8x22xbf16, #tpu.memory_space<vmem>>, vector<1x8x22xbf16>
    %200 = vector.shape_cast %199 : vector<1x8x22xbf16> to vector<8x22xbf16>
    %cst_199 = arith.constant dense<0.000000e+00> : vector<8x352xf32>
    %201 = tpu.matmul %200, %170, %cst_199 {dimension_numbers = #tpu.dot_dimension_numbers<[1], [0], [0], [1], [0, 0, 1, 1], [], []>} : vector<8x22xbf16>, vector<22x352xbf16>, vector<8x352xf32> -> vector<8x352xf32>
    %202 = arith.truncf %201 : vector<8x352xf32> to vector<8x352xbf16>
    %c3_200 = arith.constant 3 : index
    %c0_201 = arith.constant 0 : index
    %c0_202 = arith.constant 0 : index
    %203 = vector.load %arg14[%c3_200, %c0_201, %c0_202] : memref<5x352x128xbf16, #tpu.memory_space<vmem>>, vector<1x352x128xbf16>
    %204 = vector.shape_cast %203 : vector<1x352x128xbf16> to vector<352x128xbf16>
    %cst_203 = arith.constant dense<0.000000e+00> : vector<8x128xf32>
    %205 = tpu.matmul %202, %204, %cst_203 {dimension_numbers = #tpu.dot_dimension_numbers<[1], [0], [0], [1], [0, 0, 1, 1], [], []>} : vector<8x352xbf16>, vector<352x128xbf16>, vector<8x128xf32> -> vector<8x128xf32>
    %c0_204 = arith.constant 0 : index
    %c0_205 = arith.constant 0 : index
    %206 = vector.load %arg27[%c0_204, %c0_205] : memref<8x128xf32, #tpu.memory_space<vmem>>, vector<8x128xf32>
    %207 = arith.addf %206, %205 : vector<8x128xf32>
    %c0_206 = arith.constant 0 : index
    %c0_207 = arith.constant 0 : index
    %208 = vector.load %arg27[%c0_206, %c0_207] : memref<8x128xf32, #tpu.memory_space<vmem>>, vector<8x128xf32>
    tpu.vector_store %arg27[%c0_206, %c0_207], %207 {strides = array<i32>} : memref<8x128xf32, #tpu.memory_space<vmem>>, vector<8x128xf32>,
    %c4_208 = arith.constant 4 : index
    %c0_209 = arith.constant 0 : index
    %c0_210 = arith.constant 0 : index
    %209 = vector.load %arg13[%c4_208, %c0_209, %c0_210] : memref<5x8x22xbf16, #tpu.memory_space<vmem>>, vector<1x8x22xbf16>
    %210 = vector.shape_cast %209 : vector<1x8x22xbf16> to vector<8x22xbf16>
    %cst_211 = arith.constant dense<0.000000e+00> : vector<8x352xf32>
    %211 = tpu.matmul %210, %170, %cst_211 {dimension_numbers = #tpu.dot_dimension_numbers<[1], [0], [0], [1], [0, 0, 1, 1], [], []>} : vector<8x22xbf16>, vector<22x352xbf16>, vector<8x352xf32> -> vector<8x352xf32>
    %212 = arith.truncf %211 : vector<8x352xf32> to vector<8x352xbf16>
    %c4_212 = arith.constant 4 : index
    %c0_213 = arith.constant 0 : index
    %c0_214 = arith.constant 0 : index
    %213 = vector.load %arg14[%c4_212, %c0_213, %c0_214] : memref<5x352x128xbf16, #tpu.memory_space<vmem>>, vector<1x352x128xbf16>
    %214 = vector.shape_cast %213 : vector<1x352x128xbf16> to vector<352x128xbf16>
    %cst_215 = arith.constant dense<0.000000e+00> : vector<8x128xf32>
    %215 = tpu.matmul %212, %214, %cst_215 {dimension_numbers = #tpu.dot_dimension_numbers<[1], [0], [0], [1], [0, 0, 1, 1], [], []>} : vector<8x352xbf16>, vector<352x128xbf16>, vector<8x128xf32> -> vector<8x128xf32>
    %c0_216 = arith.constant 0 : index
    %c0_217 = arith.constant 0 : index
    %216 = vector.load %arg27[%c0_216, %c0_217] : memref<8x128xf32, #tpu.memory_space<vmem>>, vector<8x128xf32>
    %217 = arith.addf %216, %215 : vector<8x128xf32>
    %c0_218 = arith.constant 0 : index
    %c0_219 = arith.constant 0 : index
    %218 = vector.load %arg27[%c0_218, %c0_219] : memref<8x128xf32, #tpu.memory_space<vmem>>, vector<8x128xf32>
    tpu.vector_store %arg27[%c0_218, %c0_219], %217 {strides = array<i32>} : memref<8x128xf32, #tpu.memory_space<vmem>>, vector<8x128xf32>,
    %c0_220 = arith.constant 0 : index
    %c0_221 = arith.constant 0 : index
    %219 = vector.load %arg27[%c0_220, %c0_221] : memref<8x128xf32, #tpu.memory_space<vmem>>, vector<8x128xf32>
    %cst_222 = arith.constant dense<0.000000e+00> : vector<128xf32>
    %220 = vector.multi_reduction <add>, %219, %cst_222 [0] : vector<8x128xf32> to vector<128xf32>
    %221 = vector.shape_cast %220 : vector<128xf32> to vector<1x128xf32>
    %222 = arith.mulf %219, %219 : vector<8x128xf32>
    %cst_223 = arith.constant dense<0.000000e+00> : vector<128xf32>
    %223 = vector.multi_reduction <add>, %222, %cst_223 [0] : vector<8x128xf32> to vector<128xf32>
    %224 = vector.shape_cast %223 : vector<128xf32> to vector<1x128xf32>
    %c0_224 = arith.constant 0 : index
    %c0_225 = arith.constant 0 : index
    %225 = vector.load %arg15[%c0_224, %c0_225] : memref<128x32xf32, #tpu.memory_space<vmem>>, vector<128x32xf32>
    %cst_226 = arith.constant dense<0.000000e+00> : vector<1x32xf32>
    %226 = tpu.matmul %221, %225, %cst_226 {dimension_numbers = #tpu.dot_dimension_numbers<[1], [0], [0], [1], [0, 0, 1, 1], [], []>} : vector<1x128xf32>, vector<128x32xf32>, vector<1x32xf32> -> vector<1x32xf32>
    %cst_227 = arith.constant 3.200000e+01 : f32
    %227 = vector.broadcast %cst_227 : f32 to vector<1x32xf32>
    %228 = arith.divf %226, %227 : vector<1x32xf32>
    %c0_228 = arith.constant 0 : index
    %c0_229 = arith.constant 0 : index
    %229 = vector.load %arg15[%c0_228, %c0_229] : memref<128x32xf32, #tpu.memory_space<vmem>>, vector<128x32xf32>
    %cst_230 = arith.constant dense<0.000000e+00> : vector<1x32xf32>
    %230 = tpu.matmul %224, %229, %cst_230 {dimension_numbers = #tpu.dot_dimension_numbers<[1], [0], [0], [1], [0, 0, 1, 1], [], []>} : vector<1x128xf32>, vector<128x32xf32>, vector<1x32xf32> -> vector<1x32xf32>
    %cst_231 = arith.constant 3.200000e+01 : f32
    %231 = vector.broadcast %cst_231 : f32 to vector<1x32xf32>
    %232 = arith.divf %230, %231 : vector<1x32xf32>
    %233 = arith.mulf %228, %228 : vector<1x32xf32>
    %234 = arith.subf %232, %233 : vector<1x32xf32>
    %cst_232 = arith.constant 0.000000e+00 : f32
    %235 = vector.broadcast %cst_232 : f32 to vector<1x32xf32>
    %236 = arith.maximumf %234, %235 : vector<1x32xf32>
    %c0_233 = arith.constant 0 : index
    %c0_234 = arith.constant 0 : index
    %237 = vector.load %arg17[%c0_233, %c0_234] : memref<1x32xf32, #tpu.memory_space<vmem>>, vector<1x32xf32>
    %cst_235 = arith.constant 9.99999974E-6 : f32
    %238 = vector.broadcast %cst_235 : f32 to vector<1x32xf32>
    %239 = arith.addf %236, %238 : vector<1x32xf32>
    %240 = math.rsqrt %239 : vector<1x32xf32>
    %241 = arith.mulf %237, %240 : vector<1x32xf32>
    %c0_236 = arith.constant 0 : index
    %c0_237 = arith.constant 0 : index
    %242 = vector.load %arg18[%c0_236, %c0_237] : memref<1x32xf32, #tpu.memory_space<vmem>>, vector<1x32xf32>
    %243 = arith.mulf %228, %241 : vector<1x32xf32>
    %244 = arith.subf %242, %243 : vector<1x32xf32>
    %c0_238 = arith.constant 0 : index
    %c0_239 = arith.constant 0 : index
    %245 = vector.load %arg16[%c0_238, %c0_239] : memref<32x128xf32, #tpu.memory_space<vmem>>, vector<32x128xf32>
    %cst_240 = arith.constant dense<0.000000e+00> : vector<1x128xf32>
    %246 = tpu.matmul %241, %245, %cst_240 {dimension_numbers = #tpu.dot_dimension_numbers<[1], [0], [0], [1], [0, 0, 1, 1], [], []>} : vector<1x32xf32>, vector<32x128xf32>, vector<1x128xf32> -> vector<1x128xf32>
    %c0_241 = arith.constant 0 : index
    %c0_242 = arith.constant 0 : index
    %247 = vector.load %arg16[%c0_241, %c0_242] : memref<32x128xf32, #tpu.memory_space<vmem>>, vector<32x128xf32>
    %cst_243 = arith.constant dense<0.000000e+00> : vector<1x128xf32>
    %248 = tpu.matmul %244, %247, %cst_243 {dimension_numbers = #tpu.dot_dimension_numbers<[1], [0], [0], [1], [0, 0, 1, 1], [], []>} : vector<1x32xf32>, vector<32x128xf32>, vector<1x128xf32> -> vector<1x128xf32>
    %249 = vector.broadcast %246 : vector<1x128xf32> to vector<8x128xf32>
    %250 = arith.mulf %219, %249 : vector<8x128xf32>
    %251 = vector.broadcast %248 : vector<1x128xf32> to vector<8x128xf32>
    %252 = arith.addf %250, %251 : vector<8x128xf32>
    %cst_244 = arith.constant 0.000000e+00 : f32
    %253 = vector.broadcast %cst_244 : f32 to vector<8x128xf32>
    %254 = arith.maximumf %252, %253 : vector<8x128xf32>
    %c0_245 = arith.constant 0 : index
    %c0_246 = arith.constant 0 : index
    %255 = vector.load %arg19[%c0_245, %c0_246] : memref<128x8xf32, #tpu.memory_space<vmem>>, vector<128x8xf32>
    %cst_247 = arith.constant dense<0.000000e+00> : vector<8x8xf32>
    %256 = tpu.matmul %254, %255, %cst_247 {dimension_numbers = #tpu.dot_dimension_numbers<[1], [0], [0], [1], [0, 0, 1, 1], [], []>} : vector<8x128xf32>, vector<128x8xf32>, vector<8x8xf32> -> vector<8x8xf32>
    %c0_248 = arith.constant 0 : index
    %c0_249 = arith.constant 0 : index
    %257 = vector.load %arg20[%c0_248, %c0_249] : memref<8x8xf32, #tpu.memory_space<vmem>>, vector<8x8xf32>
    %258 = arith.mulf %256, %257 : vector<8x8xf32>
    %c0_250 = arith.constant 0 : index
    %c0_251 = arith.constant 0 : index
    %259 = vector.load %arg21[%c0_250, %c0_251] : memref<8x2xf32, #tpu.memory_space<vmem>>, vector<8x2xf32>
    %cst_252 = arith.constant dense<0.000000e+00> : vector<8x2xf32>
    %260 = tpu.matmul %258, %259, %cst_252 {dimension_numbers = #tpu.dot_dimension_numbers<[1], [0], [0], [1], [0, 0, 1, 1], [], []>} : vector<8x8xf32>, vector<8x2xf32>, vector<8x2xf32> -> vector<8x2xf32>
    %c0_253 = arith.constant 0 : index
    %c0_254 = arith.constant 0 : index
    %261 = vector.load %arg22[%c0_253, %c0_254] : memref<2x8xf32, #tpu.memory_space<vmem>>, vector<2x8xf32>
    %cst_255 = arith.constant dense<0.000000e+00> : vector<2x2xf32>
    %262 = tpu.matmul %261, %260, %cst_255 {dimension_numbers = #tpu.dot_dimension_numbers<[1], [0], [0], [1], [0, 0, 1, 1], [], []>} : vector<2x8xf32>, vector<8x2xf32>, vector<2x2xf32> -> vector<2x2xf32>
    %c0_256 = arith.constant 0 : index
    %c0_257 = arith.constant 0 : index
    %263 = vector.load %arg23[%c0_256, %c0_257] : memref<1x2xf32, #tpu.memory_space<vmem>>, vector<1x2xf32>
    %264 = vector.broadcast %263 : vector<1x2xf32> to vector<2x2xf32>
    %265 = arith.addf %262, %264 : vector<2x2xf32>
    %c0_258 = arith.constant 0 : index
    %c0_259 = arith.constant 0 : index
    %266 = vector.load %arg24[%c0_258, %c0_259] : memref<2x2xf32, #tpu.memory_space<vmem>>, vector<2x2xf32>
    tpu.vector_store %arg24[%c0_258, %c0_259], %265 {strides = array<i32>} : memref<2x2xf32, #tpu.memory_space<vmem>>, vector<2x2xf32>,
    return
  }
}

</mosaic_0001>

<bundles_post_ra>
// kernel: dqn_forward.1
= control target key start
LH: loop header
LB: loop body
LE: loop exit
PB: predicated region body
PF: predicated region fallthrough
CT: control target
= control target key end

     0   :  { %s20740_s0 = inlined_call_operand.vmem [shape: bf16[108,216], index: 0, kind: input, shape index: {}]   ;;  %s20741_s1 = inlined_call_operand.vmem [shape: bf16[5,50,108], index: 1, kind: input, shape index: {}]   ;;  %s20742_s2 = inlined_call_operand.vmem [shape: bf16[5,216,400], index: 2, kind: input, shape index: {}]   ;;  %s20743_s3 = inlined_call_operand.vmem [shape: f32[400,16], index: 3, kind: input, shape index: {}]   ;;  %s20744_s4 = inlined_call_operand.vmem [shape: f32[16,400], index: 4, kind: input, shape index: {}]   ;;  %s20745_s5 = inlined_call_operand.vmem [shape: f32[1,16], index: 5, kind: input, shape index: {}]   ;;  %s20746_s6 = inlined_call_operand.vmem [shape: f32[1,16], index: 6, kind: input, shape index: {}]   ;;  %s20747_s7 = inlined_call_operand.vmem [shape: bf16[5,22,50], index: 7, kind: input, shape index: {}]   ;;  %s20748_s8 = inlined_call_operand.vmem [shape: bf16[5,400,352], index: 8, kind: input, shape index: {}]   ;;  %s20749_s9 = inlined_call_operand.vmem [shape: f32[352,32], index: 9, kind: input, shape index: {}]   ;;  %s20750_s10 = inlined_call_operand.vmem [shape: f32[32,352], index: 10, kind: input, shape index: {}]   ;;  %s20751_s11 = inlined_call_operand.vmem [shape: f32[1,32], index: 11, kind: input, shape index: {}]   ;;  %s20752_s12 = inlined_call_operand.vmem [shape: f32[1,32], index: 12, kind: input, shape index: {}]   ;;  %s20753_s13 = inlined_call_operand.vmem [shape: bf16[5,8,22], index: 13, kind: input, shape index: {}]   ;;  %s20754_s14 = inlined_call_operand.vmem [shape: bf16[5,352,128], index: 14, kind: input, shape index: {}]   ;;  %s20755_s15 = inlined_call_operand.vmem [shape: f32[128,32], index: 15, kind: input, shape index: {}]   ;;  %s20756_s16 = inlined_call_operand.vmem [shape: f32[32,128], index: 16, kind: input, shape index: {}]   ;;  %s20757_s17 = inlined_call_operand.vmem [shape: f32[1,32], index: 17, kind: input, shape index: {}]   ;;  %s20758_s18 = inlined_call_operand.vmem [shape: f32[1,32], index: 18, kind: input, shape index: {}]   ;;  %s20759_s19 = inlined_call_operand.vmem [shape: f32[128,8], index: 19, kind: input, shape index: {}]   ;;  %s20760_s20 = inlined_call_operand.vmem [shape: f32[8,8], index: 20, kind: input, shape index: {}]   ;;  %s20761_s21 = inlined_call_operand.vmem [shape: f32[8,2], index: 21, kind: input, shape index: {}]   ;;  %s20762_s22 = inlined_call_operand.vmem [shape: f32[2,8], index: 22, kind: input, shape index: {}]   ;;  %s20763_s23 = inlined_call_operand.vmem [shape: f32[1,2], index: 23, kind: input, shape index: {}]   ;;  %s20764_s24 = inlined_call_operand.hbm [shape: f32[2,2], index: 24, kind: output, shape index: {}]  }
   0x1   :  { %20837 = sst [smem:[#allocation51_spill]] %s20740_s0 }
   0x2   :  { %20838 = sst [smem:[#allocation52_spill]] %s20741_s1 }
   0x3   :  { %20839 = sst [smem:[#allocation53_spill]] %s20742_s2 }
   0x4   :  { %20840 = sst [smem:[#allocation54_spill]] %s20743_s3 }
   0x5   :  { %20841 = sst [smem:[#allocation55_spill]] %s20744_s4 }
   0x6   :  { %20842 = sst [smem:[#allocation56_spill]] %s20745_s5 }
   0x7   :  { %20843 = sst [smem:[#allocation57_spill]] %s20746_s6 }
   0x8   :  { %20844 = sst [smem:[#allocation58_spill]] %s20747_s7 }
   0x9   :  { %20845 = sst [smem:[#allocation59_spill]] %s20748_s8 }
   0xa   :  { %s20846_s27 = sld [smem:[#allocation51_spill]]  ;;  %vm199_vm0 = vcmask 1045504   ;;  %v20772_v4 = vmov 0   ;;  %vm186_vm1 = vcmask 883712   ;;  %vm622_vm2 = vcmask 1043456  }
   0xb   :  { %238 = vmatprep.mubr.bf16.mxu0 %v20772_v4  ;;  %s20847_s0 = sld [smem:[#allocation53_spill]]  ;;  %vm609_vm3 = vcmask 719872  }
   0xc   :  { %s20848_s8 = sld [smem:[#allocation52_spill]] }
  0x10   :  { %v15928_v0 = vld [vmem:[%s20846_s27 + $0x64] ss:$8 sps:$4 sm:$0x3f]   ;;  %v14658_v1 = vld [vmem:[%s20846_s27 + $0x60] ss:$8 sps:$4 sm:$0x3f]  }
  0x11   :  { %11989 = vmatprep.subr.msk.bf16.mxu0 %vm199_vm0, %v15928_v0  ;;  %v14659_v2 = vld [vmem:[%s20846_s27 + $0x54] ss:$8 sps:$4 sm:$0xff]   ;;  %v15939_v3 = vsel %vm199_vm0, %v14658_v1, 0  ;;  %v14661_v5 = vld [vmem:[%s20846_s27 + $0x50] ss:$8 sps:$4 sm:$0xff]   ;;  %v337_v40 = vld [vmem:[%s20847_s0 + $0x1a0] sm:$0xff] }
  0x12   :  { %209 = vmatpush1.bf16.msra.mxu0 %v15939_v3  ;;  %v14662_v6 = vld [vmem:[%s20846_s27 + $0x44] ss:$8 sps:$4 sm:$0xff]   ;;  %v14664_v7 = vld [vmem:[%s20846_s27 + $0x40] ss:$8 sps:$4 sm:$0xff]   ;;  %v14665_v8 = vld [vmem:[%s20846_s27 + $0x34] ss:$8 sps:$4 sm:$0xff]   ;;  %v12046_v44 = vcombine.low %v337_v40, %v337_v40  ;;  %v12047_v47 = vcombine.high %v337_v40, %v337_v40 }
  0x13   :  { %210 = vmatprep.subr.bf16.mxu0 %v14659_v2  ;;  %v14667_v9 = vld [vmem:[%s20846_s27 + $0x30] ss:$8 sps:$4 sm:$0xff]   ;;  %v14668_v10 = vld [vmem:[%s20846_s27 + $0x24] ss:$8 sps:$4 sm:$0xff]   ;;  %v14670_v12 = vld [vmem:[%s20846_s27 + $0x20] ss:$8 sps:$4 sm:$0xff]  }
  0x14   :  { %v14681_v11 = vld [vmem:[%s20847_s0 + $0xe4] ss:$16 sps:$4 sm:$0xff]   ;;  %v14686_v13 = vld [vmem:[%s20847_s0 + $0xe0] ss:$16 sps:$4 sm:$0xff]   ;;  %v14685_v23 = vld [vmem:[%s20847_s0 + $0xec] ss:$16 sps:$4 sm:$0xff]  }
  0x15   :  { %635 = vmatprep.subr.bf16.mxu1 %v14681_v11  ;;  %v14687_v14 = vld [vmem:[%s20847_s0 + $0xc4] ss:$16 sps:$4 sm:$0xff]   ;;  %v14692_v16 = vld [vmem:[%s20847_s0 + $0xc0] ss:$16 sps:$4 sm:$0xff]   ;;  %v14683_v27 = vld [vmem:[%s20847_s0 + $0xe8] ss:$16 sps:$4 sm:$0xff]  }
  0x16   :  { %211 = vmatpush1.bf16.msra.mxu0 %v14661_v5  ;;  %v14671_v15 = vld [vmem:[%s20846_s27 + $0x14] ss:$8 sps:$4 sm:$0xff]   ;;  %636 = vmatpush1.bf16.msra.mxu1 %v14686_v13  ;;  %v14673_v18 = vld [vmem:[%s20846_s27 + $0x10] ss:$8 sps:$4 sm:$0xff]   ;;  %v14674_v19 = vld [vmem:[%s20846_s27 + $0x4] ss:$8 sps:$4 sm:$0xff]  }
  0x17   :  { %212 = vmatprep.subr.bf16.mxu0 %v14662_v6  ;;  %637 = vmatprep.subr.bf16.mxu1 %v14687_v14  ;;  %v14693_v17 = vld [vmem:[%s20847_s0 + $0xa4] ss:$16 sps:$4 sm:$0xff]   ;;  %v14698_v20 = vld [vmem:[%s20847_s0 + $0xa0] ss:$16 sps:$4 sm:$0xff]   ;;  %v14691_v28 = vld [vmem:[%s20847_s0 + $0xcc] ss:$16 sps:$4 sm:$0xff]  }
  0x18   :  { %v14699_v21 = vld [vmem:[%s20847_s0 + $0x84] ss:$16 sps:$4 sm:$0xff]   ;;  %v14676_v22 = vld [vmem:[%s20846_s27] ss:$8 sps:$4 sm:$0xff]   ;;  %v14697_v32 = vld [vmem:[%s20847_s0 + $0xac] ss:$16 sps:$4 sm:$0xff]  }
  0x19   :  { %v14704_v24 = vld [vmem:[%s20847_s0 + $0x80] ss:$16 sps:$4 sm:$0xff]   ;;  %v14705_v25 = vld [vmem:[%s20847_s0 + $0x64] ss:$16 sps:$4 sm:$0xff]   ;;  %v14689_v31 = vld [vmem:[%s20847_s0 + $0xc8] ss:$16 sps:$4 sm:$0xff]  }
  0x1a   :  { %213 = vmatpush1.bf16.msra.mxu0 %v14664_v7  ;;  %638 = vmatpush1.bf16.msra.mxu1 %v14692_v16  ;;  %v14677_v26 = vld [vmem:[%s20848_s8] sm:$0xff]   ;;  %v14678_v35 = vld [vmem:[%s20848_s8 + $0x8] sm:$0xff]   ;;  %v14679_v45 = vld [vmem:[%s20848_s8 + $0x10] sm:$0xff]   ;;  %v624_v50 = vsel %vm622_vm2, %v12046_v44, 0 }
  0x1b   :  { %214 = vmatprep.subr.bf16.mxu0 %v14665_v8  ;;  %639 = vmatprep.subr.bf16.mxu1 %v14693_v17  ;;  %v14710_v29 = vld [vmem:[%s20847_s0 + $0x60] ss:$16 sps:$4 sm:$0xff]   ;;  %v14711_v30 = vld [vmem:[%s20847_s0 + $0x44] ss:$16 sps:$4 sm:$0xff]   ;;  %v14695_v36 = vld [vmem:[%s20847_s0 + $0xa8] ss:$16 sps:$4 sm:$0xff]  }
  0x1c   :  { %v14716_v33 = vld [vmem:[%s20847_s0 + $0x40] ss:$16 sps:$4 sm:$0xff]   ;;  %v14717_v34 = vld [vmem:[%s20847_s0 + $0x24] ss:$16 sps:$4 sm:$0xff]   ;;  %v14703_v37 = vld [vmem:[%s20847_s0 + $0x8c] ss:$16 sps:$4 sm:$0xff]  }
  0x1d   :  { %v14722_v38 = vld [vmem:[%s20847_s0 + $0x20] ss:$16 sps:$4 sm:$0xff]   ;;  %v14723_v39 = vld [vmem:[%s20847_s0 + $0x4] ss:$16 sps:$4 sm:$0xff]   ;;  %v14701_v41 = vld [vmem:[%s20847_s0 + $0x88] ss:$16 sps:$4 sm:$0xff]  }
  0x1e   :  { %215 = vmatpush1.bf16.msra.mxu0 %v14667_v9  ;;  %640 = vmatpush1.bf16.msra.mxu1 %v14698_v20  ;;  %v14709_v42 = vld [vmem:[%s20847_s0 + $0x6c] ss:$16 sps:$4 sm:$0xff]   ;;  %v14728_v43 = vld [vmem:[%s20847_s0] ss:$16 sps:$4 sm:$0xff]   ;;  %v14707_v46 = vld [vmem:[%s20847_s0 + $0x68] ss:$16 sps:$4 sm:$0xff]  }
  0x1f   :  { %216 = vmatprep.subr.bf16.mxu0 %v14668_v10  ;;  %641 = vmatprep.subr.bf16.mxu1 %v14699_v21  ;;  %v14715_v48 = vld [vmem:[%s20847_s0 + $0x4c] ss:$16 sps:$4 sm:$0xff]   ;;  %v14733_v49 = vld [vmem:[%s20847_s0 + $0x184] ss:$16 sps:$4 sm:$0xff]   ;;  %v14713_v51 = vld [vmem:[%s20847_s0 + $0x48] ss:$16 sps:$4 sm:$0xff]  }
  0x20   :  { %v14721_v52 = vld [vmem:[%s20847_s0 + $0x2c] ss:$16 sps:$4 sm:$0xff]   ;;  %v14738_v53 = vld [vmem:[%s20847_s0 + $0x180] ss:$16 sps:$4 sm:$0xff]   ;;  %v14739_v54 = vld [vmem:[%s20847_s0 + $0x164] ss:$16 sps:$4 sm:$0xff]  }
  0x21   :  { %v14680_v55 = vld [vmem:[%s20848_s8 + $0x18] ss:$0 sps:$4 sm:$0x11]   ;;  %v14727_v57 = vld [vmem:[%s20847_s0 + $0xc] ss:$16 sps:$4 sm:$0xff]  }
  0x22   :  { %217 = vmatpush1.bf16.msra.mxu0 %v14670_v12  ;;  %642 = vmatpush1.bf16.msra.mxu1 %v14704_v24  ;;  %v14719_v56 = vld [vmem:[%s20847_s0 + $0x28] ss:$16 sps:$4 sm:$0xff]   ;;  %v14744_v58 = vld [vmem:[%s20847_s0 + $0x160] ss:$16 sps:$4 sm:$0xff]   ;;  %v14745_v60 = vld [vmem:[%s20847_s0 + $0x144] ss:$16 sps:$4 sm:$0xff]  }
  0x23   :  { %218 = vmatprep.subr.bf16.mxu0 %v14671_v15  ;;  %643 = vmatprep.subr.bf16.mxu1 %v14705_v25  ;;  %v338_v59 = vld [vmem:[%s20847_s0 + $0x1a8] sm:$0xff]  ;;  %v14750_v62 = vld [vmem:[%s20847_s0 + $0x140] ss:$16 sps:$4 sm:$0xff]   ;;  %v14751_v11 = vld [vmem:[%s20847_s0 + $0x124] ss:$16 sps:$4 sm:$0xff]  }
  0x24   :  { %v14725_v61 = vld [vmem:[%s20847_s0 + $0x8] ss:$16 sps:$4 sm:$0xff]   ;;  %v12049_v63 = vcombine.high %v338_v59, %v338_v59  ;;  %v12048_v1 = vcombine.low %v338_v59, %v338_v59  ;;  %v14737_v2 = vld [vmem:[%s20847_s0 + $0x18c] ss:$16 sps:$4 sm:$0xff]   ;;  %v14756_v14 = vld [vmem:[%s20847_s0 + $0x120] ss:$16 sps:$4 sm:$0xff]  }
  0x25   :  { %v14735_v6 = vld [vmem:[%s20847_s0 + $0x188] ss:$16 sps:$4 sm:$0xff]   ;;  %v14743_v7 = vld [vmem:[%s20847_s0 + $0x16c] ss:$16 sps:$4 sm:$0xff]   ;;  %v14757_v15 = vld [vmem:[%s20847_s0 + $0x104] ss:$16 sps:$4 sm:$0xff]  }
  0x26   :  { %219 = vmatpush1.bf16.msra.mxu0 %v14673_v18  ;;  %644 = vmatpush1.bf16.msra.mxu1 %v14710_v29  ;;  %v630_v5 = vsel %vm622_vm2, %v12048_v1, 0  ;;  %v14741_v8 = vld [vmem:[%s20847_s0 + $0x168] ss:$16 sps:$4 sm:$0xff]   ;;  %v14749_v9 = vld [vmem:[%s20847_s0 + $0x14c] ss:$16 sps:$4 sm:$0xff]  }
  0x27   :  { %220 = vmatprep.subr.bf16.mxu0 %v14674_v19  ;;  %645 = vmatprep.subr.bf16.mxu1 %v14711_v30  ;;  %v14747_v10 = vld [vmem:[%s20847_s0 + $0x148] ss:$16 sps:$4 sm:$0xff]   ;;  %v14755_v12 = vld [vmem:[%s20847_s0 + $0x12c] ss:$16 sps:$4 sm:$0xff]   ;;  %v14762_v18 = vld [vmem:[%s20847_s0 + $0x100] ss:$16 sps:$4 sm:$0xff]  }
  0x28   :  { %v14753_v13 = vld [vmem:[%s20847_s0 + $0x128] ss:$16 sps:$4 sm:$0xff]   ;;  %v14761_v16 = vld [vmem:[%s20847_s0 + $0x10c] ss:$16 sps:$4 sm:$0xff]   ;;  %v14769_v19 = vld [vmem:[%s20847_s0 + $0x294] ss:$16 sps:$4 sm:$0xff]  }
  0x29   :  { %v14759_v17 = vld [vmem:[%s20847_s0 + $0x108] ss:$16 sps:$4 sm:$0xff]   ;;  %v14775_v25 = vld [vmem:[%s20847_s0 + $0x274] ss:$16 sps:$4 sm:$0xff]  }
  0x2a   :  { %221 = vmatpush1.bf16.msra.mxu0 %v14676_v22  ;;  %646 = vmatpush1.bf16.msra.mxu1 %v14716_v33  ;;  %v14781_v30 = vld [vmem:[%s20847_s0 + $0x254] ss:$16 sps:$4 sm:$0xff]   ;;  %v14779_v33 = vld [vmem:[%s20847_s0 + $0x250] ss:$16 sps:$4 sm:$0xff]   ;;  %v14770_v1 = vld [vmem:[%s20847_s0 + $0x298] ss:$16 sps:$4 sm:$0xff]  }
  0x2b   :  { %706 = vmatprep.subr.bf16.mxu0 %v14685_v23  ;;  %647 = vmatprep.subr.bf16.mxu1 %v14717_v34  ;;  %v14767_v23 = vld [vmem:[%s20847_s0 + $0x290] ss:$16 sps:$4 sm:$0xff]   ;;  %v15735_v40 = vld [vmem:[%s20846_s27 + $0x44] ss:$8 sps:$4 sm:$0xff]  }
  0x2c   :  { %v15742_v59 = vld [vmem:[%s20846_s27 + $0x10] ss:$8 sps:$4 sm:$0xff]  }
  0x2d   :  { %11990 = vmatmul.mubr.msk.bf16.vlgmr.msra.gmra.mxu0 %vm186_vm1, %v14677_v26 }
  0x2e   :  { %248 = vmatprep.mubr.bf16.mxu0 %v20772_v4  ;;  %707 = vmatpush1.bf16.msra.mxu0 %v14683_v27 }
  0x2f   :  { %708 = vmatprep.subr.bf16.mxu0 %v14691_v28  ;;  %648 = vmatpush1.bf16.msra.mxu1 %v14722_v38  ;;  %v14773_v28 = vld [vmem:[%s20847_s0 + $0x270] ss:$16 sps:$4 sm:$0xff]  }
  0x30   :  { %649 = vmatprep.subr.bf16.mxu1 %v14723_v39 }
  0x32   :  { %709 = vmatpush1.bf16.msra.mxu0 %v14689_v31 }
  0x33   :  { %710 = vmatprep.subr.bf16.mxu0 %v14697_v32  ;;  %650 = vmatpush1.bf16.msra.mxu1 %v14728_v43  ;;  %v15733_v32 = vld [vmem:[%s20846_s27 + $0x54] ss:$8 sps:$4 sm:$0xff]   ;;  %v15736_v43 = vld [vmem:[%s20846_s27 + $0x40] ss:$8 sps:$4 sm:$0xff]  }
  0x34   :  { %12050 = vmatprep.subr.msk.bf16.mxu1 %vm622_vm2, %v12047_v47 }
  0x35   :  { %11991 = vmatmul.mubr.msk.bf16.gmra.mxu0 %vm186_vm1, %v14678_v35  ;;  %v14787_v35 = vld [vmem:[%s20847_s0 + $0x234] ss:$16 sps:$4 sm:$0xff]  }
  0x36   :  { %258 = vmatprep.mubr.bf16.mxu0 %v20772_v4  ;;  %711 = vmatpush1.bf16.msra.mxu0 %v14695_v36 }
  0x37   :  { %712 = vmatprep.subr.bf16.mxu0 %v14703_v37  ;;  %656 = vmatpush2.bf16.msra.mxu1 %v624_v50  ;;  %v15734_v37 = vld [vmem:[%s20846_s27 + $0x50] ss:$8 sps:$4 sm:$0xff]  }
  0x38   :  { %657 = vmatprep.subr.bf16.mxu1 %v14733_v49 }
  0x3a   :  { %713 = vmatpush1.bf16.msra.mxu0 %v14701_v41  ;;  %v14785_v41 = vld [vmem:[%s20847_s0 + $0x230] ss:$16 sps:$4 sm:$0xff]  }
  0x3b   :  { %714 = vmatprep.subr.bf16.mxu0 %v14709_v42  ;;  %658 = vmatpush2.bf16.msra.mxu1 %v14738_v53 }
  0x3c   :  { %659 = vmatprep.subr.bf16.mxu1 %v14739_v54  ;;  %v15740_v54 = vld [vmem:[%s20846_s27 + $0x20] ss:$8 sps:$4 sm:$0xff]  }
  0x3d   :  { %11992 = vmatmul.mubr.msk.bf16.gmra.mxu0 %vm186_vm1, %v14679_v45  ;;  %v15737_v45 = vld [vmem:[%s20846_s27 + $0x34] ss:$8 sps:$4 sm:$0xff]  }
  0x3e   :  { %268 = vmatprep.mubr.bf16.mxu0 %v20772_v4  ;;  %715 = vmatpush1.bf16.msra.mxu0 %v14707_v46 }
  0x3f   :  { %716 = vmatprep.subr.bf16.mxu0 %v14715_v48  ;;  %660 = vmatpush2.bf16.msra.mxu1 %v14744_v58  ;;  %v15738_v48 = vld [vmem:[%s20846_s27 + $0x30] ss:$8 sps:$4 sm:$0xff]   ;;  %v14772_v58 = vld [vmem:[%s20847_s0 + $0x29c] ss:$16 sps:$4 sm:$0xff]  }
  0x40   :  { %661 = vmatprep.subr.bf16.mxu1 %v14745_v60 }
  0x42   :  { %717 = vmatpush1.bf16.msra.mxu0 %v14713_v51  ;;  %v15739_v51 = vld [vmem:[%s20846_s27 + $0x24] ss:$8 sps:$4 sm:$0xff]  }
  0x43   :  { %718 = vmatprep.subr.bf16.mxu0 %v14721_v52  ;;  %662 = vmatpush2.bf16.msra.mxu1 %v14750_v62  ;;  %v15744_v62 = vld [vmem:[%s20846_s27] ss:$8 sps:$4 sm:$0xff]  }
  0x44   :  { %663 = vmatprep.subr.bf16.mxu1 %v14751_v11  ;;  %v14765_v11 = vld [vmem:[%s20848_s8 + $0x2c] sm:$0xff]  }
  0x45   :  { %11993 = vmatmul.mubr.msk.bf16.gmra.mxu0 %vm186_vm1, %v14680_v55 }
  0x46   :  { %719 = vmatpush1.bf16.msra.mxu0 %v14719_v56  ;;  %v15741_v56 = vld [vmem:[%s20846_s27 + $0x14] ss:$8 sps:$4 sm:$0xff]  }
  0x47   :  { %720 = vmatprep.subr.bf16.mxu0 %v14727_v57  ;;  %664 = vmatpush2.bf16.msra.mxu1 %v14756_v14  ;;  %v14796_v14 = vld [vmem:[%s20847_s0 + $0x21c] ss:$16 sps:$4 sm:$0xff]  }
  0x48   :  { %665 = vmatprep.subr.bf16.mxu1 %v14757_v15  ;;  %v14791_v15 = vld [vmem:[%s20847_s0 + $0x210] ss:$16 sps:$4 sm:$0xff]  }
  0x4a   :  { %721 = vmatpush1.bf16.msra.mxu0 %v14725_v61  ;;  %v15743_v61 = vld [vmem:[%s20846_s27 + $0x4] ss:$8 sps:$4 sm:$0xff]  }
  0x4b   :  { %12055 = vmatprep.subr.msk.bf16.mxu0 %vm622_vm2, %v12049_v63  ;;  %666 = vmatpush2.bf16.msra.mxu1 %v14762_v18  ;;  %v14763_v63 = vld [vmem:[%s20848_s8 + $0x1c] sm:$0xff]  }
  0x4c   :  { %12071 = vmatprep.subr.msk.bf16.mxu1 %vm199_vm0, %v15928_v0  ;;  %v14802_v18 = vld [vmem:[%s20847_s0 + $0x1fc] ss:$16 sps:$4 sm:$0xff]  }
  0x4e   :  { %727 = vmatpush2.bf16.msra.mxu0 %v630_v5  ;;  %v14776_v5 = vld [vmem:[%s20847_s0 + $0x278] ss:$16 sps:$4 sm:$0xff]  }
  0x4f   :  { %728 = vmatprep.subr.bf16.mxu0 %v14737_v2  ;;  %v14778_v2 = vld [vmem:[%s20847_s0 + $0x27c] ss:$16 sps:$4 sm:$0xff]  }
  0x52   :  { %729 = vmatpush2.bf16.msra.mxu0 %v14735_v6  ;;  %v14784_v6 = vld [vmem:[%s20847_s0 + $0x25c] ss:$16 sps:$4 sm:$0xff]  }
  0x53   :  { %730 = vmatprep.subr.bf16.mxu0 %v14743_v7  ;;  %v14764_v7 = vld [vmem:[%s20848_s8 + $0x24] sm:$0xff]  }
  0x56   :  { %731 = vmatpush2.bf16.msra.mxu0 %v14741_v8  ;;  %v14782_v8 = vld [vmem:[%s20847_s0 + $0x258] ss:$16 sps:$4 sm:$0xff]  }
  0x57   :  { %732 = vmatprep.subr.bf16.mxu0 %v14749_v9  ;;  %v14790_v9 = vld [vmem:[%s20847_s0 + $0x23c] ss:$16 sps:$4 sm:$0xff]  }
  0x5a   :  { %733 = vmatpush2.bf16.msra.mxu0 %v14747_v10  ;;  %v14788_v10 = vld [vmem:[%s20847_s0 + $0x238] ss:$16 sps:$4 sm:$0xff]  }
  0x5b   :  { %734 = vmatprep.subr.bf16.mxu0 %v14755_v12  ;;  %v14766_v12 = vld [vmem:[%s20848_s8 + $0x34] ss:$0 sps:$4 sm:$0x11]  }
  0x5e   :  { %735 = vmatpush2.bf16.msra.mxu0 %v14753_v13  ;;  %v14793_v13 = vld [vmem:[%s20847_s0 + $0x214] ss:$16 sps:$4 sm:$0xff]  }
  0x5f   :  { %736 = vmatprep.subr.bf16.mxu0 %v14761_v16  ;;  %v14794_v16 = vld [vmem:[%s20847_s0 + $0x218] ss:$16 sps:$4 sm:$0xff]  }
  0x62   :  { %737 = vmatpush2.bf16.msra.mxu0 %v14759_v17  ;;  %v14799_v17 = vld [vmem:[%s20847_s0 + $0x1f4] ss:$16 sps:$4 sm:$0xff]  }
  0x63   :  { %1273 = vmatprep.subr.bf16.mxu0 %v14769_v19  ;;  %v14797_v19 = vld [vmem:[%s20847_s0 + $0x1f0] ss:$16 sps:$4 sm:$0xff]  }
  0xed   :  { %v240_v20 = vpop.f32.mrf.mxu0 }
  0xef   :  { %v242_v21 = vpop.f32.mrf.mxu0 }
  0xf1   :  { %v244_v22 = vpop.f32.mrf.mxu0 }
  0xf2   :  { %v277_v0 = vpack.c.bf16 %v244_v22, %v240_v20  ;;  %v14800_v20 = vld [vmem:[%s20847_s0 + $0x1f8] ss:$16 sps:$4 sm:$0xff]   ;;  %v14808_v22 = vld [vmem:[%s20847_s0 + $0x1dc] ss:$16 sps:$4 sm:$0xff]  }
  0xf3   :  { %v246_v24 = vpop.f32.mrf.mxu0 }
  0xf4   :  { %v278_v26 = vpack.c.bf16 %v246_v24, %v242_v21  ;;  %v14805_v21 = vld [vmem:[%s20847_s0 + $0x1d4] ss:$16 sps:$4 sm:$0xff]   ;;  %v14806_v24 = vld [vmem:[%s20847_s0 + $0x1d8] ss:$16 sps:$4 sm:$0xff]  }
  0xf5   :  { %v250_v27 = vpop.f32.mrf.mxu0 }
  0xf6   :  { %12051 = vmatprep.mubr.msk.bf16.mxu1 %vm609_vm3, %v278_v26  ;;  %12056 = vmatprep.mubr.msk.bf16.mxu0 %vm609_vm3, %v278_v26  ;;  %v14814_v26 = vld [vmem:[%s20847_s0 + $0x1bc] ss:$16 sps:$4 sm:$0xff]  }
  0xf7   :  { %v252_v29 = vpop.f32.mrf.mxu0  ;;  %668 = vmatmul.mubr.bf16.vlgmr.msra.gmra.mxu1 %v277_v0  ;;  %739 = vmatmul.mubr.bf16.vlgmr.msra.gmra.mxu0 %v277_v0  ;;  %v14809_v0 = vld [vmem:[%s20847_s0 + $0x1b0] ss:$16 sps:$4 sm:$0xff]  }
  0xf8   :  { %848 = vmatpush1.bf16.msra.mxu1 %v15939_v3  ;;  %1274 = vmatpush1.bf16.msra.mxu0 %v14767_v23  ;;  %v14803_v23 = vld [vmem:[%s20847_s0 + $0x1d0] ss:$16 sps:$4 sm:$0xff]  }
  0xf9   :  { %v254_v31 = vpop.f32.mrf.mxu0  ;;  %849 = vmatprep.subr.bf16.mxu1 %v15733_v32  ;;  %1275 = vmatprep.subr.bf16.mxu0 %v14775_v25  ;;  %v14811_v25 = vld [vmem:[%s20847_s0 + $0x1b4] ss:$16 sps:$4 sm:$0xff]  }
  0xfa   :  { %v279_v38 = vpack.c.bf16 %v254_v31, %v250_v27  ;;  %v14812_v27 = vld [vmem:[%s20847_s0 + $0x1b8] ss:$16 sps:$4 sm:$0xff]  }
  0xfb   :  { %v256_v34 = vpop.f32.mrf.mxu0 }
  0xfc   :  { %v280_v36 = vpack.c.bf16 %v256_v34, %v252_v29  ;;  %850 = vmatpush1.bf16.msra.mxu1 %v15734_v37  ;;  %1276 = vmatpush1.bf16.msra.mxu0 %v14773_v28  ;;  %v12128_v28 = vld [vmem:[%s20847_s0 + $0x350] sm:$0xff]  ;;  %v12129_v29 = vld [vmem:[%s20847_s0 + $0x358] sm:$0xff] }
  0xfd   :  { %v260_v39 = vpop.f32.mrf.mxu0  ;;  %851 = vmatprep.subr.bf16.mxu1 %v15735_v40  ;;  %1277 = vmatprep.subr.bf16.mxu0 %v14781_v30  ;;  %v12183_v30 = vcombine.high %v12128_v28, %v12128_v28  ;;  %v12185_v31 = vcombine.high %v12129_v29, %v12129_v29  ;;  %v12182_v32 = vcombine.low %v12128_v28, %v12128_v28  ;;  %v14824_v37 = vld [vmem:[%s20847_s0 + $0x33c] ss:$16 sps:$4 sm:$0xff]   ;;  %v14827_v40 = vld [vmem:[%s20847_s0 + $0x314] ss:$16 sps:$4 sm:$0xff]  }
  0xfe   :  { %12052 = vmatprep.mubr.msk.bf16.mxu1 %vm609_vm3, %v280_v36  ;;  %12057 = vmatprep.mubr.msk.bf16.mxu0 %vm609_vm3, %v280_v36  ;;  %v14821_v36 = vld [vmem:[%s20847_s0 + $0x334] ss:$16 sps:$4 sm:$0xff]  }
  0xff   :  { %v262_v42 = vpop.f32.mrf.mxu0  ;;  %678 = vmatmul.mubr.bf16.gmra.mxu1 %v279_v38  ;;  %749 = vmatmul.mubr.bf16.gmra.mxu0 %v279_v38  ;;  %v1262_v34 = vsel %vm622_vm2, %v12182_v32, 0  ;;  %v14819_v38 = vld [vmem:[%s20847_s0 + $0x330] ss:$16 sps:$4 sm:$0xff]  }
 0x100   :  { %852 = vmatpush1.bf16.msra.mxu1 %v15736_v43  ;;  %1278 = vmatpush1.bf16.msra.mxu0 %v14779_v33  ;;  %v12184_v33 = vcombine.low %v12129_v29, %v12129_v29  ;;  %v14828_v43 = vld [vmem:[%s20847_s0 + $0x318] ss:$16 sps:$4 sm:$0xff]  }
 0x101   :  { %v264_v44 = vpop.f32.mrf.mxu0  ;;  %853 = vmatprep.subr.bf16.mxu1 %v15737_v45  ;;  %1279 = vmatprep.subr.bf16.mxu0 %v14787_v35  ;;  %v14836_v45 = vld [vmem:[%s20847_s0 + $0x2fc] ss:$16 sps:$4 sm:$0xff]  }
 0x102   :  { %v281_v49 = vpack.c.bf16 %v264_v44, %v260_v39  ;;  %v1268_v35 = vsel %vm622_vm2, %v12184_v33, 0  ;;  %v14822_v39 = vld [vmem:[%s20847_s0 + $0x338] ss:$16 sps:$4 sm:$0xff]   ;;  %v14833_v44 = vld [vmem:[%s20847_s0 + $0x2f4] ss:$16 sps:$4 sm:$0xff]  }
 0x103   :  { %v266_v46 = vpop.f32.mrf.mxu0 }
 0x104   :  { %v282_v47 = vpack.c.bf16 %v266_v46, %v262_v42  ;;  %854 = vmatpush1.bf16.msra.mxu1 %v15738_v48  ;;  %1280 = vmatpush1.bf16.msra.mxu0 %v14785_v41  ;;  %v14830_v41 = vld [vmem:[%s20847_s0 + $0x31c] ss:$16 sps:$4 sm:$0xff]   ;;  %v14825_v42 = vld [vmem:[%s20847_s0 + $0x310] ss:$16 sps:$4 sm:$0xff]   ;;  %v14839_v48 = vld [vmem:[%s20847_s0 + $0x2d4] ss:$16 sps:$4 sm:$0xff]  }
 0x105   :  { %v270_v50 = vpop.f32.mrf.mxu0  ;;  %855 = vmatprep.subr.bf16.mxu1 %v15739_v51  ;;  %1281 = vmatprep.subr.bf16.mxu0 %v14793_v13  ;;  %v14831_v46 = vld [vmem:[%s20847_s0 + $0x2f0] ss:$16 sps:$4 sm:$0xff]   ;;  %v14840_v51 = vld [vmem:[%s20847_s0 + $0x2d8] ss:$16 sps:$4 sm:$0xff]  }
 0x106   :  { %12053 = vmatprep.mubr.msk.bf16.mxu1 %vm609_vm3, %v282_v47  ;;  %12058 = vmatprep.mubr.msk.bf16.mxu0 %vm609_vm3, %v282_v47  ;;  %v283_v60 = vpack.c.bf16 %v270_v50, %v270_v50  ;;  %v14834_v47 = vld [vmem:[%s20847_s0 + $0x2f8] ss:$16 sps:$4 sm:$0xff]   ;;  %v14837_v50 = vld [vmem:[%s20847_s0 + $0x2d0] ss:$16 sps:$4 sm:$0xff]  }
 0x107   :  { %v272_v52 = vpop.f32.mrf.mxu0  ;;  %688 = vmatmul.mubr.bf16.gmra.mxu1 %v281_v49  ;;  %759 = vmatmul.mubr.bf16.gmra.mxu0 %v281_v49  ;;  %v14842_v49 = vld [vmem:[%s20847_s0 + $0x2dc] ss:$16 sps:$4 sm:$0xff]  }
 0x108   :  { %v284_v53 = vpack.c.bf16 %v272_v52, %v272_v52  ;;  %856 = vmatpush1.bf16.msra.mxu1 %v15740_v54  ;;  %1282 = vmatpush1.bf16.msra.mxu0 %v14791_v15  ;;  %v14845_v52 = vld [vmem:[%s20847_s0 + $0x2b4] ss:$16 sps:$4 sm:$0xff]   ;;  %v14843_v54 = vld [vmem:[%s20847_s0 + $0x2b0] ss:$16 sps:$4 sm:$0xff]  }
 0x109   :  { %v274_v55 = vpop.f32.mrf.mxu0  ;;  %857 = vmatprep.subr.bf16.mxu1 %v15741_v56  ;;  %1283 = vmatprep.subr.bf16.mxu0 %v14799_v17  ;;  %v16397_v56 = vld [vmem:[%s20846_s27 + $0x64] ss:$8 sps:$4 sm:$0x3f]  }
 0x10a   :  { %12054 = vmatprep.mubr.msk.bf16.mxu1 %vm609_vm3, %v284_v53  ;;  %12059 = vmatprep.mubr.msk.bf16.mxu0 %vm609_vm3, %v284_v53  ;;  %v14848_v53 = vld [vmem:[%s20847_s0 + $0x2bc] ss:$16 sps:$4 sm:$0xff]   ;;  %v14846_v55 = vld [vmem:[%s20847_s0 + $0x2b8] ss:$16 sps:$4 sm:$0xff]  }
 0x10b   :  { %v275_v57 = vpop.f32.mrf.mxu0 }
 0x10c   :  { %858 = vmatpush1.bf16.msra.mxu1 %v15742_v59  ;;  %1284 = vmatpush1.bf16.msra.mxu0 %v14797_v19 }
 0x10d   :  { %859 = vmatprep.subr.bf16.mxu1 %v15743_v61  ;;  %1285 = vmatprep.subr.bf16.mxu0 %v14805_v21 }
 0x10f   :  { %698 = vmatmul.mubr.bf16.gmra.mxu1 %v283_v60  ;;  %769 = vmatmul.mubr.bf16.gmra.mxu0 %v283_v60 }
 0x110   :  { %860 = vmatpush1.bf16.msra.mxu1 %v15744_v62  ;;  %877 = vmatprep.mubr.bf16.mxu1 %v20772_v4 }
 0x111   :  { %1344 = vmatprep.subr.bf16.mxu1 %v14772_v58  ;;  %1286 = vmatpush1.bf16.msra.mxu0 %v14803_v23 }
 0x112   :  { %1287 = vmatprep.subr.bf16.mxu0 %v14811_v25 }
 0x115   :  { %1288 = vmatpush1.bf16.msra.mxu0 %v14809_v0 }
 0x116   :  { %12186 = vmatprep.subr.msk.bf16.mxu0 %vm622_vm2, %v12183_v30 }
 0x117   :  { %12072 = vmatmul.mubr.msk.bf16.vlgmr.msra.gmra.mxu1 %vm186_vm1, %v14763_v63 }
 0x118   :  { %887 = vmatprep.mubr.bf16.mxu1 %v20772_v4  ;;  %1345 = vmatpush1.bf16.msra.mxu1 %v14770_v1 }
 0x119   :  { %1346 = vmatprep.subr.bf16.mxu1 %v14778_v2  ;;  %1294 = vmatpush2.bf16.msra.mxu0 %v1262_v34 }
 0x11a   :  { %1295 = vmatprep.subr.bf16.mxu0 %v14821_v36 }
 0x11c   :  { %1347 = vmatpush1.bf16.msra.mxu1 %v14776_v5 }
 0x11d   :  { %1348 = vmatprep.subr.bf16.mxu1 %v14784_v6  ;;  %1296 = vmatpush2.bf16.msra.mxu0 %v14819_v38 }
 0x11e   :  { %1297 = vmatprep.subr.bf16.mxu0 %v14827_v40 }
 0x11f   :  { %12073 = vmatmul.mubr.msk.bf16.gmra.mxu1 %vm186_vm1, %v14764_v7 }
 0x120   :  { %897 = vmatprep.mubr.bf16.mxu1 %v20772_v4  ;;  %1349 = vmatpush1.bf16.msra.mxu1 %v14782_v8 }
 0x121   :  { %1350 = vmatprep.subr.bf16.mxu1 %v14790_v9  ;;  %1298 = vmatpush2.bf16.msra.mxu0 %v14825_v42 }
 0x122   :  { %1299 = vmatprep.subr.bf16.mxu0 %v14833_v44 }
 0x124   :  { %1351 = vmatpush1.bf16.msra.mxu1 %v14788_v10 }
 0x125   :  { %1352 = vmatprep.subr.bf16.mxu1 %v14796_v14  ;;  %1300 = vmatpush2.bf16.msra.mxu0 %v14831_v46 }
 0x126   :  { %1301 = vmatprep.subr.bf16.mxu0 %v14839_v48 }
 0x127   :  { %12074 = vmatmul.mubr.msk.bf16.gmra.mxu1 %vm186_vm1, %v14765_v11 }
 0x128   :  { %907 = vmatprep.mubr.bf16.mxu1 %v20772_v4  ;;  %1353 = vmatpush1.bf16.msra.mxu1 %v14794_v16 }
 0x129   :  { %1354 = vmatprep.subr.bf16.mxu1 %v14802_v18  ;;  %1302 = vmatpush2.bf16.msra.mxu0 %v14837_v50 }
 0x12a   :  { %1303 = vmatprep.subr.bf16.mxu0 %v14845_v52 }
 0x12c   :  { %1355 = vmatpush1.bf16.msra.mxu1 %v14800_v20 }
 0x12d   :  { %1356 = vmatprep.subr.bf16.mxu1 %v14808_v22  ;;  %1304 = vmatpush2.bf16.msra.mxu0 %v14843_v54 }
 0x12e   :  { %12207 = vmatprep.subr.msk.bf16.mxu0 %vm199_vm0, %v16397_v56 }
 0x12f   :  { %12075 = vmatmul.mubr.msk.bf16.gmra.mxu1 %vm186_vm1, %v14766_v12 }
 0x130   :  { %1357 = vmatpush1.bf16.msra.mxu1 %v14806_v24 }
 0x131   :  { %1358 = vmatprep.subr.bf16.mxu1 %v14814_v26 }
 0x134   :  { %1359 = vmatpush1.bf16.msra.mxu1 %v14812_v27 }
 0x135   :  { %12191 = vmatprep.subr.msk.bf16.mxu1 %vm622_vm2, %v12185_v31 }
 0x138   :  { %1365 = vmatpush2.bf16.msra.mxu1 %v1268_v35 }
 0x139   :  { %1366 = vmatprep.subr.bf16.mxu1 %v14824_v37 }
 0x13c   :  { %1367 = vmatpush2.bf16.msra.mxu1 %v14822_v39 }
 0x13d   :  { %1368 = vmatprep.subr.bf16.mxu1 %v14830_v41 }
 0x140   :  { %1369 = vmatpush2.bf16.msra.mxu1 %v14828_v43 }
 0x141   :  { %1370 = vmatprep.subr.bf16.mxu1 %v14836_v45 }
 0x144   :  { %1371 = vmatpush2.bf16.msra.mxu1 %v14834_v47 }
 0x145   :  { %1372 = vmatprep.subr.bf16.mxu1 %v14842_v49 }
 0x148   :  { %1373 = vmatpush2.bf16.msra.mxu1 %v14840_v51 }
 0x149   :  { %1374 = vmatprep.subr.bf16.mxu1 %v14848_v53 }
 0x14c   :  { %1375 = vmatpush2.bf16.msra.mxu1 %v14846_v55 }
 0x14d   :  { %29 = vsyncpa [#allocation6], 0  ;;  %v14855_v57 = vld [vmem:[%s20847_s0 + $0x444] ss:$16 sps:$4 sm:$0xff]   ;;  %vm780_vm4 = vcmask 130048   ;;  %vm805_vm5 = vcmask 123904  }
 0x14e   :  { %1965 = vmatprep.subr.bf16.mxu1 %v14855_v57  ;;  %v14853_v33 = vld [vmem:[%s20847_s0 + $0x440] ss:$16 sps:$4 sm:$0xff]   ;;  %v14861_v36 = vld [vmem:[%s20847_s0 + $0x424] ss:$16 sps:$4 sm:$0xff]   ;;  %s20854_s25 = sld [smem:[#allocation54_spill]]  ;;  %vm3608_vm6 = vcmask 1041408  }
 0x14f   :  { %v14859_v38 = vld [vmem:[%s20847_s0 + $0x420] ss:$16 sps:$4 sm:$0xff]   ;;  %v16462_v40 = vld [vmem:[%s20846_s27 + $0x54] ss:$8 sps:$4 sm:$0xff]   ;;  %v16480_v48 = vld [vmem:[%s20846_s27 + $0x44] ss:$8 sps:$4 sm:$0xff]  }
 0x150   :  { %v14867_v41 = vld [vmem:[%s20847_s0 + $0x404] ss:$16 sps:$4 sm:$0xff]   ;;  %v16471_v44 = vld [vmem:[%s20846_s27 + $0x50] ss:$8 sps:$4 sm:$0xff]   ;;  %v16491_v51 = vld [vmem:[%s20846_s27 + $0x40] ss:$8 sps:$4 sm:$0xff]  }
 0x151   :  { %v14865_v45 = vld [vmem:[%s20847_s0 + $0x400] ss:$16 sps:$4 sm:$0xff]   ;;  %v14873_v49 = vld [vmem:[%s20847_s0 + $0x3e4] ss:$16 sps:$4 sm:$0xff]   ;;  %s20933_s4 = sld [smem:[#allocation55_spill]]  ;;  %vm4545_vm7 = vcmask 1040384  }
 0x152   :  { %v14871_v52 = vld [vmem:[%s20847_s0 + $0x3e0] ss:$16 sps:$4 sm:$0xff]   ;;  %v16500_v54 = vld [vmem:[%s20846_s27 + $0x34] ss:$8 sps:$4 sm:$0xff]   ;;  %s20935_s6 = sld [smem:[#allocation57_spill]]  ;;  %vm4538_vm8 = vcmask 408576  }
 0x153   :  { %s20937_s29 = sld [smem:[#allocation59_spill]]  ;;  %vm5374_vm9 = vcmask 785408   ;;  %vm5381_vm10 = vcmask 783360   ;;  %vm15798_vm11 = vmmov 0   ;;  %vm9254_vm12 = vcmask 261120  }
 0x154   :  { %s20950_s7 = sld [smem:[#allocation58_spill]]  ;;  %vm9605_vm13 = vcmask 1042432   ;;  %vm9601_vm14 = vcmask 179200   ;;  %vm11800_vm15 = vcmask 64512  }
 0x1b7   :  { %v16404_v58 = vpop.f32.mrf.mxu1  ;;  %v16406_v59 = vpop.f32.mrf.mxu0 }
 0x1b9   :  { %v16408_v60 = vpop.f32.mrf.mxu1  ;;  %v742_v61 = vpop.f32.mrf.mxu0 }
 0x1ba   :  { %781 = vst.msk [vmem:[#allocation2 + $0x18] sm:$0xff] %vm780_vm4, %v742_v61  ;;  %v16506_v61 = vld [vmem:[%s20846_s27 + $0x30] ss:$8 sps:$4 sm:$0xff]  }
 0x1bb   :  { %v16411_v62 = vpop.f32.mrf.mxu1  ;;  %v16413_v63 = vpop.f32.mrf.mxu0 }
 0x1bd   :  { %v16415_v1 = vpop.f32.mrf.mxu1  ;;  %v746_v2 = vpop.f32.mrf.mxu0 }
 0x1be   :  { %785 = vst.msk [vmem:[#allocation2 + $0x38] sm:$0xff] %vm780_vm4, %v746_v2 }
 0x1bf   :  { %v16418_v5 = vpop.f32.mrf.mxu1  ;;  %v16420_v6 = vpop.f32.mrf.mxu0 }
 0x1c1   :  { %v16422_v7 = vpop.f32.mrf.mxu1  ;;  %v752_v8 = vpop.f32.mrf.mxu0 }
 0x1c2   :  { %789 = vst.msk [vmem:[#allocation2 + $0x58] sm:$0xff] %vm780_vm4, %v752_v8 }
 0x1c3   :  { %v16425_v9 = vpop.f32.mrf.mxu1  ;;  %v16427_v10 = vpop.f32.mrf.mxu0 }
 0x1c5   :  { %v16429_v11 = vpop.f32.mrf.mxu1  ;;  %v756_v12 = vpop.f32.mrf.mxu0 }
 0x1c6   :  { %20849 = vst [vmem:[#allocation8_spill] sm:$0xff] %v16429_v11  ;;  %793 = vst.msk [vmem:[#allocation2 + $0x78] sm:$0xff] %vm780_vm4, %v756_v12  ;;  %v16512_v12 = vld [vmem:[%s20846_s27 + $0x24] ss:$8 sps:$4 sm:$0xff]  }
 0x1c7   :  { %v16432_v13 = vpop.f32.mrf.mxu1  ;;  %v16434_v14 = vpop.f32.mrf.mxu0 }
 0x1c9   :  { %v16436_v15 = vpop.f32.mrf.mxu1  ;;  %v762_v16 = vpop.f32.mrf.mxu0 }
 0x1ca   :  { %797 = vst.msk [vmem:[#allocation2 + $0x98] sm:$0xff] %vm780_vm4, %v762_v16 }
 0x1cb   :  { %v16439_v17 = vpop.f32.mrf.mxu1  ;;  %v16441_v18 = vpop.f32.mrf.mxu0 }
 0x1cd   :  { %v16443_v19 = vpop.f32.mrf.mxu1  ;;  %v766_v20 = vpop.f32.mrf.mxu0 }
 0x1ce   :  { %20850 = vst [vmem:[#allocation9_spill] sm:$0xff] %v16443_v19  ;;  %801 = vst.msk [vmem:[#allocation2 + $0xb8] sm:$0xff] %vm780_vm4, %v766_v20 }
 0x1cf   :  { %v699_v21 = vpop.f32.mrf.mxu1  ;;  %v770_v22 = vpop.f32.mrf.mxu0 }
 0x1d0   :  { %802 = vst [vmem:[#allocation2 + $0xc0] sm:$0x3] %v699_v21  ;;  %804 = vst [vmem:[#allocation2 + $0xd0] sm:$0x3] %v770_v22  ;;  %v16520_v21 = vld [vmem:[%s20846_s27 + $0x20] ss:$8 sps:$4 sm:$0xff]  }
 0x1d1   :  { %v701_v23 = vpop.f32.mrf.mxu1  ;;  %v772_v24 = vpop.f32.mrf.mxu0 }
 0x1d2   :  { %803 = vst [vmem:[#allocation2 + $0xc8] sm:$0x3] %v701_v23  ;;  %806 = vst.msk [vmem:[#allocation2 + $0xd8] sm:$0x3] %vm805_vm5, %v772_v24  ;;  %v16526_v23 = vld [vmem:[%s20846_s27 + $0x14] ss:$8 sps:$4 sm:$0xff]  }
 0x1d3   :  { %v703_v25 = vpop.f32.mrf.mxu1  ;;  %v774_v26 = vpop.f32.mrf.mxu0 }
 0x1d4   :  { %v16534_v25 = vld [vmem:[%s20846_s27 + $0x10] ss:$8 sps:$4 sm:$0xff]  }
 0x1d5   :  { %v704_v0 = vpop.f32.mrf.mxu1  ;;  %v775_v27 = vpop.f32.mrf.mxu0 }
 0x1d6   :  { %v16540_v0 = vld [vmem:[%s20846_s27 + $0x4] ss:$8 sps:$4 sm:$0xff]  }
 0x1d7   :  { %v879_v28 = vpop.f32.mrf.mxu1  ;;  %v14858_v27 = vld [vmem:[%s20847_s0 + $0x44c] ss:$16 sps:$4 sm:$0xff]  }
 0x1d9   :  { %v881_v29 = vpop.f32.mrf.mxu1 }
 0x1db   :  { %v883_v30 = vpop.f32.mrf.mxu1 }
 0x1dc   :  { %v916_v34 = vpack.c.bf16 %v883_v30, %v879_v28  ;;  %v16549_v28 = vld [vmem:[%s20846_s27] ss:$8 sps:$4 sm:$0xff]  }
 0x1dd   :  { %v885_v31 = vpop.f32.mrf.mxu1  ;;  %v14856_v30 = vld [vmem:[%s20847_s0 + $0x448] ss:$16 sps:$4 sm:$0xff]  }
 0x1de   :  { %v917_v32 = vpack.c.bf16 %v885_v31, %v881_v29  ;;  %v14849_v29 = vld [vmem:[%s20848_s8 + $0x38] sm:$0xff]  }
 0x1df   :  { %v889_v35 = vpop.f32.mrf.mxu1  ;;  %v14864_v31 = vld [vmem:[%s20847_s0 + $0x42c] ss:$16 sps:$4 sm:$0xff]  }
 0x1e0   :  { %12187 = vmatprep.mubr.msk.bf16.mxu0 %vm609_vm3, %v917_v32  ;;  %12192 = vmatprep.mubr.msk.bf16.mxu1 %vm609_vm3, %v917_v32  ;;  %v14862_v32 = vld [vmem:[%s20847_s0 + $0x428] ss:$16 sps:$4 sm:$0xff]  }
 0x1e1   :  { %v891_v37 = vpop.f32.mrf.mxu1  ;;  %1306 = vmatmul.mubr.bf16.vlgmr.msra.gmra.mxu0 %v916_v34  ;;  %1377 = vmatmul.mubr.bf16.vlgmr.msra.gmra.mxu1 %v916_v34  ;;  %v14850_v34 = vld [vmem:[%s20848_s8 + $0x40] sm:$0xff]  }
 0x1e2   :  { %1540 = vmatpush1.bf16.msra.mxu0 %v15939_v3  ;;  %1966 = vmatpush1.bf16.msra.mxu1 %v14853_v33  ;;  %v14870_v33 = vld [vmem:[%s20847_s0 + $0x40c] ss:$16 sps:$4 sm:$0xff]  }
 0x1e3   :  { %v893_v39 = vpop.f32.mrf.mxu1  ;;  %1541 = vmatprep.subr.bf16.mxu0 %v16462_v40  ;;  %1967 = vmatprep.subr.bf16.mxu1 %v14861_v36  ;;  %v14876_v36 = vld [vmem:[%s20847_s0 + $0x3ec] ss:$16 sps:$4 sm:$0xff]  }
 0x1e4   :  { %v918_v46 = vpack.c.bf16 %v893_v39, %v889_v35  ;;  %v14868_v35 = vld [vmem:[%s20847_s0 + $0x408] ss:$16 sps:$4 sm:$0xff]   ;;  %v14852_v39 = vld [vmem:[%s20848_s8 + $0x50] ss:$0 sps:$4 sm:$0x11]  }
 0x1e5   :  { %v895_v42 = vpop.f32.mrf.mxu1 }
 0x1e6   :  { %v919_v43 = vpack.c.bf16 %v895_v42, %v891_v37  ;;  %1542 = vmatpush1.bf16.msra.mxu0 %v16471_v44  ;;  %1968 = vmatpush1.bf16.msra.mxu1 %v14859_v38  ;;  %v14874_v37 = vld [vmem:[%s20847_s0 + $0x3e8] ss:$16 sps:$4 sm:$0xff]   ;;  %v14882_v42 = vld [vmem:[%s20847_s0 + $0x3cc] ss:$16 sps:$4 sm:$0xff]  }
 0x1e7   :  { %v899_v47 = vpop.f32.mrf.mxu1  ;;  %1543 = vmatprep.subr.bf16.mxu0 %v16480_v48  ;;  %1969 = vmatprep.subr.bf16.mxu1 %v14867_v41  ;;  %v14851_v38 = vld [vmem:[%s20848_s8 + $0x48] sm:$0xff]   ;;  %v14879_v41 = vld [vmem:[%s20847_s0 + $0x3c4] ss:$16 sps:$4 sm:$0xff]  }
 0x1e8   :  { %12188 = vmatprep.mubr.msk.bf16.mxu0 %vm609_vm3, %v919_v43  ;;  %12193 = vmatprep.mubr.msk.bf16.mxu1 %vm609_vm3, %v919_v43  ;;  %v14877_v43 = vld [vmem:[%s20847_s0 + $0x3c0] ss:$16 sps:$4 sm:$0xff]  }
 0x1e9   :  { %v901_v50 = vpop.f32.mrf.mxu1  ;;  %1316 = vmatmul.mubr.bf16.gmra.mxu0 %v918_v46  ;;  %1387 = vmatmul.mubr.bf16.gmra.mxu1 %v918_v46  ;;  %v14885_v46 = vld [vmem:[%s20847_s0 + $0x3a4] ss:$16 sps:$4 sm:$0xff]  }
 0x1ea   :  { %1544 = vmatpush1.bf16.msra.mxu0 %v16491_v51  ;;  %1970 = vmatpush1.bf16.msra.mxu1 %v14865_v45  ;;  %v14880_v45 = vld [vmem:[%s20847_s0 + $0x3c8] ss:$16 sps:$4 sm:$0xff]  }
 0x1eb   :  { %v903_v53 = vpop.f32.mrf.mxu1  ;;  %1545 = vmatprep.subr.bf16.mxu0 %v16500_v54  ;;  %1971 = vmatprep.subr.bf16.mxu1 %v14873_v49  ;;  %v14883_v49 = vld [vmem:[%s20847_s0 + $0x3a0] ss:$16 sps:$4 sm:$0xff]  }
 0x1ec   :  { %v920_v2 = vpack.c.bf16 %v903_v53, %v899_v47  ;;  %v14888_v47 = vld [vmem:[%s20847_s0 + $0x3ac] ss:$16 sps:$4 sm:$0xff]  }
 0x1ed   :  { %v905_v55 = vpop.f32.mrf.mxu1  ;;  %v14894_v53 = vld [vmem:[%s20847_s0 + $0x38c] ss:$16 sps:$4 sm:$0xff]  }
 0x1ee   :  { %v921_v57 = vpack.c.bf16 %v905_v55, %v901_v50  ;;  %1546 = vmatpush1.bf16.msra.mxu0 %v16506_v61  ;;  %1972 = vmatpush1.bf16.msra.mxu1 %v14871_v52  ;;  %v14886_v50 = vld [vmem:[%s20847_s0 + $0x3a8] ss:$16 sps:$4 sm:$0xff]   ;;  %v14891_v52 = vld [vmem:[%s20847_s0 + $0x384] ss:$16 sps:$4 sm:$0xff]   ;;  %v14889_v55 = vld [vmem:[%s20847_s0 + $0x380] ss:$16 sps:$4 sm:$0xff]  }
 0x1ef   :  { %v909_v8 = vpop.f32.mrf.mxu1  ;;  %1547 = vmatprep.subr.bf16.mxu0 %v16512_v12  ;;  %1973 = vmatprep.subr.bf16.mxu1 %v14879_v41  ;;  %v14914_v41 = vld [vmem:[%s20847_s0 + $0x4c8] ss:$16 sps:$4 sm:$0xff]  }
 0x1f0   :  { %12189 = vmatprep.mubr.msk.bf16.mxu0 %vm609_vm3, %v921_v57  ;;  %12194 = vmatprep.mubr.msk.bf16.mxu1 %vm609_vm3, %v921_v57  ;;  %v922_v26 = vpack.c.bf16 %v909_v8, %v909_v8  ;;  %v14892_v57 = vld [vmem:[%s20847_s0 + $0x388] ss:$16 sps:$4 sm:$0xff]   ;;  %v14900_v8 = vld [vmem:[%s20847_s0 + $0x36c] ss:$16 sps:$4 sm:$0xff]  }
 0x1f1   :  { %v911_v16 = vpop.f32.mrf.mxu1  ;;  %1326 = vmatmul.mubr.bf16.gmra.mxu0 %v920_v2  ;;  %1397 = vmatmul.mubr.bf16.gmra.mxu1 %v920_v2  ;;  %v14897_v2 = vld [vmem:[%s20847_s0 + $0x364] ss:$16 sps:$4 sm:$0xff]  }
 0x1f2   :  { %v923_v20 = vpack.c.bf16 %v911_v16, %v911_v16  ;;  %1548 = vmatpush1.bf16.msra.mxu0 %v16520_v21  ;;  %1974 = vmatpush1.bf16.msra.mxu1 %v14877_v43  ;;  %v14895_v16 = vld [vmem:[%s20847_s0 + $0x360] ss:$16 sps:$4 sm:$0xff]   ;;  %v14922_v43 = vld [vmem:[%s20847_s0 + $0x4ac] ss:$16 sps:$4 sm:$0xff]  }
 0x1f3   :  { %v913_v22 = vpop.f32.mrf.mxu1  ;;  %1549 = vmatprep.subr.bf16.mxu0 %v16526_v23  ;;  %1975 = vmatprep.subr.bf16.mxu1 %v14885_v46  ;;  %v14920_v46 = vld [vmem:[%s20847_s0 + $0x4a8] ss:$16 sps:$4 sm:$0xff]  }
 0x1f4   :  { %12190 = vmatprep.mubr.msk.bf16.mxu0 %vm609_vm3, %v923_v20  ;;  %12195 = vmatprep.mubr.msk.bf16.mxu1 %vm609_vm3, %v923_v20  ;;  %v14898_v20 = vld [vmem:[%s20847_s0 + $0x368] ss:$16 sps:$4 sm:$0xff]   ;;  %v12264_v22 = vld [vmem:[%s20847_s0 + $0x500] sm:$0xff] }
 0x1f5   :  { %v914_v24 = vpop.f32.mrf.mxu1 }
 0x1f6   :  { %1550 = vmatpush1.bf16.msra.mxu0 %v16534_v25  ;;  %1976 = vmatpush1.bf16.msra.mxu1 %v14883_v49  ;;  %v12265_v24 = vld [vmem:[%s20847_s0 + $0x508] sm:$0xff] }
 0x1f7   :  { %1551 = vmatprep.subr.bf16.mxu0 %v16540_v0  ;;  %1977 = vmatprep.subr.bf16.mxu1 %v14891_v52  ;;  %v14928_v49 = vld [vmem:[%s20847_s0 + $0x48c] ss:$16 sps:$4 sm:$0xff]   ;;  %v14926_v52 = vld [vmem:[%s20847_s0 + $0x488] ss:$16 sps:$4 sm:$0xff]  }
 0x1f9   :  { %1336 = vmatmul.mubr.bf16.gmra.mxu0 %v922_v26  ;;  %1407 = vmatmul.mubr.bf16.gmra.mxu1 %v922_v26  ;;  %v12319_v26 = vcombine.high %v12264_v22, %v12264_v22 }
 0x1fa   :  { %1552 = vmatpush1.bf16.msra.mxu0 %v16549_v28  ;;  %1569 = vmatprep.mubr.bf16.mxu0 %v20772_v4 }
 0x1fb   :  { %2036 = vmatprep.subr.bf16.mxu0 %v14858_v27  ;;  %1978 = vmatpush1.bf16.msra.mxu1 %v14889_v55  ;;  %v12321_v27 = vcombine.high %v12265_v24, %v12265_v24  ;;  %v14934_v55 = vld [vmem:[%s20847_s0 + $0x46c] ss:$16 sps:$4 sm:$0xff]  }
 0x1fc   :  { %1979 = vmatprep.subr.bf16.mxu1 %v14897_v2  ;;  %v14932_v2 = vld [vmem:[%s20847_s0 + $0x468] ss:$16 sps:$4 sm:$0xff]  }
 0x1ff   :  { %1980 = vmatpush1.bf16.msra.mxu1 %v14895_v16 }
 0x200   :  { %12322 = vmatprep.subr.msk.bf16.mxu1 %vm622_vm2, %v12319_v26  ;;  %v1418_v26 = vld [vmem:[#allocation2 + $0x18] sm:$0xff] }
 0x201   :  { %12208 = vmatmul.mubr.msk.bf16.vlgmr.msra.gmra.mxu0 %vm186_vm1, %v14849_v29  ;;  %v12318_v29 = vcombine.low %v12264_v22, %v12264_v22 }
 0x202   :  { %1579 = vmatprep.mubr.bf16.mxu0 %v20772_v4  ;;  %2037 = vmatpush1.bf16.msra.mxu0 %v14856_v30  ;;  %v12320_v30 = vcombine.low %v12265_v24, %v12265_v24 }
 0x203   :  { %2038 = vmatprep.subr.bf16.mxu0 %v14864_v31  ;;  %v1954_v31 = vsel %vm622_vm2, %v12318_v29, 0 }
 0x204   :  { %1986 = vmatpush2.bf16.msra.mxu1 %v1954_v31 }
 0x206   :  { %2039 = vmatpush1.bf16.msra.mxu0 %v14862_v32  ;;  %v1960_v32 = vsel %vm622_vm2, %v12320_v30, 0 }
 0x207   :  { %2040 = vmatprep.subr.bf16.mxu0 %v14870_v33  ;;  %v14907_v33 = vld [vmem:[%s20847_s0 + $0x4e4] ss:$16 sps:$4 sm:$0xff]  }
 0x208   :  { %1987 = vmatprep.subr.bf16.mxu1 %v14907_v33 }
 0x209   :  { %12209 = vmatmul.mubr.msk.bf16.gmra.mxu0 %vm186_vm1, %v14850_v34  ;;  %v14910_v34 = vld [vmem:[%s20847_s0 + $0x4ec] ss:$16 sps:$4 sm:$0xff]  }
 0x20a   :  { %1589 = vmatprep.mubr.bf16.mxu0 %v20772_v4  ;;  %2041 = vmatpush1.bf16.msra.mxu0 %v14868_v35  ;;  %v14905_v35 = vld [vmem:[%s20847_s0 + $0x4e0] ss:$16 sps:$4 sm:$0xff]  }
 0x20b   :  { %2042 = vmatprep.subr.bf16.mxu0 %v14876_v36  ;;  %v14908_v36 = vld [vmem:[%s20847_s0 + $0x4e8] ss:$16 sps:$4 sm:$0xff]   ;;  %1988 = vmatpush2.bf16.msra.mxu1 %v14905_v35 }
 0x20e   :  { %2043 = vmatpush1.bf16.msra.mxu0 %v14874_v37  ;;  %v14913_v37 = vld [vmem:[%s20847_s0 + $0x4c4] ss:$16 sps:$4 sm:$0xff]  }
 0x20f   :  { %2044 = vmatprep.subr.bf16.mxu0 %v14882_v42  ;;  %1989 = vmatprep.subr.bf16.mxu1 %v14913_v37  ;;  %v14919_v42 = vld [vmem:[%s20847_s0 + $0x4a4] ss:$16 sps:$4 sm:$0xff]  }
 0x211   :  { %12210 = vmatmul.mubr.msk.bf16.gmra.mxu0 %vm186_vm1, %v14851_v38  ;;  %v14916_v38 = vld [vmem:[%s20847_s0 + $0x4cc] ss:$16 sps:$4 sm:$0xff]  }
 0x212   :  { %1599 = vmatprep.mubr.bf16.mxu0 %v20772_v4  ;;  %2045 = vmatpush1.bf16.msra.mxu0 %v14880_v45  ;;  %v14917_v45 = vld [vmem:[%s20847_s0 + $0x4a0] ss:$16 sps:$4 sm:$0xff]  }
 0x213   :  { %2046 = vmatprep.subr.bf16.mxu0 %v14888_v47  ;;  %v14925_v47 = vld [vmem:[%s20847_s0 + $0x484] ss:$16 sps:$4 sm:$0xff]  }
 0x216   :  { %2047 = vmatpush1.bf16.msra.mxu0 %v14886_v50  ;;  %v14923_v50 = vld [vmem:[%s20847_s0 + $0x480] ss:$16 sps:$4 sm:$0xff]  }
 0x217   :  { %2048 = vmatprep.subr.bf16.mxu0 %v14894_v53  ;;  %v14931_v53 = vld [vmem:[%s20847_s0 + $0x464] ss:$16 sps:$4 sm:$0xff]  }
 0x219   :  { %12211 = vmatmul.mubr.msk.bf16.gmra.mxu0 %vm186_vm1, %v14852_v39  ;;  %v14911_v39 = vld [vmem:[%s20847_s0 + $0x4c0] ss:$16 sps:$4 sm:$0xff]  }
 0x21a   :  { %2049 = vmatpush1.bf16.msra.mxu0 %v14892_v57  ;;  %1990 = vmatpush2.bf16.msra.mxu1 %v14911_v39  ;;  %v14929_v57 = vld [vmem:[%s20847_s0 + $0x460] ss:$16 sps:$4 sm:$0xff]  }
 0x21b   :  { %2050 = vmatprep.subr.bf16.mxu0 %v14900_v8  ;;  %1991 = vmatprep.subr.bf16.mxu1 %v14919_v42  ;;  %v14941_v8 = vld [vmem:[%s20847_s0 + $0x5f4] ss:$16 sps:$4 sm:$0xff]  }
 0x21e   :  { %2051 = vmatpush1.bf16.msra.mxu0 %v14898_v20  ;;  %1992 = vmatpush2.bf16.msra.mxu1 %v14917_v45 }
 0x21f   :  { %12327 = vmatprep.subr.msk.bf16.mxu0 %vm622_vm2, %v12321_v27  ;;  %1993 = vmatprep.subr.bf16.mxu1 %v14925_v47 }
 0x222   :  { %2057 = vmatpush2.bf16.msra.mxu0 %v1960_v32  ;;  %1994 = vmatpush2.bf16.msra.mxu1 %v14923_v50  ;;  %v1422_v32 = vld [vmem:[#allocation2 + $0x38] sm:$0xff] }
 0x223   :  { %2058 = vmatprep.subr.bf16.mxu0 %v14910_v34  ;;  %1995 = vmatprep.subr.bf16.mxu1 %v14931_v53 }
 0x226   :  { %2059 = vmatpush2.bf16.msra.mxu0 %v14908_v36  ;;  %1996 = vmatpush2.bf16.msra.mxu1 %v14929_v57 }
 0x227   :  { %2060 = vmatprep.subr.bf16.mxu0 %v14916_v38  ;;  %12343 = vmatprep.subr.msk.bf16.mxu1 %vm199_vm0, %v16397_v56  ;;  %v1426_v38 = vld [vmem:[#allocation2 + $0x58] sm:$0xff] }
 0x22a   :  { %2061 = vmatpush2.bf16.msra.mxu0 %v14914_v41 }
 0x22b   :  { %2062 = vmatprep.subr.bf16.mxu0 %v14922_v43 }
 0x22e   :  { %2063 = vmatpush2.bf16.msra.mxu0 %v14920_v46  ;;  %v1430_v46 = vld [vmem:[#allocation2 + $0x78] sm:$0xff] }
 0x22f   :  { %2064 = vmatprep.subr.bf16.mxu0 %v14928_v49 }
 0x232   :  { %2065 = vmatpush2.bf16.msra.mxu0 %v14926_v52 }
 0x233   :  { %2066 = vmatprep.subr.bf16.mxu0 %v14934_v55  ;;  %v1434_v55 = vld [vmem:[#allocation2 + $0x98] sm:$0xff] }
 0x236   :  { %2067 = vmatpush2.bf16.msra.mxu0 %v14932_v2 }
 0x237   :  { %2657 = vmatprep.subr.bf16.mxu0 %v14941_v8 }
 0x2a1   :  { %v16716_v16 = vpop.f32.mrf.mxu0  ;;  %v16718_v20 = vpop.f32.mrf.mxu1 }
 0x2a3   :  { %v16720_v22 = vpop.f32.mrf.mxu0  ;;  %v1380_v24 = vpop.f32.mrf.mxu1 }
 0x2a4   :  { %v1446_v27 = vadd.f32 %v1418_v26, %v1380_v24 }
 0x2a5   :  { %v16722_v29 = vpop.f32.mrf.mxu0  ;;  %v16724_v30 = vpop.f32.mrf.mxu1 }
 0x2a6   :  { %1474 = vst.msk [vmem:[#allocation2 + $0x18] sm:$0xff] %vm780_vm4, %v1446_v27  ;;  %v1438_v27 = vld [vmem:[#allocation2 + $0xb8] sm:$0xff] }
 0x2a7   :  { %v16727_v56 = vpop.f32.mrf.mxu0  ;;  %v1384_v31 = vpop.f32.mrf.mxu1 }
 0x2a8   :  { %v1450_v33 = vadd.f32 %v1422_v32, %v1384_v31 }
 0x2a9   :  { %v16729_v34 = vpop.f32.mrf.mxu0  ;;  %v16731_v35 = vpop.f32.mrf.mxu1 }
 0x2aa   :  { %1478 = vst.msk [vmem:[#allocation2 + $0x38] sm:$0xff] %vm780_vm4, %v1450_v33  ;;  %v1439_v33 = vld [vmem:[#allocation2 + $0xc0] sm:$0x3] }
 0x2ab   :  { %v16734_v36 = vpop.f32.mrf.mxu0  ;;  %v1390_v37 = vpop.f32.mrf.mxu1 }
 0x2ac   :  { %v1454_v39 = vadd.f32 %v1426_v38, %v1390_v37  ;;  %v1441_v38 = vld [vmem:[#allocation2 + $0xd0] sm:$0x3] }
 0x2ad   :  { %v16736_v41 = vpop.f32.mrf.mxu0  ;;  %v16738_v42 = vpop.f32.mrf.mxu1 }
 0x2ae   :  { %1482 = vst.msk [vmem:[#allocation2 + $0x58] sm:$0xff] %vm780_vm4, %v1454_v39 }
 0x2af   :  { %v16741_v43 = vpop.f32.mrf.mxu0  ;;  %v1394_v45 = vpop.f32.mrf.mxu1 }
 0x2b0   :  { %20851 = vst [vmem:[#allocation10_spill] sm:$0xff] %v16741_v43  ;;  %v1458_v47 = vadd.f32 %v1430_v46, %v1394_v45 }
 0x2b1   :  { %v16743_v49 = vpop.f32.mrf.mxu0  ;;  %v16745_v50 = vpop.f32.mrf.mxu1 }
 0x2b2   :  { %1486 = vst.msk [vmem:[#allocation2 + $0x78] sm:$0xff] %vm780_vm4, %v1458_v47  ;;  %v1440_v47 = vld [vmem:[#allocation2 + $0xc8] sm:$0x3] }
 0x2b3   :  { %v16748_v52 = vpop.f32.mrf.mxu0  ;;  %v1400_v53 = vpop.f32.mrf.mxu1 }
 0x2b4   :  { %v1462_v57 = vadd.f32 %v1434_v55, %v1400_v53  ;;  %v1442_v55 = vld [vmem:[#allocation2 + $0xd8] sm:$0x3] }
 0x2b5   :  { %v16750_v2 = vpop.f32.mrf.mxu0  ;;  %v16752_v8 = vpop.f32.mrf.mxu1 }
 0x2b6   :  { %1490 = vst.msk [vmem:[#allocation2 + $0x98] sm:$0xff] %vm780_vm4, %v1462_v57 }
 0x2b7   :  { %v16755_v24 = vpop.f32.mrf.mxu0  ;;  %v1404_v26 = vpop.f32.mrf.mxu1 }
 0x2b8   :  { %20852 = vst [vmem:[#allocation11_spill] sm:$0xff] %v16755_v24  ;;  %v1466_v31 = vadd.f32 %v1438_v27, %v1404_v26 }
 0x2b9   :  { %v1337_v32 = vpop.f32.mrf.mxu0  ;;  %v1408_v37 = vpop.f32.mrf.mxu1 }
 0x2ba   :  { %1494 = vst.msk [vmem:[#allocation2 + $0xb8] sm:$0xff] %vm780_vm4, %v1466_v31  ;;  %v1467_v39 = vadd.f32 %v1439_v33, %v1337_v32  ;;  %v1469_v45 = vadd.f32 %v1441_v38, %v1408_v37  ;;  %v14939_v37 = vld [vmem:[%s20847_s0 + $0x5f0] ss:$16 sps:$4 sm:$0xff]  }
 0x2bb   :  { %v1339_v46 = vpop.f32.mrf.mxu0  ;;  %v1410_v53 = vpop.f32.mrf.mxu1 }
 0x2bc   :  { %1495 = vst [vmem:[#allocation2 + $0xc0] sm:$0x3] %v1467_v39  ;;  %1497 = vst [vmem:[#allocation2 + $0xd0] sm:$0x3] %v1469_v45  ;;  %v1468_v57 = vadd.f32 %v1440_v47, %v1339_v46  ;;  %v1470_v4 = vadd.f32 %v1442_v55, %v1410_v53  ;;  %v14951_v47 = vld [vmem:[%s20847_s0 + $0x5b0] ss:$16 sps:$4 sm:$0xff]  }
 0x2bd   :  { %v1341_v24 = vpop.f32.mrf.mxu0  ;;  %v1412_v19 = vpop.f32.mrf.mxu1 }
 0x2be   :  { %1496 = vst [vmem:[#allocation2 + $0xc8] sm:$0x3] %v1468_v57  ;;  %1498 = vst.msk [vmem:[#allocation2 + $0xd8] sm:$0x3] %vm805_vm5, %v1470_v4  ;;  %v14947_v19 = vld [vmem:[%s20847_s0 + $0x5d4] ss:$16 sps:$4 sm:$0xff]  }
 0x2bf   :  { %v1342_v26 = vpop.f32.mrf.mxu0  ;;  %v1413_v27 = vpop.f32.mrf.mxu1  ;;  %v14953_v24 = vld [vmem:[%s20847_s0 + $0x5b4] ss:$16 sps:$4 sm:$0xff]  }
 0x2c1   :  { %v1571_v43 = vpop.f32.mrf.mxu0 }
 0x2c3   :  { %v1573_v11 = vpop.f32.mrf.mxu0 }
 0x2c5   :  { %v1575_v31 = vpop.f32.mrf.mxu0 }
 0x2c6   :  { %v1608_v38 = vpack.c.bf16 %v1575_v31, %v1571_v43 }
 0x2c7   :  { %v1577_v32 = vpop.f32.mrf.mxu0 }
 0x2c8   :  { %v1609_v33 = vpack.c.bf16 %v1577_v32, %v1573_v11  ;;  %v14945_v11 = vld [vmem:[%s20847_s0 + $0x5d0] ss:$16 sps:$4 sm:$0xff]  }
 0x2c9   :  { %v1581_v39 = vpop.f32.mrf.mxu0 }
 0x2ca   :  { %12323 = vmatprep.mubr.msk.bf16.mxu1 %vm609_vm3, %v1609_v33  ;;  %12328 = vmatprep.mubr.msk.bf16.mxu0 %vm609_vm3, %v1609_v33 }
 0x2cb   :  { %v1583_v4 = vpop.f32.mrf.mxu0  ;;  %1998 = vmatmul.mubr.bf16.vlgmr.msra.gmra.mxu1 %v1608_v38  ;;  %2069 = vmatmul.mubr.bf16.vlgmr.msra.gmra.mxu0 %v1608_v38  ;;  %v14956_v38 = vld [vmem:[%s20847_s0 + $0x5bc] ss:$16 sps:$4 sm:$0xff]  }
 0x2cc   :  { %2232 = vmatpush1.bf16.msra.mxu1 %v15939_v3  ;;  %2658 = vmatpush1.bf16.msra.mxu0 %v14939_v37  ;;  %v14944_v37 = vld [vmem:[%s20847_s0 + $0x5fc] ss:$16 sps:$4 sm:$0xff]  }
 0x2cd   :  { %v1585_v43 = vpop.f32.mrf.mxu0  ;;  %2233 = vmatprep.subr.bf16.mxu1 %v16462_v40  ;;  %2659 = vmatprep.subr.bf16.mxu0 %v14947_v19  ;;  %v14959_v40 = vld [vmem:[%s20847_s0 + $0x594] ss:$16 sps:$4 sm:$0xff]   ;;  %v14954_v19 = vld [vmem:[%s20847_s0 + $0x5b8] ss:$16 sps:$4 sm:$0xff]  }
 0x2ce   :  { %v1610_v53 = vpack.c.bf16 %v1585_v43, %v1581_v39  ;;  %v14936_v39 = vld [vmem:[%s20848_s8 + $0x5c] sm:$0xff]   ;;  %v14937_v43 = vld [vmem:[%s20848_s8 + $0x64] sm:$0xff]  }
 0x2cf   :  { %v1587_v45 = vpop.f32.mrf.mxu0 }
 0x2d0   :  { %v1611_v46 = vpack.c.bf16 %v1587_v45, %v1583_v4  ;;  %2234 = vmatpush1.bf16.msra.mxu1 %v16471_v44  ;;  %2660 = vmatpush1.bf16.msra.mxu0 %v14945_v11  ;;  %v14957_v44 = vld [vmem:[%s20847_s0 + $0x590] ss:$16 sps:$4 sm:$0xff]   ;;  %v14962_v4 = vld [vmem:[%s20847_s0 + $0x59c] ss:$16 sps:$4 sm:$0xff]   ;;  %v14960_v11 = vld [vmem:[%s20847_s0 + $0x598] ss:$16 sps:$4 sm:$0xff]  }
 0x2d1   :  { %v1591_v55 = vpop.f32.mrf.mxu0  ;;  %2235 = vmatprep.subr.bf16.mxu1 %v16480_v48  ;;  %2661 = vmatprep.subr.bf16.mxu0 %v14953_v24  ;;  %v14938_v24 = vld [vmem:[%s20848_s8 + $0x6c] ss:$0 sps:$4 sm:$0x11]   ;;  %v14965_v45 = vld [vmem:[%s20847_s0 + $0x574] ss:$16 sps:$4 sm:$0xff]  }
 0x2d2   :  { %12324 = vmatprep.mubr.msk.bf16.mxu1 %vm609_vm3, %v1611_v46  ;;  %12329 = vmatprep.mubr.msk.bf16.mxu0 %vm609_vm3, %v1611_v46  ;;  %v14968_v46 = vld [vmem:[%s20847_s0 + $0x57c] ss:$16 sps:$4 sm:$0xff]  }
 0x2d3   :  { %v1593_v57 = vpop.f32.mrf.mxu0  ;;  %2008 = vmatmul.mubr.bf16.gmra.mxu1 %v1610_v53  ;;  %2079 = vmatmul.mubr.bf16.gmra.mxu0 %v1610_v53  ;;  %v14966_v53 = vld [vmem:[%s20847_s0 + $0x578] ss:$16 sps:$4 sm:$0xff]  }
 0x2d4   :  { %2236 = vmatpush1.bf16.msra.mxu1 %v16491_v51  ;;  %2662 = vmatpush1.bf16.msra.mxu0 %v14951_v47  ;;  %v14963_v47 = vld [vmem:[%s20847_s0 + $0x570] ss:$16 sps:$4 sm:$0xff]  }
 0x2d5   :  { %v1595_v48 = vpop.f32.mrf.mxu0  ;;  %2237 = vmatprep.subr.bf16.mxu1 %v16500_v54  ;;  %2663 = vmatprep.subr.bf16.mxu0 %v14959_v40  ;;  %v14974_v40 = vld [vmem:[%s20847_s0 + $0x55c] ss:$16 sps:$4 sm:$0xff]  }
 0x2d6   :  { %v1612_v31 = vpack.c.bf16 %v1595_v48, %v1591_v55  ;;  %v14971_v55 = vld [vmem:[%s20847_s0 + $0x554] ss:$16 sps:$4 sm:$0xff]  }
 0x2d7   :  { %v1597_v26 = vpop.f32.mrf.mxu0  ;;  %v14977_v48 = vld [vmem:[%s20847_s0 + $0x534] ss:$16 sps:$4 sm:$0xff]  }
 0x2d8   :  { %v1613_v27 = vpack.c.bf16 %v1597_v26, %v1593_v57  ;;  %2238 = vmatpush1.bf16.msra.mxu1 %v16506_v61  ;;  %2664 = vmatpush1.bf16.msra.mxu0 %v14957_v44  ;;  %v14969_v57 = vld [vmem:[%s20847_s0 + $0x550] ss:$16 sps:$4 sm:$0xff]   ;;  %v14972_v44 = vld [vmem:[%s20847_s0 + $0x558] ss:$16 sps:$4 sm:$0xff]   ;;  %v14980_v26 = vld [vmem:[%s20847_s0 + $0x53c] ss:$16 sps:$4 sm:$0xff]  }
 0x2d9   :  { %v1601_v32 = vpop.f32.mrf.mxu0  ;;  %2239 = vmatprep.subr.bf16.mxu1 %v16512_v12  ;;  %2665 = vmatprep.subr.bf16.mxu0 %v14965_v45  ;;  %v14997_v45 = vld [vmem:[%s20847_s0 + $0x670] ss:$16 sps:$4 sm:$0xff]  }
 0x2da   :  { %12325 = vmatprep.mubr.msk.bf16.mxu1 %vm609_vm3, %v1613_v27  ;;  %12330 = vmatprep.mubr.msk.bf16.mxu0 %vm609_vm3, %v1613_v27  ;;  %v1614_v12 = vpack.c.bf16 %v1601_v32, %v1601_v32  ;;  %v14975_v27 = vld [vmem:[%s20847_s0 + $0x530] ss:$16 sps:$4 sm:$0xff]   ;;  %v14983_v32 = vld [vmem:[%s20847_s0 + $0x514] ss:$16 sps:$4 sm:$0xff]  }
 0x2db   :  { %v1603_v51 = vpop.f32.mrf.mxu0  ;;  %2018 = vmatmul.mubr.bf16.gmra.mxu1 %v1612_v31  ;;  %2089 = vmatmul.mubr.bf16.gmra.mxu0 %v1612_v31  ;;  %v14978_v31 = vld [vmem:[%s20847_s0 + $0x538] ss:$16 sps:$4 sm:$0xff]  }
 0x2dc   :  { %v1615_v33 = vpack.c.bf16 %v1603_v51, %v1603_v51  ;;  %2240 = vmatpush1.bf16.msra.mxu1 %v16520_v21  ;;  %v20853_v21 = vmov 0   ;;  %2666 = vmatpush1.bf16.msra.mxu0 %v14963_v47  ;;  %v14986_v51 = vld [vmem:[%s20847_s0 + $0x51c] ss:$16 sps:$4 sm:$0xff]   ;;  %v15005_v47 = vld [vmem:[%s20847_s0 + $0x654] ss:$16 sps:$4 sm:$0xff]  }
 0x2dd   :  { %v1605_v54 = vpop.f32.mrf.mxu0  ;;  %2241 = vmatprep.subr.bf16.mxu1 %v16526_v23  ;;  %v14935_v23 = vld [vmem:[%s20848_s8 + $0x54] sm:$0xff]   ;;  %2667 = vmatprep.subr.bf16.mxu0 %v14971_v55  ;;  %v15003_v55 = vld [vmem:[%s20847_s0 + $0x650] ss:$16 sps:$4 sm:$0xff]  }
 0x2de   :  { %12326 = vmatprep.mubr.msk.bf16.mxu1 %vm609_vm3, %v1615_v33  ;;  %12331 = vmatprep.mubr.msk.bf16.mxu0 %vm609_vm3, %v1615_v33  ;;  %v14981_v33 = vld [vmem:[%s20847_s0 + $0x510] ss:$16 sps:$4 sm:$0xff]   ;;  %v14984_v54 = vld [vmem:[%s20847_s0 + $0x518] ss:$16 sps:$4 sm:$0xff]  }
 0x2df   :  { %v1606_v61 = vpop.f32.mrf.mxu0 }
 0x2e0   :  { %2242 = vmatpush1.bf16.msra.mxu1 %v16534_v25  ;;  %v14942_v25 = vld [vmem:[%s20847_s0 + $0x5f8] ss:$16 sps:$4 sm:$0xff]   ;;  %2668 = vmatpush1.bf16.msra.mxu0 %v14969_v57  ;;  %v12400_v61 = vld [vmem:[%s20847_s0 + $0x6b0] sm:$0xff] }
 0x2e1   :  { %2243 = vmatprep.subr.bf16.mxu1 %v16540_v0  ;;  %v14950_v0 = vld [vmem:[%s20847_s0 + $0x5dc] ss:$16 sps:$4 sm:$0xff]   ;;  %2669 = vmatprep.subr.bf16.mxu0 %v14977_v48  ;;  %v15011_v57 = vld [vmem:[%s20847_s0 + $0x634] ss:$16 sps:$4 sm:$0xff]   ;;  %v15009_v48 = vld [vmem:[%s20847_s0 + $0x630] ss:$16 sps:$4 sm:$0xff]  }
 0x2e3   :  { %2028 = vmatmul.mubr.bf16.gmra.mxu1 %v1614_v12  ;;  %2099 = vmatmul.mubr.bf16.gmra.mxu0 %v1614_v12  ;;  %v12401_v12 = vld [vmem:[%s20847_s0 + $0x6b8] sm:$0xff] }
 0x2e4   :  { %2244 = vmatpush1.bf16.msra.mxu1 %v16549_v28  ;;  %2261 = vmatprep.mubr.bf16.mxu1 %v20853_v21  ;;  %v14948_v28 = vld [vmem:[%s20847_s0 + $0x5d8] ss:$16 sps:$4 sm:$0xff]  }
 0x2e5   :  { %2728 = vmatprep.subr.bf16.mxu1 %v14944_v37  ;;  %2670 = vmatpush1.bf16.msra.mxu0 %v14975_v27  ;;  %v12455_v37 = vcombine.high %v12400_v61, %v12400_v61  ;;  %v15017_v27 = vld [vmem:[%s20847_s0 + $0x614] ss:$16 sps:$4 sm:$0xff]  }
 0x2e6   :  { %2671 = vmatprep.subr.bf16.mxu0 %v14983_v32  ;;  %v15015_v32 = vld [vmem:[%s20847_s0 + $0x610] ss:$16 sps:$4 sm:$0xff]  }
 0x2e9   :  { %2672 = vmatpush1.bf16.msra.mxu0 %v14981_v33  ;;  %v15758_v33 = vld [vmem:[%s20846_s27 + $0x64] ss:$8 sps:$4 sm:$0x3f]  }
 0x2ea   :  { %12458 = vmatprep.subr.msk.bf16.mxu0 %vm622_vm2, %v12455_v37 }
 0x2eb   :  { %12344 = vmatmul.mubr.msk.bf16.vlgmr.msra.gmra.mxu1 %vm186_vm1, %v14935_v23  ;;  %v12457_v23 = vcombine.high %v12401_v12, %v12401_v12 }
 0x2ec   :  { %2271 = vmatprep.mubr.bf16.mxu1 %v20853_v21  ;;  %2729 = vmatpush1.bf16.msra.mxu1 %v14942_v25  ;;  %v12454_v25 = vcombine.low %v12400_v61, %v12400_v61  ;;  %v1443_v61 = vadd.f32 %v16716_v16, %v16404_v58  ;;  %v1449_v58 = vadd.f32 %v16724_v30, %v16413_v63 }
 0x2ed   :  { %2730 = vmatprep.subr.bf16.mxu1 %v14950_v0  ;;  %v12456_v0 = vcombine.low %v12401_v12, %v12401_v12  ;;  %v1445_v12 = vadd.f32 %v16718_v20, %v16406_v59  ;;  %v1453_v63 = vadd.f32 %v16731_v35, %v16420_v6  ;;  %v1457_v6 = vadd.f32 %v16738_v42, %v16427_v10 }
 0x2ee   :  { %v1461_v10 = vadd.f32 %v16745_v50, %v16434_v14  ;;  %v1465_v14 = vadd.f32 %v16752_v8, %v16441_v18  ;;  %v2133_v18 = vld [vmem:[#allocation2 + $0xd0] sm:$0x3] }
 0x2f0   :  { %2731 = vmatpush1.bf16.msra.mxu1 %v14948_v28  ;;  %v2646_v28 = vsel %vm622_vm2, %v12454_v25, 0  ;;  %v1444_v25 = vadd.f32 %v16720_v22, %v16408_v60 }
 0x2f1   :  { %2732 = vmatprep.subr.bf16.mxu1 %v14956_v38  ;;  %v2652_v38 = vsel %vm622_vm2, %v12456_v0, 0  ;;  %2678 = vmatpush2.bf16.msra.mxu0 %v2646_v28 }
 0x2f3   :  { %12345 = vmatmul.mubr.msk.bf16.gmra.mxu1 %vm186_vm1, %v14936_v39  ;;  %v14993_v39 = vld [vmem:[%s20847_s0 + $0x694] ss:$16 sps:$4 sm:$0xff]  }
 0x2f4   :  { %2281 = vmatprep.mubr.bf16.mxu1 %v20853_v21  ;;  %2733 = vmatpush1.bf16.msra.mxu1 %v14954_v19  ;;  %v14996_v19 = vld [vmem:[%s20847_s0 + $0x69c] ss:$16 sps:$4 sm:$0xff]  }
 0x2f5   :  { %2734 = vmatprep.subr.bf16.mxu1 %v14962_v4  ;;  %v14991_v4 = vld [vmem:[%s20847_s0 + $0x690] ss:$16 sps:$4 sm:$0xff]   ;;  %2679 = vmatprep.subr.bf16.mxu0 %v14993_v39 }
 0x2f6   :  { %2680 = vmatpush2.bf16.msra.mxu0 %v14991_v4  ;;  %v1447_v4 = vadd.f32 %v16722_v29, %v16411_v62  ;;  %v1451_v62 = vadd.f32 %v16729_v34, %v16418_v5  ;;  %v1455_v5 = vadd.f32 %v16736_v41, %v16425_v9  ;;  %v1459_v9 = vadd.f32 %v16743_v49, %v16432_v13 }
 0x2f7   :  { %v1463_v13 = vadd.f32 %v16750_v2, %v16439_v17  ;;  %v2131_v2 = vld [vmem:[#allocation2 + $0xc0] sm:$0x3] }
 0x2f8   :  { %2735 = vmatpush1.bf16.msra.mxu1 %v14960_v11  ;;  %v14994_v11 = vld [vmem:[%s20847_s0 + $0x698] ss:$16 sps:$4 sm:$0xff]  }
 0x2f9   :  { %2736 = vmatprep.subr.bf16.mxu1 %v14968_v46  ;;  %v15000_v46 = vld [vmem:[%s20847_s0 + $0x678] ss:$16 sps:$4 sm:$0xff]  }
 0x2fb   :  { %12346 = vmatmul.mubr.msk.bf16.gmra.mxu1 %vm186_vm1, %v14937_v43  ;;  %v14999_v43 = vld [vmem:[%s20847_s0 + $0x674] ss:$16 sps:$4 sm:$0xff]  }
 0x2fc   :  { %2291 = vmatprep.mubr.bf16.mxu1 %v20853_v21  ;;  %2737 = vmatpush1.bf16.msra.mxu1 %v14966_v53  ;;  %v15008_v53 = vld [vmem:[%s20847_s0 + $0x65c] ss:$16 sps:$4 sm:$0xff]  }
 0x2fd   :  { %2738 = vmatprep.subr.bf16.mxu1 %v14974_v40  ;;  %2681 = vmatprep.subr.bf16.mxu0 %v14999_v43  ;;  %v15006_v40 = vld [vmem:[%s20847_s0 + $0x658] ss:$16 sps:$4 sm:$0xff]  }
 0x2fe   :  { %2682 = vmatpush2.bf16.msra.mxu0 %v14997_v45  ;;  %v2114_v45 = vld [vmem:[#allocation2 + $0x38] sm:$0xff] }
 0x2ff   :  { %2683 = vmatprep.subr.bf16.mxu0 %v15005_v47  ;;  %v1452_v47 = vadd.f32 %v16734_v36, %v16422_v7 }
 0x300   :  { %2739 = vmatpush1.bf16.msra.mxu1 %v14972_v44  ;;  %v15014_v44 = vld [vmem:[%s20847_s0 + $0x63c] ss:$16 sps:$4 sm:$0xff]  }
 0x301   :  { %2740 = vmatprep.subr.bf16.mxu1 %v14980_v26  ;;  %v15012_v26 = vld [vmem:[%s20847_s0 + $0x638] ss:$16 sps:$4 sm:$0xff]  }
 0x302   :  { %2684 = vmatpush2.bf16.msra.mxu0 %v15003_v55 }
 0x303   :  { %12347 = vmatmul.mubr.msk.bf16.gmra.mxu1 %vm186_vm1, %v14938_v24  ;;  %v15002_v24 = vld [vmem:[%s20847_s0 + $0x67c] ss:$16 sps:$4 sm:$0xff]   ;;  %2685 = vmatprep.subr.bf16.mxu0 %v15011_v57 }
 0x304   :  { %2741 = vmatpush1.bf16.msra.mxu1 %v14978_v31  ;;  %v15020_v31 = vld [vmem:[%s20847_s0 + $0x61c] ss:$16 sps:$4 sm:$0xff]  }
 0x305   :  { %2742 = vmatprep.subr.bf16.mxu1 %v14986_v51  ;;  %v15018_v51 = vld [vmem:[%s20847_s0 + $0x618] ss:$16 sps:$4 sm:$0xff]  }
 0x306   :  { %2686 = vmatpush2.bf16.msra.mxu0 %v15009_v48 }
 0x307   :  { %2687 = vmatprep.subr.bf16.mxu0 %v15017_v27 }
 0x308   :  { %2743 = vmatpush1.bf16.msra.mxu1 %v14984_v54  ;;  %v15027_v54 = vld [vmem:[%s20847_s0 + $0x7a4] ss:$16 sps:$4 sm:$0xff]  }
 0x309   :  { %12463 = vmatprep.subr.msk.bf16.mxu1 %vm622_vm2, %v12457_v23 }
 0x30a   :  { %2688 = vmatpush2.bf16.msra.mxu0 %v15015_v32  ;;  %v2122_v32 = vld [vmem:[#allocation2 + $0x78] sm:$0xff] }
 0x30b   :  { %12479 = vmatprep.subr.msk.bf16.mxu0 %vm199_vm0, %v15758_v33  ;;  %v1460_v33 = vadd.f32 %v16748_v52, %v16436_v15 }
 0x30c   :  { %2749 = vmatpush2.bf16.msra.mxu1 %v2652_v38 }
 0x30d   :  { %2750 = vmatprep.subr.bf16.mxu1 %v14996_v19  ;;  %v2110_v19 = vld [vmem:[#allocation2 + $0x18] sm:$0xff] }
 0x310   :  { %2751 = vmatpush2.bf16.msra.mxu1 %v14994_v11 }
 0x311   :  { %2752 = vmatprep.subr.bf16.mxu1 %v15002_v24 }
 0x314   :  { %2753 = vmatpush2.bf16.msra.mxu1 %v15000_v46 }
 0x315   :  { %2754 = vmatprep.subr.bf16.mxu1 %v15008_v53 }
 0x318   :  { %2755 = vmatpush2.bf16.msra.mxu1 %v15006_v40 }
 0x319   :  { %2756 = vmatprep.subr.bf16.mxu1 %v15014_v44  ;;  %v2118_v44 = vld [vmem:[#allocation2 + $0x58] sm:$0xff] }
 0x31c   :  { %2757 = vmatpush2.bf16.msra.mxu1 %v15012_v26 }
 0x31d   :  { %2758 = vmatprep.subr.bf16.mxu1 %v15020_v31 }
 0x320   :  { %2759 = vmatpush2.bf16.msra.mxu1 %v15018_v51 }
 0x321   :  { %3349 = vmatprep.subr.bf16.mxu1 %v15027_v54 }
 0x38b   :  { %v1999_v37 = vpop.f32.mrf.mxu1  ;;  %v2070_v23 = vpop.f32.mrf.mxu0 }
 0x38c   :  { %v16976_v0 = vadd.f32 %v1999_v37, %v1443_v61  ;;  %v16978_v28 = vadd.f32 %v2070_v23, %v1445_v12  ;;  %v2126_v23 = vld [vmem:[#allocation2 + $0x98] sm:$0xff] }
 0x38d   :  { %v2001_v38 = vpop.f32.mrf.mxu1  ;;  %v2072_v39 = vpop.f32.mrf.mxu0 }
 0x38e   :  { %v16984_v16 = vadd.f32 %v2001_v38, %v1444_v25  ;;  %v2138_v59 = vadd.f32 %v2110_v19, %v2072_v39 }
 0x38f   :  { %v2003_v20 = vpop.f32.mrf.mxu1  ;;  %v2074_v11 = vpop.f32.mrf.mxu0 }
 0x390   :  { %2166 = vst.msk [vmem:[#allocation2 + $0x18] sm:$0xff] %vm780_vm4, %v2138_v59  ;;  %v16987_v60 = vadd.f32 %v2003_v20, %v1447_v4  ;;  %v16989_v22 = vadd.f32 %v2074_v11, %v1449_v58  ;;  %v2130_v4 = vld [vmem:[#allocation2 + $0xb8] sm:$0xff] }
 0x391   :  { %v16991_v43 = vpop.f32.mrf.mxu1  ;;  %v2076_v24 = vpop.f32.mrf.mxu0 }
 0x392   :  { %v2142_v29 = vadd.f32 %v2114_v45, %v2076_v24  ;;  %v2132_v24 = vld [vmem:[#allocation2 + $0xc8] sm:$0x3] }
 0x393   :  { %v2009_v30 = vpop.f32.mrf.mxu1  ;;  %v2080_v46 = vpop.f32.mrf.mxu0 }
 0x394   :  { %2170 = vst.msk [vmem:[#allocation2 + $0x38] sm:$0xff] %vm780_vm4, %v2142_v29  ;;  %v17000_v53 = vadd.f32 %v2009_v30, %v1451_v62  ;;  %v17002_v55 = vadd.f32 %v2080_v46, %v1453_v63  ;;  %v2134_v62 = vld [vmem:[#allocation2 + $0xd8] sm:$0x3] }
 0x395   :  { %v2011_v40 = vpop.f32.mrf.mxu1  ;;  %v2082_v57 = vpop.f32.mrf.mxu0 }
 0x396   :  { %v17008_v34 = vadd.f32 %v2011_v40, %v1452_v47  ;;  %v2146_v35 = vadd.f32 %v2118_v44, %v2082_v57 }
 0x397   :  { %v2013_v48 = vpop.f32.mrf.mxu1  ;;  %v2084_v7 = vpop.f32.mrf.mxu0 }
 0x398   :  { %2174 = vst.msk [vmem:[#allocation2 + $0x58] sm:$0xff] %vm780_vm4, %v2146_v35  ;;  %v17011_v36 = vadd.f32 %v2013_v48, %v1455_v5  ;;  %v17013_v26 = vadd.f32 %v2084_v7, %v1457_v6  ;;  %v15025_v48 = vld [vmem:[%s20847_s0 + $0x7a0] ss:$16 sps:$4 sm:$0xff]  }
 0x399   :  { %v17015_v27 = vpop.f32.mrf.mxu1  ;;  %v2086_v31 = vpop.f32.mrf.mxu0 }
 0x39a   :  { %v2150_v41 = vadd.f32 %v2122_v32, %v2086_v31  ;;  %v15033_v32 = vld [vmem:[%s20847_s0 + $0x784] ss:$16 sps:$4 sm:$0xff]  }
 0x39b   :  { %v2019_v42 = vpop.f32.mrf.mxu1  ;;  %v2090_v51 = vpop.f32.mrf.mxu0 }
 0x39c   :  { %2178 = vst.msk [vmem:[#allocation2 + $0x78] sm:$0xff] %vm780_vm4, %v2150_v41  ;;  %v17024_v54 = vadd.f32 %v2019_v42, %v1459_v9  ;;  %v17026_v61 = vadd.f32 %v2090_v51, %v1461_v10  ;;  %v15031_v10 = vld [vmem:[%s20847_s0 + $0x780] ss:$16 sps:$4 sm:$0xff]   ;;  %v15759_v42 = vld [vmem:[%s20846_s27 + $0x54] ss:$8 sps:$4 sm:$0xff]  }
 0x39d   :  { %v2021_v12 = vpop.f32.mrf.mxu1  ;;  %v2092_v37 = vpop.f32.mrf.mxu0  ;;  %v15039_v51 = vld [vmem:[%s20847_s0 + $0x764] ss:$16 sps:$4 sm:$0xff]  }
 0x39e   :  { %v17032_v49 = vadd.f32 %v2021_v12, %v1460_v33  ;;  %v2154_v50 = vadd.f32 %v2126_v23, %v2092_v37  ;;  %v15037_v37 = vld [vmem:[%s20847_s0 + $0x760] ss:$16 sps:$4 sm:$0xff]  }
 0x39f   :  { %v2023_v25 = vpop.f32.mrf.mxu1  ;;  %v2094_v15 = vpop.f32.mrf.mxu0 }
 0x3a0   :  { %2182 = vst.msk [vmem:[#allocation2 + $0x98] sm:$0xff] %vm780_vm4, %v2154_v50  ;;  %v17035_v52 = vadd.f32 %v2023_v25, %v1463_v13  ;;  %v17037_v38 = vadd.f32 %v2094_v15, %v1465_v14  ;;  %v15761_v14 = vld [vmem:[%s20846_s27 + $0x44] ss:$8 sps:$4 sm:$0xff]   ;;  %v15762_v15 = vld [vmem:[%s20846_s27 + $0x40] ss:$8 sps:$4 sm:$0xff]  }
 0x3a1   :  { %v17039_v39 = vpop.f32.mrf.mxu1  ;;  %v2096_v19 = vpop.f32.mrf.mxu0  ;;  %v15045_v50 = vld [vmem:[%s20847_s0 + $0x744] ss:$16 sps:$4 sm:$0xff]  }
 0x3a2   :  { %v2158_v58 = vadd.f32 %v2130_v4, %v2096_v19  ;;  %v15043_v19 = vld [vmem:[%s20847_s0 + $0x740] ss:$16 sps:$4 sm:$0xff]  }
 0x3a3   :  { %v2029_v17 = vpop.f32.mrf.mxu1  ;;  %v2100_v59 = vpop.f32.mrf.mxu0 }
 0x3a4   :  { %2186 = vst.msk [vmem:[#allocation2 + $0xb8] sm:$0xff] %vm780_vm4, %v2158_v58  ;;  %v2159_v8 = vadd.f32 %v2131_v2, %v2029_v17  ;;  %v2161_v20 = vadd.f32 %v2133_v18, %v2100_v59  ;;  %v15763_v58 = vld [vmem:[%s20846_s27 + $0x34] ss:$8 sps:$4 sm:$0xff]   ;;  %v15764_v59 = vld [vmem:[%s20846_s27 + $0x30] ss:$8 sps:$4 sm:$0xff]  }
 0x3a5   :  { %v2031_v11 = vpop.f32.mrf.mxu1  ;;  %v2102_v45 = vpop.f32.mrf.mxu0 }
 0x3a6   :  { %2187 = vst [vmem:[#allocation2 + $0xc0] sm:$0x3] %v2159_v8  ;;  %2189 = vst [vmem:[#allocation2 + $0xd0] sm:$0x3] %v2161_v20  ;;  %v2160_v63 = vadd.f32 %v2132_v24, %v2031_v11  ;;  %v2162_v29 = vadd.f32 %v2134_v62, %v2102_v45  ;;  %v15765_v20 = vld [vmem:[%s20846_s27 + $0x24] ss:$8 sps:$4 sm:$0xff]  }
 0x3a7   :  { %v2033_v30 = vpop.f32.mrf.mxu1  ;;  %v2104_v46 = vpop.f32.mrf.mxu0  ;;  %v15766_v45 = vld [vmem:[%s20846_s27 + $0x20] ss:$8 sps:$4 sm:$0xff]  }
 0x3a8   :  { %2188 = vst [vmem:[#allocation2 + $0xc8] sm:$0x3] %v2160_v63  ;;  %2190 = vst.msk [vmem:[#allocation2 + $0xd8] sm:$0x3] %vm805_vm5, %v2162_v29  ;;  %v15767_v63 = vld [vmem:[%s20846_s27 + $0x14] ss:$8 sps:$4 sm:$0xff]  }
 0x3a9   :  { %v2034_v47 = vpop.f32.mrf.mxu1  ;;  %v2105_v40 = vpop.f32.mrf.mxu0  ;;  %v15768_v30 = vld [vmem:[%s20846_s27 + $0x10] ss:$8 sps:$4 sm:$0xff]  }
 0x3aa   :  { %v15769_v47 = vld [vmem:[%s20846_s27 + $0x4] ss:$8 sps:$4 sm:$0xff]  }
 0x3ab   :  { %v2263_v57 = vpop.f32.mrf.mxu1  ;;  %v15030_v40 = vld [vmem:[%s20847_s0 + $0x7ac] ss:$16 sps:$4 sm:$0xff]  }
 0x3ad   :  { %v2265_v44 = vpop.f32.mrf.mxu1 }
 0x3af   :  { %v2267_v5 = vpop.f32.mrf.mxu1 }
 0x3b0   :  { %v2300_v7 = vpack.c.bf16 %v2267_v5, %v2263_v57  ;;  %v15770_v57 = vld [vmem:[%s20846_s27] ss:$8 sps:$4 sm:$0xff]  }
 0x3b1   :  { %v2269_v6 = vpop.f32.mrf.mxu1  ;;  %v15028_v5 = vld [vmem:[%s20847_s0 + $0x7a8] ss:$16 sps:$4 sm:$0xff]  }
 0x3b2   :  { %v2301_v35 = vpack.c.bf16 %v2269_v6, %v2265_v44  ;;  %v15021_v44 = vld [vmem:[%s20848_s8 + $0x70] sm:$0xff]   ;;  %v15036_v6 = vld [vmem:[%s20847_s0 + $0x78c] ss:$16 sps:$4 sm:$0xff]  }
 0x3b3   :  { %v2273_v31 = vpop.f32.mrf.mxu1 }
 0x3b4   :  { %12459 = vmatprep.mubr.msk.bf16.mxu0 %vm609_vm3, %v2301_v35  ;;  %12464 = vmatprep.mubr.msk.bf16.mxu1 %vm609_vm3, %v2301_v35  ;;  %v15034_v35 = vld [vmem:[%s20847_s0 + $0x788] ss:$16 sps:$4 sm:$0xff]  }
 0x3b5   :  { %v2275_v9 = vpop.f32.mrf.mxu1  ;;  %2690 = vmatmul.mubr.bf16.vlgmr.msra.gmra.mxu0 %v2300_v7  ;;  %2761 = vmatmul.mubr.bf16.vlgmr.msra.gmra.mxu1 %v2300_v7  ;;  %v15022_v7 = vld [vmem:[%s20848_s8 + $0x78] sm:$0xff]  }
 0x3b6   :  { %2924 = vmatpush1.bf16.msra.mxu0 %v15939_v3  ;;  %3350 = vmatpush1.bf16.msra.mxu1 %v15025_v48  ;;  %v15760_v3 = vld [vmem:[%s20846_s27 + $0x50] ss:$8 sps:$4 sm:$0xff]   ;;  %v15042_v48 = vld [vmem:[%s20847_s0 + $0x76c] ss:$16 sps:$4 sm:$0xff]  }
 0x3b7   :  { %v2277_v41 = vpop.f32.mrf.mxu1  ;;  %2925 = vmatprep.subr.bf16.mxu0 %v15759_v42  ;;  %3351 = vmatprep.subr.bf16.mxu1 %v15033_v32  ;;  %v15048_v32 = vld [vmem:[%s20847_s0 + $0x74c] ss:$16 sps:$4 sm:$0xff]   ;;  %v15051_v42 = vld [vmem:[%s20847_s0 + $0x724] ss:$16 sps:$4 sm:$0xff]  }
 0x3b8   :  { %v2302_v23 = vpack.c.bf16 %v2277_v41, %v2273_v31  ;;  %v15040_v31 = vld [vmem:[%s20847_s0 + $0x768] ss:$16 sps:$4 sm:$0xff]  }
 0x3b9   :  { %v2279_v33 = vpop.f32.mrf.mxu1  ;;  %v15024_v41 = vld [vmem:[%s20848_s8 + $0x88] ss:$0 sps:$4 sm:$0x11]  }
 0x3ba   :  { %v2303_v12 = vpack.c.bf16 %v2279_v33, %v2275_v9  ;;  %2926 = vmatpush1.bf16.msra.mxu0 %v15760_v3  ;;  %3352 = vmatpush1.bf16.msra.mxu1 %v15031_v10  ;;  %v15046_v9 = vld [vmem:[%s20847_s0 + $0x748] ss:$16 sps:$4 sm:$0xff]   ;;  %v15023_v10 = vld [vmem:[%s20848_s8 + $0x80] sm:$0xff]  }
 0x3bb   :  { %v2283_v13 = vpop.f32.mrf.mxu1  ;;  %2927 = vmatprep.subr.bf16.mxu0 %v15761_v14  ;;  %3353 = vmatprep.subr.bf16.mxu1 %v15039_v51  ;;  %v15054_v51 = vld [vmem:[%s20847_s0 + $0x72c] ss:$16 sps:$4 sm:$0xff]   ;;  %v15049_v33 = vld [vmem:[%s20847_s0 + $0x720] ss:$16 sps:$4 sm:$0xff]   ;;  %v15057_v3 = vld [vmem:[%s20847_s0 + $0x704] ss:$16 sps:$4 sm:$0xff]  }
 0x3bc   :  { %12460 = vmatprep.mubr.msk.bf16.mxu0 %vm609_vm3, %v2303_v12  ;;  %12465 = vmatprep.mubr.msk.bf16.mxu1 %vm609_vm3, %v2303_v12  ;;  %v15052_v12 = vld [vmem:[%s20847_s0 + $0x728] ss:$16 sps:$4 sm:$0xff]   ;;  %v15063_v14 = vld [vmem:[%s20847_s0 + $0x6e4] ss:$16 sps:$4 sm:$0xff]  }
 0x3bd   :  { %v2285_v25 = vpop.f32.mrf.mxu1  ;;  %2700 = vmatmul.mubr.bf16.gmra.mxu0 %v2302_v23  ;;  %2771 = vmatmul.mubr.bf16.gmra.mxu1 %v2302_v23  ;;  %v15055_v23 = vld [vmem:[%s20847_s0 + $0x700] ss:$16 sps:$4 sm:$0xff]  }
 0x3be   :  { %2928 = vmatpush1.bf16.msra.mxu0 %v15762_v15  ;;  %3354 = vmatpush1.bf16.msra.mxu1 %v15037_v37  ;;  %v15060_v37 = vld [vmem:[%s20847_s0 + $0x70c] ss:$16 sps:$4 sm:$0xff]   ;;  %v15064_v15 = vld [vmem:[%s20847_s0 + $0x6e8] ss:$16 sps:$4 sm:$0xff]  }
 0x3bf   :  { %v2287_v4 = vpop.f32.mrf.mxu1  ;;  %2929 = vmatprep.subr.bf16.mxu0 %v15763_v58  ;;  %3355 = vmatprep.subr.bf16.mxu1 %v15045_v50  ;;  %v15066_v50 = vld [vmem:[%s20847_s0 + $0x6ec] ss:$16 sps:$4 sm:$0xff]   ;;  %v15067_v58 = vld [vmem:[%s20847_s0 + $0x6c0] ss:$16 sps:$4 sm:$0xff]  }
 0x3c0   :  { %v2304_v18 = vpack.c.bf16 %v2287_v4, %v2283_v13  ;;  %v15058_v13 = vld [vmem:[%s20847_s0 + $0x708] ss:$16 sps:$4 sm:$0xff]   ;;  %v15072_v4 = vld [vmem:[%s20847_s0 + $0x6cc] ss:$16 sps:$4 sm:$0xff]  }
 0x3c1   :  { %v2289_v17 = vpop.f32.mrf.mxu1 }
 0x3c2   :  { %v2305_v2 = vpack.c.bf16 %v2289_v17, %v2285_v25  ;;  %2930 = vmatpush1.bf16.msra.mxu0 %v15764_v59  ;;  %3356 = vmatpush1.bf16.msra.mxu1 %v15043_v19  ;;  %v15061_v25 = vld [vmem:[%s20847_s0 + $0x6e0] ss:$16 sps:$4 sm:$0xff]   ;;  %v15069_v19 = vld [vmem:[%s20847_s0 + $0x6c4] ss:$16 sps:$4 sm:$0xff]   ;;  %v15070_v17 = vld [vmem:[%s20847_s0 + $0x6c8] ss:$16 sps:$4 sm:$0xff]  }
 0x3c3   :  { %v2293_v8 = vpop.f32.mrf.mxu1  ;;  %2931 = vmatprep.subr.bf16.mxu0 %v15765_v20  ;;  %3357 = vmatprep.subr.bf16.mxu1 %v15051_v42  ;;  %v12537_v59 = vld [vmem:[%s20847_s0 + $0x868] sm:$0xff] }
 0x3c4   :  { %12461 = vmatprep.mubr.msk.bf16.mxu0 %vm609_vm3, %v2305_v2  ;;  %12466 = vmatprep.mubr.msk.bf16.mxu1 %vm609_vm3, %v2305_v2  ;;  %v2306_v46 = vpack.c.bf16 %v2293_v8, %v2293_v8  ;;  %v12536_v2 = vld [vmem:[%s20847_s0 + $0x860] sm:$0xff]  ;;  %v12593_v8 = vcombine.high %v12537_v59, %v12537_v59  ;;  %v15104_v42 = vld [vmem:[%s20847_s0 + $0x7c8] ss:$16 sps:$4 sm:$0xff]  }
 0x3c5   :  { %v2295_v11 = vpop.f32.mrf.mxu1  ;;  %2710 = vmatmul.mubr.bf16.gmra.mxu0 %v2304_v18  ;;  %2781 = vmatmul.mubr.bf16.gmra.mxu1 %v2304_v18  ;;  %v12591_v18 = vcombine.high %v12536_v2, %v12536_v2  ;;  %v12590_v20 = vcombine.low %v12536_v2, %v12536_v2 }
 0x3c6   :  { %v2307_v24 = vpack.c.bf16 %v2295_v11, %v2295_v11  ;;  %2932 = vmatpush1.bf16.msra.mxu0 %v15766_v45  ;;  %3358 = vmatpush1.bf16.msra.mxu1 %v15049_v33  ;;  %v12592_v11 = vcombine.low %v12537_v59, %v12537_v59 }
 0x3c7   :  { %v2297_v62 = vpop.f32.mrf.mxu1  ;;  %2933 = vmatprep.subr.bf16.mxu0 %v15767_v63  ;;  %3359 = vmatprep.subr.bf16.mxu1 %v15057_v3  ;;  %v15082_v63 = vld [vmem:[%s20847_s0 + $0x84c] ss:$16 sps:$4 sm:$0xff]  }
 0x3c8   :  { %12462 = vmatprep.mubr.msk.bf16.mxu0 %vm609_vm3, %v2307_v24  ;;  %12467 = vmatprep.mubr.msk.bf16.mxu1 %vm609_vm3, %v2307_v24  ;;  %v3338_v24 = vsel %vm622_vm2, %v12590_v20, 0  ;;  %v3344_v45 = vsel %vm622_vm2, %v12592_v11, 0  ;;  %v15079_v62 = vld [vmem:[%s20847_s0 + $0x844] ss:$16 sps:$4 sm:$0xff]   ;;  %v2810_v20 = vld [vmem:[#allocation2 + $0x58] sm:$0xff] }
 0x3c9   :  { %v2298_v29 = vpop.f32.mrf.mxu1 }
 0x3ca   :  { %2934 = vmatpush1.bf16.msra.mxu0 %v15768_v30  ;;  %3360 = vmatpush1.bf16.msra.mxu1 %v15055_v23  ;;  %v15077_v29 = vld [vmem:[%s20847_s0 + $0x840] ss:$16 sps:$4 sm:$0xff]   ;;  %v15080_v30 = vld [vmem:[%s20847_s0 + $0x848] ss:$16 sps:$4 sm:$0xff]  }
 0x3cb   :  { %2935 = vmatprep.subr.bf16.mxu0 %v15769_v47  ;;  %3361 = vmatprep.subr.bf16.mxu1 %v15063_v14  ;;  %v15088_v47 = vld [vmem:[%s20847_s0 + $0x82c] ss:$16 sps:$4 sm:$0xff]  }
 0x3cd   :  { %2720 = vmatmul.mubr.bf16.gmra.mxu0 %v2306_v46  ;;  %2791 = vmatmul.mubr.bf16.gmra.mxu1 %v2306_v46  ;;  %v15085_v46 = vld [vmem:[%s20847_s0 + $0x824] ss:$16 sps:$4 sm:$0xff]  }
 0x3ce   :  { %2936 = vmatpush1.bf16.msra.mxu0 %v15770_v57  ;;  %2953 = vmatprep.mubr.bf16.mxu0 %v20853_v21  ;;  %v15086_v57 = vld [vmem:[%s20847_s0 + $0x828] ss:$16 sps:$4 sm:$0xff]  }
 0x3cf   :  { %3420 = vmatprep.subr.bf16.mxu0 %v15030_v40  ;;  %3362 = vmatpush1.bf16.msra.mxu1 %v15061_v25  ;;  %v15083_v40 = vld [vmem:[%s20847_s0 + $0x820] ss:$16 sps:$4 sm:$0xff]  }
 0x3d0   :  { %3363 = vmatprep.subr.bf16.mxu1 %v15069_v19 }
 0x3d3   :  { %3364 = vmatpush1.bf16.msra.mxu1 %v15067_v58  ;;  %v2806_v58 = vld [vmem:[#allocation2 + $0x38] sm:$0xff] }
 0x3d4   :  { %12594 = vmatprep.subr.msk.bf16.mxu1 %vm622_vm2, %v12591_v18 }
 0x3d5   :  { %12480 = vmatmul.mubr.msk.bf16.vlgmr.msra.gmra.mxu0 %vm186_vm1, %v15021_v44  ;;  %v15091_v44 = vld [vmem:[%s20847_s0 + $0x804] ss:$16 sps:$4 sm:$0xff]  }
 0x3d6   :  { %2963 = vmatprep.mubr.bf16.mxu0 %v20853_v21  ;;  %3421 = vmatpush1.bf16.msra.mxu0 %v15028_v5  ;;  %v15094_v5 = vld [vmem:[%s20847_s0 + $0x80c] ss:$16 sps:$4 sm:$0xff]  }
 0x3d7   :  { %3422 = vmatprep.subr.bf16.mxu0 %v15036_v6  ;;  %3370 = vmatpush2.bf16.msra.mxu1 %v3338_v24  ;;  %v15089_v6 = vld [vmem:[%s20847_s0 + $0x800] ss:$16 sps:$4 sm:$0xff]  }
 0x3d8   :  { %3371 = vmatprep.subr.bf16.mxu1 %v15079_v62 }
 0x3da   :  { %3423 = vmatpush1.bf16.msra.mxu0 %v15034_v35  ;;  %v15092_v35 = vld [vmem:[%s20847_s0 + $0x808] ss:$16 sps:$4 sm:$0xff]  }
 0x3db   :  { %3424 = vmatprep.subr.bf16.mxu0 %v15042_v48  ;;  %3372 = vmatpush2.bf16.msra.mxu1 %v15077_v29  ;;  %v15097_v48 = vld [vmem:[%s20847_s0 + $0x7e4] ss:$16 sps:$4 sm:$0xff]   ;;  %v2814_v29 = vld [vmem:[#allocation2 + $0x78] sm:$0xff] }
 0x3dc   :  { %3373 = vmatprep.subr.bf16.mxu1 %v15085_v46 }
 0x3dd   :  { %12481 = vmatmul.mubr.msk.bf16.gmra.mxu0 %vm186_vm1, %v15022_v7  ;;  %v15100_v7 = vld [vmem:[%s20847_s0 + $0x7ec] ss:$16 sps:$4 sm:$0xff]  }
 0x3de   :  { %2973 = vmatprep.mubr.bf16.mxu0 %v20853_v21  ;;  %3425 = vmatpush1.bf16.msra.mxu0 %v15040_v31  ;;  %v15095_v31 = vld [vmem:[%s20847_s0 + $0x7e0] ss:$16 sps:$4 sm:$0xff]  }
 0x3df   :  { %3426 = vmatprep.subr.bf16.mxu0 %v15048_v32  ;;  %3374 = vmatpush2.bf16.msra.mxu1 %v15083_v40  ;;  %v15098_v32 = vld [vmem:[%s20847_s0 + $0x7e8] ss:$16 sps:$4 sm:$0xff]  }
 0x3e0   :  { %3375 = vmatprep.subr.bf16.mxu1 %v15091_v44  ;;  %v2818_v44 = vld [vmem:[#allocation2 + $0x98] sm:$0xff] }
 0x3e2   :  { %3427 = vmatpush1.bf16.msra.mxu0 %v15046_v9  ;;  %v15103_v9 = vld [vmem:[%s20847_s0 + $0x7c4] ss:$16 sps:$4 sm:$0xff]  }
 0x3e3   :  { %3428 = vmatprep.subr.bf16.mxu0 %v15054_v51  ;;  %3376 = vmatpush2.bf16.msra.mxu1 %v15089_v6 }
 0x3e4   :  { %3377 = vmatprep.subr.bf16.mxu1 %v15097_v48 }
 0x3e5   :  { %12482 = vmatmul.mubr.msk.bf16.gmra.mxu0 %vm186_vm1, %v15023_v10  ;;  %v15106_v10 = vld [vmem:[%s20847_s0 + $0x7cc] ss:$16 sps:$4 sm:$0xff]  }
 0x3e6   :  { %2983 = vmatprep.mubr.bf16.mxu0 %v20853_v21  ;;  %3429 = vmatpush1.bf16.msra.mxu0 %v15052_v12  ;;  %v17585_v21 = vld [vmem:[%s20854_s25 + $0x18] sm:$0xff] }
 0x3e7   :  { %3430 = vmatprep.subr.bf16.mxu0 %v15060_v37  ;;  %3378 = vmatpush2.bf16.msra.mxu1 %v15095_v31  ;;  %v2822_v31 = vld [vmem:[#allocation2 + $0xb8] sm:$0xff]  ;;  %20874 = vst [vmem:[#allocation31_spill] sm:$0xff] %v17585_v21 }
 0x3e8   :  { %3379 = vmatprep.subr.bf16.mxu1 %v15103_v9 }
 0x3ea   :  { %3431 = vmatpush1.bf16.msra.mxu0 %v15058_v13  ;;  %v2802_v13 = vld [vmem:[#allocation2 + $0x18] sm:$0xff] }
 0x3eb   :  { %3432 = vmatprep.subr.bf16.mxu0 %v15066_v50 }
 0x3ed   :  { %12483 = vmatmul.mubr.msk.bf16.gmra.mxu0 %vm186_vm1, %v15024_v41  ;;  %v15101_v41 = vld [vmem:[%s20847_s0 + $0x7c0] ss:$16 sps:$4 sm:$0xff]   ;;  %s20934_s0 = sld [smem:[#allocation56_spill]] }
 0x3ee   :  { %3433 = vmatpush1.bf16.msra.mxu0 %v15064_v15  ;;  %3380 = vmatpush2.bf16.msra.mxu1 %v15101_v41  ;;  %v2825_v41 = vld [vmem:[#allocation2 + $0xd0] sm:$0x3] }
 0x3ef   :  { %3434 = vmatprep.subr.bf16.mxu0 %v15072_v4 }
 0x3f2   :  { %3435 = vmatpush1.bf16.msra.mxu0 %v15070_v17 }
 0x3f3   :  { %12599 = vmatprep.subr.msk.bf16.mxu0 %vm622_vm2, %v12593_v8 }
 0x3f6   :  { %3441 = vmatpush2.bf16.msra.mxu0 %v3344_v45 }
 0x3f7   :  { %3442 = vmatprep.subr.bf16.mxu0 %v15082_v63 }
 0x3fa   :  { %3443 = vmatpush2.bf16.msra.mxu0 %v15080_v30 }
 0x3fb   :  { %3444 = vmatprep.subr.bf16.mxu0 %v15088_v47 }
 0x3fe   :  { %3445 = vmatpush2.bf16.msra.mxu0 %v15086_v57 }
 0x3ff   :  { %3446 = vmatprep.subr.bf16.mxu0 %v15094_v5 }
 0x402   :  { %3447 = vmatpush2.bf16.msra.mxu0 %v15092_v35 }
 0x403   :  { %3448 = vmatprep.subr.bf16.mxu0 %v15100_v7 }
 0x406   :  { %3449 = vmatpush2.bf16.msra.mxu0 %v15098_v32 }
 0x407   :  { %3450 = vmatprep.subr.bf16.mxu0 %v15106_v10  ;;  %v2823_v10 = vld [vmem:[#allocation2 + $0xc0] sm:$0x3] }
 0x40a   :  { %3451 = vmatpush2.bf16.msra.mxu0 %v15104_v42 }
 0x475   :  { %v2691_v51 = vpop.f32.mrf.mxu0  ;;  %v2762_v33 = vpop.f32.mrf.mxu1 }
 0x476   :  { %v17272_v12 = vadd.f32 %v2691_v51, %v16976_v0  ;;  %v17275_v3 = vadd.f32 %v2762_v33, %v16978_v28 }
 0x477   :  { %v2693_v37 = vpop.f32.mrf.mxu0  ;;  %v2764_v23 = vpop.f32.mrf.mxu1 }
 0x478   :  { %v17278_v14 = vadd.f32 %v2693_v37, %v16984_v16  ;;  %v2830_v50 = vadd.f32 %v2802_v13, %v2764_v23  ;;  %v2824_v37 = vld [vmem:[#allocation2 + $0xc8] sm:$0x3]  ;;  %v2826_v23 = vld [vmem:[#allocation2 + $0xd8] sm:$0x3] }
 0x479   :  { %v2695_v25 = vpop.f32.mrf.mxu0  ;;  %v2766_v15 = vpop.f32.mrf.mxu1 }
 0x47a   :  { %2858 = vst.msk [vmem:[#allocation2 + $0x18] sm:$0xff] %vm780_vm4, %v2830_v50  ;;  %v17282_v19 = vadd.f32 %v2695_v25, %v16987_v60  ;;  %v17285_v0 = vadd.f32 %v2766_v15, %v16989_v22 }
 0x47b   :  { %v17287_v4 = vpop.f32.mrf.mxu0  ;;  %v2768_v28 = vpop.f32.mrf.mxu1 }
 0x47c   :  { %v2834_v17 = vadd.f32 %v2806_v58, %v2768_v28 }
 0x47d   :  { %v2701_v2 = vpop.f32.mrf.mxu0  ;;  %v2772_v59 = vpop.f32.mrf.mxu1 }
 0x47e   :  { %2862 = vst.msk [vmem:[#allocation2 + $0x38] sm:$0xff] %vm780_vm4, %v2834_v17  ;;  %v17291_v16 = vadd.f32 %v2701_v2, %v17000_v53  ;;  %v17294_v18 = vadd.f32 %v2772_v59, %v17002_v55 }
 0x47f   :  { %v2703_v60 = vpop.f32.mrf.mxu0  ;;  %v2774_v8 = vpop.f32.mrf.mxu1 }
 0x480   :  { %v17297_v22 = vadd.f32 %v2703_v60, %v17008_v34  ;;  %v2838_v11 = vadd.f32 %v2810_v20, %v2774_v8 }
 0x481   :  { %v2705_v24 = vpop.f32.mrf.mxu0  ;;  %v2776_v45 = vpop.f32.mrf.mxu1 }
 0x482   :  { %2866 = vst.msk [vmem:[#allocation2 + $0x58] sm:$0xff] %vm780_vm4, %v2838_v11  ;;  %v17301_v62 = vadd.f32 %v2705_v24, %v17011_v36  ;;  %v17304_v53 = vadd.f32 %v2776_v45, %v17013_v26 }
 0x483   :  { %v17306_v63 = vpop.f32.mrf.mxu0  ;;  %v2778_v55 = vpop.f32.mrf.mxu1 }
 0x484   :  { %v2842_v30 = vadd.f32 %v2814_v29, %v2778_v55 }
 0x485   :  { %v2711_v46 = vpop.f32.mrf.mxu0  ;;  %v2782_v47 = vpop.f32.mrf.mxu1 }
 0x486   :  { %2870 = vst.msk [vmem:[#allocation2 + $0x78] sm:$0xff] %vm780_vm4, %v2842_v30  ;;  %v17310_v34 = vadd.f32 %v2711_v46, %v17024_v54  ;;  %v17313_v40 = vadd.f32 %v2782_v47, %v17026_v61 }
 0x487   :  { %v2713_v36 = vpop.f32.mrf.mxu0  ;;  %v2784_v57 = vpop.f32.mrf.mxu1 }
 0x488   :  { %v17316_v26 = vadd.f32 %v2713_v36, %v17032_v49  ;;  %v2846_v5 = vadd.f32 %v2818_v44, %v2784_v57 }
 0x489   :  { %v2715_v6 = vpop.f32.mrf.mxu0  ;;  %v2786_v35 = vpop.f32.mrf.mxu1 }
 0x48a   :  { %2874 = vst.msk [vmem:[#allocation2 + $0x98] sm:$0xff] %vm780_vm4, %v2846_v5  ;;  %v17320_v48 = vadd.f32 %v2715_v6, %v17035_v52  ;;  %v17323_v54 = vadd.f32 %v2786_v35, %v17037_v38 }
 0x48b   :  { %v17325_v7 = vpop.f32.mrf.mxu0  ;;  %v2788_v61 = vpop.f32.mrf.mxu1 }
 0x48c   :  { %v2850_v32 = vadd.f32 %v2822_v31, %v2788_v61 }
 0x48d   :  { %v2721_v9 = vpop.f32.mrf.mxu0  ;;  %v2792_v49 = vpop.f32.mrf.mxu1 }
 0x48e   :  { %2878 = vst.msk [vmem:[#allocation2 + $0xb8] sm:$0xff] %vm780_vm4, %v2850_v32  ;;  %v2851_v42 = vadd.f32 %v2823_v10, %v2721_v9  ;;  %v2853_v51 = vadd.f32 %v2825_v41, %v2792_v49  ;;  %v20794_v9 = vmov 0.0   ;;  %v17341_v10 = vld [vmem:[%s20854_s25 + $0x178] sm:$0xff]  ;;  %v17348_v49 = vld [vmem:[%s20854_s25 + $0x170] sm:$0xff] }
 0x48f   :  { %v2723_v33 = vpop.f32.mrf.mxu0  ;;  %v2794_v52 = vpop.f32.mrf.mxu1  ;;  %3871 = vmatprep.subr.mxu0 %v20794_v9  ;;  %v17354_v41 = vld [vmem:[%s20854_s25 + $0xf8] sm:$0xff] }
 0x490   :  { %2879 = vst [vmem:[#allocation2 + $0xc0] sm:$0x3] %v2851_v42  ;;  %2881 = vst [vmem:[#allocation2 + $0xd0] sm:$0x3] %v2853_v51  ;;  %v2852_v38 = vadd.f32 %v2824_v37, %v2723_v33  ;;  %v2854_v13 = vadd.f32 %v2826_v23, %v2794_v52  ;;  %13778 = vmatprep.subr.mxu1 %v17354_v41  ;;  %v17361_v42 = vld [vmem:[%s20854_s25 + $0x78] sm:$0xff]  ;;  %v17366_v51 = vld [vmem:[%s20854_s25 + $0x168] sm:$0xff] }
 0x491   :  { %v2725_v50 = vpop.f32.mrf.mxu0  ;;  %v2796_v25 = vpop.f32.mrf.mxu1  ;;  %v17373_v33 = vld [vmem:[%s20854_s25 + $0xf0] sm:$0xff]  ;;  %v17385_v52 = vld [vmem:[%s20854_s25 + $0x160] sm:$0xff]  ;;  %v17392_v23 = vld [vmem:[%s20854_s25 + $0xe8] sm:$0xff] }
 0x492   :  { %2880 = vst [vmem:[#allocation2 + $0xc8] sm:$0x3] %v2852_v38  ;;  %2882 = vst.msk [vmem:[#allocation2 + $0xd8] sm:$0x3] %vm805_vm5, %v2854_v13  ;;  %v17380_v37 = vld [vmem:[%s20854_s25 + $0x70] sm:$0xff]  ;;  %v17399_v38 = vld [vmem:[%s20854_s25 + $0x68] sm:$0xff] }
 0x493   :  { %v2726_v15 = vpop.f32.mrf.mxu0  ;;  %v2797_v28 = vpop.f32.mrf.mxu1  ;;  %v17404_v13 = vld [vmem:[%s20854_s25 + $0x158] sm:$0xff]  ;;  %v17411_v50 = vld [vmem:[%s20854_s25 + $0xe0] sm:$0xff] }
 0x494   :  { %v17418_v25 = vld [vmem:[%s20854_s25 + $0x60] sm:$0xff]  ;;  %v17423_v15 = vld [vmem:[%s20854_s25 + $0x150] sm:$0xff]  ;;  %v17430_v28 = vld [vmem:[%s20854_s25 + $0xd8] sm:$0xff] }
 0x495   :  { %v2955_v58 = vpop.f32.mrf.mxu0 }
 0x497   :  { %v2957_v17 = vpop.f32.mrf.mxu0 }
 0x499   :  { %v2959_v2 = vpop.f32.mrf.mxu0 }
 0x49a   :  { %v2992_v8 = vpack.c.bf16 %v2959_v2, %v2955_v58  ;;  %v17437_v58 = vld [vmem:[%s20854_s25 + $0x58] sm:$0xff]  ;;  %v17449_v2 = vld [vmem:[%s20854_s25 + $0xd0] sm:$0xff] }
 0x49b   :  { %v2961_v59 = vpop.f32.mrf.mxu0 }
 0x49c   :  { %v2993_v60 = vpack.c.bf16 %v2961_v59, %v2957_v17  ;;  %v17442_v17 = vld [vmem:[%s20854_s25 + $0x148] sm:$0xff]  ;;  %v17456_v59 = vld [vmem:[%s20854_s25 + $0x50] sm:$0xff] }
 0x49d   :  { %v2965_v20 = vpop.f32.mrf.mxu0  ;;  %20855 = vst [vmem:[#allocation12_spill] sm:$0xff] %v17442_v17 }
 0x49e   :  { %12595 = vmatprep.mubr.msk.bf16.mxu1 %vm609_vm3, %v2993_v60  ;;  %12600 = vmatprep.mubr.msk.bf16.mxu0 %vm609_vm3, %v2993_v60  ;;  %v17461_v60 = vld [vmem:[%s20854_s25 + $0x140] sm:$0xff] }
 0x49f   :  { %v2967_v11 = vpop.f32.mrf.mxu0  ;;  %3382 = vmatmul.mubr.bf16.vlgmr.msra.gmra.mxu1 %v2992_v8  ;;  %3453 = vmatmul.mubr.bf16.vlgmr.msra.gmra.mxu0 %v2992_v8  ;;  %20856 = vst [vmem:[#allocation13_spill] sm:$0xff] %v17461_v60  ;;  %v17466_v8 = vld [vmem:[%s20854_s25 + $0xc8] sm:$0xff] }
 0x4a0   :  { %3872 = vmatpush1.msra.mxu0 %v17341_v10  ;;  %13779 = vmatpush3.msra.mxu1 %v17361_v42 }
 0x4a1   :  { %v2969_v24 = vpop.f32.mrf.mxu0  ;;  %3873 = vmatprep.subr.mxu0 %v20794_v9  ;;  %13780 = vmatprep.subr.mxu1 %v17373_v33 }
 0x4a2   :  { %v2994_v29 = vpack.c.bf16 %v2969_v24, %v2965_v20  ;;  %3874 = vmatpush1.msra.mxu0 %v17348_v49  ;;  %13781 = vmatpush3.msra.mxu1 %v17380_v37  ;;  %v17473_v20 = vld [vmem:[%s20854_s25 + $0x48] sm:$0xff]  ;;  %v17483_v24 = vld [vmem:[%s20854_s25 + $0xc0] sm:$0xff] }
 0x4a3   :  { %v2971_v45 = vpop.f32.mrf.mxu0  ;;  %3875 = vmatprep.subr.mxu0 %v20794_v9  ;;  %13782 = vmatprep.subr.mxu1 %v17392_v23  ;;  %20858 = vst [vmem:[#allocation15_spill] sm:$0xff] %v17483_v24 }
 0x4a4   :  { %v2995_v55 = vpack.c.bf16 %v2971_v45, %v2967_v11  ;;  %3876 = vmatpush1.msra.mxu0 %v17366_v51  ;;  %13783 = vmatpush3.msra.mxu1 %v17399_v38  ;;  %v17478_v11 = vld [vmem:[%s20854_s25 + $0x138] sm:$0xff]  ;;  %v17490_v45 = vld [vmem:[%s20854_s25 + $0x40] sm:$0xff] }
 0x4a5   :  { %v2975_v30 = vpop.f32.mrf.mxu0  ;;  %3877 = vmatprep.subr.mxu0 %v20794_v9  ;;  %13784 = vmatprep.subr.mxu1 %v17411_v50  ;;  %20857 = vst [vmem:[#allocation14_spill] sm:$0xff] %v17478_v11  ;;  %20859 = vst [vmem:[#allocation16_spill] sm:$0xff] %v17490_v45 }
 0x4a6   :  { %12596 = vmatprep.mubr.msk.bf16.mxu1 %vm609_vm3, %v2995_v55  ;;  %12601 = vmatprep.mubr.msk.bf16.mxu0 %vm609_vm3, %v2995_v55  ;;  %v17495_v55 = vld [vmem:[%s20854_s25 + $0x130] sm:$0xff] }
 0x4a7   :  { %v2977_v46 = vpop.f32.mrf.mxu0  ;;  %3392 = vmatmul.mubr.bf16.gmra.mxu1 %v2994_v29  ;;  %3463 = vmatmul.mubr.bf16.gmra.mxu0 %v2994_v29  ;;  %20860 = vst [vmem:[#allocation17_spill] sm:$0xff] %v17495_v55  ;;  %v17502_v29 = vld [vmem:[%s20854_s25 + $0xb8] sm:$0xff] }
 0x4a8   :  { %3878 = vmatpush1.msra.mxu0 %v17385_v52  ;;  %13785 = vmatpush3.msra.mxu1 %v17418_v25  ;;  %20861 = vst [vmem:[#allocation18_spill] sm:$0xff] %v17502_v29 }
 0x4a9   :  { %v2979_v47 = vpop.f32.mrf.mxu0  ;;  %3879 = vmatprep.subr.mxu0 %v20794_v9  ;;  %13786 = vmatprep.subr.mxu1 %v17430_v28 }
 0x4aa   :  { %v2996_v44 = vpack.c.bf16 %v2979_v47, %v2975_v30  ;;  %3880 = vmatpush1.msra.mxu0 %v17404_v13  ;;  %13787 = vmatpush3.msra.mxu1 %v17437_v58  ;;  %v17509_v30 = vld [vmem:[%s20854_s25 + $0x38] sm:$0xff]  ;;  %v17521_v47 = vld [vmem:[%s20854_s25 + $0xb0] sm:$0xff] }
 0x4ab   :  { %v2981_v36 = vpop.f32.mrf.mxu0  ;;  %3881 = vmatprep.subr.mxu0 %v20794_v9  ;;  %13788 = vmatprep.subr.mxu1 %v17449_v2  ;;  %20862 = vst [vmem:[#allocation19_spill] sm:$0xff] %v17509_v30  ;;  %20864 = vst [vmem:[#allocation21_spill] sm:$0xff] %v17521_v47 }
 0x4ac   :  { %v2997_v57 = vpack.c.bf16 %v2981_v36, %v2977_v46  ;;  %3882 = vmatpush1.msra.mxu0 %v17423_v15  ;;  %13789 = vmatpush3.msra.mxu1 %v17456_v59  ;;  %v17514_v46 = vld [vmem:[%s20854_s25 + $0x128] sm:$0xff]  ;;  %v17528_v36 = vld [vmem:[%s20854_s25 + $0x30] sm:$0xff] }
 0x4ad   :  { %v2985_v5 = vpop.f32.mrf.mxu0  ;;  %3883 = vmatprep.subr.mxu0 %v20794_v9  ;;  %13790 = vmatprep.subr.mxu1 %v17466_v8  ;;  %20863 = vst [vmem:[#allocation20_spill] sm:$0xff] %v17514_v46  ;;  %20865 = vst [vmem:[#allocation22_spill] sm:$0xff] %v17528_v36 }
 0x4ae   :  { %12597 = vmatprep.mubr.msk.bf16.mxu1 %vm609_vm3, %v2997_v57  ;;  %12602 = vmatprep.mubr.msk.bf16.mxu0 %vm609_vm3, %v2997_v57  ;;  %v2998_v32 = vpack.c.bf16 %v2985_v5, %v2985_v5  ;;  %v17533_v57 = vld [vmem:[%s20854_s25 + $0x120] sm:$0xff]  ;;  %v17547_v5 = vld [vmem:[%s20854_s25 + $0x28] sm:$0xff] }
 0x4af   :  { %v2987_v6 = vpop.f32.mrf.mxu0  ;;  %3402 = vmatmul.mubr.bf16.gmra.mxu1 %v2996_v44  ;;  %3473 = vmatmul.mubr.bf16.gmra.mxu0 %v2996_v44  ;;  %20866 = vst [vmem:[#allocation23_spill] sm:$0xff] %v17533_v57  ;;  %v17540_v44 = vld [vmem:[%s20854_s25 + $0xa8] sm:$0xff]  ;;  %20868 = vst [vmem:[#allocation25_spill] sm:$0xff] %v17547_v5 }
 0x4b0   :  { %v2999_v35 = vpack.c.bf16 %v2987_v6, %v2987_v6  ;;  %3884 = vmatpush1.msra.mxu0 %v17442_v17  ;;  %13791 = vmatpush3.msra.mxu1 %v17473_v20  ;;  %20867 = vst [vmem:[#allocation24_spill] sm:$0xff] %v17540_v44  ;;  %v17552_v6 = vld [vmem:[%s20854_s25 + $0x118] sm:$0xff] }
 0x4b1   :  { %v2989_v61 = vpop.f32.mrf.mxu0  ;;  %3885 = vmatprep.subr.mxu0 %v20794_v9  ;;  %13792 = vmatprep.subr.mxu1 %v17483_v24  ;;  %20869 = vst [vmem:[#allocation26_spill] sm:$0xff] %v17552_v6 }
 0x4b2   :  { %12598 = vmatprep.mubr.msk.bf16.mxu1 %vm609_vm3, %v2999_v35  ;;  %12603 = vmatprep.mubr.msk.bf16.mxu0 %vm609_vm3, %v2999_v35  ;;  %v17559_v35 = vld [vmem:[%s20854_s25 + $0xa0] sm:$0xff] }
 0x4b3   :  { %v2990_v31 = vpop.f32.mrf.mxu0  ;;  %3886 = vmatpush1.msra.mxu0 %v17461_v60  ;;  %13793 = vmatpush3.msra.mxu1 %v17490_v45  ;;  %20870 = vst [vmem:[#allocation27_spill] sm:$0xff] %v17559_v35  ;;  %v17566_v61 = vld [vmem:[%s20854_s25 + $0x20] sm:$0xff] }
 0x4b4   :  { %3887 = vmatprep.subr.mxu0 %v20794_v9  ;;  %13794 = vmatprep.subr.mxu1 %v17502_v29  ;;  %20871 = vst [vmem:[#allocation28_spill] sm:$0xff] %v17566_v61  ;;  %v17571_v31 = vld [vmem:[%s20854_s25 + $0x110] sm:$0xff] }
 0x4b5   :  { %3888 = vmatpush1.msra.mxu0 %v17478_v11  ;;  %13795 = vmatpush3.msra.mxu1 %v17509_v30  ;;  %20872 = vst [vmem:[#allocation29_spill] sm:$0xff] %v17571_v31 }
 0x4b6   :  { %3889 = vmatprep.subr.mxu0 %v20794_v9  ;;  %13796 = vmatprep.subr.mxu1 %v17521_v47  ;;  %v3517_v47 = vld [vmem:[#allocation2 + $0xd0] sm:$0x3] }
 0x4b7   :  { %3412 = vmatmul.mubr.bf16.gmra.mxu1 %v2998_v32  ;;  %3483 = vmatmul.mubr.bf16.gmra.mxu0 %v2998_v32  ;;  %v17578_v32 = vld [vmem:[%s20854_s25 + $0x98] sm:$0xff] }
 0x4b8   :  { %3890 = vmatpush1.msra.mxu0 %v17495_v55  ;;  %13797 = vmatpush3.msra.mxu1 %v17528_v36  ;;  %20873 = vst [vmem:[#allocation30_spill] sm:$0xff] %v17578_v32 }
 0x4b9   :  { %3891 = vmatprep.subr.mxu0 %v20794_v9  ;;  %13798 = vmatprep.subr.mxu1 %v17540_v44 }
 0x4ba   :  { %3892 = vmatpush1.msra.mxu0 %v17514_v46  ;;  %13799 = vmatpush3.msra.mxu1 %v17547_v5  ;;  %v1448_v46 = vadd.f32 %v16727_v56, %v16415_v1 }
 0x4bb   :  { %3893 = vmatprep.subr.mxu0 %v20794_v9  ;;  %13800 = vmatprep.subr.mxu1 %v17559_v35  ;;  %v17604_v35 = vld [vmem:[%s20854_s25 + $0x10] sm:$0xff] }
 0x4bc   :  { %3894 = vmatpush1.msra.mxu0 %v17533_v57  ;;  %v17590_v57 = vld [vmem:[%s20854_s25 + $0x108] sm:$0xff]  ;;  %13801 = vmatpush3.msra.mxu1 %v17566_v61  ;;  %20877 = vst [vmem:[#allocation34_spill] sm:$0xff] %v17604_v35  ;;  %v17609_v61 = vld [vmem:[%s20854_s25 + $0x100] sm:$0xff] }
 0x4bd   :  { %3895 = vmatprep.subr.mxu0 %v20794_v9  ;;  %20875 = vst [vmem:[#allocation32_spill] sm:$0xff] %v17590_v57  ;;  %13802 = vmatprep.subr.mxu1 %v17578_v32  ;;  %20878 = vst [vmem:[#allocation35_spill] sm:$0xff] %v17609_v61  ;;  %v17623_v32 = vld [vmem:[%s20854_s25 + $0x8] sm:$0xff] }
 0x4be   :  { %3896 = vmatpush1.msra.mxu0 %v17552_v6  ;;  %v17597_v6 = vld [vmem:[%s20854_s25 + $0x90] sm:$0xff]  ;;  %13803 = vmatpush3.msra.mxu1 %v17585_v21  ;;  %20880 = vst [vmem:[#allocation37_spill] sm:$0xff] %v17623_v32  ;;  %v17628_v21 = vld [vmem:[%s20854_s25 + $0x188] sm:$0xff] }
 0x4bf   :  { %3897 = vmatprep.subr.mxu0 %v20794_v9  ;;  %20876 = vst [vmem:[#allocation33_spill] sm:$0xff] %v17597_v6  ;;  %13804 = vmatprep.subr.mxu1 %v17597_v6  ;;  %20881 = vst [vmem:[#allocation38_spill] sm:$0xff] %v17628_v21  ;;  %v17642_v6 = vld [vmem:[%s20854_s25] sm:$0xff] }
 0x4c0   :  { %3898 = vmatpush1.msra.mxu0 %v17571_v31  ;;  %v17616_v31 = vld [vmem:[%s20854_s25 + $0x88] sm:$0xff]  ;;  %13805 = vmatpush3.msra.mxu1 %v17604_v35  ;;  %20883 = vst [vmem:[#allocation40_spill] sm:$0xff] %v17642_v6  ;;  %v17647_v35 = vld [vmem:[%s20854_s25 + $0x180] sm:$0xff] }
 0x4c1   :  { %3899 = vmatprep.subr.mxu0 %v20794_v9  ;;  %20879 = vst [vmem:[#allocation36_spill] sm:$0xff] %v17616_v31  ;;  %13806 = vmatprep.subr.mxu1 %v17616_v31  ;;  %20884 = vst [vmem:[#allocation41_spill] sm:$0xff] %v17647_v35 }
 0x4c2   :  { %3900 = vmatpush1.msra.mxu0 %v17590_v57  ;;  %v17635_v57 = vld [vmem:[%s20854_s25 + $0x80] sm:$0xff]  ;;  %13807 = vmatpush3.msra.mxu1 %v17623_v32 }
 0x4c3   :  { %3901 = vmatprep.subr.mxu0 %v20794_v9  ;;  %20882 = vst [vmem:[#allocation39_spill] sm:$0xff] %v17635_v57  ;;  %13808 = vmatprep.subr.mxu1 %v17635_v57 }
 0x4c4   :  { %3902 = vmatpush1.msra.mxu0 %v17609_v61  ;;  %13809 = vmatpush3.msra.mxu1 %v17642_v6  ;;  %v3494_v6 = vld [vmem:[#allocation2 + $0x18] sm:$0xff] }
 0x4c5   :  { %3931 = vmatprep.subr.mxu0 %v20794_v9  ;;  %13813 = vmatprep.subr.mxu1 %v17354_v41 }
 0x4c6   :  { %3932 = vmatpush2.msra.mxu0 %v17628_v21 }
 0x4c7   :  { %3933 = vmatprep.subr.mxu0 %v20794_v9 }
 0x4c8   :  { %3934 = vmatpush2.msra.mxu0 %v17647_v35  ;;  %v2140_v35 = vadd.f32 %v16991_v43, %v1448_v46  ;;  %v3498_v46 = vld [vmem:[#allocation2 + $0x38] sm:$0xff] }
 0x4c9   :  { %4016 = vmatprep.subr.mxu0 %v20794_v9 }
 0x4ca   :  { %v2832_v1 = vadd.f32 %v17287_v4, %v2140_v35  ;;  %v20888_v4 = vld [vmem:[#allocation10_spill] sm:$0xff] }
 0x55f   :  { %v3383_v61 = vpop.f32.mrf.mxu1  ;;  %v3454_v31 = vpop.f32.mrf.mxu0 }
 0x560   :  { %v17660_v32 = vadd.f32 %v3383_v61, %v17272_v12  ;;  %v17663_v21 = vadd.f32 %v3454_v31, %v17275_v3  ;;  %v20887_v61 = vld [vmem:[#allocation8_spill] sm:$0xff] }
 0x561   :  { %v3385_v57 = vpop.f32.mrf.mxu1  ;;  %v3456_v5 = vpop.f32.mrf.mxu0  ;;  %v1456_v35 = vadd.f32 %v20888_v4, %v20887_v61  ;;  %v20891_v4 = vld [vmem:[#allocation9_spill] sm:$0xff] }
 0x562   :  { %3549 = vst [vmem:[#allocation2 + $0x10] sm:$0xff] %v17663_v21  ;;  %v17668_v41 = vadd.f32 %v3385_v57, %v17278_v14  ;;  %v3522_v9 = vadd.f32 %v3494_v6, %v3456_v5 }
 0x563   :  { %v3387_v44 = vpop.f32.mrf.mxu1  ;;  %v3458_v55 = vpop.f32.mrf.mxu0  ;;  %v2148_v31 = vadd.f32 %v17015_v27, %v1456_v35  ;;  %v20892_v35 = vld [vmem:[#allocation11_spill] sm:$0xff] }
 0x564   :  { %20885 = vst [vmem:[#allocation42_spill] sm:$0xff] %v17668_v41  ;;  %3550 = vst.msk [vmem:[#allocation2 + $0x18] sm:$0xff] %vm780_vm4, %v3522_v9  ;;  %v17673_v56 = vadd.f32 %v3387_v44, %v17282_v19  ;;  %v17676_v12 = vadd.f32 %v3458_v55, %v17285_v0  ;;  %v3502_v44 = vld [vmem:[#allocation2 + $0x58] sm:$0xff] }
 0x565   :  { %v3389_v3 = vpop.f32.mrf.mxu1  ;;  %v3460_v43 = vpop.f32.mrf.mxu0 }
 0x566   :  { %3553 = vst [vmem:[#allocation2 + $0x30] sm:$0xff] %v17676_v12  ;;  %v17679_v14 = vadd.f32 %v3389_v3, %v2832_v1  ;;  %v3526_v57 = vadd.f32 %v3498_v46, %v3460_v43 }
 0x567   :  { %v3393_v5 = vpop.f32.mrf.mxu1  ;;  %v3464_v6 = vpop.f32.mrf.mxu0 }
 0x568   :  { %20886 = vst [vmem:[#allocation43_spill] sm:$0xff] %v17679_v14  ;;  %3554 = vst.msk [vmem:[#allocation2 + $0x38] sm:$0xff] %vm780_vm4, %v3526_v57  ;;  %v17685_v19 = vadd.f32 %v3393_v5, %v17291_v16  ;;  %v17688_v0 = vadd.f32 %v3464_v6, %v17294_v18  ;;  %v2840_v57 = vadd.f32 %v17306_v63, %v2148_v31  ;;  %v3506_v6 = vld [vmem:[#allocation2 + $0x78] sm:$0xff] }
 0x569   :  { %v3395_v9 = vpop.f32.mrf.mxu1  ;;  %v3466_v55 = vpop.f32.mrf.mxu0 }
 0x56a   :  { %3557 = vst [vmem:[#allocation2 + $0x50] sm:$0xff] %v17688_v0  ;;  %v17693_v1 = vadd.f32 %v3395_v9, %v17297_v22  ;;  %v3530_v3 = vadd.f32 %v3502_v44, %v3466_v55  ;;  %v1464_v9 = vadd.f32 %v20892_v35, %v20891_v4  ;;  %v3630_v35 = vadd.f32 %v17676_v12, %v17663_v21 }
 0x56b   :  { %v3397_v43 = vpop.f32.mrf.mxu1  ;;  %v3468_v46 = vpop.f32.mrf.mxu0 }
 0x56c   :  { %20889 = vst [vmem:[#allocation8_spill] sm:$0xff] %v17693_v1  ;;  %3558 = vst.msk [vmem:[#allocation2 + $0x58] sm:$0xff] %vm780_vm4, %v3530_v3  ;;  %v17698_v16 = vadd.f32 %v3397_v43, %v17301_v62  ;;  %v17701_v18 = vadd.f32 %v3468_v46, %v17304_v53  ;;  %v2156_v53 = vadd.f32 %v17039_v39, %v1464_v9  ;;  %v3510_v43 = vld [vmem:[#allocation2 + $0x98] sm:$0xff] }
 0x56d   :  { %v3399_v5 = vpop.f32.mrf.mxu1  ;;  %v3470_v27 = vpop.f32.mrf.mxu0 }
 0x56e   :  { %v17703_v61 = vadd.f32 %v3399_v5, %v2840_v57  ;;  %v3534_v22 = vadd.f32 %v3506_v6, %v3470_v27  ;;  %v2848_v27 = vadd.f32 %v17325_v7, %v2156_v53  ;;  %v3603_v7 = vadd.f32 %v17673_v56, %v17660_v32 }
 0x56f   :  { %v3403_v55 = vpop.f32.mrf.mxu1  ;;  %v3474_v44 = vpop.f32.mrf.mxu0  ;;  %v17718_v5 = vld [vmem:[#allocation2 + $0x38] sm:$0xff] }
 0x570   :  { %20890 = vst [vmem:[#allocation10_spill] sm:$0xff] %v17703_v61  ;;  %3562 = vst.msk [vmem:[#allocation2 + $0x78] sm:$0xff] %vm780_vm4, %v3534_v22  ;;  %v17709_v63 = vadd.f32 %v3403_v55, %v17310_v34  ;;  %v17712_v62 = vadd.f32 %v3474_v44, %v17313_v40  ;;  %v3667_v34 = vmul.f32 %v17679_v14, %v17679_v14  ;;  %v3514_v44 = vld [vmem:[#allocation2 + $0xb8] sm:$0xff] }
 0x571   :  { %v3405_v31 = vpop.f32.mrf.mxu1  ;;  %v3476_v3 = vpop.f32.mrf.mxu0  ;;  %20894 = vst [vmem:[#allocation11_spill] sm:$0xff] %v17718_v5  ;;  %v3669_v53 = vmul.f32 %v17718_v5, %v17718_v5 }
 0x572   :  { %v17716_v46 = vadd.f32 %v3405_v31, %v17316_v26  ;;  %v3538_v57 = vadd.f32 %v3510_v43, %v3476_v3  ;;  %v17730_v26 = vld [vmem:[#allocation2 + $0x18] sm:$0xff]  ;;  %v3604_v43 = vadd.f32 %v3603_v7, %v17685_v19 }
 0x573   :  { %v3407_v6 = vpop.f32.mrf.mxu1  ;;  %v3478_v22 = vpop.f32.mrf.mxu0  ;;  %20895 = vst [vmem:[#allocation44_spill] sm:$0xff] %v17730_v26  ;;  %v17732_v4 = vld [vmem:[#allocation2 + $0x58] sm:$0xff]  ;;  %v3665_v30 = vmul.f32 %v17730_v26, %v17730_v26 }
 0x574   :  { %20893 = vst [vmem:[#allocation9_spill] sm:$0xff] %v17716_v46  ;;  %3566 = vst.msk [vmem:[#allocation2 + $0x98] sm:$0xff] %vm780_vm4, %v3538_v57  ;;  %v17725_v39 = vadd.f32 %v3407_v6, %v17320_v48  ;;  %v17728_v40 = vadd.f32 %v3478_v22, %v17323_v54  ;;  %v3617_v48 = vadd.f32 %v17679_v14, %v17668_v41  ;;  %v3515_v22 = vld [vmem:[#allocation2 + $0xc0] sm:$0x3] }
 0x575   :  { %20896 = vst [vmem:[#allocation45_spill] sm:$0xff] %v17732_v4  ;;  %v3409_v9 = vpop.f32.mrf.mxu1  ;;  %v3480_v55 = vpop.f32.mrf.mxu0  ;;  %v3663_v54 = vmul.f32 %v17668_v41, %v17668_v41  ;;  %v3631_v57 = vadd.f32 %v3630_v35, %v17688_v0  ;;  %v3605_v60 = vadd.f32 %v3604_v43, %v17698_v16  ;;  %v3675_v43 = vmul.f32 %v17703_v61, %v17703_v61 }
 0x576   :  { %v17744_v31 = vadd.f32 %v3409_v9, %v2848_v27  ;;  %v3542_v3 = vadd.f32 %v3514_v44, %v3480_v55  ;;  %v3618_v14 = vadd.f32 %v3617_v48, %v17693_v1  ;;  %v3673_v27 = vmul.f32 %v17732_v4, %v17732_v4  ;;  %v3516_v48 = vld [vmem:[#allocation2 + $0xc8] sm:$0x3] }
 0x577   :  { %v3413_v6 = vpop.f32.mrf.mxu1  ;;  %v3484_v36 = vpop.f32.mrf.mxu0  ;;  %v17749_v11 = vld [vmem:[#allocation2 + $0x78] sm:$0xff]  ;;  %v3703_v41 = vadd.f32 %v3667_v34, %v3663_v54  ;;  %v3644_v9 = vsel %vm780_vm4, %v17718_v5, 0.0  ;;  %v3671_v55 = vmul.f32 %v17693_v1, %v17693_v1  ;;  %v3643_v54 = vsel %vm780_vm4, %v17730_v26, 0.0 }
 0x578   :  { %20897 = vst [vmem:[#allocation46_spill] sm:$0xff] %v17744_v31  ;;  %20898 = vst [vmem:[#allocation47_spill] sm:$0xff] %v17749_v11  ;;  %v3543_v7 = vadd.f32 %v3515_v22, %v3413_v6  ;;  %v3545_v35 = vadd.f32 %v3517_v47, %v3484_v36  ;;  %v3518_v34 = vld [vmem:[#allocation2 + $0xd8] sm:$0x3]  ;;  %v3730_v47 = vsel %vm780_vm4, %v3669_v53, 0.0  ;;  %v3646_v22 = vsel %vm780_vm4, %v17732_v4, 0.0 }
 0x579   :  { %3570 = vst.msk [vmem:[#allocation2 + $0xb8] sm:$0xff] %vm780_vm4, %v3542_v3  ;;  %v3415_v44 = vpop.f32.mrf.mxu1  ;;  %v3486_v29 = vpop.f32.mrf.mxu0  ;;  %v3677_v3 = vmul.f32 %v17749_v11, %v17749_v11  ;;  %v3632_v5 = vadd.f32 %v3631_v57, %v17701_v18  ;;  %v3645_v26 = vadd.f32 %v3644_v9, %v3643_v54  ;;  %v3729_v17 = vsel %vm780_vm4, %v3665_v30, 0.0 }
 0x57a   :  { %3571 = vst [vmem:[#allocation2 + $0xc0] sm:$0x3] %v3543_v7  ;;  %3573 = vst [vmem:[#allocation2 + $0xd0] sm:$0x3] %v3545_v35  ;;  %v3544_v36 = vadd.f32 %v3516_v48, %v3415_v44  ;;  %v3546_v6 = vadd.f32 %v3518_v34, %v3486_v29  ;;  %v3732_v53 = vsel %vm780_vm4, %v3673_v27, 0.0  ;;  %v3648_v29 = vsel %vm780_vm4, %v17749_v11, 0.0 }
 0x57b   :  { %v3417_v1 = vpop.f32.mrf.mxu1  ;;  %v3488_v45 = vpop.f32.mrf.mxu0  ;;  %v17769_v24 = vld [vmem:[#allocation2 + $0x98] sm:$0xff]  ;;  %v3704_v7 = vadd.f32 %v3703_v41, %v3671_v55  ;;  %v3619_v9 = vadd.f32 %v3618_v14, %v17703_v61  ;;  %v3647_v44 = vadd.f32 %v3646_v22, %v3645_v26  ;;  %v3679_v30 = vmul.f32 %v17716_v46, %v17716_v46 }
 0x57c   :  { %20899 = vst [vmem:[#allocation48_spill] sm:$0xff] %v17769_v24  ;;  %3572 = vst [vmem:[#allocation2 + $0xc8] sm:$0x3] %v3544_v36  ;;  %v3681_v45 = vmul.f32 %v17769_v24, %v17769_v24  ;;  %v3731_v1 = vadd.f32 %v3730_v47, %v3729_v17  ;;  %v3734_v27 = vsel %vm780_vm4, %v3677_v3, 0.0  ;;  %v3650_v48 = vsel %vm780_vm4, %v17769_v24, 0.0 }
 0x57d   :  { %3574 = vst.msk [vmem:[#allocation2 + $0xd8] sm:$0x3] %vm805_vm5, %v3546_v6  ;;  %v3418_v57 = vpop.f32.mrf.mxu1  ;;  %v3489_v35 = vpop.f32.mrf.mxu0  ;;  %v3606_v34 = vadd.f32 %v3605_v60, %v17709_v63  ;;  %v3633_v41 = vadd.f32 %v3632_v5, %v17712_v62  ;;  %v3620_v17 = vadd.f32 %v3619_v9, %v17716_v46  ;;  %v3649_v47 = vadd.f32 %v3648_v29, %v3647_v44 }
 0x57e   :  { %v3733_v55 = vadd.f32 %v3732_v53, %v3731_v1  ;;  %v3705_v14 = vadd.f32 %v3704_v7, %v3675_v43  ;;  %v3736_v26 = vsel %vm780_vm4, %v3681_v45, 0.0  ;;  %v3683_v57 = vmul.f32 %v17744_v31, %v17744_v31 }
 0x57f   :  { %v3607_v3 = vadd.f32 %v3606_v34, %v17725_v39  ;;  %v3621_v5 = vadd.f32 %v3620_v17, %v17744_v31  ;;  %v3651_v22 = vadd.f32 %v3650_v48, %v3649_v47  ;;  %v3634_v43 = vadd.f32 %v3633_v41, %v17728_v40 }
 0x580   :  { %v17789_v54 = vld [vmem:[#allocation2 + $0xb8] sm:$0xff]  ;;  %v3735_v60 = vadd.f32 %v3734_v27, %v3733_v55  ;;  %v3706_v29 = vadd.f32 %v3705_v14, %v3679_v30 }
 0x581   :  { %20900 = vst [vmem:[#allocation49_spill] sm:$0xff] %v17789_v54  ;;  %v3652_v36 = vsel %vm780_vm4, %v17789_v54, 0.0  ;;  %v3685_v6 = vmul.f32 %v17789_v54, %v17789_v54  ;;  %v17798_v53 = vld [vmem:[#allocation2 + $0xc0] sm:$0x3]  ;;  %v17800_v1 = vld [vmem:[#allocation2 + $0xd0] sm:$0x3] }
 0x582   :  { %v3609_v7 = vsel %vm3608_vm6, %v17798_v53, 0.0  ;;  %v3635_v45 = vsel %vm3608_vm6, %v17800_v1, 0.0  ;;  %v3737_v35 = vadd.f32 %v3736_v26, %v3735_v60  ;;  %v3653_v27 = vadd.f32 %v3652_v36, %v3651_v22 }
 0x583   :  { %v17809_v9 = vld [vmem:[#allocation2 + $0xc8] sm:$0x3]  ;;  %v3610_v48 = vadd.f32 %v3609_v7, %v3607_v3  ;;  %v3636_v34 = vadd.f32 %v3635_v45, %v3634_v43  ;;  %v3738_v41 = vsel %vm780_vm4, %v3685_v6, 0.0  ;;  %v3707_v3 = vadd.f32 %v3706_v29, %v3683_v57 }
 0x584   :  { %v17811_v44 = vld [vmem:[#allocation2 + $0xd8] sm:$0x3]  ;;  %v3622_v30 = vsel %vm3608_vm6, %v17809_v9, 0.0  ;;  %v3687_v17 = vmul.f32 %v17809_v9, %v17809_v9  ;;  %v3739_v6 = vadd.f32 %v3738_v41, %v3737_v35  ;;  %v3666_v41 = vmul.f32 %v17673_v56, %v17673_v56 }
 0x585   :  { %20901 = vst [vmem:[#allocation50_spill] sm:$0xff] %v17811_v44  ;;  %v3654_v55 = vsel %vm805_vm5, %v17811_v44, 0.0  ;;  %v3689_v47 = vmul.f32 %v17811_v44, %v17811_v44  ;;  %v3623_v14 = vadd.f32 %v3622_v30, %v3621_v5  ;;  %v3611_v60 = vrot.slane %v3610_v48, 4 }
 0x586   :  { %v3655_v26 = vadd.f32 %v3654_v55, %v3653_v27  ;;  %v3637_v36 = vrot.slane %v3636_v34, 4  ;;  %v3708_v22 = vsel %vm3608_vm6, %v3687_v17, 0.0 }
 0x587   :  { %v3740_v43 = vsel %vm805_vm5, %v3689_v47, 0.0  ;;  %v3624_v7 = vrot.slane %v3623_v14, 4  ;;  %v3612_v11 = vadd.f32 %v3611_v60, %v3610_v48  ;;  %v3709_v54 = vadd.f32 %v3708_v22, %v3707_v3 }
 0x588   :  { %v3656_v45 = vrot.slane %v3655_v26, 4  ;;  %v3638_v4 = vadd.f32 %v3637_v36, %v3636_v34  ;;  %v3741_v24 = vadd.f32 %v3740_v43, %v3739_v6  ;;  %v3662_v34 = vmul.f32 %v17660_v32, %v17660_v32 }
 0x589   :  { %v3625_v61 = vadd.f32 %v3624_v7, %v3623_v14  ;;  %v3613_v46 = vrot.slane %v3612_v11, 2  ;;  %v3710_v5 = vrot.slane %v3709_v54, 4  ;;  %v3668_v14 = vmul.f32 %v17676_v12, %v17676_v12 }
 0x58a   :  { %v3657_v31 = vadd.f32 %v3656_v45, %v3655_v26  ;;  %v3639_v44 = vrot.slane %v3638_v4, 2  ;;  %v3742_v27 = vrot.slane %v3741_v24, 4  ;;  %v3674_v12 = vmul.f32 %v17698_v16, %v17698_v16 }
 0x58b   :  { %v3626_v30 = vrot.slane %v3625_v61, 2  ;;  %v3614_v29 = vadd.f32 %v3613_v46, %v3612_v11  ;;  %v3711_v17 = vadd.f32 %v3710_v5, %v3709_v54  ;;  %v3664_v46 = vmul.f32 %v17663_v21, %v17663_v21 }
 0x58c   :  { %v3658_v55 = vrot.slane %v3657_v31, 2  ;;  %v3640_v57 = vadd.f32 %v3639_v44, %v3638_v4  ;;  %v3743_v35 = vadd.f32 %v3742_v27, %v3741_v24  ;;  %v3670_v24 = vmul.f32 %v17685_v19, %v17685_v19 }
 0x58d   :  { %v3627_v47 = vadd.f32 %v3626_v30, %v3625_v61  ;;  %v3615_v26 = vrot.slane %v3614_v29, 1  ;;  %v3712_v36 = vrot.slane %v3711_v17, 2  ;;  %v3716_v6 = vadd.f32 %v3668_v14, %v3664_v46  ;;  %v20915_v46 = vld [vmem:[#allocation20_spill] sm:$0xff] }
 0x58e   :  { %v3659_v48 = vadd.f32 %v3658_v55, %v3657_v31  ;;  %v3641_v60 = vrot.slane %v3640_v57, 1  ;;  %v3744_v3 = vrot.slane %v3743_v35, 2  ;;  %v3690_v31 = vadd.f32 %v3666_v41, %v3662_v34 }
 0x58f   :  { %v3628_v22 = vrot.slane %v3627_v47, 1  ;;  %v3713_v61 = vadd.f32 %v3712_v36, %v3711_v17  ;;  %v3616_v43 = vadd.f32 %v3615_v26, %v3614_v29  ;;  %v3678_v27 = vmul.f32 %v17709_v63, %v17709_v63 }
 0x590   :  { %v3660_v11 = vrot.slane %v3659_v48, 1  ;;  %v3745_v4 = vadd.f32 %v3744_v3, %v3743_v35  ;;  %v3642_v7 = vadd.f32 %v3641_v60, %v3640_v57  ;;  %v3691_v21 = vadd.f32 %v3690_v31, %v3670_v24  ;;  %v20911_v3 = vld [vmem:[#allocation22_spill] sm:$0xff]  ;;  %v20914_v24 = vld [vmem:[#allocation25_spill] sm:$0xff] }
 0x591   :  { %v3629_v54 = vadd.f32 %v3628_v22, %v3627_v47  ;;  %v3714_v45 = vrot.slane %v3713_v61, 1  ;;  %v3672_v30 = vmul.f32 %v17688_v0, %v17688_v0  ;;  %v3686_v29 = vmul.f32 %v17798_v53, %v17798_v53  ;;  %v20912_v22 = vld [vmem:[#allocation17_spill] sm:$0xff] }
 0x592   :  { %v3661_v44 = vadd.f32 %v3660_v11, %v3659_v48  ;;  %v3746_v5 = vrot.slane %v3745_v4, 1  ;;  %v3682_v57 = vmul.f32 %v17725_v39, %v17725_v39  ;;  %v3692_v35 = vadd.f32 %v3691_v21, %v3674_v12  ;;  %v20913_v11 = vld [vmem:[#allocation24_spill] sm:$0xff]  ;;  %v20919_v12 = vld [vmem:[#allocation30_spill] sm:$0xff]  ;;  %v20924_v21 = vld [vmem:[#allocation29_spill] sm:$0xff] }
 0x593   :  { %3865 = vmatprep.mubr.f32.mxu1 %v3629_v54  ;;  %v3715_v55 = vadd.f32 %v3714_v45, %v3713_v61  ;;  %v3676_v41 = vmul.f32 %v17701_v18, %v17701_v18  ;;  %v20902_v0 = vmov 0.0   ;;  %v3717_v48 = vadd.f32 %v3716_v6, %v3672_v30  ;;  %v20916_v61 = vld [vmem:[#allocation27_spill] sm:$0xff]  ;;  %v20917_v54 = vld [vmem:[#allocation28_spill] sm:$0xff] }
 0x594   :  { %12604 = vmatprep.mubr.msk.f32.mxu0 %vm780_vm4, %v3661_v44  ;;  %3866 = vmatmul.mubr.f32.vlgmr.msra.gmra.mxu1 %v3616_v43  ;;  %v3747_v17 = vadd.f32 %v3746_v5, %v3745_v4  ;;  %v3693_v47 = vadd.f32 %v3692_v35, %v3678_v27  ;;  %v3688_v34 = vmul.f32 %v17800_v1, %v17800_v1  ;;  %v20918_v44 = vld [vmem:[#allocation23_spill] sm:$0xff]  ;;  %v20921_v43 = vld [vmem:[#allocation26_spill] sm:$0xff]  ;;  %v20925_v30 = vld [vmem:[#allocation36_spill] sm:$0xff] }
 0x595   :  { %3936 = vmatmul.mubr.f32.vlgmr.msra.gmra.mxu0 %v3642_v7  ;;  %13814 = vmatpush3.msra.mxu1 %v17361_v42  ;;  %v3680_v42 = vmul.f32 %v17712_v62, %v17712_v62  ;;  %v3684_v14 = vmul.f32 %v17728_v40, %v17728_v40  ;;  %v3718_v26 = vadd.f32 %v3717_v48, %v3676_v41  ;;  %v20920_v6 = vld [vmem:[#allocation31_spill] sm:$0xff]  ;;  %v20922_v7 = vld [vmem:[#allocation33_spill] sm:$0xff]  ;;  %v20923_v27 = vld [vmem:[#allocation34_spill] sm:$0xff] }
 0x596   :  { %4017 = vmatpush1.msra.mxu0 %v17341_v10  ;;  %13815 = vmatprep.subr.mxu1 %v17373_v33  ;;  %v3695_v10 = vsel %vm3608_vm6, %v3686_v29, 0.0  ;;  %v3694_v33 = vadd.f32 %v3693_v47, %v3682_v57  ;;  %v20928_v29 = vld [vmem:[#allocation39_spill] sm:$0xff]  ;;  %v20929_v41 = vld [vmem:[#allocation40_spill] sm:$0xff] }
 0x597   :  { %4010 = vmatprep.mubr.f32.mxu1 %v3715_v55  ;;  %4018 = vmatprep.subr.mxu0 %v20902_v0  ;;  %v20926_v55 = vld [vmem:[#allocation37_spill] sm:$0xff]  ;;  %v20930_v47 = vld [vmem:[#allocation35_spill] sm:$0xff] }
 0x598   :  { %12605 = vmatprep.mubr.msk.f32.mxu0 %vm780_vm4, %v3747_v17  ;;  %13816 = vmatpush3.msra.mxu1 %v17380_v37  ;;  %v3719_v37 = vadd.f32 %v3718_v26, %v3680_v42  ;;  %v20927_v17 = vld [vmem:[#allocation32_spill] sm:$0xff]  ;;  %v20931_v42 = vld [vmem:[#allocation38_spill] sm:$0xff] }
 0x599   :  { %4019 = vmatpush1.msra.mxu0 %v17348_v49  ;;  %13817 = vmatprep.subr.mxu1 %v17392_v23  ;;  %v3696_v49 = vadd.f32 %v3695_v10, %v3694_v33  ;;  %v3721_v23 = vsel %vm3608_vm6, %v3688_v34, 0.0  ;;  %v20932_v10 = vld [vmem:[#allocation41_spill] sm:$0xff]  ;;  %v4102_v34 = vld [vmem:[%s20933_s4 + $0x28] sm:$0xff]  ;;  %v4101_v33 = vld [vmem:[%s20933_s4 + $0x20] sm:$0xff] }
 0x59a   :  { %4020 = vmatprep.subr.mxu0 %v20902_v0  ;;  %13818 = vmatpush3.msra.mxu1 %v17399_v38  ;;  %v3720_v60 = vadd.f32 %v3719_v37, %v3684_v14  ;;  %v4098_v14 = vld [vmem:[%s20933_s4 + $0x8] sm:$0xff]  ;;  %v4097_v26 = vld [vmem:[%s20933_s4] sm:$0xff] }
 0x59b   :  { %4021 = vmatpush1.msra.mxu0 %v17366_v51  ;;  %13819 = vmatprep.subr.mxu1 %v17411_v50  ;;  %v3697_v51 = vrot.slane %v3696_v49, 4  ;;  %v20904_v50 = vld [vmem:[#allocation15_spill] sm:$0xff] }
 0x59c   :  { %4022 = vmatprep.subr.mxu0 %v20902_v0  ;;  %13820 = vmatpush3.msra.mxu1 %v17418_v25  ;;  %v3722_v38 = vadd.f32 %v3721_v23, %v3720_v60 }
 0x59d   :  { %4023 = vmatpush1.msra.mxu0 %v17385_v52  ;;  %13821 = vmatprep.subr.mxu1 %v17430_v28  ;;  %v20903_v52 = vld [vmem:[#allocation12_spill] sm:$0xff] }
 0x59e   :  { %4024 = vmatprep.subr.mxu0 %v20902_v0  ;;  %13822 = vmatpush3.msra.mxu1 %v17437_v58  ;;  %v3723_v25 = vrot.slane %v3722_v38, 4  ;;  %v20905_v28 = vld [vmem:[#allocation16_spill] sm:$0xff]  ;;  %v20906_v58 = vld [vmem:[#allocation13_spill] sm:$0xff] }
 0x59f   :  { %4025 = vmatpush1.msra.mxu0 %v17404_v13  ;;  %13823 = vmatprep.subr.mxu1 %v17449_v2  ;;  %v3698_v13 = vadd.f32 %v3697_v51, %v3696_v49  ;;  %v20907_v2 = vld [vmem:[#allocation18_spill] sm:$0xff] }
 0x5a0   :  { %4026 = vmatprep.subr.mxu0 %v20902_v0  ;;  %13824 = vmatpush3.msra.mxu1 %v17456_v59  ;;  %v20909_v59 = vld [vmem:[#allocation14_spill] sm:$0xff]  ;;  %v3724_v36 = vadd.f32 %v3723_v25, %v3722_v38 }
 0x5a1   :  { %4027 = vmatpush1.msra.mxu0 %v17423_v15  ;;  %13825 = vmatprep.subr.mxu1 %v17466_v8  ;;  %v20908_v15 = vld [vmem:[#allocation19_spill] sm:$0xff]  ;;  %v20910_v8 = vld [vmem:[#allocation21_spill] sm:$0xff] }
 0x5a2   :  { %4028 = vmatprep.subr.mxu0 %v20902_v0  ;;  %13826 = vmatpush3.msra.mxu1 %v17473_v20  ;;  %v3699_v20 = vrot.slane %v3698_v13, 2  ;;  %v3725_v31 = vrot.slane %v3724_v36, 2  ;;  %v4104_v49 = vld [vmem:[%s20933_s4 + $0x38] sm:$0xff] }
 0x5a3   :  { %4029 = vmatpush1.msra.mxu0 %v20903_v52  ;;  %13827 = vmatprep.subr.mxu1 %v20904_v50 }
 0x5a4   :  { %4030 = vmatprep.subr.mxu0 %v20902_v0  ;;  %13828 = vmatpush3.msra.mxu1 %v20905_v28  ;;  %v3700_v4 = vadd.f32 %v3699_v20, %v3698_v13  ;;  %v3726_v5 = vadd.f32 %v3725_v31, %v3724_v36 }
 0x5a5   :  { %4031 = vmatpush1.msra.mxu0 %v20906_v58  ;;  %13829 = vmatprep.subr.mxu1 %v20907_v2 }
 0x5a6   :  { %4032 = vmatprep.subr.mxu0 %v20902_v0  ;;  %13830 = vmatpush3.msra.mxu1 %v20908_v15  ;;  %v3701_v45 = vrot.slane %v3700_v4, 1  ;;  %v3727_v35 = vrot.slane %v3726_v5, 1 }
 0x5a7   :  { %4033 = vmatpush1.msra.mxu0 %v20909_v59  ;;  %13831 = vmatprep.subr.mxu1 %v20910_v8 }
 0x5a8   :  { %4034 = vmatprep.subr.mxu0 %v20902_v0  ;;  %13832 = vmatpush3.msra.mxu1 %v20911_v3  ;;  %v3702_v57 = vadd.f32 %v3701_v45, %v3700_v4  ;;  %v3728_v48 = vadd.f32 %v3727_v35, %v3726_v5  ;;  %v4099_v4 = vld [vmem:[%s20933_s4 + $0x10] sm:$0xff]  ;;  %v15117_v5 = vld [vmem:[%s20937_s29 + $0x7c] ss:$12 sps:$4 sm:$0xff]  }
 0x5a9   :  { %4035 = vmatpush1.msra.mxu0 %v20912_v22  ;;  %13833 = vmatprep.subr.mxu1 %v20913_v11  ;;  %v4090_v22 = vld [vmem:[%s20934_s0] sm:$0x1]  ;;  %v15112_v45 = vld [vmem:[%s20937_s29 + $0x90] ss:$12 sps:$4 sm:$0xff]  }
 0x5aa   :  { %4036 = vmatprep.subr.mxu0 %v20902_v0  ;;  %13834 = vmatpush3.msra.mxu1 %v20914_v24  ;;  %v15129_v35 = vld [vmem:[%s20937_s29 + $0x1c] ss:$12 sps:$4 sm:$0xff]  }
 0x5ab   :  { %4037 = vmatpush1.msra.mxu0 %v20915_v46  ;;  %13835 = vmatprep.subr.mxu1 %v20916_v61  ;;  %v4103_v46 = vld [vmem:[%s20933_s4 + $0x30] sm:$0xff]  ;;  %v4100_v61 = vld [vmem:[%s20933_s4 + $0x18] sm:$0xff] }
 0x5ac   :  { %4038 = vmatprep.subr.mxu0 %v20902_v0  ;;  %13836 = vmatpush3.msra.mxu1 %v20917_v54  ;;  %v4094_v54 = vld [vmem:[%s20935_s6] sm:$0x1] }
 0x5ad   :  { %4039 = vmatpush1.msra.mxu0 %v20918_v44  ;;  %13837 = vmatprep.subr.mxu1 %v20919_v12  ;;  %v20936_v12 = vmov 0  }
 0x5ae   :  { %4040 = vmatprep.subr.mxu0 %v20902_v0  ;;  %13838 = vmatpush3.msra.mxu1 %v20920_v6  ;;  %v15109_v6 = vld [vmem:[%s20937_s29 + $0xa8] ss:$12 sps:$4 sm:$0xff]  }
 0x5af   :  { %4041 = vmatpush1.msra.mxu0 %v20921_v43  ;;  %13839 = vmatprep.subr.mxu1 %v20922_v7  ;;  %v15111_v43 = vld [vmem:[%s20937_s29 + $0xac] ss:$12 sps:$4 sm:$0xff]   ;;  %v15114_v7 = vld [vmem:[%s20937_s29 + $0x94] ss:$12 sps:$4 sm:$0xff]  }
 0x5b0   :  { %4042 = vmatprep.subr.mxu0 %v20902_v0  ;;  %13840 = vmatpush3.msra.mxu1 %v20923_v27  ;;  %v15115_v27 = vld [vmem:[%s20937_s29 + $0x78] ss:$12 sps:$4 sm:$0xff]  }
 0x5b1   :  { %4043 = vmatpush1.msra.mxu0 %v20924_v21  ;;  %13841 = vmatprep.subr.mxu1 %v20925_v30  ;;  %v15120_v21 = vld [vmem:[%s20937_s29 + $0x64] ss:$12 sps:$4 sm:$0xff]   ;;  %v15118_v30 = vld [vmem:[%s20937_s29 + $0x60] ss:$12 sps:$4 sm:$0xff]  }
 0x5b2   :  { %4044 = vmatprep.subr.mxu0 %v20902_v0  ;;  %13842 = vmatpush3.msra.mxu1 %v20926_v55  ;;  %v15123_v55 = vld [vmem:[%s20937_s29 + $0x4c] ss:$12 sps:$4 sm:$0xff]  }
 0x5b3   :  { %4045 = vmatpush1.msra.mxu0 %v20927_v17  ;;  %13843 = vmatprep.subr.mxu1 %v20928_v29  ;;  %v15121_v17 = vld [vmem:[%s20937_s29 + $0x48] ss:$12 sps:$4 sm:$0xff]  }
 0x5b4   :  { %4046 = vmatprep.subr.mxu0 %v20902_v0  ;;  %13844 = vmatpush3.msra.mxu1 %v20929_v41  ;;  %v15126_v29 = vld [vmem:[%s20937_s29 + $0x34] ss:$12 sps:$4 sm:$0xff]   ;;  %v15127_v41 = vld [vmem:[%s20937_s29 + $0x18] ss:$12 sps:$4 sm:$0xff]  }
 0x5b5   :  { %4047 = vmatpush1.msra.mxu0 %v20930_v47  ;;  %4011 = vmatmul.mubr.f32.vlgmr.msra.gmra.mxu1 %v3702_v57  ;;  %v15124_v57 = vld [vmem:[%s20937_s29 + $0x30] ss:$12 sps:$4 sm:$0xff]  }
 0x5b6   :  { %4076 = vmatprep.subr.mxu0 %v20902_v0  ;;  %4172 = vmatprep.mubr.f32.mxu1 %v20902_v0  ;;  %v15132_v47 = vld [vmem:[%s20937_s29 + $0x4] ss:$12 sps:$4 sm:$0xff]  }
 0x5b7   :  { %4077 = vmatpush2.msra.mxu0 %v20931_v42  ;;  %4136 = vmatprep.subr.mxu1 %v4102_v34  ;;  %v15130_v42 = vld [vmem:[%s20937_s29] ss:$12 sps:$4 sm:$0xff]  }
 0x5b8   :  { %4078 = vmatprep.subr.mxu0 %v20902_v0  ;;  %4137 = vmatpush1.msra.mxu1 %v4101_v33 }
 0x5b9   :  { %4079 = vmatpush2.msra.mxu0 %v20932_v10  ;;  %4138 = vmatprep.subr.mxu1 %v4098_v14  ;;  %v15133_v10 = vld [vmem:[%s20937_s29 + $0x168] ss:$12 sps:$4 sm:$0xff]  }
 0x5ba   :  { %4081 = vmatmul.mubr.f32.vlgmr.msra.gmra.mxu0 %v3728_v48  ;;  %4139 = vmatpush1.msra.mxu1 %v4097_v26  ;;  %v15135_v48 = vld [vmem:[%s20937_s29 + $0x16c] ss:$12 sps:$4 sm:$0xff]  }
 0x5bb   :  { %4207 = vmatprep.subr.mxu1 %v4104_v49  ;;  %5174 = vmatprep.subr.bf16.mxu0 %v15111_v43  ;;  %v20940_v43 = vld [vmem:[#allocation46_spill] sm:$0xff] }
 0x5bc   :  { %5175 = vmatpush1.bf16.msra.mxu0 %v15109_v6 }
 0x5bd   :  { %5176 = vmatprep.subr.bf16.mxu0 %v15114_v7 }
 0x5c0   :  { %5177 = vmatpush1.bf16.msra.mxu0 %v15112_v45 }
 0x5c1   :  { %5178 = vmatprep.subr.bf16.mxu0 %v15117_v5 }
 0x5c4   :  { %5179 = vmatpush1.bf16.msra.mxu0 %v15115_v27 }
 0x5c5   :  { %5180 = vmatprep.subr.bf16.mxu0 %v15120_v21 }
 0x5c8   :  { %5181 = vmatpush1.bf16.msra.mxu0 %v15118_v30 }
 0x5c9   :  { %5182 = vmatprep.subr.bf16.mxu0 %v15123_v55 }
 0x5cc   :  { %5183 = vmatpush1.bf16.msra.mxu0 %v15121_v17  ;;  %v20943_v17 = vld [vmem:[#allocation42_spill] sm:$0xff] }
 0x5cd   :  { %5184 = vmatprep.subr.bf16.mxu0 %v15126_v29 }
 0x5d0   :  { %5185 = vmatpush1.bf16.msra.mxu0 %v15124_v57 }
 0x5d1   :  { %5186 = vmatprep.subr.bf16.mxu0 %v15129_v35 }
 0x5d4   :  { %5187 = vmatpush1.bf16.msra.mxu0 %v15127_v41 }
 0x5d5   :  { %5188 = vmatprep.subr.bf16.mxu0 %v15132_v47 }
 0x5d8   :  { %5189 = vmatpush1.bf16.msra.mxu0 %v15130_v42  ;;  %v20944_v42 = vld [vmem:[#allocation43_spill] sm:$0xff] }
 0x5d9   :  { %5190 = vmatprep.subr.bf16.mxu0 %v15135_v48 }
 0x5dc   :  { %5191 = vmatpush2.bf16.msra.mxu0 %v15133_v10 }
 0x654   :  { %v13810_v60 = vpop.f32.mrf.mxu1 }
 0x655   :  { %v3937_v37 = vpop.f32.mrf.mxu0 }
 0x656   :  { %v13811_v51 = vpop.f32.mrf.mxu1 }
 0x657   :  { %v3939_v23 = vpop.f32.mrf.mxu0  ;;  %v13812_v38 = vadd.f32 %v13811_v51, %v13810_v60  ;;  %v15148_v60 = vld [vmem:[%s20937_s29 + $0x108] ss:$12 sps:$4 sm:$0xff]  }
 0x658   :  { %v15150_v23 = vld [vmem:[%s20937_s29 + $0x10c] ss:$12 sps:$4 sm:$0xff]   ;;  %v15156_v51 = vld [vmem:[%s20937_s29 + $0xf4] ss:$12 sps:$4 sm:$0xff]  }
 0x659   :  { %v3938_v52 = vadd.f32 %v13812_v38, %v3937_v37  ;;  %v15142_v37 = vld [vmem:[%s20937_s29 + $0x120] ss:$12 sps:$4 sm:$0xff]   ;;  %v15154_v38 = vld [vmem:[%s20937_s29 + $0xf0] ss:$12 sps:$4 sm:$0xff]  }
 0x65b   :  { %v3942_v25 = vmul.f32 0.0008, %v3938_v52  ;;  %v4395_v52 = vlaneseq }
 0x65d   :  { %v4087_v8 = vmul.f32 %v3942_v25, %v3942_v25 }
 0x675   :  { %v13845_v50 = vpop.f32.mrf.mxu1 }
 0x677   :  { %v13846_v13 = vpop.f32.mrf.mxu1 }
 0x678   :  { %v13847_v28 = vadd.f32 %v13846_v13, %v13845_v50  ;;  %v4396_v50 = vshrl.u32 %v4395_v52, 7 }
 0x67a   :  { %v4082_v58 = vpop.f32.mrf.mxu0 }
 0x67b   :  { %v4083_v2 = vadd.f32 %v13847_v28, %v4082_v58 }
 0x67c   :  { %v4084_v15 = vpop.f32.mrf.mxu0 }
 0x67d   :  { %v4086_v59 = vmul.f32 0.0008, %v4083_v2 }
 0x67f   :  { %v4088_v20 = vsub.f32 %v4086_v59, %v4087_v8 }
 0x681   :  { %v4089_v36 = vmax.f32 %v4088_v20, 0.0 }
 0x683   :  { %v4091_v3 = vadd.f32 1e-05, %v4089_v36 }
 0x685   :  { %15727 = vrsqrt.f32 %v4091_v3 }
 0x692   :  { %v15728_v11 = vpop.eup %15727 }
 0x693   :  { %v4093_v24 = vmul.f32 %v15728_v11, %v4090_v22 }
 0x695   :  { %12606 = vmatmul.mubr.msk.f32.vlgmr.msra.gmra.mxu1 %vm780_vm4, %v4093_v24  ;;  %v4095_v31 = vmul.f32 %v4093_v24, %v3942_v25  ;;  %v18045_v25 = vsub.s32 0, %v4396_v50 }
 0x696   :  { %4208 = vmatpush1.msra.mxu1 %v4103_v46  ;;  %4243 = vmatprep.mubr.f32.mxu1 %v20902_v0 }
 0x697   :  { %4209 = vmatprep.subr.mxu1 %v4100_v61  ;;  %v4096_v44 = vsub.f32 %v4094_v54, %v4095_v31  ;;  %20938 = vst [vmem:[#allocation12_spill] sm:$0xff] %v18045_v25  ;;  %v20939_v54 = vld [vmem:[#allocation9_spill] sm:$0xff] }
 0x698   :  { %4210 = vmatpush1.msra.mxu1 %v4099_v4 }
 0x699   :  { %12607 = vmatmul.mubr.msk.f32.vlgmr.msra.gmra.mxu1 %vm780_vm4, %v4093_v24  ;;  %4281 = vmatprep.subr.mxu1 %v4102_v34  ;;  %v15138_v34 = vld [vmem:[%s20937_s29 + $0x154] ss:$12 sps:$4 sm:$0xff]  }
 0x69a   :  { %4282 = vmatpush1.msra.mxu1 %v4101_v33  ;;  %4317 = vmatprep.mubr.f32.mxu1 %v20902_v0  ;;  %v15136_v33 = vld [vmem:[%s20937_s29 + $0x150] ss:$12 sps:$4 sm:$0xff]  }
 0x69b   :  { %4283 = vmatprep.subr.mxu1 %v4098_v14  ;;  %5192 = vmatprep.subr.bf16.mxu0 %v15138_v34  ;;  %v15141_v14 = vld [vmem:[%s20937_s29 + $0x13c] ss:$12 sps:$4 sm:$0xff]  }
 0x69c   :  { %4284 = vmatpush1.msra.mxu1 %v4097_v26  ;;  %5193 = vmatpush2.bf16.msra.mxu0 %v15136_v33  ;;  %v15139_v26 = vld [vmem:[%s20937_s29 + $0x138] ss:$12 sps:$4 sm:$0xff]  }
 0x69d   :  { %12608 = vmatmul.mubr.msk.f32.vlgmr.msra.gmra.mxu1 %vm780_vm4, %v4096_v44  ;;  %4352 = vmatprep.subr.mxu1 %v4104_v49  ;;  %v15144_v49 = vld [vmem:[%s20937_s29 + $0x124] ss:$12 sps:$4 sm:$0xff]  }
 0x69e   :  { %4353 = vmatpush1.msra.mxu1 %v4103_v46  ;;  %4388 = vmatprep.mubr.f32.mxu1 %v20902_v0 }
 0x69f   :  { %4354 = vmatprep.subr.mxu1 %v4100_v61  ;;  %5194 = vmatprep.subr.bf16.mxu0 %v15141_v14 }
 0x6a0   :  { %4355 = vmatpush1.msra.mxu1 %v4099_v4  ;;  %5195 = vmatpush2.bf16.msra.mxu0 %v15139_v26 }
 0x6a1   :  { %12609 = vmatmul.mubr.msk.f32.vlgmr.msra.gmra.mxu1 %vm780_vm4, %v4096_v44  ;;  %5196 = vmatprep.subr.bf16.mxu0 %v15144_v49 }
 0x6a2   :  { %4590 = vmatprep.mubr.bf16.mxu1 %v20936_v12 }
 0x6a4   :  { %5197 = vmatpush2.bf16.msra.mxu0 %v15142_v37 }
 0x6a5   :  { %5198 = vmatprep.subr.bf16.mxu0 %v15150_v23 }
 0x6a8   :  { %5199 = vmatpush2.bf16.msra.mxu0 %v15148_v60 }
 0x6a9   :  { %5200 = vmatprep.subr.bf16.mxu0 %v15156_v51 }
 0x6ac   :  { %5201 = vmatpush2.bf16.msra.mxu0 %v15154_v38 }
 0x755   :  { %v4174_v13 = vpop.f32.mrf.mxu1 }
 0x756   :  { %v4398_v2 = vrot.slane %v4174_v13, %v18045_v25 }
 0x757   :  { %v4176_v28 = vpop.f32.mrf.mxu1 }
 0x758   :  { %v4402_v59 = vrot.slane %v4176_v28, %v18045_v25  ;;  %v4435_v36 = vmul.f32 %v4398_v2, %v17798_v53  ;;  %v4427_v22 = vmul.f32 %v4398_v2, %v17709_v63  ;;  %v4431_v11 = vmul.f32 %v4398_v2, %v17725_v39  ;;  %v20941_v63 = vld [vmem:[#allocation8_spill] sm:$0xff]  ;;  %v20942_v39 = vld [vmem:[#allocation10_spill] sm:$0xff] }
 0x759   :  { %v4245_v58 = vpop.f32.mrf.mxu1  ;;  %v4419_v24 = vmul.f32 %v4398_v2, %v17685_v19  ;;  %v4423_v46 = vmul.f32 %v4398_v2, %v17698_v16 }
 0x75a   :  { %v4436_v4 = vmul.f32 %v4402_v59, %v17809_v9  ;;  %v4428_v44 = vmul.f32 %v4402_v59, %v20939_v54  ;;  %v18059_v6 = vrot.slane %v4245_v58, %v18045_v25  ;;  %v4432_v7 = vmul.f32 %v4402_v59, %v20940_v43  ;;  %v20946_v54 = vld [vmem:[#allocation48_spill] sm:$0xff] }
 0x75b   :  { %v4247_v15 = vpop.f32.mrf.mxu1  ;;  %v4420_v45 = vmul.f32 %v4402_v59, %v20941_v63  ;;  %v4424_v5 = vmul.f32 %v4402_v59, %v20942_v39  ;;  %v4412_v29 = vmul.f32 %v4402_v59, %v20943_v17  ;;  %v4416_v48 = vmul.f32 %v4402_v59, %v20944_v42 }
 0x75c   :  { %v18067_v10 = vrot.slane %v4247_v15, %v18045_v25  ;;  %v4411_v15 = vmul.f32 %v4398_v2, %v17660_v32  ;;  %v4415_v59 = vmul.f32 %v4398_v2, %v17673_v56 }
 0x75d   :  { %v4319_v8 = vpop.f32.mrf.mxu1 }
 0x75e   :  { %v4442_v20 = vrot.slane %v4319_v8, %v18045_v25  ;;  %v20945_v8 = vld [vmem:[#allocation50_spill] sm:$0xff] }
 0x75f   :  { %v4321_v3 = vpop.f32.mrf.mxu1 }
 0x760   :  { %v4446_v61 = vrot.slane %v4321_v3, %v18045_v25  ;;  %v4479_v31 = vadd.f32 %v4442_v20, %v4435_v36  ;;  %v4471_v21 = vadd.f32 %v4442_v20, %v4427_v22  ;;  %v4475_v55 = vadd.f32 %v4442_v20, %v4431_v11 }
 0x761   :  { %v4390_v53 = vpop.f32.mrf.mxu1  ;;  %v4463_v14 = vadd.f32 %v4442_v20, %v4419_v24  ;;  %v4467_v23 = vadd.f32 %v4442_v20, %v4423_v46  ;;  %v4438_v36 = vmul.f32 %v18067_v10, %v20945_v8  ;;  %v4437_v11 = vmul.f32 %v18059_v6, %v17800_v1 }
 0x762   :  { %v4480_v19 = vadd.f32 %v4446_v61, %v4436_v4  ;;  %v4507_v27 = vmax.f32 %v4479_v31, 0.0  ;;  %v4472_v16 = vadd.f32 %v4446_v61, %v4428_v44  ;;  %v4476_v30 = vadd.f32 %v4446_v61, %v4432_v7 }
 0x763   :  { %v4464_v9 = vadd.f32 %v4446_v61, %v4420_v45  ;;  %v4392_v57 = vpop.f32.mrf.mxu1  ;;  %v4468_v33 = vadd.f32 %v4446_v61, %v4424_v5  ;;  %v18070_v26 = vrot.slane %v4390_v53, %v18045_v25  ;;  %v4499_v37 = vmax.f32 %v4471_v21, 0.0  ;;  %v20947_v53 = vld [vmem:[#allocation49_spill] sm:$0xff] }
 0x764   :  { %v4508_v35 = vmax.f32 %v4480_v19, 0.0  ;;  %v4523_v41 = vpack.c.bf16 %v4507_v27, %v4507_v27  ;;  %v4500_v47 = vmax.f32 %v4472_v16, 0.0  ;;  %v4504_v34 = vmax.f32 %v4476_v30, 0.0  ;;  %v20948_v21 = vld [vmem:[#allocation45_spill] sm:$0xff] }
 0x765   :  { %v18075_v60 = vrot.slane %v4392_v57, %v18045_v25  ;;  %v4503_v38 = vmax.f32 %v4475_v55, 0.0  ;;  %v4492_v52 = vmax.f32 %v4464_v9, 0.0  ;;  %v4496_v13 = vmax.f32 %v4468_v33, 0.0  ;;  %v20949_v9 = vld [vmem:[#allocation47_spill] sm:$0xff] }
 0x766   :  { %v18072_v49 = vpack.c.bf16 %v4508_v35, %v4508_v35  ;;  %v18078_v51 = vsel %vm4545_vm7, %v4523_v41, 0  ;;  %v18082_v50 = vpack.c.bf16 %v4504_v34, %v4500_v47  ;;  %v4456_v28 = vadd.f32 %v4446_v61, %v4412_v29  ;;  %v15107_v47 = vld [vmem:[%s20950_s7] sm:$0xff]   ;;  %v15771_v34 = vld [vmem:[#allocation2 + $0x50] sm:$0xff] }
 0x767   :  { %v4460_v58 = vadd.f32 %v4446_v61, %v4416_v48  ;;  %v4491_v3 = vmax.f32 %v4463_v14, 0.0  ;;  %v4495_v22 = vmax.f32 %v4467_v23, 0.0  ;;  %v18092_v24 = vpack.c.bf16 %v4503_v38, %v4499_v37  ;;  %v20951_v38 = vld [vmem:[#allocation44_spill] sm:$0xff] }
 0x768   :  { %12612 = vmatprep.subr.msk.bf16.mxu1 %vm4545_vm7, %v18072_v49  ;;  %v4455_v46 = vadd.f32 %v4442_v20, %v4411_v15  ;;  %v4459_v61 = vadd.f32 %v4442_v20, %v4415_v59  ;;  %v4482_v4 = vadd.f32 %v18075_v60, %v4438_v36  ;;  %v18095_v31 = vpack.c.bf16 %v4496_v13, %v4492_v52  ;;  %v20952_v13 = vld [vmem:[#allocation11_spill] sm:$0xff] }
 0x769   :  { %4567 = vmatpush1.bf16.msra.mxu1 %v18078_v51  ;;  %v4484_v32 = vmax.f32 %v4456_v28, 0.0  ;;  %v4488_v56 = vmax.f32 %v4460_v58, 0.0  ;;  %v4481_v2 = vadd.f32 %v18070_v26, %v4437_v11  ;;  %v4430_v44 = vmul.f32 %v18067_v10, %v20946_v54 }
 0x76a   :  { %4568 = vmatprep.subr.bf16.mxu1 %v18082_v50  ;;  %v4434_v1 = vmul.f32 %v18067_v10, %v20947_v53  ;;  %v18104_v43 = vpack.c.bf16 %v4495_v22, %v4491_v3  ;;  %v4429_v20 = vmul.f32 %v18059_v6, %v17712_v62  ;;  %v4483_v7 = vmax.f32 %v4455_v46, 0.0  ;;  %v15773_v46 = vld [vmem:[#allocation2 + $0x30] sm:$0xff] }
 0x76b   :  { %v4487_v63 = vmax.f32 %v4459_v61, 0.0  ;;  %v4474_v45 = vadd.f32 %v18075_v60, %v4430_v44  ;;  %v18110_v5 = vpack.c.bf16 %v4488_v56, %v4484_v32  ;;  %v4510_v19 = vmax.f32 %v4482_v4, 0.0  ;;  %v15108_v44 = vld [vmem:[%s20950_s7 + $0x8] ss:$0 sps:$4 sm:$0x77]  }
 0x76c   :  { %v4478_v39 = vadd.f32 %v18075_v60, %v4434_v1  ;;  %v4509_v27 = vmax.f32 %v4481_v2, 0.0  ;;  %v4433_v16 = vmul.f32 %v18059_v6, %v17728_v40  ;;  %v4422_v30 = vmul.f32 %v18067_v10, %v20948_v21  ;;  %v15157_v21 = vld [vmem:[%s20937_s29 + $0x1f8] ss:$12 sps:$4 sm:$0xff]  }
 0x76d   :  { %4569 = vmatpush1.bf16.msra.mxu1 %v18092_v24  ;;  %v4473_v62 = vadd.f32 %v18070_v26, %v4429_v20  ;;  %v4426_v17 = vmul.f32 %v18067_v10, %v20949_v9  ;;  %v18122_v29 = vpack.c.bf16 %v4487_v63, %v4483_v7  ;;  %v4502_v57 = vmax.f32 %v4474_v45, 0.0  ;;  %v15165_v9 = vld [vmem:[%s20937_s29 + $0x1e4] ss:$12 sps:$4 sm:$0xff]  }
 0x76e   :  { %4570 = vmatprep.subr.bf16.mxu1 %v18095_v31  ;;  %v4477_v55 = vadd.f32 %v18070_v26, %v4433_v16  ;;  %v4506_v35 = vmax.f32 %v4478_v39, 0.0  ;;  %v4466_v40 = vadd.f32 %v18075_v60, %v4422_v30  ;;  %v18125_v41 = vpack.c.bf16 %v4510_v19, %v4510_v19  ;;  %v15145_v39 = vld [vmem:[%s20937_s29 + $0x228] ss:$12 sps:$4 sm:$0xff]   ;;  %v15160_v30 = vld [vmem:[%s20937_s29 + $0xd8] ss:$12 sps:$4 sm:$0xff]  }
 0x76f   :  { %v4525_v42 = vpack.c.bf16 %v4509_v27, %v4509_v27  ;;  %v4470_v48 = vadd.f32 %v18075_v60, %v4426_v17  ;;  %v4421_v33 = vmul.f32 %v15771_v34, %v18059_v6  ;;  %v4425_v14 = vmul.f32 %v18059_v6, %v17701_v18  ;;  %v15153_v19 = vld [vmem:[%s20937_s29 + $0x214] ss:$12 sps:$4 sm:$0xff]   ;;  %v15151_v27 = vld [vmem:[%s20937_s29 + $0x210] ss:$12 sps:$4 sm:$0xff]  }
 0x770   :  { %v4501_v37 = vmax.f32 %v4473_v62, 0.0  ;;  %v4505_v23 = vmax.f32 %v4477_v55, 0.0  ;;  %v4414_v52 = vmul.f32 %v18067_v10, %v20951_v38  ;;  %v4418_v28 = vmul.f32 %v18067_v10, %v20952_v13  ;;  %v15772_v10 = vld [vmem:[#allocation2 + $0x10] sm:$0xff]  ;;  %v15159_v16 = vld [vmem:[%s20937_s29 + $0x1fc] ss:$12 sps:$4 sm:$0xff]  }
 0x771   :  { %4571 = vmatpush1.bf16.msra.mxu1 %v18104_v43  ;;  %v18141_v58 = vpack.c.bf16 %v4506_v35, %v4502_v57  ;;  %v4494_v15 = vmax.f32 %v4466_v40, 0.0  ;;  %v4465_v59 = vadd.f32 %v18070_v26, %v4421_v33  ;;  %v4469_v8 = vadd.f32 %v18070_v26, %v4425_v14  ;;  %v15162_v62 = vld [vmem:[%s20937_s29 + $0xdc] ss:$12 sps:$4 sm:$0xff]   ;;  %v15163_v55 = vld [vmem:[%s20937_s29 + $0x1e0] ss:$12 sps:$4 sm:$0xff]  }
 0x772   :  { %4572 = vmatprep.subr.bf16.mxu1 %v18110_v5  ;;  %v18147_v18 = vsel %vm4545_vm7, %v4525_v42, 0  ;;  %v4498_v36 = vmax.f32 %v4470_v48, 0.0  ;;  %v4458_v3 = vadd.f32 %v18075_v60, %v4414_v52  ;;  %v4462_v22 = vadd.f32 %v18075_v60, %v4418_v28  ;;  %5202 = vmatprep.subr.bf16.mxu0 %v15162_v62  ;;  %v15166_v17 = vld [vmem:[%s20937_s29 + $0xc0] ss:$12 sps:$4 sm:$0xff]   ;;  %v15168_v57 = vld [vmem:[%s20937_s29 + $0xc4] ss:$12 sps:$4 sm:$0xff]  }
 0x773   :  { %v4413_v11 = vmul.f32 %v15772_v10, %v18059_v6  ;;  %v4417_v61 = vmul.f32 %v15773_v46, %v18059_v6  ;;  %v18156_v4 = vpack.c.bf16 %v4505_v23, %v4501_v37  ;;  %v4493_v32 = vmax.f32 %v4465_v59, 0.0  ;;  %5203 = vmatpush2.bf16.msra.mxu0 %v15160_v30  ;;  %v15169_v35 = vld [vmem:[%s20937_s29 + $0x1c8] ss:$12 sps:$4 sm:$0xff]   ;;  %v15171_v40 = vld [vmem:[%s20937_s29 + $0x1cc] ss:$12 sps:$4 sm:$0xff]  }
 0x774   :  { %v4497_v56 = vmax.f32 %v4469_v8, 0.0  ;;  %v18160_v54 = vpack.c.bf16 %v4498_v36, %v4494_v15  ;;  %v4486_v53 = vmax.f32 %v4458_v3, 0.0  ;;  %v4490_v1 = vmax.f32 %v4462_v22, 0.0  ;;  %5204 = vmatprep.subr.bf16.mxu0 %v15168_v57  ;;  %v15174_v42 = vld [vmem:[%s20937_s29 + $0x1b4] ss:$12 sps:$4 sm:$0xff]  }
 0x775   :  { %4573 = vmatpush1.bf16.msra.mxu1 %v18122_v29  ;;  %v4457_v2 = vadd.f32 %v18070_v26, %v4413_v11  ;;  %v4461_v60 = vadd.f32 %v18070_v26, %v4417_v61  ;;  %v15147_v26 = vld [vmem:[%s20937_s29 + $0x22c] ss:$12 sps:$4 sm:$0xff]   ;;  %v15178_v34 = vld [vmem:[%s20937_s29 + $0x19c] ss:$12 sps:$4 sm:$0xff]   ;;  %v15182_v33 = vld [vmem:[%s20937_s29 + $0x184] ss:$12 sps:$4 sm:$0xff]  }
 0x776   :  { %12615 = vmatprep.subr.msk.bf16.mxu1 %vm4545_vm7, %v18125_v41  ;;  %v18167_v6 = vpack.c.bf16 %v4497_v56, %v4493_v32  ;;  %v18170_v63 = vpack.c.bf16 %v4490_v1, %v4486_v53  ;;  %v15176_v48 = vld [vmem:[%s20937_s29 + $0x198] ss:$12 sps:$4 sm:$0xff]   ;;  %v15180_v14 = vld [vmem:[%s20937_s29 + $0x180] ss:$12 sps:$4 sm:$0xff]   ;;  %v15188_v38 = vld [vmem:[%s20937_s29 + $0x170] ss:$12 sps:$4 sm:$0xff]  }
 0x777   :  { %v4485_v20 = vmax.f32 %v4457_v2, 0.0  ;;  %v4489_v7 = vmax.f32 %v4461_v60, 0.0  ;;  %5205 = vmatpush2.bf16.msra.mxu0 %v15166_v17  ;;  %v15184_v37 = vld [vmem:[%s20937_s29 + $0x240] ss:$12 sps:$4 sm:$0xff]   ;;  %v15186_v23 = vld [vmem:[%s20937_s29 + $0x244] ss:$12 sps:$4 sm:$0xff]  }
 0x778   :  { %12613 = vmatmul.mubr.msk.bf16.vlgmr.msra.gmra.mxu1 %vm4538_vm8, %v15107_v47  ;;  %5324 = vmatprep.subr.bf16.mxu0 %v20936_v12  ;;  %v15175_v8 = vld [vmem:[%s20937_s29 + $0x230] ss:$12 sps:$4 sm:$0xff]   ;;  %v15179_v11 = vld [vmem:[%s20937_s29 + $0x218] ss:$12 sps:$4 sm:$0xff]   ;;  %v15183_v32 = vld [vmem:[%s20937_s29 + $0x200] ss:$12 sps:$4 sm:$0xff]  }
 0x779   :  { %4618 = vmatpush1.bf16.msra.mxu1 %v18147_v18  ;;  %4600 = vmatprep.mubr.bf16.mxu1 %v20936_v12  ;;  %v18178_v45 = vpack.c.bf16 %v4489_v7, %v4485_v20  ;;  %v15189_v7 = vld [vmem:[%s20937_s29 + $0xb0] ss:$12 sps:$4 sm:$0xff]   ;;  %v15192_v30 = vld [vmem:[%s20937_s29 + $0x98] ss:$12 sps:$4 sm:$0xff]  }
 0x77a   :  { %4619 = vmatprep.subr.bf16.mxu1 %v18141_v58  ;;  %v15193_v62 = vld [vmem:[%s20937_s29 + $0x1b8] ss:$12 sps:$4 sm:$0xff]  }
 0x77d   :  { %4620 = vmatpush1.bf16.msra.mxu1 %v18156_v4 }
 0x77e   :  { %4621 = vmatprep.subr.bf16.mxu1 %v18160_v54 }
 0x780   :  { %12614 = vmatmul.mubr.msk.bf16.gmra.mxu1 %vm4538_vm8, %v15108_v44 }
 0x781   :  { %4622 = vmatpush1.bf16.msra.mxu1 %v18167_v6  ;;  %4641 = vmatprep.mubr.bf16.mxu1 %v20936_v12 }
 0x782   :  { %4623 = vmatprep.subr.bf16.mxu1 %v18170_v63 }
 0x785   :  { %4624 = vmatpush1.bf16.msra.mxu1 %v18178_v45 }
 0x786   :  { %5225 = vmatprep.subr.bf16.mxu1 %v15147_v26  ;;  %v15190_v26 = vld [vmem:[%s20937_s29 + $0x1d0] ss:$12 sps:$4 sm:$0xff]  }
 0x788   :  { %12616 = vmatmul.mubr.msk.bf16.vlgmr.msra.gmra.mxu1 %vm4538_vm8, %v15107_v47  ;;  %v15172_v47 = vld [vmem:[%s20937_s29 + $0x1b0] ss:$12 sps:$4 sm:$0xff]  }
 0x789   :  { %4651 = vmatprep.mubr.bf16.mxu1 %v20936_v12  ;;  %5226 = vmatpush1.bf16.msra.mxu1 %v15145_v39 }
 0x78a   :  { %5227 = vmatprep.subr.bf16.mxu1 %v15153_v19 }
 0x78d   :  { %5228 = vmatpush1.bf16.msra.mxu1 %v15151_v27  ;;  %v15191_v27 = vld [vmem:[%s20937_s29 + $0x158] ss:$12 sps:$4 sm:$0xff]  }
 0x78e   :  { %5229 = vmatprep.subr.bf16.mxu1 %v15159_v16 }
 0x790   :  { %12617 = vmatmul.mubr.msk.bf16.gmra.mxu1 %vm4538_vm8, %v15108_v44  ;;  %v15187_v44 = vld [vmem:[%s20937_s29 + $0x1e8] ss:$12 sps:$4 sm:$0xff]  }
 0x791   :  { %5230 = vmatpush1.bf16.msra.mxu1 %v15157_v21 }
 0x792   :  { %5231 = vmatprep.subr.bf16.mxu1 %v15165_v9 }
 0x795   :  { %5232 = vmatpush1.bf16.msra.mxu1 %v15163_v55  ;;  %v15194_v55 = vld [vmem:[%s20937_s29 + $0x140] ss:$12 sps:$4 sm:$0xff]  }
 0x796   :  { %5233 = vmatprep.subr.bf16.mxu1 %v15171_v40  ;;  %v15196_v40 = vld [vmem:[%s20937_s29 + $0x1a0] ss:$12 sps:$4 sm:$0xff]  }
 0x799   :  { %5234 = vmatpush1.bf16.msra.mxu1 %v15169_v35  ;;  %v15195_v35 = vld [vmem:[%s20937_s29 + $0x80] ss:$12 sps:$4 sm:$0xff]  }
 0x79a   :  { %5235 = vmatprep.subr.bf16.mxu1 %v15174_v42  ;;  %v15198_v42 = vld [vmem:[%s20937_s29 + $0x68] ss:$12 sps:$4 sm:$0xff]  }
 0x79d   :  { %5236 = vmatpush1.bf16.msra.mxu1 %v15172_v47  ;;  %v15197_v47 = vld [vmem:[%s20937_s29 + $0x128] ss:$12 sps:$4 sm:$0xff]  }
 0x79e   :  { %5237 = vmatprep.subr.bf16.mxu1 %v15178_v34  ;;  %v15200_v34 = vld [vmem:[%s20937_s29 + $0x110] ss:$12 sps:$4 sm:$0xff]  }
 0x7a1   :  { %5238 = vmatpush1.bf16.msra.mxu1 %v15176_v48  ;;  %v15199_v48 = vld [vmem:[%s20937_s29 + $0x188] ss:$12 sps:$4 sm:$0xff]  }
 0x7a2   :  { %5239 = vmatprep.subr.bf16.mxu1 %v15182_v33  ;;  %v15201_v33 = vld [vmem:[%s20937_s29 + $0x50] ss:$12 sps:$4 sm:$0xff]  }
 0x7a5   :  { %5240 = vmatpush1.bf16.msra.mxu1 %v15180_v14  ;;  %v15202_v14 = vld [vmem:[%s20937_s29 + $0x248] ss:$12 sps:$4 sm:$0xff]  }
 0x7a6   :  { %5255 = vmatprep.subr.bf16.mxu1 %v15186_v23  ;;  %v15204_v23 = vld [vmem:[%s20937_s29 + $0x38] ss:$12 sps:$4 sm:$0xff]  }
 0x7a9   :  { %5256 = vmatpush2.bf16.msra.mxu1 %v15184_v37  ;;  %v15203_v37 = vld [vmem:[%s20937_s29 + $0xf8] ss:$12 sps:$4 sm:$0xff]  }
 0x7aa   :  { %13848 = vmatprep.subr.bf16.mxu1 %v15188_v38  ;;  %v15205_v38 = vld [vmem:[%s20937_s29 + $0xe0] ss:$12 sps:$4 sm:$0xff]  }
 0x838   :  { %v4592_v52 = vpop.f32.mrf.mxu1 }
 0x83a   :  { %v4594_v13 = vpop.f32.mrf.mxu1 }
 0x83c   :  { %v4596_v28 = vpop.f32.mrf.mxu1 }
 0x83d   :  { %v18254_v36 = vpack.c.bf16 %v4596_v28, %v4592_v52  ;;  %v15206_v52 = vld [vmem:[%s20937_s29 + $0x20] ss:$12 sps:$4 sm:$0xff]   ;;  %v15208_v28 = vld [vmem:[%s20937_s29 + $0x8] ss:$12 sps:$4 sm:$0xff]  }
 0x83e   :  { %v4598_v15 = vpop.f32.mrf.mxu1 }
 0x83f   :  { %v4661_v59 = vpack.c.bf16 %v4598_v15, %v4594_v13  ;;  %v15207_v13 = vld [vmem:[%s20937_s29 + $0xc8] ss:$12 sps:$4 sm:$0xff]   ;;  %v15209_v15 = vld [vmem:[%s20950_s7 + $0xc] sm:$0xff]  }
 0x840   :  { %v4602_v3 = vpop.f32.mrf.mxu1 }
 0x841   :  { %5206 = vmatprep.mubr.bf16.mxu0 %v4661_v59  ;;  %v18267_v56 = vpack.c.bf16 %v4602_v3, %v4602_v3  ;;  %v15214_v3 = vld [vmem:[%s20937_s29 + $0x2e8] ss:$12 sps:$4 sm:$0xff]  }
 0x842   :  { %v4604_v22 = vpop.f32.mrf.mxu1  ;;  %5207 = vmatmul.mubr.bf16.vlgmr.msra.gmra.mxu0 %v18254_v36 }
 0x843   :  { %v18257_v10 = vpack.c.bf16 %v4604_v22, %v4604_v22  ;;  %5325 = vmatpush1.bf16.msra.mxu0 %v15175_v8  ;;  %v15211_v8 = vld [vmem:[%s20937_s29 + $0x300] ss:$12 sps:$4 sm:$0xff]  }
 0x844   :  { %v4606_v46 = vpop.f32.mrf.mxu1  ;;  %5326 = vmatprep.subr.bf16.mxu0 %v20936_v12  ;;  %v15216_v22 = vld [vmem:[%s20937_s29 + $0x2ec] ss:$12 sps:$4 sm:$0xff]  }
 0x845   :  { %5216 = vmatprep.mubr.bf16.mxu0 %v18257_v10  ;;  %v15220_v46 = vld [vmem:[%s20937_s29 + $0x2b8] ss:$12 sps:$4 sm:$0xff]  }
 0x846   :  { %v4607_v61 = vpop.f32.mrf.mxu1 }
 0x847   :  { %5327 = vmatpush1.bf16.msra.mxu0 %v15179_v11  ;;  %v15219_v11 = vld [vmem:[%s20937_s29 + $0x2d4] ss:$12 sps:$4 sm:$0xff]   ;;  %v15222_v61 = vld [vmem:[%s20937_s29 + $0x2bc] ss:$12 sps:$4 sm:$0xff]  }
 0x848   :  { %v4643_v2 = vpop.f32.mrf.mxu1  ;;  %5328 = vmatprep.subr.bf16.mxu0 %v20936_v12 }
 0x84a   :  { %v4645_v60 = vpop.f32.mrf.mxu1  ;;  %5217 = vmatmul.mubr.bf16.gmra.mxu0 %v18267_v56 }
 0x84b   :  { %5329 = vmatpush1.bf16.msra.mxu0 %v15183_v32  ;;  %v15223_v32 = vld [vmem:[%s20937_s29 + $0x2a0] ss:$12 sps:$4 sm:$0xff]  }
 0x84c   :  { %v4647_v53 = vpop.f32.mrf.mxu1  ;;  %5330 = vmatprep.subr.bf16.mxu0 %v20936_v12 }
 0x84d   :  { %v4662_v39 = vpack.c.bf16 %v4647_v53, %v4643_v2  ;;  %v15228_v2 = vld [vmem:[%s20937_s29 + $0x28c] ss:$12 sps:$4 sm:$0xff]   ;;  %v15229_v53 = vld [vmem:[%s20937_s29 + $0x270] ss:$12 sps:$4 sm:$0xff]  }
 0x84e   :  { %v4649_v1 = vpop.f32.mrf.mxu1 }
 0x84f   :  { %v4663_v20 = vpack.c.bf16 %v4649_v1, %v4645_v60  ;;  %5331 = vmatpush1.bf16.msra.mxu0 %v15187_v44  ;;  %v15226_v60 = vld [vmem:[%s20937_s29 + $0x288] ss:$12 sps:$4 sm:$0xff]  }
 0x850   :  { %5332 = vmatprep.subr.bf16.mxu0 %v20936_v12  ;;  %v4653_v19 = vpop.f32.mrf.mxu1  ;;  %v15231_v44 = vld [vmem:[%s20937_s29 + $0x274] ss:$12 sps:$4 sm:$0xff]   ;;  %v15234_v1 = vld [vmem:[%s20937_s29 + $0x25c] ss:$12 sps:$4 sm:$0xff]  }
 0x851   :  { %12693 = vmatprep.mubr.msk.bf16.mxu1 %vm780_vm4, %v4663_v20  ;;  %12695 = vmatprep.mubr.msk.bf16.mxu0 %vm780_vm4, %v4663_v20  ;;  %v4666_v17 = vpack.c.bf16 %v4653_v19, %v4653_v19  ;;  %v15232_v20 = vld [vmem:[%s20937_s29 + $0x258] ss:$12 sps:$4 sm:$0xff]   ;;  %v15238_v19 = vld [vmem:[%s20937_s29 + $0x3a8] ss:$12 sps:$4 sm:$0xff]  }
 0x852   :  { %5258 = vmatmul.mubr.bf16.vlgmr.msra.gmra.mxu1 %v4662_v39  ;;  %v4655_v16 = vpop.f32.mrf.mxu1 }
 0x853   :  { %13849 = vmatpush3.bf16.msra.mxu1 %v15189_v7  ;;  %5333 = vmatpush1.bf16.msra.mxu0 %v15190_v26  ;;  %v4667_v21 = vpack.c.bf16 %v4655_v16, %v4655_v16  ;;  %v15237_v7 = vld [vmem:[%s20937_s29 + $0x3c4] ss:$12 sps:$4 sm:$0xff]   ;;  %v15235_v26 = vld [vmem:[%s20937_s29 + $0x3c0] ss:$12 sps:$4 sm:$0xff]  }
 0x854   :  { %13850 = vmatprep.subr.bf16.mxu1 %v15191_v27  ;;  %5334 = vmatprep.subr.bf16.mxu0 %v20936_v12  ;;  %v4657_v9 = vpop.f32.mrf.mxu1  ;;  %v15243_v27 = vld [vmem:[%s20937_s29 + $0x394] ss:$12 sps:$4 sm:$0xff]   ;;  %v15241_v16 = vld [vmem:[%s20937_s29 + $0x390] ss:$12 sps:$4 sm:$0xff]  }
 0x855   :  { %12694 = vmatprep.mubr.msk.bf16.mxu1 %vm780_vm4, %v4667_v21  ;;  %v15250_v9 = vld [vmem:[%s20937_s29 + $0x360] ss:$12 sps:$4 sm:$0xff]  }
 0x856   :  { %v4658_v57 = vpop.f32.mrf.mxu1 }
 0x857   :  { %13851 = vmatpush3.bf16.msra.mxu1 %v15192_v30  ;;  %5335 = vmatpush1.bf16.msra.mxu0 %v15193_v62  ;;  %v15246_v30 = vld [vmem:[%s20937_s29 + $0x37c] ss:$12 sps:$4 sm:$0xff]   ;;  %v15247_v62 = vld [vmem:[%s20937_s29 + $0x480] ss:$12 sps:$4 sm:$0xff]  }
 0x858   :  { %13852 = vmatprep.subr.bf16.mxu1 %v15194_v55  ;;  %5336 = vmatprep.subr.bf16.mxu0 %v20936_v12  ;;  %v15249_v55 = vld [vmem:[%s20937_s29 + $0x484] ss:$12 sps:$4 sm:$0xff]   ;;  %v15253_v57 = vld [vmem:[%s20937_s29 + $0x468] ss:$12 sps:$4 sm:$0xff]  }
 0x85a   :  { %5268 = vmatmul.mubr.bf16.gmra.mxu1 %v4666_v17 }
 0x85b   :  { %13853 = vmatpush3.bf16.msra.mxu1 %v15195_v35  ;;  %5337 = vmatpush1.bf16.msra.mxu0 %v15196_v40  ;;  %v15255_v35 = vld [vmem:[%s20937_s29 + $0x46c] ss:$12 sps:$4 sm:$0xff]   ;;  %v15256_v40 = vld [vmem:[%s20937_s29 + $0x348] ss:$12 sps:$4 sm:$0xff]  }
 0x85c   :  { %5308 = vmatprep.mubr.bf16.mxu1 %v4661_v59  ;;  %13854 = vmatprep.subr.bf16.mxu1 %v15197_v47  ;;  %v15210_v59 = vld [vmem:[%s20950_s7 + $0x14] ss:$0 sps:$4 sm:$0x77]   ;;  %v15258_v47 = vld [vmem:[%s20937_s29 + $0x34c] ss:$12 sps:$4 sm:$0xff]  }
 0x85d   :  { %5338 = vmatprep.subr.bf16.mxu0 %v20936_v12 }
 0x85f   :  { %13855 = vmatpush3.bf16.msra.mxu1 %v15198_v42  ;;  %5339 = vmatpush1.bf16.msra.mxu0 %v15199_v48  ;;  %v15259_v42 = vld [vmem:[%s20937_s29 + $0x450] ss:$12 sps:$4 sm:$0xff]   ;;  %v15261_v48 = vld [vmem:[%s20937_s29 + $0x454] ss:$12 sps:$4 sm:$0xff]  }
 0x860   :  { %13856 = vmatprep.subr.bf16.mxu1 %v15200_v34  ;;  %5354 = vmatprep.subr.bf16.mxu0 %v20936_v12  ;;  %v15264_v34 = vld [vmem:[%s20937_s29 + $0x334] ss:$12 sps:$4 sm:$0xff]  }
 0x863   :  { %13857 = vmatpush3.bf16.msra.mxu1 %v15201_v33  ;;  %5355 = vmatpush2.bf16.msra.mxu0 %v15202_v14  ;;  %v15267_v33 = vld [vmem:[%s20937_s29 + $0x43c] ss:$12 sps:$4 sm:$0xff]  }
 0x864   :  { %13858 = vmatprep.subr.bf16.mxu1 %v15203_v37  ;;  %v15262_v14 = vld [vmem:[%s20937_s29 + $0x330] ss:$12 sps:$4 sm:$0xff]   ;;  %v15265_v37 = vld [vmem:[%s20937_s29 + $0x438] ss:$12 sps:$4 sm:$0xff]  }
 0x866   :  { %5357 = vmatmul.mubr.bf16.vlgmr.msra.gmra.mxu0 %v4662_v39  ;;  %v15240_v39 = vld [vmem:[%s20937_s29 + $0x3ac] ss:$12 sps:$4 sm:$0xff]  }
 0x867   :  { %13859 = vmatpush3.bf16.msra.mxu1 %v15204_v23  ;;  %12696 = vmatprep.mubr.msk.bf16.mxu0 %vm780_vm4, %v4667_v21  ;;  %v15244_v21 = vld [vmem:[%s20937_s29 + $0x378] ss:$12 sps:$4 sm:$0xff]   ;;  %v15270_v23 = vld [vmem:[%s20937_s29 + $0x31c] ss:$12 sps:$4 sm:$0xff]  }
 0x868   :  { %13860 = vmatprep.subr.bf16.mxu1 %v15205_v38  ;;  %v15268_v38 = vld [vmem:[%s20937_s29 + $0x318] ss:$12 sps:$4 sm:$0xff]  }
 0x86b   :  { %13861 = vmatpush3.bf16.msra.mxu1 %v15206_v52  ;;  %v15273_v52 = vld [vmem:[%s20937_s29 + $0x424] ss:$12 sps:$4 sm:$0xff]  }
 0x86c   :  { %13862 = vmatprep.subr.bf16.mxu1 %v15207_v13  ;;  %v15271_v13 = vld [vmem:[%s20937_s29 + $0x420] ss:$12 sps:$4 sm:$0xff]  }
 0x86e   :  { %5365 = vmatmul.mubr.bf16.gmra.mxu0 %v4666_v17  ;;  %v15252_v17 = vld [vmem:[%s20937_s29 + $0x364] ss:$12 sps:$4 sm:$0xff]  }
 0x86f   :  { %13863 = vmatpush3.bf16.msra.mxu1 %v15208_v28  ;;  %v15276_v28 = vld [vmem:[%s20937_s29 + $0x40c] ss:$12 sps:$4 sm:$0xff]  }
 0x870   :  { %12702 = vmatprep.subr.msk.bf16.mxu1 %vm4545_vm7, %v18072_v49 }
 0x872   :  { %5309 = vmatmul.mubr.bf16.vlgmr.msra.gmra.mxu1 %v18254_v36  ;;  %v15213_v36 = vld [vmem:[%s20937_s29 + $0x304] ss:$12 sps:$4 sm:$0xff]  }
 0x873   :  { %5316 = vmatprep.mubr.bf16.mxu1 %v18257_v10  ;;  %5410 = vmatpush1.bf16.msra.mxu1 %v18078_v51  ;;  %v15217_v10 = vld [vmem:[%s20937_s29 + $0x2d0] ss:$12 sps:$4 sm:$0xff]  }
 0x874   :  { %5411 = vmatprep.subr.bf16.mxu1 %v18082_v50  ;;  %6018 = vmatprep.subr.bf16.mxu0 %v15213_v36  ;;  %v15284_v36 = vld [vmem:[%s20937_s29 + $0x3dc] ss:$12 sps:$4 sm:$0xff]  }
 0x875   :  { %6019 = vmatpush1.bf16.msra.mxu0 %v15211_v8  ;;  %v15278_v8 = vld [vmem:[%s20937_s29 + $0x3f0] ss:$12 sps:$4 sm:$0xff]  }
 0x876   :  { %6020 = vmatprep.subr.bf16.mxu0 %v15216_v22  ;;  %v15288_v22 = vld [vmem:[%s20937_s29 + $0x49c] ss:$12 sps:$4 sm:$0xff]  }
 0x877   :  { %5412 = vmatpush1.bf16.msra.mxu1 %v18092_v24 }
 0x878   :  { %5413 = vmatprep.subr.bf16.mxu1 %v18095_v31 }
 0x879   :  { %6021 = vmatpush1.bf16.msra.mxu0 %v15214_v3  ;;  %v15282_v3 = vld [vmem:[%s20937_s29 + $0x3d8] ss:$12 sps:$4 sm:$0xff]  }
 0x87a   :  { %5317 = vmatmul.mubr.bf16.gmra.mxu1 %v18267_v56  ;;  %6022 = vmatprep.subr.bf16.mxu0 %v15219_v11  ;;  %v15225_v56 = vld [vmem:[%s20937_s29 + $0x2a4] ss:$12 sps:$4 sm:$0xff]   ;;  %v15290_v11 = vld [vmem:[%s20937_s29 + $0x3c8] ss:$12 sps:$4 sm:$0xff]  }
 0x87b   :  { %5414 = vmatpush1.bf16.msra.mxu1 %v18104_v43  ;;  %5433 = vmatprep.mubr.bf16.mxu1 %v20936_v12 }
 0x87c   :  { %5415 = vmatprep.subr.bf16.mxu1 %v18110_v5 }
 0x87d   :  { %6023 = vmatpush1.bf16.msra.mxu0 %v15217_v10  ;;  %v15286_v10 = vld [vmem:[%s20937_s29 + $0x498] ss:$12 sps:$4 sm:$0xff]  }
 0x87e   :  { %6024 = vmatprep.subr.bf16.mxu0 %v15222_v61 }
 0x87f   :  { %5416 = vmatpush1.bf16.msra.mxu1 %v18122_v29 }
 0x880   :  { %12705 = vmatprep.subr.msk.bf16.mxu1 %vm4545_vm7, %v18125_v41 }
 0x881   :  { %6025 = vmatpush1.bf16.msra.mxu0 %v15220_v46 }
 0x882   :  { %12703 = vmatmul.mubr.msk.bf16.vlgmr.msra.gmra.mxu1 %vm4538_vm8, %v15209_v15  ;;  %6026 = vmatprep.subr.bf16.mxu0 %v15225_v56 }
 0x883   :  { %5461 = vmatpush1.bf16.msra.mxu1 %v18147_v18  ;;  %5443 = vmatprep.mubr.bf16.mxu1 %v20936_v12 }
 0x884   :  { %5462 = vmatprep.subr.bf16.mxu1 %v18141_v58 }
 0x885   :  { %6027 = vmatpush1.bf16.msra.mxu0 %v15223_v32 }
 0x886   :  { %6028 = vmatprep.subr.bf16.mxu0 %v15228_v2 }
 0x887   :  { %5463 = vmatpush1.bf16.msra.mxu1 %v18156_v4 }
 0x888   :  { %5464 = vmatprep.subr.bf16.mxu1 %v18160_v54 }
 0x889   :  { %6029 = vmatpush1.bf16.msra.mxu0 %v15226_v60 }
 0x88a   :  { %12704 = vmatmul.mubr.msk.bf16.gmra.mxu1 %vm4538_vm8, %v15210_v59  ;;  %6030 = vmatprep.subr.bf16.mxu0 %v15231_v44 }
 0x88b   :  { %5465 = vmatpush1.bf16.msra.mxu1 %v18167_v6  ;;  %5484 = vmatprep.mubr.bf16.mxu1 %v20936_v12 }
 0x88c   :  { %5466 = vmatprep.subr.bf16.mxu1 %v18170_v63 }
 0x88d   :  { %6031 = vmatpush1.bf16.msra.mxu0 %v15229_v53 }
 0x88e   :  { %6032 = vmatprep.subr.bf16.mxu0 %v15234_v1 }
 0x88f   :  { %5467 = vmatpush1.bf16.msra.mxu1 %v18178_v45 }
 0x890   :  { %6069 = vmatprep.subr.bf16.mxu1 %v15249_v55 }
 0x891   :  { %6033 = vmatpush1.bf16.msra.mxu0 %v15232_v20 }
 0x892   :  { %12706 = vmatmul.mubr.msk.bf16.vlgmr.msra.gmra.mxu1 %vm4538_vm8, %v15209_v15  ;;  %6034 = vmatprep.subr.bf16.mxu0 %v15237_v7  ;;  %v15274_v15 = vld [vmem:[%s20937_s29 + $0x408] ss:$12 sps:$4 sm:$0xff]  }
 0x893   :  { %5494 = vmatprep.mubr.bf16.mxu1 %v20936_v12  ;;  %6070 = vmatpush1.bf16.msra.mxu1 %v15247_v62 }
 0x894   :  { %6071 = vmatprep.subr.bf16.mxu1 %v15255_v35 }
 0x895   :  { %6035 = vmatpush2.bf16.msra.mxu0 %v15235_v26 }
 0x896   :  { %6036 = vmatprep.subr.bf16.mxu0 %v15240_v39 }
 0x897   :  { %6072 = vmatpush1.bf16.msra.mxu1 %v15253_v57 }
 0x898   :  { %6073 = vmatprep.subr.bf16.mxu1 %v15261_v48 }
 0x899   :  { %6037 = vmatpush2.bf16.msra.mxu0 %v15238_v19 }
 0x89a   :  { %12707 = vmatmul.mubr.msk.bf16.gmra.mxu1 %vm4538_vm8, %v15210_v59  ;;  %6038 = vmatprep.subr.bf16.mxu0 %v15243_v27  ;;  %v15280_v59 = vld [vmem:[%s20937_s29 + $0x3f4] ss:$12 sps:$4 sm:$0xff]  }
 0x89b   :  { %6074 = vmatpush1.bf16.msra.mxu1 %v15259_v42 }
 0x89c   :  { %6075 = vmatprep.subr.bf16.mxu1 %v15267_v33 }
 0x89d   :  { %6039 = vmatpush2.bf16.msra.mxu0 %v15241_v16 }
 0x89e   :  { %6040 = vmatprep.subr.bf16.mxu0 %v15246_v30 }
 0x89f   :  { %6076 = vmatpush1.bf16.msra.mxu1 %v15265_v37 }
 0x8a0   :  { %6077 = vmatprep.subr.bf16.mxu1 %v15273_v52 }
 0x8a1   :  { %6041 = vmatpush2.bf16.msra.mxu0 %v15244_v21 }
 0x8a2   :  { %6042 = vmatprep.subr.bf16.mxu0 %v15252_v17 }
 0x8a3   :  { %6078 = vmatpush1.bf16.msra.mxu1 %v15271_v13 }
 0x8a4   :  { %6079 = vmatprep.subr.bf16.mxu1 %v15276_v28 }
 0x8a5   :  { %6043 = vmatpush2.bf16.msra.mxu0 %v15250_v9 }
 0x8a6   :  { %6044 = vmatprep.subr.bf16.mxu0 %v15258_v47 }
 0x8a7   :  { %6080 = vmatpush1.bf16.msra.mxu1 %v15274_v15 }
 0x8a8   :  { %6081 = vmatprep.subr.bf16.mxu1 %v15280_v59 }
 0x8a9   :  { %6045 = vmatpush2.bf16.msra.mxu0 %v15256_v40 }
 0x8aa   :  { %6046 = vmatprep.subr.bf16.mxu0 %v15264_v34 }
 0x8ab   :  { %6082 = vmatpush1.bf16.msra.mxu1 %v15278_v8 }
 0x8ac   :  { %6083 = vmatprep.subr.bf16.mxu1 %v15284_v36 }
 0x8ad   :  { %6047 = vmatpush2.bf16.msra.mxu0 %v15262_v14 }
 0x8ae   :  { %6048 = vmatprep.subr.bf16.mxu0 %v15270_v23 }
 0x8af   :  { %6084 = vmatpush1.bf16.msra.mxu1 %v15282_v3 }
 0x8b0   :  { %6099 = vmatprep.subr.bf16.mxu1 %v15288_v22 }
 0x8b1   :  { %6049 = vmatpush2.bf16.msra.mxu0 %v15268_v38 }
 0x8b2   :  { %6168 = vmatprep.subr.bf16.mxu0 %v20936_v12 }
 0x8b3   :  { %6100 = vmatpush2.bf16.msra.mxu1 %v15286_v10 }
 0x8b4   :  { %13876 = vmatprep.subr.bf16.mxu1 %v15290_v11 }
 0x902   :  { %v5208_v46 = vpop.f32.mrf.mxu0 }
 0x904   :  { %v18533_v61 = vpop.f32.mrf.mxu0 }
 0x906   :  { %v5212_v32 = vpop.f32.mrf.mxu0 }
 0x908   :  { %v18535_v56 = vpop.f32.mrf.mxu0 }
 0x90a   :  { %v5218_v2 = vpop.f32.mrf.mxu0 }
 0x90c   :  { %v5220_v60 = vpop.f32.mrf.mxu0 }
 0x90e   :  { %v5222_v44 = vpop.f32.mrf.mxu0 }
 0x910   :  { %v5223_v53 = vpop.f32.mrf.mxu0 }
 0x912   :  { %v5259_v1 = vpop.f32.mrf.mxu1 }
 0x913   :  { %v18537_v20 = vadd.f32 %v5259_v1, %v5208_v46 }
 0x914   :  { %v18539_v7 = vpop.f32.mrf.mxu1 }
 0x916   :  { %v5263_v26 = vpop.f32.mrf.mxu1 }
 0x917   :  { %v18541_v39 = vadd.f32 %v5263_v26, %v5212_v32  ;;  %v15281_v26 = vld [vmem:[%s20937_s29 + $0x470] ss:$12 sps:$4 sm:$0xff]  }
 0x918   :  { %v18543_v19 = vpop.f32.mrf.mxu1 }
 0x91a   :  { %v5269_v27 = vpop.f32.mrf.mxu1 }
 0x91b   :  { %v5270_v16 = vadd.f32 %v5269_v27, %v5218_v2  ;;  %v15277_v2 = vld [vmem:[%s20937_s29 + $0x488] ss:$12 sps:$4 sm:$0xff]  }
 0x91c   :  { %v5271_v21 = vpop.f32.mrf.mxu1 }
 0x91d   :  { %5379 = vst [vmem:[#allocation3 + $0x30] sm:$0x3f] %v5270_v16  ;;  %v5272_v30 = vadd.f32 %v5271_v21, %v5220_v60  ;;  %v15285_v21 = vld [vmem:[%s20937_s29 + $0x458] ss:$12 sps:$4 sm:$0xff]  }
 0x91e   :  { %v5273_v62 = vpop.f32.mrf.mxu1 }
 0x91f   :  { %5380 = vst [vmem:[#allocation3 + $0x38] sm:$0x3f] %v5272_v30 }
 0x920   :  { %v5274_v55 = vpop.f32.mrf.mxu1 }
 0x926   :  { %v5358_v9 = vpop.f32.mrf.mxu0 }
 0x928   :  { %v5360_v17 = vpop.f32.mrf.mxu0 }
 0x92a   :  { %v5361_v57 = vpop.f32.mrf.mxu0 }
 0x92c   :  { %v5363_v35 = vpop.f32.mrf.mxu0 }
 0x92e   :  { %v5366_v40 = vpop.f32.mrf.mxu0 }
 0x930   :  { %v5368_v47 = vpop.f32.mrf.mxu0 }
 0x931   :  { %v15292_v47 = vld [vmem:[%s20937_s29 + $0x428] ss:$12 sps:$4 sm:$0xff]  }
 0x932   :  { %v13864_v42 = vpop.f32.mrf.mxu1  ;;  %v5369_v48 = vpop.f32.mrf.mxu0 }
 0x934   :  { %v13865_v34 = vpop.f32.mrf.mxu1  ;;  %v5370_v33 = vpop.f32.mrf.mxu0 }
 0x935   :  { %v13866_v14 = vadd.f32 %v13865_v34, %v13864_v42  ;;  %v15293_v34 = vld [vmem:[%s20937_s29 + $0x3b0] ss:$12 sps:$4 sm:$0xff]  }
 0x936   :  { %v13867_v37 = vpop.f32.mrf.mxu1 }
 0x937   :  { %v5359_v23 = vadd.f32 %v13866_v14, %v5358_v9  ;;  %v15289_v9 = vld [vmem:[%s20937_s29 + $0x440] ss:$12 sps:$4 sm:$0xff]  }
 0x938   :  { %v13868_v38 = vpop.f32.mrf.mxu1 }
 0x939   :  { %5375 = vst.msk [vmem:[#allocation3 + $0x10] sm:$0xff] %vm5374_vm9, %v5359_v23  ;;  %v13869_v52 = vadd.f32 %v13868_v38, %v13867_v37  ;;  %v15294_v37 = vld [vmem:[%s20937_s29 + $0x2f0] ss:$12 sps:$4 sm:$0xff]   ;;  %v15296_v38 = vld [vmem:[%s20937_s29 + $0x398] ss:$12 sps:$4 sm:$0xff]  }
 0x93a   :  { %v13870_v13 = vpop.f32.mrf.mxu1  ;;  %v15295_v23 = vld [vmem:[%s20937_s29 + $0x410] ss:$12 sps:$4 sm:$0xff]  }
 0x93b   :  { %v5362_v28 = vadd.f32 %v13869_v52, %v5361_v57 }
 0x93c   :  { %v13871_v15 = vpop.f32.mrf.mxu1 }
 0x93d   :  { %5378 = vst.msk [vmem:[#allocation3 + $0x28] sm:$0xff] %vm5374_vm9, %v5362_v28  ;;  %v13872_v59 = vadd.f32 %v13871_v15, %v13870_v13  ;;  %v15297_v15 = vld [vmem:[%s20937_s29 + $0x2d8] ss:$12 sps:$4 sm:$0xff]  }
 0x93e   :  { %v13873_v8 = vpop.f32.mrf.mxu1 }
 0x93f   :  { %v5367_v36 = vadd.f32 %v13872_v59, %v5366_v40  ;;  %v15291_v40 = vld [vmem:[%s20937_s29 + $0x308] ss:$12 sps:$4 sm:$0xff]   ;;  %v15298_v59 = vld [vmem:[%s20937_s29 + $0x3f8] ss:$12 sps:$4 sm:$0xff]   ;;  %v15299_v8 = vld [vmem:[%s20937_s29 + $0x380] ss:$12 sps:$4 sm:$0xff]  }
 0x940   :  { %v13874_v3 = vpop.f32.mrf.mxu1 }
 0x941   :  { %5382 = vst.msk [vmem:[#allocation3 + $0x40] sm:$0x3f] %vm5381_vm10, %v5367_v36  ;;  %v15300_v36 = vld [vmem:[%s20937_s29 + $0x2c0] ss:$12 sps:$4 sm:$0xff]  }
 0x942   :  { %v5435_v22 = vpop.f32.mrf.mxu1  ;;  %v15301_v3 = vld [vmem:[%s20937_s29 + $0x3e0] ss:$12 sps:$4 sm:$0xff]  }
 0x944   :  { %v5437_v10 = vpop.f32.mrf.mxu1 }
 0x946   :  { %v5439_v11 = vpop.f32.mrf.mxu1 }
 0x947   :  { %v18551_v60 = vpack.c.bf16 %v5439_v11, %v5435_v22  ;;  %v15302_v22 = vld [vmem:[%s20937_s29 + $0x368] ss:$12 sps:$4 sm:$0xff]   ;;  %v15304_v11 = vld [vmem:[%s20937_s29 + $0x4a0] ss:$12 sps:$4 sm:$0xff]  }
 0x948   :  { %v5441_v46 = vpop.f32.mrf.mxu1 }
 0x949   :  { %v5504_v32 = vpack.c.bf16 %v5441_v46, %v5437_v10  ;;  %v15303_v10 = vld [vmem:[%s20937_s29 + $0x2a8] ss:$12 sps:$4 sm:$0xff]   ;;  %v15305_v46 = vld [vmem:[%s20937_s29 + $0x350] ss:$12 sps:$4 sm:$0xff]  }
 0x94a   :  { %v5445_v44 = vpop.f32.mrf.mxu1 }
 0x94b   :  { %6050 = vmatprep.mubr.bf16.mxu0 %v5504_v32  ;;  %v18564_v30 = vpack.c.bf16 %v5445_v44, %v5445_v44  ;;  %v15308_v44 = vld [vmem:[%s20937_s29 + $0x278] ss:$12 sps:$4 sm:$0xff]  }
 0x94c   :  { %v5447_v53 = vpop.f32.mrf.mxu1  ;;  %6051 = vmatmul.mubr.bf16.vlgmr.msra.gmra.mxu0 %v18551_v60 }
 0x94d   :  { %v18554_v1 = vpack.c.bf16 %v5447_v53, %v5447_v53  ;;  %6169 = vmatpush1.bf16.msra.mxu0 %v15277_v2  ;;  %v15307_v2 = vld [vmem:[%s20937_s29 + $0x338] ss:$12 sps:$4 sm:$0xff]   ;;  %v15309_v53 = vld [vmem:[%s20937_s29 + $0x320] ss:$12 sps:$4 sm:$0xff]  }
 0x94e   :  { %v5449_v27 = vpop.f32.mrf.mxu1  ;;  %6170 = vmatprep.subr.bf16.mxu0 %v20936_v12 }
 0x94f   :  { %6060 = vmatprep.mubr.bf16.mxu0 %v18554_v1  ;;  %v15313_v27 = vld [vmem:[%s20937_s29 + $0x558] ss:$12 sps:$4 sm:$0xff]  }
 0x950   :  { %v5450_v16 = vpop.f32.mrf.mxu1 }
 0x951   :  { %6171 = vmatpush1.bf16.msra.mxu0 %v15281_v26  ;;  %v15310_v26 = vld [vmem:[%s20937_s29 + $0x260] ss:$12 sps:$4 sm:$0xff]   ;;  %v15315_v16 = vld [vmem:[%s20937_s29 + $0x55c] ss:$12 sps:$4 sm:$0xff]  }
 0x952   :  { %v5486_v62 = vpop.f32.mrf.mxu1  ;;  %6172 = vmatprep.subr.bf16.mxu0 %v20936_v12 }
 0x954   :  { %v5488_v55 = vpop.f32.mrf.mxu1  ;;  %6061 = vmatmul.mubr.bf16.gmra.mxu0 %v18564_v30 }
 0x955   :  { %6173 = vmatpush1.bf16.msra.mxu0 %v15285_v21  ;;  %v15316_v21 = vld [vmem:[%s20937_s29 + $0x540] ss:$12 sps:$4 sm:$0xff]  }
 0x956   :  { %v5490_v17 = vpop.f32.mrf.mxu1  ;;  %6174 = vmatprep.subr.bf16.mxu0 %v20936_v12 }
 0x957   :  { %v5505_v42 = vpack.c.bf16 %v5490_v17, %v5486_v62  ;;  %v15319_v62 = vld [vmem:[%s20937_s29 + $0x528] ss:$12 sps:$4 sm:$0xff]  }
 0x958   :  { %v5492_v57 = vpop.f32.mrf.mxu1  ;;  %v15324_v17 = vld [vmem:[%s20937_s29 + $0x514] ss:$12 sps:$4 sm:$0xff]  }
 0x959   :  { %v5506_v35 = vpack.c.bf16 %v5492_v57, %v5488_v55  ;;  %6175 = vmatpush1.bf16.msra.mxu0 %v15289_v9  ;;  %v15321_v55 = vld [vmem:[%s20937_s29 + $0x52c] ss:$12 sps:$4 sm:$0xff]   ;;  %v15322_v9 = vld [vmem:[%s20937_s29 + $0x510] ss:$12 sps:$4 sm:$0xff]  }
 0x95a   :  { %6176 = vmatprep.subr.bf16.mxu0 %v20936_v12  ;;  %v5496_v48 = vpop.f32.mrf.mxu1  ;;  %v15325_v57 = vld [vmem:[%s20937_s29 + $0x4f8] ss:$12 sps:$4 sm:$0xff]  }
 0x95b   :  { %12883 = vmatprep.mubr.msk.bf16.mxu1 %vm780_vm4, %v5506_v35  ;;  %12885 = vmatprep.mubr.msk.bf16.mxu0 %vm780_vm4, %v5506_v35  ;;  %v5509_v13 = vpack.c.bf16 %v5496_v48, %v5496_v48  ;;  %v15327_v35 = vld [vmem:[%s20937_s29 + $0x4fc] ss:$12 sps:$4 sm:$0xff]  }
 0x95c   :  { %6102 = vmatmul.mubr.bf16.vlgmr.msra.gmra.mxu1 %v5505_v42  ;;  %v5498_v33 = vpop.f32.mrf.mxu1  ;;  %v15331_v48 = vld [vmem:[%s20937_s29 + $0x4c8] ss:$12 sps:$4 sm:$0xff]  }
 0x95d   :  { %13877 = vmatpush3.bf16.msra.mxu1 %v15291_v40  ;;  %6177 = vmatpush1.bf16.msra.mxu0 %v15292_v47  ;;  %v5510_v14 = vpack.c.bf16 %v5498_v33, %v5498_v33  ;;  %v15330_v40 = vld [vmem:[%s20937_s29 + $0x4e4] ss:$12 sps:$4 sm:$0xff]   ;;  %v15328_v47 = vld [vmem:[%s20937_s29 + $0x4e0] ss:$12 sps:$4 sm:$0xff]  }
 0x95e   :  { %13878 = vmatprep.subr.bf16.mxu1 %v15293_v34  ;;  %6178 = vmatprep.subr.bf16.mxu0 %v20936_v12  ;;  %v5500_v52 = vpop.f32.mrf.mxu1  ;;  %v15336_v34 = vld [vmem:[%s20937_s29 + $0x4b4] ss:$12 sps:$4 sm:$0xff]   ;;  %v15334_v33 = vld [vmem:[%s20937_s29 + $0x4b0] ss:$12 sps:$4 sm:$0xff]  }
 0x95f   :  { %12884 = vmatprep.mubr.msk.bf16.mxu1 %vm780_vm4, %v5510_v14  ;;  %v15345_v52 = vld [vmem:[%s20937_s29 + $0x5ec] ss:$12 sps:$4 sm:$0xff]  }
 0x960   :  { %v5501_v28 = vpop.f32.mrf.mxu1 }
 0x961   :  { %13879 = vmatpush3.bf16.msra.mxu1 %v15294_v37  ;;  %6179 = vmatpush1.bf16.msra.mxu0 %v15295_v23  ;;  %v15337_v37 = vld [vmem:[%s20937_s29 + $0x618] ss:$12 sps:$4 sm:$0xff]   ;;  %v15346_v28 = vld [vmem:[%s20937_s29 + $0x5d0] ss:$12 sps:$4 sm:$0xff]  }
 0x962   :  { %13880 = vmatprep.subr.bf16.mxu1 %v15296_v38  ;;  %6180 = vmatprep.subr.bf16.mxu0 %v20936_v12  ;;  %v15342_v23 = vld [vmem:[%s20937_s29 + $0x604] ss:$12 sps:$4 sm:$0xff]   ;;  %v15340_v38 = vld [vmem:[%s20937_s29 + $0x600] ss:$12 sps:$4 sm:$0xff]  }
 0x964   :  { %6112 = vmatmul.mubr.bf16.gmra.mxu1 %v5509_v13 }
 0x965   :  { %13881 = vmatpush3.bf16.msra.mxu1 %v15297_v15  ;;  %6181 = vmatpush1.bf16.msra.mxu0 %v15298_v59  ;;  %v15348_v15 = vld [vmem:[%s20937_s29 + $0x5d4] ss:$12 sps:$4 sm:$0xff]   ;;  %v15349_v59 = vld [vmem:[%s20937_s29 + $0x6d8] ss:$12 sps:$4 sm:$0xff]  }
 0x966   :  { %6152 = vmatprep.mubr.bf16.mxu1 %v5504_v32  ;;  %13882 = vmatprep.subr.bf16.mxu1 %v15299_v8  ;;  %v15306_v32 = vld [vmem:[%s20937_s29 + $0x290] ss:$12 sps:$4 sm:$0xff]  }
 0x967   :  { %6182 = vmatprep.subr.bf16.mxu0 %v20936_v12  ;;  %v15351_v8 = vld [vmem:[%s20937_s29 + $0x6dc] ss:$12 sps:$4 sm:$0xff]  }
 0x969   :  { %13883 = vmatpush3.bf16.msra.mxu1 %v15300_v36  ;;  %6183 = vmatpush1.bf16.msra.mxu0 %v15301_v3  ;;  %v15352_v36 = vld [vmem:[%s20937_s29 + $0x5b8] ss:$12 sps:$4 sm:$0xff]   ;;  %v15354_v3 = vld [vmem:[%s20937_s29 + $0x5bc] ss:$12 sps:$4 sm:$0xff]  }
 0x96a   :  { %13884 = vmatprep.subr.bf16.mxu1 %v15302_v22  ;;  %6198 = vmatprep.subr.bf16.mxu0 %v20936_v12  ;;  %v15355_v22 = vld [vmem:[%s20937_s29 + $0x6c0] ss:$12 sps:$4 sm:$0xff]  }
 0x96d   :  { %13885 = vmatpush3.bf16.msra.mxu1 %v15303_v10  ;;  %6199 = vmatpush2.bf16.msra.mxu0 %v15304_v11  ;;  %v15357_v10 = vld [vmem:[%s20937_s29 + $0x6c4] ss:$12 sps:$4 sm:$0xff]   ;;  %v15358_v11 = vld [vmem:[%s20937_s29 + $0x5a0] ss:$12 sps:$4 sm:$0xff]  }
 0x96e   :  { %13886 = vmatprep.subr.bf16.mxu1 %v15305_v46  ;;  %6878 = vmatprep.subr.bf16.mxu0 %v15315_v16  ;;  %v15360_v46 = vld [vmem:[%s20937_s29 + $0x5a4] ss:$12 sps:$4 sm:$0xff]  }
 0x96f   :  { %v15370_v16 = vld [vmem:[%s20937_s29 + $0x570] ss:$12 sps:$4 sm:$0xff]  }
 0x970   :  { %6201 = vmatmul.mubr.bf16.vlgmr.msra.gmra.mxu0 %v5505_v42  ;;  %v15333_v42 = vld [vmem:[%s20937_s29 + $0x4cc] ss:$12 sps:$4 sm:$0xff]  }
 0x971   :  { %13887 = vmatpush3.bf16.msra.mxu1 %v15306_v32  ;;  %12886 = vmatprep.mubr.msk.bf16.mxu0 %vm780_vm4, %v5510_v14  ;;  %v15339_v14 = vld [vmem:[%s20937_s29 + $0x61c] ss:$12 sps:$4 sm:$0xff]  }
 0x972   :  { %13888 = vmatprep.subr.bf16.mxu1 %v15307_v2  ;;  %6879 = vmatpush1.bf16.msra.mxu0 %v15313_v27  ;;  %v15361_v32 = vld [vmem:[%s20937_s29 + $0x6a8] ss:$12 sps:$4 sm:$0xff]   ;;  %v15363_v2 = vld [vmem:[%s20937_s29 + $0x6ac] ss:$12 sps:$4 sm:$0xff]  }
 0x973   :  { %v15375_v27 = vld [vmem:[%s20937_s29 + $0x67c] ss:$12 sps:$4 sm:$0xff]  }
 0x975   :  { %13889 = vmatpush3.bf16.msra.mxu1 %v15308_v44  ;;  %v15366_v44 = vld [vmem:[%s20937_s29 + $0x58c] ss:$12 sps:$4 sm:$0xff]  }
 0x976   :  { %13890 = vmatprep.subr.bf16.mxu1 %v15309_v53  ;;  %v15369_v53 = vld [vmem:[%s20937_s29 + $0x694] ss:$12 sps:$4 sm:$0xff]  }
 0x978   :  { %6209 = vmatmul.mubr.bf16.gmra.mxu0 %v5509_v13  ;;  %v15343_v13 = vld [vmem:[%s20937_s29 + $0x5e8] ss:$12 sps:$4 sm:$0xff]  }
 0x979   :  { %13891 = vmatpush3.bf16.msra.mxu1 %v15310_v26  ;;  %v15364_v26 = vld [vmem:[%s20937_s29 + $0x588] ss:$12 sps:$4 sm:$0xff]  }
 0x97a   :  { %12892 = vmatprep.subr.msk.bf16.mxu1 %vm4545_vm7, %v18072_v49 }
 0x97c   :  { %6153 = vmatmul.mubr.bf16.vlgmr.msra.gmra.mxu1 %v18551_v60  ;;  %v15311_v60 = vld [vmem:[%s20950_s7 + $0x18] sm:$0xff]  }
 0x97d   :  { %6160 = vmatprep.mubr.bf16.mxu1 %v18554_v1  ;;  %6270 = vmatpush1.bf16.msra.mxu1 %v18078_v51  ;;  %v15312_v1 = vld [vmem:[%s20950_s7 + $0x20] ss:$0 sps:$4 sm:$0x77]  }
 0x97e   :  { %6271 = vmatprep.subr.bf16.mxu1 %v18082_v50 }
 0x981   :  { %6272 = vmatpush1.bf16.msra.mxu1 %v18092_v24 }
 0x982   :  { %6273 = vmatprep.subr.bf16.mxu1 %v18095_v31 }
 0x984   :  { %6161 = vmatmul.mubr.bf16.gmra.mxu1 %v18564_v30  ;;  %v15318_v30 = vld [vmem:[%s20937_s29 + $0x544] ss:$12 sps:$4 sm:$0xff]  }
 0x985   :  { %6274 = vmatpush1.bf16.msra.mxu1 %v18104_v43  ;;  %6293 = vmatprep.mubr.bf16.mxu1 %v20936_v12 }
 0x986   :  { %6275 = vmatprep.subr.bf16.mxu1 %v18110_v5  ;;  %6880 = vmatprep.subr.bf16.mxu0 %v15318_v30  ;;  %v15378_v30 = vld [vmem:[%s20937_s29 + $0x664] ss:$12 sps:$4 sm:$0xff]  }
 0x987   :  { %6881 = vmatpush1.bf16.msra.mxu0 %v15316_v21  ;;  %v15373_v21 = vld [vmem:[%s20937_s29 + $0x678] ss:$12 sps:$4 sm:$0xff]  }
 0x988   :  { %6882 = vmatprep.subr.bf16.mxu0 %v15321_v55  ;;  %v15382_v55 = vld [vmem:[%s20937_s29 + $0x64c] ss:$12 sps:$4 sm:$0xff]  }
 0x989   :  { %6276 = vmatpush1.bf16.msra.mxu1 %v18122_v29 }
 0x98a   :  { %12895 = vmatprep.subr.msk.bf16.mxu1 %vm4545_vm7, %v18125_v41 }
 0x98b   :  { %6883 = vmatpush1.bf16.msra.mxu0 %v15319_v62  ;;  %v15376_v62 = vld [vmem:[%s20937_s29 + $0x660] ss:$12 sps:$4 sm:$0xff]  }
 0x98c   :  { %12893 = vmatmul.mubr.msk.bf16.vlgmr.msra.gmra.mxu1 %vm4538_vm8, %v15311_v60  ;;  %6884 = vmatprep.subr.bf16.mxu0 %v15324_v17  ;;  %v15386_v17 = vld [vmem:[%s20937_s29 + $0x634] ss:$12 sps:$4 sm:$0xff]  }
 0x98d   :  { %6321 = vmatpush1.bf16.msra.mxu1 %v18147_v18  ;;  %6303 = vmatprep.mubr.bf16.mxu1 %v20936_v12 }
 0x98e   :  { %6322 = vmatprep.subr.bf16.mxu1 %v18141_v58 }
 0x98f   :  { %6885 = vmatpush1.bf16.msra.mxu0 %v15322_v9  ;;  %v15380_v9 = vld [vmem:[%s20937_s29 + $0x648] ss:$12 sps:$4 sm:$0xff]  }
 0x990   :  { %6886 = vmatprep.subr.bf16.mxu0 %v15327_v35  ;;  %v15390_v35 = vld [vmem:[%s20937_s29 + $0x6f4] ss:$12 sps:$4 sm:$0xff]  }
 0x991   :  { %6323 = vmatpush1.bf16.msra.mxu1 %v18156_v4 }
 0x992   :  { %6324 = vmatprep.subr.bf16.mxu1 %v18160_v54 }
 0x993   :  { %6887 = vmatpush1.bf16.msra.mxu0 %v15325_v57  ;;  %v15384_v57 = vld [vmem:[%s20937_s29 + $0x630] ss:$12 sps:$4 sm:$0xff]  }
 0x994   :  { %12894 = vmatmul.mubr.msk.bf16.gmra.mxu1 %vm4538_vm8, %v15312_v1  ;;  %6888 = vmatprep.subr.bf16.mxu0 %v15330_v40  ;;  %v15388_v40 = vld [vmem:[%s20937_s29 + $0x6f0] ss:$12 sps:$4 sm:$0xff]  }
 0x995   :  { %6325 = vmatpush1.bf16.msra.mxu1 %v18167_v6  ;;  %6344 = vmatprep.mubr.bf16.mxu1 %v20936_v12 }
 0x996   :  { %6326 = vmatprep.subr.bf16.mxu1 %v18170_v63 }
 0x997   :  { %6889 = vmatpush1.bf16.msra.mxu0 %v15328_v47  ;;  %v15392_v47 = vld [vmem:[%s20937_s29 + $0x620] ss:$12 sps:$4 sm:$0xff]  }
 0x998   :  { %6890 = vmatprep.subr.bf16.mxu0 %v15333_v42 }
 0x999   :  { %6327 = vmatpush1.bf16.msra.mxu1 %v18178_v45 }
 0x99a   :  { %6929 = vmatprep.subr.bf16.mxu1 %v15351_v8 }
 0x99b   :  { %6891 = vmatpush1.bf16.msra.mxu0 %v15331_v48 }
 0x99c   :  { %12896 = vmatmul.mubr.msk.bf16.vlgmr.msra.gmra.mxu1 %vm4538_vm8, %v15311_v60  ;;  %6892 = vmatprep.subr.bf16.mxu0 %v15336_v34  ;;  %v15367_v60 = vld [vmem:[%s20937_s29 + $0x690] ss:$12 sps:$4 sm:$0xff]  }
 0x99d   :  { %6354 = vmatprep.mubr.bf16.mxu1 %v20936_v12  ;;  %6930 = vmatpush1.bf16.msra.mxu1 %v15349_v59 }
 0x99e   :  { %6931 = vmatprep.subr.bf16.mxu1 %v15357_v10 }
 0x99f   :  { %6893 = vmatpush1.bf16.msra.mxu0 %v15334_v33 }
 0x9a0   :  { %6894 = vmatprep.subr.bf16.mxu0 %v15339_v14 }
 0x9a1   :  { %6932 = vmatpush1.bf16.msra.mxu1 %v15355_v22 }
 0x9a2   :  { %6933 = vmatprep.subr.bf16.mxu1 %v15363_v2 }
 0x9a3   :  { %6895 = vmatpush2.bf16.msra.mxu0 %v15337_v37 }
 0x9a4   :  { %12897 = vmatmul.mubr.msk.bf16.gmra.mxu1 %vm4538_vm8, %v15312_v1  ;;  %6896 = vmatprep.subr.bf16.mxu0 %v15342_v23  ;;  %v15372_v1 = vld [vmem:[%s20937_s29 + $0x574] ss:$12 sps:$4 sm:$0xff]  }
 0x9a5   :  { %6934 = vmatpush1.bf16.msra.mxu1 %v15361_v32 }
 0x9a6   :  { %6935 = vmatprep.subr.bf16.mxu1 %v15369_v53 }
 0x9a7   :  { %6897 = vmatpush2.bf16.msra.mxu0 %v15340_v38 }
 0x9a8   :  { %6898 = vmatprep.subr.bf16.mxu0 %v15345_v52 }
 0x9a9   :  { %6936 = vmatpush1.bf16.msra.mxu1 %v15367_v60 }
 0x9aa   :  { %6937 = vmatprep.subr.bf16.mxu1 %v15375_v27 }
 0x9ab   :  { %6899 = vmatpush2.bf16.msra.mxu0 %v15343_v13 }
 0x9ac   :  { %6900 = vmatprep.subr.bf16.mxu0 %v15348_v15 }
 0x9ad   :  { %6938 = vmatpush1.bf16.msra.mxu1 %v15373_v21 }
 0x9ae   :  { %6939 = vmatprep.subr.bf16.mxu1 %v15378_v30 }
 0x9af   :  { %6901 = vmatpush2.bf16.msra.mxu0 %v15346_v28 }
 0x9b0   :  { %6902 = vmatprep.subr.bf16.mxu0 %v15354_v3 }
 0x9b1   :  { %6940 = vmatpush1.bf16.msra.mxu1 %v15376_v62 }
 0x9b2   :  { %6941 = vmatprep.subr.bf16.mxu1 %v15382_v55 }
 0x9b3   :  { %6903 = vmatpush2.bf16.msra.mxu0 %v15352_v36 }
 0x9b4   :  { %6904 = vmatprep.subr.bf16.mxu0 %v15360_v46 }
 0x9b5   :  { %6942 = vmatpush1.bf16.msra.mxu1 %v15380_v9 }
 0x9b6   :  { %6943 = vmatprep.subr.bf16.mxu1 %v15386_v17 }
 0x9b7   :  { %6905 = vmatpush2.bf16.msra.mxu0 %v15358_v11  ;;  %v6222_v11 = vld [vmem:[#allocation3 + $0x30] sm:$0x3f] }
 0x9b8   :  { %6906 = vmatprep.subr.bf16.mxu0 %v15366_v44  ;;  %v6223_v44 = vld [vmem:[#allocation3 + $0x38] sm:$0x3f] }
 0x9b9   :  { %6944 = vmatpush1.bf16.msra.mxu1 %v15384_v57 }
 0x9ba   :  { %6959 = vmatprep.subr.bf16.mxu1 %v15390_v35 }
 0x9bb   :  { %6907 = vmatpush2.bf16.msra.mxu0 %v15364_v26 }
 0x9bc   :  { %6908 = vmatprep.subr.bf16.mxu0 %v15372_v1 }
 0x9bd   :  { %6960 = vmatpush2.bf16.msra.mxu1 %v15388_v40  ;;  %v6218_v40 = vld [vmem:[#allocation3 + $0x10] sm:$0xff] }
 0x9be   :  { %13904 = vmatprep.subr.bf16.mxu1 %v15392_v47 }
 0x9bf   :  { %6909 = vmatpush2.bf16.msra.mxu0 %v15370_v16 }
 0x9c0   :  { %7028 = vmatprep.subr.bf16.mxu0 %v20936_v12 }
 0xa0c   :  { %v6052_v42 = vpop.f32.mrf.mxu0 }
 0xa0e   :  { %v18830_v48 = vpop.f32.mrf.mxu0 }
 0xa10   :  { %v6056_v34 = vpop.f32.mrf.mxu0 }
 0xa12   :  { %v18832_v33 = vpop.f32.mrf.mxu0 }
 0xa14   :  { %v6062_v14 = vpop.f32.mrf.mxu0 }
 0xa16   :  { %v6064_v37 = vpop.f32.mrf.mxu0 }
 0xa18   :  { %v6066_v23 = vpop.f32.mrf.mxu0 }
 0xa19   :  { %v6221_v23 = vld [vmem:[#allocation3 + $0x28] sm:$0xff] }
 0xa1a   :  { %v6067_v38 = vpop.f32.mrf.mxu0 }
 0xa1c   :  { %v6103_v52 = vpop.f32.mrf.mxu1 }
 0xa1d   :  { %v6104_v13 = vadd.f32 %v6103_v52, %v6052_v42 }
 0xa1e   :  { %v18834_v28 = vpop.f32.mrf.mxu1 }
 0xa1f   :  { %v18837_v15 = vadd.f32 %v6104_v13, %v18537_v20 }
 0xa20   :  { %v6107_v59 = vpop.f32.mrf.mxu1 }
 0xa21   :  { %v6108_v8 = vadd.f32 %v6107_v59, %v6056_v34 }
 0xa22   :  { %v18839_v36 = vpop.f32.mrf.mxu1 }
 0xa23   :  { %v18842_v3 = vadd.f32 %v6108_v8, %v18541_v39 }
 0xa24   :  { %v6113_v22 = vpop.f32.mrf.mxu1 }
 0xa25   :  { %v6114_v10 = vadd.f32 %v6113_v22, %v6062_v14  ;;  %v6224_v22 = vld [vmem:[#allocation3 + $0x40] sm:$0x3f] }
 0xa26   :  { %v6115_v46 = vpop.f32.mrf.mxu1 }
 0xa27   :  { %v6231_v32 = vadd.f32 %v6222_v11, %v6114_v10  ;;  %v6116_v2 = vadd.f32 %v6115_v46, %v6064_v37 }
 0xa28   :  { %v6117_v53 = vpop.f32.mrf.mxu1 }
 0xa29   :  { %6240 = vst [vmem:[#allocation3 + $0x30] sm:$0x3f] %v6231_v32  ;;  %v6232_v26 = vadd.f32 %v6223_v44, %v6116_v2 }
 0xa2a   :  { %v6118_v60 = vpop.f32.mrf.mxu1 }
 0xa2b   :  { %6241 = vst [vmem:[#allocation3 + $0x38] sm:$0x3f] %v6232_v26  ;;  %v15379_v26 = vld [vmem:[%s20937_s29 + $0x6e0] ss:$12 sps:$4 sm:$0xff]  }
 0xa30   :  { %v6202_v20 = vpop.f32.mrf.mxu0 }
 0xa32   :  { %v6204_v1 = vpop.f32.mrf.mxu0 }
 0xa34   :  { %v6205_v27 = vpop.f32.mrf.mxu0 }
 0xa36   :  { %v6207_v16 = vpop.f32.mrf.mxu0 }
 0xa37   :  { %v15383_v16 = vld [vmem:[%s20937_s29 + $0x6c8] ss:$12 sps:$4 sm:$0xff]  }
 0xa38   :  { %v6210_v21 = vpop.f32.mrf.mxu0 }
 0xa3a   :  { %v6212_v30 = vpop.f32.mrf.mxu0 }
 0xa3c   :  { %v13892_v39 = vpop.f32.mrf.mxu1  ;;  %v6213_v62 = vpop.f32.mrf.mxu0 }
 0xa3e   :  { %v13893_v55 = vpop.f32.mrf.mxu1  ;;  %v6214_v9 = vpop.f32.mrf.mxu0 }
 0xa3f   :  { %v13894_v17 = vadd.f32 %v13893_v55, %v13892_v39  ;;  %v15387_v39 = vld [vmem:[%s20937_s29 + $0x6b0] ss:$12 sps:$4 sm:$0xff]  }
 0xa40   :  { %v13895_v57 = vpop.f32.mrf.mxu1 }
 0xa41   :  { %v6203_v35 = vadd.f32 %v13894_v17, %v6202_v20  ;;  %v15391_v17 = vld [vmem:[%s20937_s29 + $0x698] ss:$12 sps:$4 sm:$0xff]  }
 0xa42   :  { %v13896_v47 = vpop.f32.mrf.mxu1 }
 0xa43   :  { %v6227_v42 = vadd.f32 %v6218_v40, %v6203_v35  ;;  %v13897_v34 = vadd.f32 %v13896_v47, %v13895_v57  ;;  %v15393_v47 = vld [vmem:[%s20937_s29 + $0x560] ss:$12 sps:$4 sm:$0xff]  }
 0xa44   :  { %v13898_v14 = vpop.f32.mrf.mxu1 }
 0xa45   :  { %6236 = vst.msk [vmem:[#allocation3 + $0x10] sm:$0xff] %vm5374_vm9, %v6227_v42  ;;  %v6206_v37 = vadd.f32 %v13897_v34, %v6205_v27  ;;  %v15394_v42 = vld [vmem:[%s20937_s29 + $0x680] ss:$12 sps:$4 sm:$0xff]  }
 0xa46   :  { %v13899_v38 = vpop.f32.mrf.mxu1 }
 0xa47   :  { %v6230_v52 = vadd.f32 %v6221_v23, %v6206_v37  ;;  %v13900_v13 = vadd.f32 %v13899_v38, %v13898_v14  ;;  %v15395_v37 = vld [vmem:[%s20937_s29 + $0x608] ss:$12 sps:$4 sm:$0xff]  }
 0xa48   :  { %v13901_v59 = vpop.f32.mrf.mxu1 }
 0xa49   :  { %6239 = vst.msk [vmem:[#allocation3 + $0x28] sm:$0xff] %vm5374_vm9, %v6230_v52  ;;  %v6211_v8 = vadd.f32 %v13900_v13, %v6210_v21  ;;  %v15396_v52 = vld [vmem:[%s20937_s29 + $0x548] ss:$12 sps:$4 sm:$0xff]   ;;  %v15398_v59 = vld [vmem:[%s20937_s29 + $0x5f0] ss:$12 sps:$4 sm:$0xff]  }
 0xa4a   :  { %v13902_v10 = vpop.f32.mrf.mxu1  ;;  %v15397_v13 = vld [vmem:[%s20937_s29 + $0x668] ss:$12 sps:$4 sm:$0xff]  }
 0xa4b   :  { %v6233_v11 = vadd.f32 %v6224_v22, %v6211_v8 }
 0xa4c   :  { %v6295_v46 = vpop.f32.mrf.mxu1 }
 0xa4d   :  { %6242 = vst.msk [vmem:[#allocation3 + $0x40] sm:$0x3f] %vm5381_vm10, %v6233_v11  ;;  %v15399_v11 = vld [vmem:[%s20937_s29 + $0x530] ss:$12 sps:$4 sm:$0xff]  }
 0xa4e   :  { %v6297_v32 = vpop.f32.mrf.mxu1 }
 0xa50   :  { %v6299_v2 = vpop.f32.mrf.mxu1 }
 0xa51   :  { %v18850_v60 = vpack.c.bf16 %v6299_v2, %v6295_v46  ;;  %v15400_v46 = vld [vmem:[%s20937_s29 + $0x650] ss:$12 sps:$4 sm:$0xff]   ;;  %v15402_v2 = vld [vmem:[%s20937_s29 + $0x518] ss:$12 sps:$4 sm:$0xff]  }
 0xa52   :  { %v6301_v44 = vpop.f32.mrf.mxu1 }
 0xa53   :  { %v6364_v53 = vpack.c.bf16 %v6301_v44, %v6297_v32  ;;  %v15401_v32 = vld [vmem:[%s20937_s29 + $0x5d8] ss:$12 sps:$4 sm:$0xff]  }
 0xa54   :  { %v6305_v20 = vpop.f32.mrf.mxu1  ;;  %v15403_v44 = vld [vmem:[%s20937_s29 + $0x638] ss:$12 sps:$4 sm:$0xff]  }
 0xa55   :  { %6910 = vmatprep.mubr.bf16.mxu0 %v6364_v53  ;;  %v18863_v62 = vpack.c.bf16 %v6305_v20, %v6305_v20  ;;  %v15405_v20 = vld [vmem:[%s20937_s29 + $0x500] ss:$12 sps:$4 sm:$0xff]  }
 0xa56   :  { %v6307_v1 = vpop.f32.mrf.mxu1  ;;  %6911 = vmatmul.mubr.bf16.vlgmr.msra.gmra.mxu0 %v18850_v60 }
 0xa57   :  { %v18853_v27 = vpack.c.bf16 %v6307_v1, %v6307_v1  ;;  %7029 = vmatpush1.bf16.msra.mxu0 %v15379_v26  ;;  %v15404_v26 = vld [vmem:[%s20937_s29 + $0x5c0] ss:$12 sps:$4 sm:$0xff]   ;;  %v15406_v1 = vld [vmem:[%s20937_s29 + $0x6f8] ss:$12 sps:$4 sm:$0xff]  }
 0xa58   :  { %v6309_v21 = vpop.f32.mrf.mxu1  ;;  %7030 = vmatprep.subr.bf16.mxu0 %v20936_v12 }
 0xa59   :  { %6920 = vmatprep.mubr.bf16.mxu0 %v18853_v27  ;;  %v15409_v21 = vld [vmem:[%s20937_s29 + $0x590] ss:$12 sps:$4 sm:$0xff]  }
 0xa5a   :  { %v6310_v30 = vpop.f32.mrf.mxu1 }
 0xa5b   :  { %7031 = vmatpush1.bf16.msra.mxu0 %v15383_v16  ;;  %v15408_v16 = vld [vmem:[%s20937_s29 + $0x4e8] ss:$12 sps:$4 sm:$0xff]   ;;  %v15410_v30 = vld [vmem:[%s20937_s29 + $0x4d0] ss:$12 sps:$4 sm:$0xff]  }
 0xa5c   :  { %v6346_v55 = vpop.f32.mrf.mxu1  ;;  %7032 = vmatprep.subr.bf16.mxu0 %v20936_v12 }
 0xa5e   :  { %v6348_v9 = vpop.f32.mrf.mxu1  ;;  %6921 = vmatmul.mubr.bf16.gmra.mxu0 %v18863_v62 }
 0xa5f   :  { %7033 = vmatpush1.bf16.msra.mxu0 %v15387_v39  ;;  %v15411_v39 = vld [vmem:[%s20937_s29 + $0x578] ss:$12 sps:$4 sm:$0xff]  }
 0xa60   :  { %v6350_v57 = vpop.f32.mrf.mxu1  ;;  %7034 = vmatprep.subr.bf16.mxu0 %v20936_v12 }
 0xa61   :  { %v6365_v34 = vpack.c.bf16 %v6350_v57, %v6346_v55  ;;  %v15412_v55 = vld [vmem:[%s20937_s29 + $0x4b8] ss:$12 sps:$4 sm:$0xff]   ;;  %v15420_v57 = vld [vmem:[%s20937_s29 + $0x79c] ss:$12 sps:$4 sm:$0xff]  }
 0xa62   :  { %v6352_v35 = vpop.f32.mrf.mxu1 }
 0xa63   :  { %v6366_v40 = vpack.c.bf16 %v6352_v35, %v6348_v9  ;;  %7035 = vmatpush1.bf16.msra.mxu0 %v15391_v17  ;;  %v15417_v9 = vld [vmem:[%s20937_s29 + $0x7b4] ss:$12 sps:$4 sm:$0xff]   ;;  %v15418_v17 = vld [vmem:[%s20937_s29 + $0x798] ss:$12 sps:$4 sm:$0xff]  }
 0xa64   :  { %7036 = vmatprep.subr.bf16.mxu0 %v20936_v12  ;;  %v6356_v14 = vpop.f32.mrf.mxu1  ;;  %v15421_v35 = vld [vmem:[%s20937_s29 + $0x780] ss:$12 sps:$4 sm:$0xff]  }
 0xa65   :  { %13073 = vmatprep.mubr.msk.bf16.mxu1 %vm780_vm4, %v6366_v40  ;;  %13075 = vmatprep.mubr.msk.bf16.mxu0 %vm780_vm4, %v6366_v40  ;;  %v6369_v22 = vpack.c.bf16 %v6356_v14, %v6356_v14  ;;  %v15423_v40 = vld [vmem:[%s20937_s29 + $0x784] ss:$12 sps:$4 sm:$0xff]   ;;  %v15429_v14 = vld [vmem:[%s20937_s29 + $0x754] ss:$12 sps:$4 sm:$0xff]  }
 0xa66   :  { %6962 = vmatmul.mubr.bf16.vlgmr.msra.gmra.mxu1 %v6365_v34  ;;  %v6358_v23 = vpop.f32.mrf.mxu1 }
 0xa67   :  { %13905 = vmatpush3.bf16.msra.mxu1 %v15393_v47  ;;  %7037 = vmatpush1.bf16.msra.mxu0 %v15394_v42  ;;  %v6370_v38 = vpack.c.bf16 %v6358_v23, %v6358_v23  ;;  %v15424_v47 = vld [vmem:[%s20937_s29 + $0x768] ss:$12 sps:$4 sm:$0xff]   ;;  %v15426_v42 = vld [vmem:[%s20937_s29 + $0x76c] ss:$12 sps:$4 sm:$0xff]  }
 0xa68   :  { %13906 = vmatprep.subr.bf16.mxu1 %v15395_v37  ;;  %7038 = vmatprep.subr.bf16.mxu0 %v20936_v12  ;;  %v6360_v8 = vpop.f32.mrf.mxu1  ;;  %v15432_v37 = vld [vmem:[%s20937_s29 + $0x73c] ss:$12 sps:$4 sm:$0xff]   ;;  %v15430_v23 = vld [vmem:[%s20937_s29 + $0x738] ss:$12 sps:$4 sm:$0xff]  }
 0xa69   :  { %13074 = vmatprep.mubr.msk.bf16.mxu1 %vm780_vm4, %v6370_v38  ;;  %v15441_v8 = vld [vmem:[%s20937_s29 + $0x874] ss:$12 sps:$4 sm:$0xff]  }
 0xa6a   :  { %v6361_v10 = vpop.f32.mrf.mxu1 }
 0xa6b   :  { %13907 = vmatpush3.bf16.msra.mxu1 %v15396_v52  ;;  %7039 = vmatpush1.bf16.msra.mxu0 %v15397_v13  ;;  %v15433_v52 = vld [vmem:[%s20937_s29 + $0x720] ss:$12 sps:$4 sm:$0xff]   ;;  %v15444_v10 = vld [vmem:[%s20937_s29 + $0x85c] ss:$12 sps:$4 sm:$0xff]  }
 0xa6c   :  { %13908 = vmatprep.subr.bf16.mxu1 %v15398_v59  ;;  %7040 = vmatprep.subr.bf16.mxu0 %v20936_v12  ;;  %v15438_v13 = vld [vmem:[%s20937_s29 + $0x70c] ss:$12 sps:$4 sm:$0xff]   ;;  %v15436_v59 = vld [vmem:[%s20937_s29 + $0x708] ss:$12 sps:$4 sm:$0xff]  }
 0xa6e   :  { %6972 = vmatmul.mubr.bf16.gmra.mxu1 %v6369_v22 }
 0xa6f   :  { %13909 = vmatpush3.bf16.msra.mxu1 %v15399_v11  ;;  %7041 = vmatpush1.bf16.msra.mxu0 %v15400_v46  ;;  %v15442_v11 = vld [vmem:[%s20937_s29 + $0x858] ss:$12 sps:$4 sm:$0xff]  }
 0xa70   :  { %7012 = vmatprep.mubr.bf16.mxu1 %v6364_v53  ;;  %13910 = vmatprep.subr.bf16.mxu1 %v15401_v32  ;;  %v15407_v53 = vld [vmem:[%s20937_s29 + $0x5a8] ss:$12 sps:$4 sm:$0xff]   ;;  %v15447_v46 = vld [vmem:[%s20937_s29 + $0x844] ss:$12 sps:$4 sm:$0xff]   ;;  %v15445_v32 = vld [vmem:[%s20937_s29 + $0x840] ss:$12 sps:$4 sm:$0xff]  }
 0xa71   :  { %7042 = vmatprep.subr.bf16.mxu0 %v20936_v12 }
 0xa73   :  { %13911 = vmatpush3.bf16.msra.mxu1 %v15402_v2  ;;  %7043 = vmatpush1.bf16.msra.mxu0 %v15403_v44  ;;  %v15448_v2 = vld [vmem:[%s20937_s29 + $0x828] ss:$12 sps:$4 sm:$0xff]   ;;  %v15450_v44 = vld [vmem:[%s20937_s29 + $0x82c] ss:$12 sps:$4 sm:$0xff]  }
 0xa74   :  { %13912 = vmatprep.subr.bf16.mxu1 %v15404_v26  ;;  %7058 = vmatprep.subr.bf16.mxu0 %v20936_v12  ;;  %v15451_v26 = vld [vmem:[%s20937_s29 + $0x930] ss:$12 sps:$4 sm:$0xff]  }
 0xa77   :  { %13913 = vmatpush3.bf16.msra.mxu1 %v15405_v20  ;;  %7059 = vmatpush2.bf16.msra.mxu0 %v15406_v1  ;;  %v15453_v20 = vld [vmem:[%s20937_s29 + $0x934] ss:$12 sps:$4 sm:$0xff]   ;;  %v15454_v1 = vld [vmem:[%s20937_s29 + $0x810] ss:$12 sps:$4 sm:$0xff]  }
 0xa78   :  { %13914 = vmatprep.subr.bf16.mxu1 %v15407_v53  ;;  %7738 = vmatprep.subr.bf16.mxu0 %v15417_v9  ;;  %v15456_v53 = vld [vmem:[%s20937_s29 + $0x814] ss:$12 sps:$4 sm:$0xff]  }
 0xa79   :  { %v15466_v9 = vld [vmem:[%s20937_s29 + $0x7e0] ss:$12 sps:$4 sm:$0xff]  }
 0xa7a   :  { %7061 = vmatmul.mubr.bf16.vlgmr.msra.gmra.mxu0 %v6365_v34  ;;  %v15427_v34 = vld [vmem:[%s20937_s29 + $0x750] ss:$12 sps:$4 sm:$0xff]  }
 0xa7b   :  { %13915 = vmatpush3.bf16.msra.mxu1 %v15408_v16  ;;  %13076 = vmatprep.mubr.msk.bf16.mxu0 %vm780_vm4, %v6370_v38  ;;  %v15435_v38 = vld [vmem:[%s20937_s29 + $0x724] ss:$12 sps:$4 sm:$0xff]  }
 0xa7c   :  { %13916 = vmatprep.subr.bf16.mxu1 %v15409_v21  ;;  %v15457_v16 = vld [vmem:[%s20937_s29 + $0x918] ss:$12 sps:$4 sm:$0xff]   ;;  %v15459_v21 = vld [vmem:[%s20937_s29 + $0x91c] ss:$12 sps:$4 sm:$0xff]  }
 0xa7f   :  { %13917 = vmatpush3.bf16.msra.mxu1 %v15410_v30  ;;  %v15460_v30 = vld [vmem:[%s20937_s29 + $0x7f8] ss:$12 sps:$4 sm:$0xff]  }
 0xa80   :  { %13918 = vmatprep.subr.bf16.mxu1 %v15411_v39  ;;  %v15462_v39 = vld [vmem:[%s20937_s29 + $0x7fc] ss:$12 sps:$4 sm:$0xff]  }
 0xa82   :  { %7069 = vmatmul.mubr.bf16.gmra.mxu0 %v6369_v22  ;;  %v15439_v22 = vld [vmem:[%s20937_s29 + $0x870] ss:$12 sps:$4 sm:$0xff]  }
 0xa83   :  { %13919 = vmatpush3.bf16.msra.mxu1 %v15412_v55  ;;  %v15463_v55 = vld [vmem:[%s20937_s29 + $0x900] ss:$12 sps:$4 sm:$0xff]  }
 0xa84   :  { %13082 = vmatprep.subr.msk.bf16.mxu1 %vm4545_vm7, %v18072_v49 }
 0xa86   :  { %7013 = vmatmul.mubr.bf16.vlgmr.msra.gmra.mxu1 %v18850_v60  ;;  %v15413_v60 = vld [vmem:[%s20950_s7 + $0x24] sm:$0xff]  }
 0xa87   :  { %7020 = vmatprep.mubr.bf16.mxu1 %v18853_v27  ;;  %7130 = vmatpush1.bf16.msra.mxu1 %v18078_v51  ;;  %v15414_v27 = vld [vmem:[%s20950_s7 + $0x2c] ss:$0 sps:$4 sm:$0x77]  }
 0xa88   :  { %7131 = vmatprep.subr.bf16.mxu1 %v18082_v50 }
 0xa8b   :  { %7132 = vmatpush1.bf16.msra.mxu1 %v18092_v24 }
 0xa8c   :  { %7133 = vmatprep.subr.bf16.mxu1 %v18095_v31 }
 0xa8e   :  { %7021 = vmatmul.mubr.bf16.gmra.mxu1 %v18863_v62  ;;  %v15415_v62 = vld [vmem:[%s20937_s29 + $0x7b0] ss:$12 sps:$4 sm:$0xff]  }
 0xa8f   :  { %7134 = vmatpush1.bf16.msra.mxu1 %v18104_v43  ;;  %7153 = vmatprep.mubr.bf16.mxu1 %v20936_v12 }
 0xa90   :  { %7135 = vmatprep.subr.bf16.mxu1 %v18110_v5  ;;  %7739 = vmatpush1.bf16.msra.mxu0 %v15415_v62  ;;  %v15471_v62 = vld [vmem:[%s20937_s29 + $0x8ec] ss:$12 sps:$4 sm:$0xff]  }
 0xa91   :  { %7740 = vmatprep.subr.bf16.mxu0 %v15420_v57  ;;  %v15474_v57 = vld [vmem:[%s20937_s29 + $0x7cc] ss:$12 sps:$4 sm:$0xff]  }
 0xa93   :  { %7136 = vmatpush1.bf16.msra.mxu1 %v18122_v29 }
 0xa94   :  { %13085 = vmatprep.subr.msk.bf16.mxu1 %vm4545_vm7, %v18125_v41  ;;  %7741 = vmatpush1.bf16.msra.mxu0 %v15418_v17  ;;  %v15469_v17 = vld [vmem:[%s20937_s29 + $0x8e8] ss:$12 sps:$4 sm:$0xff]  }
 0xa95   :  { %7742 = vmatprep.subr.bf16.mxu0 %v15423_v40  ;;  %v15472_v40 = vld [vmem:[%s20937_s29 + $0x7c8] ss:$12 sps:$4 sm:$0xff]  }
 0xa96   :  { %13083 = vmatmul.mubr.msk.bf16.vlgmr.msra.gmra.mxu1 %vm4538_vm8, %v15413_v60 }
 0xa97   :  { %7181 = vmatpush1.bf16.msra.mxu1 %v18147_v18  ;;  %7163 = vmatprep.mubr.bf16.mxu1 %v20936_v12 }
 0xa98   :  { %7182 = vmatprep.subr.bf16.mxu1 %v18141_v58  ;;  %7743 = vmatpush1.bf16.msra.mxu0 %v15421_v35  ;;  %v15477_v35 = vld [vmem:[%s20937_s29 + $0x8d4] ss:$12 sps:$4 sm:$0xff]  }
 0xa99   :  { %7744 = vmatprep.subr.bf16.mxu0 %v15426_v42  ;;  %v15480_v42 = vld [vmem:[%s20937_s29 + $0x8bc] ss:$12 sps:$4 sm:$0xff]  }
 0xa9b   :  { %7183 = vmatpush1.bf16.msra.mxu1 %v18156_v4 }
 0xa9c   :  { %7184 = vmatprep.subr.bf16.mxu1 %v18160_v54  ;;  %7745 = vmatpush1.bf16.msra.mxu0 %v15424_v47  ;;  %v15475_v47 = vld [vmem:[%s20937_s29 + $0x8d0] ss:$12 sps:$4 sm:$0xff]  }
 0xa9d   :  { %7746 = vmatprep.subr.bf16.mxu0 %v15429_v14  ;;  %v15484_v14 = vld [vmem:[%s20937_s29 + $0x8a4] ss:$12 sps:$4 sm:$0xff]  }
 0xa9e   :  { %13084 = vmatmul.mubr.msk.bf16.gmra.mxu1 %vm4538_vm8, %v15414_v27 }
 0xa9f   :  { %7185 = vmatpush1.bf16.msra.mxu1 %v18167_v6  ;;  %7204 = vmatprep.mubr.bf16.mxu1 %v20936_v12 }
 0xaa0   :  { %7186 = vmatprep.subr.bf16.mxu1 %v18170_v63  ;;  %7747 = vmatpush1.bf16.msra.mxu0 %v15427_v34  ;;  %v15478_v34 = vld [vmem:[%s20937_s29 + $0x8b8] ss:$12 sps:$4 sm:$0xff]  }
 0xaa1   :  { %7748 = vmatprep.subr.bf16.mxu0 %v15432_v37  ;;  %v15482_v37 = vld [vmem:[%s20937_s29 + $0x8a0] ss:$12 sps:$4 sm:$0xff]  }
 0xaa3   :  { %7187 = vmatpush1.bf16.msra.mxu1 %v18178_v45 }
 0xaa4   :  { %7749 = vmatpush1.bf16.msra.mxu0 %v15430_v23  ;;  %7789 = vmatprep.subr.bf16.mxu1 %v15453_v20  ;;  %v15488_v23 = vld [vmem:[%s20937_s29 + $0x88c] ss:$12 sps:$4 sm:$0xff]  }
 0xaa5   :  { %7750 = vmatprep.subr.bf16.mxu0 %v15435_v38  ;;  %v15486_v38 = vld [vmem:[%s20937_s29 + $0x888] ss:$12 sps:$4 sm:$0xff]  }
 0xaa6   :  { %13086 = vmatmul.mubr.msk.bf16.vlgmr.msra.gmra.mxu1 %vm4538_vm8, %v15413_v60  ;;  %v15465_v60 = vld [vmem:[%s20937_s29 + $0x904] ss:$12 sps:$4 sm:$0xff]  }
 0xaa7   :  { %7214 = vmatprep.mubr.bf16.mxu1 %v20936_v12  ;;  %7790 = vmatpush1.bf16.msra.mxu1 %v15451_v26  ;;  %v6106_v26 = vadd.f32 %v18834_v28, %v18830_v48 }
 0xaa8   :  { %7751 = vmatpush1.bf16.msra.mxu0 %v15433_v52  ;;  %7791 = vmatprep.subr.bf16.mxu1 %v15459_v21  ;;  %v15492_v52 = vld [vmem:[%s20937_s29 + $0x94c] ss:$12 sps:$4 sm:$0xff]  }
 0xaa9   :  { %7752 = vmatprep.subr.bf16.mxu0 %v15438_v13  ;;  %v15490_v13 = vld [vmem:[%s20937_s29 + $0x948] ss:$12 sps:$4 sm:$0xff]  }
 0xaab   :  { %7792 = vmatpush1.bf16.msra.mxu1 %v15457_v16 }
 0xaac   :  { %7753 = vmatpush1.bf16.msra.mxu0 %v15436_v59  ;;  %7793 = vmatprep.subr.bf16.mxu1 %v15465_v60  ;;  %v15494_v59 = vld [vmem:[%s20937_s29 + $0x878] ss:$12 sps:$4 sm:$0xff]  }
 0xaad   :  { %7754 = vmatprep.subr.bf16.mxu0 %v15441_v8 }
 0xaae   :  { %13087 = vmatmul.mubr.msk.bf16.gmra.mxu1 %vm4538_vm8, %v15414_v27  ;;  %v15468_v27 = vld [vmem:[%s20937_s29 + $0x7e4] ss:$12 sps:$4 sm:$0xff]  }
 0xaaf   :  { %7794 = vmatpush1.bf16.msra.mxu1 %v15463_v55 }
 0xab0   :  { %7755 = vmatpush2.bf16.msra.mxu0 %v15439_v22  ;;  %7795 = vmatprep.subr.bf16.mxu1 %v15471_v62 }
 0xab1   :  { %7756 = vmatprep.subr.bf16.mxu0 %v15444_v10 }
 0xab3   :  { %7796 = vmatpush1.bf16.msra.mxu1 %v15469_v17 }
 0xab4   :  { %7757 = vmatpush2.bf16.msra.mxu0 %v15442_v11  ;;  %7797 = vmatprep.subr.bf16.mxu1 %v15477_v35 }
 0xab5   :  { %7758 = vmatprep.subr.bf16.mxu0 %v15447_v46 }
 0xab7   :  { %7798 = vmatpush1.bf16.msra.mxu1 %v15475_v47  ;;  %v7083_v47 = vld [vmem:[#allocation3 + $0x38] sm:$0x3f] }
 0xab8   :  { %7759 = vmatpush2.bf16.msra.mxu0 %v15445_v32  ;;  %7799 = vmatprep.subr.bf16.mxu1 %v15480_v42 }
 0xab9   :  { %7760 = vmatprep.subr.bf16.mxu0 %v15450_v44 }
 0xabb   :  { %7800 = vmatpush1.bf16.msra.mxu1 %v15478_v34 }
 0xabc   :  { %7761 = vmatpush2.bf16.msra.mxu0 %v15448_v2  ;;  %7801 = vmatprep.subr.bf16.mxu1 %v15484_v14 }
 0xabd   :  { %7762 = vmatprep.subr.bf16.mxu0 %v15456_v53 }
 0xabf   :  { %7802 = vmatpush1.bf16.msra.mxu1 %v15482_v37 }
 0xac0   :  { %7763 = vmatpush2.bf16.msra.mxu0 %v15454_v1  ;;  %7803 = vmatprep.subr.bf16.mxu1 %v15488_v23  ;;  %v5262_v1 = vadd.f32 %v18539_v7, %v18533_v61 }
 0xac1   :  { %7764 = vmatprep.subr.bf16.mxu0 %v15462_v39 }
 0xac2   :  { %v6226_v21 = vadd.f32 %v6106_v26, %v5262_v1  ;;  %v7081_v1 = vld [vmem:[#allocation3 + $0x28] sm:$0xff] }
 0xac3   :  { %7804 = vmatpush1.bf16.msra.mxu1 %v15486_v38 }
 0xac4   :  { %7765 = vmatpush2.bf16.msra.mxu0 %v15460_v30  ;;  %7819 = vmatprep.subr.bf16.mxu1 %v15492_v52  ;;  %v6110_v30 = vadd.f32 %v18839_v36, %v18832_v33 }
 0xac5   :  { %7766 = vmatprep.subr.bf16.mxu0 %v15468_v27  ;;  %v5266_v27 = vadd.f32 %v18543_v19, %v18535_v56 }
 0xac7   :  { %7820 = vmatpush2.bf16.msra.mxu1 %v15490_v13 }
 0xac8   :  { %7767 = vmatpush2.bf16.msra.mxu0 %v15466_v9  ;;  %13932 = vmatprep.subr.bf16.mxu1 %v15494_v59  ;;  %v6229_v9 = vadd.f32 %v6110_v30, %v5266_v27 }
 0xac9   :  { %7768 = vmatprep.subr.bf16.mxu0 %v15474_v57 }
 0xacc   :  { %7769 = vmatpush2.bf16.msra.mxu0 %v15472_v40 }
 0xacd   :  { %7888 = vmatprep.subr.bf16.mxu0 %v20936_v12 }
 0xb16   :  { %v6912_v8 = vpop.f32.mrf.mxu0 }
 0xb18   :  { %v6914_v22 = vpop.f32.mrf.mxu0 }
 0xb1a   :  { %v6916_v10 = vpop.f32.mrf.mxu0 }
 0xb1c   :  { %v6918_v11 = vpop.f32.mrf.mxu0 }
 0xb1e   :  { %v6922_v46 = vpop.f32.mrf.mxu0 }
 0xb20   :  { %v6924_v32 = vpop.f32.mrf.mxu0 }
 0xb22   :  { %v6926_v2 = vpop.f32.mrf.mxu0 }
 0xb24   :  { %v6927_v44 = vpop.f32.mrf.mxu0 }
 0xb26   :  { %v6963_v20 = vpop.f32.mrf.mxu1 }
 0xb27   :  { %v6964_v53 = vadd.f32 %v6963_v20, %v6912_v8 }
 0xb28   :  { %v6965_v16 = vpop.f32.mrf.mxu1 }
 0xb29   :  { %v19136_v39 = vadd.f32 %v6964_v53, %v18837_v15  ;;  %v6966_v55 = vadd.f32 %v6965_v16, %v6914_v22  ;;  %v7082_v15 = vld [vmem:[#allocation3 + $0x30] sm:$0x3f] }
 0xb2a   :  { %v6967_v60 = vpop.f32.mrf.mxu1 }
 0xb2b   :  { %v19140_v62 = vadd.f32 %v6966_v55, %v6226_v21  ;;  %v6968_v48 = vadd.f32 %v6967_v60, %v6916_v10  ;;  %v7084_v60 = vld [vmem:[#allocation3 + $0x40] sm:$0x3f] }
 0xb2c   :  { %v6969_v28 = vpop.f32.mrf.mxu1 }
 0xb2d   :  { %v19143_v61 = vadd.f32 %v6968_v48, %v18842_v3  ;;  %v6970_v7 = vadd.f32 %v6969_v28, %v6918_v11 }
 0xb2e   :  { %v6973_v17 = vpop.f32.mrf.mxu1 }
 0xb2f   :  { %v19145_v57 = vadd.f32 %v6970_v7, %v6229_v9  ;;  %v6974_v33 = vadd.f32 %v6973_v17, %v6922_v46  ;;  %v7078_v46 = vld [vmem:[#allocation3 + $0x10] sm:$0xff] }
 0xb30   :  { %v6975_v36 = vpop.f32.mrf.mxu1 }
 0xb31   :  { %v7091_v35 = vadd.f32 %v7082_v15, %v6974_v33  ;;  %v6976_v40 = vadd.f32 %v6975_v36, %v6924_v32  ;;  %v15481_v15 = vld [vmem:[%s20937_s29 + $0x938] ss:$12 sps:$4 sm:$0xff]  }
 0xb32   :  { %v6977_v42 = vpop.f32.mrf.mxu1 }
 0xb33   :  { %7100 = vst [vmem:[#allocation3 + $0x30] sm:$0x3f] %v7091_v35  ;;  %v7092_v56 = vadd.f32 %v7083_v47, %v6976_v40  ;;  %v15485_v42 = vld [vmem:[%s20937_s29 + $0x920] ss:$12 sps:$4 sm:$0xff]  }
 0xb34   :  { %v6978_v19 = vpop.f32.mrf.mxu1 }
 0xb35   :  { %7101 = vst [vmem:[#allocation3 + $0x38] sm:$0x3f] %v7092_v56 }
 0xb3a   :  { %v7062_v34 = vpop.f32.mrf.mxu0 }
 0xb3c   :  { %v7064_v14 = vpop.f32.mrf.mxu0 }
 0xb3e   :  { %v7065_v37 = vpop.f32.mrf.mxu0 }
 0xb40   :  { %v7067_v3 = vpop.f32.mrf.mxu0 }
 0xb42   :  { %v7070_v23 = vpop.f32.mrf.mxu0 }
 0xb44   :  { %v7072_v38 = vpop.f32.mrf.mxu0 }
 0xb46   :  { %v13920_v52 = vpop.f32.mrf.mxu1  ;;  %v7073_v13 = vpop.f32.mrf.mxu0 }
 0xb48   :  { %v13921_v59 = vpop.f32.mrf.mxu1  ;;  %v7074_v8 = vpop.f32.mrf.mxu0 }
 0xb49   :  { %v13922_v22 = vadd.f32 %v13921_v59, %v13920_v52  ;;  %v15495_v59 = vld [vmem:[%s20937_s29 + $0x7b8] ss:$12 sps:$4 sm:$0xff]  }
 0xb4a   :  { %v13923_v10 = vpop.f32.mrf.mxu1  ;;  %v15496_v8 = vld [vmem:[%s20937_s29 + $0x8d8] ss:$12 sps:$4 sm:$0xff]  }
 0xb4b   :  { %v7063_v11 = vadd.f32 %v13922_v22, %v7062_v34  ;;  %v15489_v34 = vld [vmem:[%s20937_s29 + $0x908] ss:$12 sps:$4 sm:$0xff]  }
 0xb4c   :  { %v13924_v32 = vpop.f32.mrf.mxu1 }
 0xb4d   :  { %v7087_v2 = vadd.f32 %v7078_v46, %v7063_v11  ;;  %v13925_v44 = vadd.f32 %v13924_v32, %v13923_v10  ;;  %v15497_v11 = vld [vmem:[%s20937_s29 + $0x860] ss:$12 sps:$4 sm:$0xff]  }
 0xb4e   :  { %v13926_v26 = vpop.f32.mrf.mxu1 }
 0xb4f   :  { %7096 = vst.msk [vmem:[#allocation3 + $0x10] sm:$0xff] %vm5374_vm9, %v7087_v2  ;;  %v7066_v20 = vadd.f32 %v13925_v44, %v7065_v37  ;;  %v15498_v2 = vld [vmem:[%s20937_s29 + $0x7a0] ss:$12 sps:$4 sm:$0xff]  }
 0xb50   :  { %v13927_v53 = vpop.f32.mrf.mxu1  ;;  %v15499_v44 = vld [vmem:[%s20937_s29 + $0x8c0] ss:$12 sps:$4 sm:$0xff]  }
 0xb51   :  { %v7090_v16 = vadd.f32 %v7081_v1, %v7066_v20  ;;  %v13928_v21 = vadd.f32 %v13927_v53, %v13926_v26  ;;  %v15500_v26 = vld [vmem:[%s20937_s29 + $0x848] ss:$12 sps:$4 sm:$0xff]  }
 0xb52   :  { %v13929_v30 = vpop.f32.mrf.mxu1 }
 0xb53   :  { %7099 = vst.msk [vmem:[#allocation3 + $0x28] sm:$0xff] %vm5374_vm9, %v7090_v16  ;;  %v7071_v55 = vadd.f32 %v13928_v21, %v7070_v23  ;;  %v15493_v23 = vld [vmem:[%s20937_s29 + $0x8f0] ss:$12 sps:$4 sm:$0xff]   ;;  %v15501_v16 = vld [vmem:[%s20937_s29 + $0x788] ss:$12 sps:$4 sm:$0xff]  }
 0xb54   :  { %v13930_v27 = vpop.f32.mrf.mxu1  ;;  %v15502_v21 = vld [vmem:[%s20937_s29 + $0x8a8] ss:$12 sps:$4 sm:$0xff]   ;;  %v15503_v30 = vld [vmem:[%s20937_s29 + $0x830] ss:$12 sps:$4 sm:$0xff]  }
 0xb55   :  { %v7093_v48 = vadd.f32 %v7084_v60, %v7071_v55  ;;  %v15504_v55 = vld [vmem:[%s20937_s29 + $0x770] ss:$12 sps:$4 sm:$0xff]   ;;  %v15506_v27 = vld [vmem:[%s20937_s29 + $0x818] ss:$12 sps:$4 sm:$0xff]  }
 0xb56   :  { %v7155_v28 = vpop.f32.mrf.mxu1  ;;  %v15505_v60 = vld [vmem:[%s20937_s29 + $0x890] ss:$12 sps:$4 sm:$0xff]  }
 0xb57   :  { %7102 = vst.msk [vmem:[#allocation3 + $0x40] sm:$0x3f] %vm5381_vm10, %v7093_v48  ;;  %v15507_v48 = vld [vmem:[%s20937_s29 + $0x758] ss:$12 sps:$4 sm:$0xff]  }
 0xb58   :  { %v7157_v9 = vpop.f32.mrf.mxu1 }
 0xb5a   :  { %v7159_v7 = vpop.f32.mrf.mxu1 }
 0xb5b   :  { %v19153_v36 = vpack.c.bf16 %v7159_v7, %v7155_v28  ;;  %v15508_v28 = vld [vmem:[%s20937_s29 + $0x950] ss:$12 sps:$4 sm:$0xff]   ;;  %v15510_v7 = vld [vmem:[%s20937_s29 + $0x740] ss:$12 sps:$4 sm:$0xff]  }
 0xb5c   :  { %v7161_v17 = vpop.f32.mrf.mxu1 }
 0xb5d   :  { %v7224_v33 = vpack.c.bf16 %v7161_v17, %v7157_v9  ;;  %v15509_v9 = vld [vmem:[%s20937_s29 + $0x800] ss:$12 sps:$4 sm:$0xff]   ;;  %v15511_v17 = vld [vmem:[%s20937_s29 + $0x7e8] ss:$12 sps:$4 sm:$0xff]  }
 0xb5e   :  { %v7165_v35 = vpop.f32.mrf.mxu1 }
 0xb5f   :  { %7770 = vmatprep.mubr.bf16.mxu0 %v7224_v33  ;;  %v19166_v14 = vpack.c.bf16 %v7165_v35, %v7165_v35  ;;  %v15514_v35 = vld [vmem:[%s20937_s29 + $0x710] ss:$12 sps:$4 sm:$0xff]  }
 0xb60   :  { %v7167_v40 = vpop.f32.mrf.mxu1  ;;  %7771 = vmatmul.mubr.bf16.vlgmr.msra.gmra.mxu0 %v19153_v36 }
 0xb61   :  { %v19156_v47 = vpack.c.bf16 %v7167_v40, %v7167_v40  ;;  %7889 = vmatpush1.bf16.msra.mxu0 %v15481_v15  ;;  %v15513_v15 = vld [vmem:[%s20937_s29 + $0x7d0] ss:$12 sps:$4 sm:$0xff]   ;;  %v15538_v40 = vld [vmem:[%s20937_s29 + $0x960] ss:$12 sps:$4 sm:$0xff]  }
 0xb62   :  { %v7169_v56 = vpop.f32.mrf.mxu1  ;;  %7890 = vmatprep.subr.bf16.mxu0 %v20936_v12 }
 0xb63   :  { %7780 = vmatprep.mubr.bf16.mxu0 %v19156_v47  ;;  %v15546_v56 = vld [vmem:[%s20937_s29 + $0xab4] ss:$12 sps:$4 sm:$0xff]  }
 0xb64   :  { %v7170_v19 = vpop.f32.mrf.mxu1 }
 0xb65   :  { %7891 = vmatpush1.bf16.msra.mxu0 %v15485_v42  ;;  %v15541_v42 = vld [vmem:[%s20937_s29 + $0xac8] ss:$12 sps:$4 sm:$0xff]   ;;  %v15544_v19 = vld [vmem:[%s20937_s29 + $0xab0] ss:$12 sps:$4 sm:$0xff]  }
 0xb66   :  { %v7206_v37 = vpop.f32.mrf.mxu1  ;;  %7892 = vmatprep.subr.bf16.mxu0 %v20936_v12 }
 0xb68   :  { %v7208_v3 = vpop.f32.mrf.mxu1  ;;  %7781 = vmatmul.mubr.bf16.gmra.mxu0 %v19166_v14 }
 0xb69   :  { %7893 = vmatpush1.bf16.msra.mxu0 %v15489_v34  ;;  %v15549_v34 = vld [vmem:[%s20937_s29 + $0xa9c] ss:$12 sps:$4 sm:$0xff]  }
 0xb6a   :  { %v7210_v38 = vpop.f32.mrf.mxu1  ;;  %7894 = vmatprep.subr.bf16.mxu0 %v20936_v12 }
 0xb6b   :  { %v7225_v22 = vpack.c.bf16 %v7210_v38, %v7206_v37  ;;  %v15550_v37 = vld [vmem:[%s20937_s29 + $0xa80] ss:$12 sps:$4 sm:$0xff]  }
 0xb6c   :  { %v7212_v52 = vpop.f32.mrf.mxu1  ;;  %v15555_v38 = vld [vmem:[%s20937_s29 + $0xb8c] ss:$12 sps:$4 sm:$0xff]  }
 0xb6d   :  { %v7226_v13 = vpack.c.bf16 %v7212_v52, %v7208_v3  ;;  %7895 = vmatpush1.bf16.msra.mxu0 %v15493_v23  ;;  %v15552_v3 = vld [vmem:[%s20937_s29 + $0xa84] ss:$12 sps:$4 sm:$0xff]   ;;  %v15553_v23 = vld [vmem:[%s20937_s29 + $0xb88] ss:$12 sps:$4 sm:$0xff]  }
 0xb6e   :  { %7896 = vmatprep.subr.bf16.mxu0 %v20936_v12  ;;  %v7216_v10 = vpop.f32.mrf.mxu1  ;;  %v15556_v52 = vld [vmem:[%s20937_s29 + $0xa68] ss:$12 sps:$4 sm:$0xff]  }
 0xb6f   :  { %13263 = vmatprep.mubr.msk.bf16.mxu1 %vm780_vm4, %v7226_v13  ;;  %13265 = vmatprep.mubr.msk.bf16.mxu0 %vm780_vm4, %v7226_v13  ;;  %v7229_v1 = vpack.c.bf16 %v7216_v10, %v7216_v10  ;;  %v15558_v13 = vld [vmem:[%s20937_s29 + $0xa6c] ss:$12 sps:$4 sm:$0xff]   ;;  %v15564_v10 = vld [vmem:[%s20937_s29 + $0xa54] ss:$12 sps:$4 sm:$0xff]  }
 0xb70   :  { %7822 = vmatmul.mubr.bf16.vlgmr.msra.gmra.mxu1 %v7225_v22  ;;  %v7218_v46 = vpop.f32.mrf.mxu1 }
 0xb71   :  { %13933 = vmatpush3.bf16.msra.mxu1 %v15495_v59  ;;  %7897 = vmatpush1.bf16.msra.mxu0 %v15496_v8  ;;  %v7230_v32 = vpack.c.bf16 %v7218_v46, %v7218_v46  ;;  %v15559_v59 = vld [vmem:[%s20937_s29 + $0xb70] ss:$12 sps:$4 sm:$0xff]   ;;  %v15561_v8 = vld [vmem:[%s20937_s29 + $0xb74] ss:$12 sps:$4 sm:$0xff]  }
 0xb72   :  { %13934 = vmatprep.subr.bf16.mxu1 %v15497_v11  ;;  %7898 = vmatprep.subr.bf16.mxu0 %v20936_v12  ;;  %v7220_v20 = vpop.f32.mrf.mxu1  ;;  %v15565_v11 = vld [vmem:[%s20937_s29 + $0xb58] ss:$12 sps:$4 sm:$0xff]   ;;  %v15567_v46 = vld [vmem:[%s20937_s29 + $0xb5c] ss:$12 sps:$4 sm:$0xff]  }
 0xb73   :  { %13264 = vmatprep.mubr.msk.bf16.mxu1 %vm780_vm4, %v7230_v32  ;;  %v15576_v20 = vld [vmem:[%s20937_s29 + $0xa24] ss:$12 sps:$4 sm:$0xff]  }
 0xb74   :  { %v7221_v53 = vpop.f32.mrf.mxu1 }
 0xb75   :  { %13935 = vmatpush3.bf16.msra.mxu1 %v15498_v2  ;;  %7899 = vmatpush1.bf16.msra.mxu0 %v15499_v44  ;;  %v15573_v2 = vld [vmem:[%s20937_s29 + $0xb44] ss:$12 sps:$4 sm:$0xff]   ;;  %v15574_v53 = vld [vmem:[%s20937_s29 + $0xa20] ss:$12 sps:$4 sm:$0xff]  }
 0xb76   :  { %13936 = vmatprep.subr.bf16.mxu1 %v15500_v26  ;;  %7900 = vmatprep.subr.bf16.mxu0 %v20936_v12  ;;  %v15568_v44 = vld [vmem:[%s20937_s29 + $0xa38] ss:$12 sps:$4 sm:$0xff]   ;;  %v15571_v26 = vld [vmem:[%s20937_s29 + $0xb40] ss:$12 sps:$4 sm:$0xff]  }
 0xb78   :  { %7832 = vmatmul.mubr.bf16.gmra.mxu1 %v7229_v1 }
 0xb79   :  { %13937 = vmatpush3.bf16.msra.mxu1 %v15501_v16  ;;  %7901 = vmatpush1.bf16.msra.mxu0 %v15502_v21  ;;  %v15577_v16 = vld [vmem:[%s20937_s29 + $0xb28] ss:$12 sps:$4 sm:$0xff]  }
 0xb7a   :  { %7872 = vmatprep.mubr.bf16.mxu1 %v7224_v33  ;;  %13938 = vmatprep.subr.bf16.mxu1 %v15503_v30  ;;  %v15512_v33 = vld [vmem:[%s20937_s29 + $0x728] ss:$12 sps:$4 sm:$0xff]   ;;  %v15580_v30 = vld [vmem:[%s20937_s29 + $0xb10] ss:$12 sps:$4 sm:$0xff]  }
 0xb7b   :  { %7902 = vmatprep.subr.bf16.mxu0 %v20936_v12  ;;  %v15582_v21 = vld [vmem:[%s20937_s29 + $0xb14] ss:$12 sps:$4 sm:$0xff]  }
 0xb7d   :  { %13939 = vmatpush3.bf16.msra.mxu1 %v15504_v55  ;;  %7903 = vmatpush1.bf16.msra.mxu0 %v15505_v60  ;;  %v15586_v55 = vld [vmem:[%s20937_s29 + $0xafc] ss:$12 sps:$4 sm:$0xff]   ;;  %v15584_v60 = vld [vmem:[%s20937_s29 + $0xaf8] ss:$12 sps:$4 sm:$0xff]  }
 0xb7e   :  { %13940 = vmatprep.subr.bf16.mxu1 %v15506_v27  ;;  %7918 = vmatprep.subr.bf16.mxu0 %v20936_v12  ;;  %v15590_v27 = vld [vmem:[%s20937_s29 + $0xae4] ss:$12 sps:$4 sm:$0xff]  }
 0xb81   :  { %13941 = vmatpush3.bf16.msra.mxu1 %v15507_v48  ;;  %7919 = vmatpush2.bf16.msra.mxu0 %v15508_v28  ;;  %v15588_v48 = vld [vmem:[%s20937_s29 + $0xae0] ss:$12 sps:$4 sm:$0xff]   ;;  %v15594_v28 = vld [vmem:[%s20937_s29 + $0xba4] ss:$12 sps:$4 sm:$0xff]  }
 0xb82   :  { %13942 = vmatprep.subr.bf16.mxu1 %v15509_v9  ;;  %v15592_v9 = vld [vmem:[%s20937_s29 + $0xba0] ss:$12 sps:$4 sm:$0xff]  }
 0xb84   :  { %7921 = vmatmul.mubr.bf16.vlgmr.msra.gmra.mxu0 %v7225_v22  ;;  %v15562_v22 = vld [vmem:[%s20937_s29 + $0xa50] ss:$12 sps:$4 sm:$0xff]  }
 0xb85   :  { %13943 = vmatpush3.bf16.msra.mxu1 %v15510_v7  ;;  %13266 = vmatprep.mubr.msk.bf16.mxu0 %vm780_vm4, %v7230_v32  ;;  %v15570_v32 = vld [vmem:[%s20937_s29 + $0xa3c] ss:$12 sps:$4 sm:$0xff]  }
 0xb86   :  { %13944 = vmatprep.subr.bf16.mxu1 %v15511_v17  ;;  %v15596_v7 = vld [vmem:[%s20937_s29 + $0xad0] ss:$12 sps:$4 sm:$0xff]  }
 0xb89   :  { %13945 = vmatpush3.bf16.msra.mxu1 %v15512_v33 }
 0xb8a   :  { %13946 = vmatprep.subr.bf16.mxu1 %v15513_v15 }
 0xb8c   :  { %7929 = vmatmul.mubr.bf16.gmra.mxu0 %v7229_v1  ;;  %v15579_v1 = vld [vmem:[%s20937_s29 + $0xb2c] ss:$12 sps:$4 sm:$0xff]  }
 0xb8d   :  { %13947 = vmatpush3.bf16.msra.mxu1 %v15514_v35 }
 0xb8e   :  { %13272 = vmatprep.subr.msk.bf16.mxu1 %vm4545_vm7, %v18072_v49  ;;  %v15515_v49 = vld [vmem:[%s20950_s7 + $0x30] sm:$0xff]  }
 0xb90   :  { %7873 = vmatmul.mubr.bf16.vlgmr.msra.gmra.mxu1 %v19153_v36  ;;  %v15540_v36 = vld [vmem:[%s20937_s29 + $0x964] ss:$12 sps:$4 sm:$0xff]  }
 0xb91   :  { %7880 = vmatprep.mubr.bf16.mxu1 %v19156_v47  ;;  %7990 = vmatpush1.bf16.msra.mxu1 %v18078_v51  ;;  %v15516_v51 = vld [vmem:[%s20950_s7 + $0x38] ss:$0 sps:$4 sm:$0x77]  }
 0xb92   :  { %7991 = vmatprep.subr.bf16.mxu1 %v18082_v50  ;;  %v15517_v50 = vld [vmem:[%s20937_s29 + $0xa08] ss:$12 sps:$4 sm:$0xff]   ;;  %v15543_v47 = vld [vmem:[%s20937_s29 + $0xacc] ss:$12 sps:$4 sm:$0xff]  }
 0xb95   :  { %7992 = vmatpush1.bf16.msra.mxu1 %v18092_v24  ;;  %v15519_v24 = vld [vmem:[%s20937_s29 + $0xa0c] ss:$12 sps:$4 sm:$0xff]  }
 0xb96   :  { %7993 = vmatprep.subr.bf16.mxu1 %v18095_v31  ;;  %8598 = vmatprep.subr.bf16.mxu0 %v15519_v24  ;;  %v15520_v31 = vld [vmem:[%s20937_s29 + $0x9f0] ss:$12 sps:$4 sm:$0xff]  }
 0xb97   :  { %8599 = vmatpush1.bf16.msra.mxu0 %v15517_v50 }
 0xb98   :  { %7881 = vmatmul.mubr.bf16.gmra.mxu1 %v19166_v14  ;;  %v15547_v14 = vld [vmem:[%s20937_s29 + $0xa98] ss:$12 sps:$4 sm:$0xff]  }
 0xb99   :  { %7994 = vmatpush1.bf16.msra.mxu1 %v18104_v43  ;;  %8013 = vmatprep.mubr.bf16.mxu1 %v20936_v12  ;;  %v15522_v43 = vld [vmem:[%s20937_s29 + $0x9f4] ss:$12 sps:$4 sm:$0xff]  }
 0xb9a   :  { %7995 = vmatprep.subr.bf16.mxu1 %v18110_v5  ;;  %8600 = vmatprep.subr.bf16.mxu0 %v15522_v43  ;;  %v15523_v5 = vld [vmem:[%s20937_s29 + $0x9d8] ss:$12 sps:$4 sm:$0xff]  }
 0xb9b   :  { %8601 = vmatpush1.bf16.msra.mxu0 %v15520_v31 }
 0xb9d   :  { %7996 = vmatpush1.bf16.msra.mxu1 %v18122_v29  ;;  %v15525_v29 = vld [vmem:[%s20937_s29 + $0x9dc] ss:$12 sps:$4 sm:$0xff]  }
 0xb9e   :  { %13275 = vmatprep.subr.msk.bf16.mxu1 %vm4545_vm7, %v18125_v41  ;;  %8602 = vmatprep.subr.bf16.mxu0 %v15525_v29  ;;  %v15526_v41 = vld [vmem:[%s20937_s29 + $0x9c0] ss:$12 sps:$4 sm:$0xff]  }
 0xb9f   :  { %8603 = vmatpush1.bf16.msra.mxu0 %v15523_v5 }
 0xba0   :  { %13273 = vmatmul.mubr.msk.bf16.vlgmr.msra.gmra.mxu1 %vm4538_vm8, %v15515_v49 }
 0xba1   :  { %8041 = vmatpush1.bf16.msra.mxu1 %v18147_v18  ;;  %8023 = vmatprep.mubr.bf16.mxu1 %v20936_v12  ;;  %v15529_v18 = vld [vmem:[%s20937_s29 + $0x9a8] ss:$12 sps:$4 sm:$0xff]  }
 0xba2   :  { %8042 = vmatprep.subr.bf16.mxu1 %v18141_v58  ;;  %v15528_v58 = vld [vmem:[%s20937_s29 + $0x9c4] ss:$12 sps:$4 sm:$0xff]  }
 0xba3   :  { %8604 = vmatprep.subr.bf16.mxu0 %v15528_v58 }
 0xba4   :  { %8605 = vmatpush1.bf16.msra.mxu0 %v15526_v41 }
 0xba5   :  { %8043 = vmatpush1.bf16.msra.mxu1 %v18156_v4  ;;  %v15531_v4 = vld [vmem:[%s20937_s29 + $0x9ac] ss:$12 sps:$4 sm:$0xff]  }
 0xba6   :  { %8044 = vmatprep.subr.bf16.mxu1 %v18160_v54  ;;  %8606 = vmatprep.subr.bf16.mxu0 %v15531_v4  ;;  %v15534_v54 = vld [vmem:[%s20937_s29 + $0x994] ss:$12 sps:$4 sm:$0xff]  }
 0xba8   :  { %13274 = vmatmul.mubr.msk.bf16.gmra.mxu1 %vm4538_vm8, %v15516_v51  ;;  %8607 = vmatpush1.bf16.msra.mxu0 %v15529_v18 }
 0xba9   :  { %8045 = vmatpush1.bf16.msra.mxu1 %v18167_v6  ;;  %8064 = vmatprep.mubr.bf16.mxu1 %v20936_v12  ;;  %v15532_v6 = vld [vmem:[%s20937_s29 + $0x990] ss:$12 sps:$4 sm:$0xff]  }
 0xbaa   :  { %8046 = vmatprep.subr.bf16.mxu1 %v18170_v63  ;;  %8608 = vmatprep.subr.bf16.mxu0 %v15534_v54  ;;  %v15537_v63 = vld [vmem:[%s20937_s29 + $0x97c] ss:$12 sps:$4 sm:$0xff]  }
 0xbac   :  { %8609 = vmatpush1.bf16.msra.mxu0 %v15532_v6 }
 0xbad   :  { %8047 = vmatpush1.bf16.msra.mxu1 %v18178_v45  ;;  %v15535_v45 = vld [vmem:[%s20937_s29 + $0x978] ss:$12 sps:$4 sm:$0xff]   ;;  %8610 = vmatprep.subr.bf16.mxu0 %v15537_v63 }
 0xbae   :  { %8649 = vmatprep.subr.bf16.mxu1 %v15555_v38 }
 0xbb0   :  { %13276 = vmatmul.mubr.msk.bf16.vlgmr.msra.gmra.mxu1 %vm4538_vm8, %v15515_v49  ;;  %8611 = vmatpush1.bf16.msra.mxu0 %v15535_v45 }
 0xbb1   :  { %8074 = vmatprep.mubr.bf16.mxu1 %v20936_v12  ;;  %8612 = vmatprep.subr.bf16.mxu0 %v15540_v36 }
 0xbb2   :  { %8650 = vmatpush1.bf16.msra.mxu1 %v15553_v23 }
 0xbb3   :  { %8651 = vmatprep.subr.bf16.mxu1 %v15561_v8 }
 0xbb4   :  { %8613 = vmatpush1.bf16.msra.mxu0 %v15538_v40 }
 0xbb5   :  { %8614 = vmatprep.subr.bf16.mxu0 %v15543_v47  ;;  %v7942_v47 = vld [vmem:[#allocation3 + $0x30] sm:$0x3f] }
 0xbb6   :  { %8652 = vmatpush1.bf16.msra.mxu1 %v15559_v59 }
 0xbb7   :  { %8653 = vmatprep.subr.bf16.mxu1 %v15567_v46  ;;  %v7938_v46 = vld [vmem:[#allocation3 + $0x10] sm:$0xff] }
 0xbb8   :  { %13277 = vmatmul.mubr.msk.bf16.gmra.mxu1 %vm4538_vm8, %v15516_v51  ;;  %8615 = vmatpush2.bf16.msra.mxu0 %v15541_v42 }
 0xbb9   :  { %8616 = vmatprep.subr.bf16.mxu0 %v15546_v56 }
 0xbba   :  { %8654 = vmatpush1.bf16.msra.mxu1 %v15565_v11 }
 0xbbb   :  { %8655 = vmatprep.subr.bf16.mxu1 %v15573_v2 }
 0xbbc   :  { %8617 = vmatpush2.bf16.msra.mxu0 %v15544_v19  ;;  %v7943_v19 = vld [vmem:[#allocation3 + $0x38] sm:$0x3f] }
 0xbbd   :  { %8618 = vmatprep.subr.bf16.mxu0 %v15549_v34 }
 0xbbe   :  { %8656 = vmatpush1.bf16.msra.mxu1 %v15571_v26 }
 0xbbf   :  { %8657 = vmatprep.subr.bf16.mxu1 %v15579_v1  ;;  %v7941_v1 = vld [vmem:[#allocation3 + $0x28] sm:$0xff] }
 0xbc0   :  { %8619 = vmatpush2.bf16.msra.mxu0 %v15547_v14 }
 0xbc1   :  { %8620 = vmatprep.subr.bf16.mxu0 %v15552_v3 }
 0xbc2   :  { %8658 = vmatpush1.bf16.msra.mxu1 %v15577_v16 }
 0xbc3   :  { %8659 = vmatprep.subr.bf16.mxu1 %v15582_v21 }
 0xbc4   :  { %8621 = vmatpush2.bf16.msra.mxu0 %v15550_v37 }
 0xbc5   :  { %8622 = vmatprep.subr.bf16.mxu0 %v15558_v13 }
 0xbc6   :  { %8660 = vmatpush1.bf16.msra.mxu1 %v15580_v30 }
 0xbc7   :  { %8661 = vmatprep.subr.bf16.mxu1 %v15586_v55 }
 0xbc8   :  { %8623 = vmatpush2.bf16.msra.mxu0 %v15556_v52 }
 0xbc9   :  { %8624 = vmatprep.subr.bf16.mxu0 %v15564_v10 }
 0xbca   :  { %8662 = vmatpush1.bf16.msra.mxu1 %v15584_v60  ;;  %v7944_v60 = vld [vmem:[#allocation3 + $0x40] sm:$0x3f] }
 0xbcb   :  { %8663 = vmatprep.subr.bf16.mxu1 %v15590_v27 }
 0xbcc   :  { %8625 = vmatpush2.bf16.msra.mxu0 %v15562_v22 }
 0xbcd   :  { %8626 = vmatprep.subr.bf16.mxu0 %v15570_v32 }
 0xbce   :  { %8664 = vmatpush1.bf16.msra.mxu1 %v15588_v48 }
 0xbcf   :  { %8679 = vmatprep.subr.bf16.mxu1 %v15594_v28 }
 0xbd0   :  { %8627 = vmatpush2.bf16.msra.mxu0 %v15568_v44 }
 0xbd1   :  { %8628 = vmatprep.subr.bf16.mxu0 %v15576_v20 }
 0xbd2   :  { %8680 = vmatpush2.bf16.msra.mxu1 %v15592_v9 }
 0xbd3   :  { %13960 = vmatprep.subr.bf16.mxu1 %v15596_v7 }
 0xbd4   :  { %8629 = vmatpush2.bf16.msra.mxu0 %v15574_v53 }
 0xbd5   :  { %8748 = vmatprep.subr.bf16.mxu0 %v20936_v12 }
 0xc20   :  { %v7772_v17 = vpop.f32.mrf.mxu0 }
 0xc22   :  { %v7774_v33 = vpop.f32.mrf.mxu0 }
 0xc24   :  { %v7776_v15 = vpop.f32.mrf.mxu0 }
 0xc26   :  { %v7778_v35 = vpop.f32.mrf.mxu0 }
 0xc28   :  { %v7782_v49 = vpop.f32.mrf.mxu0 }
 0xc2a   :  { %v7784_v51 = vpop.f32.mrf.mxu0 }
 0xc2c   :  { %v7786_v50 = vpop.f32.mrf.mxu0 }
 0xc2e   :  { %v7787_v24 = vpop.f32.mrf.mxu0 }
 0xc2f   :  { %v15587_v24 = vld [vmem:[%s20937_s29 + $0xb78] ss:$12 sps:$4 sm:$0xff]  }
 0xc30   :  { %v7823_v31 = vpop.f32.mrf.mxu1 }
 0xc31   :  { %v7824_v43 = vadd.f32 %v7823_v31, %v7772_v17 }
 0xc32   :  { %v7825_v5 = vpop.f32.mrf.mxu1 }
 0xc33   :  { %v19433_v29 = vadd.f32 %v7824_v43, %v19136_v39  ;;  %v7826_v41 = vadd.f32 %v7825_v5, %v7774_v33  ;;  %v15591_v5 = vld [vmem:[%s20937_s29 + $0xb60] ss:$12 sps:$4 sm:$0xff]  }
 0xc34   :  { %v7827_v58 = vpop.f32.mrf.mxu1 }
 0xc35   :  { %v19436_v18 = vadd.f32 %v7826_v41, %v19140_v62  ;;  %v7828_v4 = vadd.f32 %v7827_v58, %v7776_v15  ;;  %v15583_v15 = vld [vmem:[%s20937_s29 + $0xb90] ss:$12 sps:$4 sm:$0xff]  }
 0xc36   :  { %v7829_v54 = vpop.f32.mrf.mxu1 }
 0xc37   :  { %v19439_v6 = vadd.f32 %v7828_v4, %v19143_v61  ;;  %v7830_v63 = vadd.f32 %v7829_v54, %v7778_v35  ;;  %v15595_v54 = vld [vmem:[%s20937_s29 + $0xb48] ss:$12 sps:$4 sm:$0xff]  }
 0xc38   :  { %v7833_v45 = vpop.f32.mrf.mxu1 }
 0xc39   :  { %v19442_v36 = vadd.f32 %v7830_v63, %v19145_v57  ;;  %v7834_v40 = vadd.f32 %v7833_v45, %v7782_v49 }
 0xc3a   :  { %v7835_v42 = vpop.f32.mrf.mxu1 }
 0xc3b   :  { %v7951_v39 = vadd.f32 %v7942_v47, %v7834_v40  ;;  %v7836_v56 = vadd.f32 %v7835_v42, %v7784_v51  ;;  %v15597_v47 = vld [vmem:[%s20937_s29 + $0xa10] ss:$12 sps:$4 sm:$0xff]  }
 0xc3c   :  { %v7837_v34 = vpop.f32.mrf.mxu1  ;;  %v15598_v42 = vld [vmem:[%s20937_s29 + $0xb30] ss:$12 sps:$4 sm:$0xff]  }
 0xc3d   :  { %7960 = vst [vmem:[#allocation3 + $0x30] sm:$0x3f] %v7951_v39  ;;  %v7952_v62 = vadd.f32 %v7943_v19, %v7836_v56  ;;  %v15599_v19 = vld [vmem:[%s20937_s29 + $0xab8] ss:$12 sps:$4 sm:$0xff]  }
 0xc3e   :  { %v7838_v14 = vpop.f32.mrf.mxu1 }
 0xc3f   :  { %7961 = vst [vmem:[#allocation3 + $0x38] sm:$0x3f] %v7952_v62  ;;  %v15600_v14 = vld [vmem:[%s20937_s29 + $0x9f8] ss:$12 sps:$4 sm:$0xff]  }
 0xc44   :  { %v7922_v37 = vpop.f32.mrf.mxu0 }
 0xc46   :  { %v7924_v3 = vpop.f32.mrf.mxu0 }
 0xc47   :  { %v15602_v3 = vld [vmem:[%s20937_s29 + $0xaa0] ss:$12 sps:$4 sm:$0xff]  }
 0xc48   :  { %v7925_v61 = vpop.f32.mrf.mxu0 }
 0xc4a   :  { %v7927_v23 = vpop.f32.mrf.mxu0 }
 0xc4c   :  { %v7930_v38 = vpop.f32.mrf.mxu0 }
 0xc4e   :  { %v7932_v52 = vpop.f32.mrf.mxu0 }
 0xc4f   :  { %v15603_v52 = vld [vmem:[%s20937_s29 + $0x9e0] ss:$12 sps:$4 sm:$0xff]  }
 0xc50   :  { %v13948_v13 = vpop.f32.mrf.mxu1  ;;  %v7933_v57 = vpop.f32.mrf.mxu0 }
 0xc51   :  { %v15605_v57 = vld [vmem:[%s20937_s29 + $0xa88] ss:$12 sps:$4 sm:$0xff]  }
 0xc52   :  { %v13949_v59 = vpop.f32.mrf.mxu1  ;;  %v7934_v8 = vpop.f32.mrf.mxu0 }
 0xc53   :  { %v13950_v22 = vadd.f32 %v13949_v59, %v13948_v13  ;;  %v15604_v13 = vld [vmem:[%s20937_s29 + $0xb00] ss:$12 sps:$4 sm:$0xff]   ;;  %v15606_v59 = vld [vmem:[%s20937_s29 + $0x9c8] ss:$12 sps:$4 sm:$0xff]  }
 0xc54   :  { %v13951_v10 = vpop.f32.mrf.mxu1  ;;  %v15607_v8 = vld [vmem:[%s20937_s29 + $0xae8] ss:$12 sps:$4 sm:$0xff]  }
 0xc55   :  { %v7923_v11 = vadd.f32 %v13950_v22, %v7922_v37  ;;  %v15601_v37 = vld [vmem:[%s20937_s29 + $0xb18] ss:$12 sps:$4 sm:$0xff]   ;;  %v15608_v22 = vld [vmem:[%s20937_s29 + $0xa70] ss:$12 sps:$4 sm:$0xff]  }
 0xc56   :  { %v13952_v32 = vpop.f32.mrf.mxu1 }
 0xc57   :  { %v7947_v2 = vadd.f32 %v7938_v46, %v7923_v11  ;;  %v13953_v44 = vadd.f32 %v13952_v32, %v13951_v10  ;;  %v15609_v10 = vld [vmem:[%s20937_s29 + $0x9b0] ss:$12 sps:$4 sm:$0xff]   ;;  %v15610_v11 = vld [vmem:[%s20937_s29 + $0xba8] ss:$12 sps:$4 sm:$0xff]   ;;  %v15611_v46 = vld [vmem:[%s20937_s29 + $0xa58] ss:$12 sps:$4 sm:$0xff]  }
 0xc58   :  { %v13954_v26 = vpop.f32.mrf.mxu1  ;;  %v15612_v32 = vld [vmem:[%s20937_s29 + $0x998] ss:$12 sps:$4 sm:$0xff]  }
 0xc59   :  { %7956 = vst.msk [vmem:[#allocation3 + $0x10] sm:$0xff] %vm5374_vm9, %v7947_v2  ;;  %v7926_v20 = vadd.f32 %v13953_v44, %v7925_v61  ;;  %v15613_v2 = vld [vmem:[%s20937_s29 + $0xa40] ss:$12 sps:$4 sm:$0xff]  }
 0xc5a   :  { %v13955_v53 = vpop.f32.mrf.mxu1  ;;  %v15614_v44 = vld [vmem:[%s20937_s29 + $0x980] ss:$12 sps:$4 sm:$0xff]  }
 0xc5b   :  { %v7950_v16 = vadd.f32 %v7941_v1, %v7926_v20  ;;  %v13956_v21 = vadd.f32 %v13955_v53, %v13954_v26  ;;  %v15615_v26 = vld [vmem:[%s20937_s29 + $0xa28] ss:$12 sps:$4 sm:$0xff]   ;;  %v19547_v1 = vld [vmem:[%s20749_s9 + $0xf8] sm:$0xff] }
 0xc5c   :  { %v13957_v30 = vpop.f32.mrf.mxu1  ;;  %v15616_v20 = vld [vmem:[%s20937_s29 + $0x968] ss:$12 sps:$4 sm:$0xff]   ;;  %v19552_v53 = vld [vmem:[%s20749_s9 + $0x78] sm:$0xff] }
 0xc5d   :  { %7959 = vst.msk [vmem:[#allocation3 + $0x28] sm:$0xff] %vm5374_vm9, %v7950_v16  ;;  %v7931_v55 = vadd.f32 %v13956_v21, %v7930_v38  ;;  %v19559_v16 = vld [vmem:[%s20749_s9 + $0xf0] sm:$0xff]  ;;  %v19571_v30 = vld [vmem:[%s20749_s9 + $0xe8] sm:$0xff] }
 0xc5e   :  { %v13958_v27 = vpop.f32.mrf.mxu1  ;;  %v19564_v21 = vld [vmem:[%s20749_s9 + $0x70] sm:$0xff] }
 0xc5f   :  { %v7953_v48 = vadd.f32 %v7944_v60, %v7931_v55  ;;  %v19576_v55 = vld [vmem:[%s20749_s9 + $0x68] sm:$0xff]  ;;  %v19581_v60 = vld [vmem:[%s20749_s9 + $0xe0] sm:$0xff] }
 0xc60   :  { %v8015_v28 = vpop.f32.mrf.mxu1  ;;  %v19587_v27 = vld [vmem:[%s20749_s9 + $0x60] sm:$0xff] }
 0xc61   :  { %7962 = vst.msk [vmem:[#allocation3 + $0x40] sm:$0x3f] %vm5381_vm10, %v7953_v48  ;;  %v19593_v48 = vld [vmem:[%s20749_s9 + $0xd8] sm:$0xff] }
 0xc62   :  { %v8017_v9 = vpop.f32.mrf.mxu1 }
 0xc64   :  { %v8019_v7 = vpop.f32.mrf.mxu1 }
 0xc65   :  { %v19450_v35 = vpack.c.bf16 %v8019_v7, %v8015_v28  ;;  %v19599_v28 = vld [vmem:[%s20749_s9 + $0x58] sm:$0xff]  ;;  %v19611_v7 = vld [vmem:[%s20749_s9 + $0x50] sm:$0xff] }
 0xc66   :  { %v8021_v17 = vpop.f32.mrf.mxu1 }
 0xc67   :  { %v8084_v33 = vpack.c.bf16 %v8021_v17, %v8017_v9  ;;  %v19605_v9 = vld [vmem:[%s20749_s9 + $0xd0] sm:$0xff]  ;;  %v19617_v17 = vld [vmem:[%s20749_s9 + $0xc8] sm:$0xff] }
 0xc68   :  { %v8025_v49 = vpop.f32.mrf.mxu1 }
 0xc69   :  { %8630 = vmatprep.mubr.bf16.mxu0 %v8084_v33  ;;  %v19463_v41 = vpack.c.bf16 %v8025_v49, %v8025_v49  ;;  %v19641_v49 = vld [vmem:[%s20749_s9 + $0xb8] sm:$0xff] }
 0xc6a   :  { %v8027_v51 = vpop.f32.mrf.mxu1  ;;  %8631 = vmatmul.mubr.bf16.vlgmr.msra.gmra.mxu0 %v19450_v35 }
 0xc6b   :  { %v19453_v50 = vpack.c.bf16 %v8027_v51, %v8027_v51  ;;  %8749 = vmatpush1.bf16.msra.mxu0 %v15583_v15  ;;  %v19629_v15 = vld [vmem:[%s20749_s9 + $0xc0] sm:$0xff]  ;;  %v19647_v51 = vld [vmem:[%s20749_s9 + $0x38] sm:$0xff] }
 0xc6c   :  { %v8029_v31 = vpop.f32.mrf.mxu1  ;;  %8750 = vmatprep.subr.bf16.mxu0 %v20936_v12 }
 0xc6d   :  { %8640 = vmatprep.mubr.bf16.mxu0 %v19453_v50  ;;  %v19665_v31 = vld [vmem:[%s20749_s9 + $0xa8] sm:$0xff] }
 0xc6e   :  { %v8030_v43 = vpop.f32.mrf.mxu1 }
 0xc6f   :  { %8751 = vmatpush1.bf16.msra.mxu0 %v15587_v24  ;;  %v19659_v24 = vld [vmem:[%s20749_s9 + $0x30] sm:$0xff]  ;;  %v19671_v43 = vld [vmem:[%s20749_s9 + $0x28] sm:$0xff] }
 0xc70   :  { %v8066_v58 = vpop.f32.mrf.mxu1  ;;  %8752 = vmatprep.subr.bf16.mxu0 %v20936_v12 }
 0xc72   :  { %v8068_v4 = vpop.f32.mrf.mxu1  ;;  %8641 = vmatmul.mubr.bf16.gmra.mxu0 %v19463_v41 }
 0xc73   :  { %8753 = vmatpush1.bf16.msra.mxu0 %v15591_v5  ;;  %v19677_v5 = vld [vmem:[%s20749_s9 + $0xa0] sm:$0xff] }
 0xc74   :  { %v8070_v63 = vpop.f32.mrf.mxu1  ;;  %8754 = vmatprep.subr.bf16.mxu0 %v20936_v12 }
 0xc75   :  { %v8085_v39 = vpack.c.bf16 %v8070_v63, %v8066_v58  ;;  %v19689_v58 = vld [vmem:[%s20749_s9 + $0x98] sm:$0xff]  ;;  %v19709_v63 = vld [vmem:[%s20749_s9 + $0x10] sm:$0xff] }
 0xc76   :  { %v8072_v45 = vpop.f32.mrf.mxu1 }
 0xc77   :  { %v8086_v40 = vpack.c.bf16 %v8072_v45, %v8068_v4  ;;  %8755 = vmatpush1.bf16.msra.mxu0 %v15595_v54  ;;  %v19695_v4 = vld [vmem:[%s20749_s9 + $0x18] sm:$0xff]  ;;  %v19701_v54 = vld [vmem:[%s20749_s9 + $0x90] sm:$0xff]  ;;  %v19714_v45 = vld [vmem:[%s20749_s9 + $0x88] sm:$0xff] }
 0xc78   :  { %8756 = vmatprep.subr.bf16.mxu0 %v20936_v12  ;;  %v8076_v56 = vpop.f32.mrf.mxu1 }
 0xc79   :  { %13453 = vmatprep.mubr.msk.bf16.mxu1 %vm780_vm4, %v8086_v40  ;;  %13455 = vmatprep.mubr.msk.bf16.mxu0 %vm780_vm4, %v8086_v40  ;;  %v8089_v23 = vpack.c.bf16 %v8076_v56, %v8076_v56  ;;  %v19719_v40 = vld [vmem:[%s20749_s9 + $0x8] sm:$0xff]  ;;  %v19745_v56 = vld [vmem:[%s20749_s9 + $0x150] sm:$0xff] }
 0xc7a   :  { %8682 = vmatmul.mubr.bf16.vlgmr.msra.gmra.mxu1 %v8085_v39  ;;  %v8078_v34 = vpop.f32.mrf.mxu1  ;;  %20953 = vst [vmem:[#allocation15_spill] sm:$0xff] %v19745_v56 }
 0xc7b   :  { %13961 = vmatpush3.bf16.msra.mxu1 %v15597_v47  ;;  %8757 = vmatpush1.bf16.msra.mxu0 %v15598_v42  ;;  %v8090_v62 = vpack.c.bf16 %v8078_v34, %v8078_v34  ;;  %v19725_v47 = vld [vmem:[%s20749_s9 + $0x80] sm:$0xff] }
 0xc7c   :  { %13962 = vmatprep.subr.bf16.mxu1 %v15599_v19  ;;  %8758 = vmatprep.subr.bf16.mxu0 %v20936_v12  ;;  %v8080_v61 = vpop.f32.mrf.mxu1  ;;  %v19733_v42 = vld [vmem:[%s20749_s9] sm:$0xff]  ;;  %v19752_v19 = vld [vmem:[%s20749_s9 + $0x148] sm:$0xff] }
 0xc7d   :  { %13454 = vmatprep.mubr.msk.bf16.mxu1 %vm780_vm4, %v8090_v62  ;;  %20954 = vst [vmem:[#allocation16_spill] sm:$0xff] %v19752_v19  ;;  %v19759_v34 = vld [vmem:[%s20749_s9 + $0x140] sm:$0xff]  ;;  %v19794_v61 = vld [vmem:[%s20749_s9 + $0x118] sm:$0xff] }
 0xc7e   :  { %v8081_v38 = vpop.f32.mrf.mxu1  ;;  %20955 = vst [vmem:[#allocation13_spill] sm:$0xff] %v19759_v34  ;;  %20960 = vst [vmem:[#allocation22_spill] sm:$0xff] %v19794_v61 }
 0xc7f   :  { %13963 = vmatpush3.bf16.msra.mxu1 %v15600_v14  ;;  %8759 = vmatpush1.bf16.msra.mxu0 %v15601_v37  ;;  %v19773_v14 = vld [vmem:[%s20749_s9 + $0x130] sm:$0xff]  ;;  %v19780_v37 = vld [vmem:[%s20749_s9 + $0x128] sm:$0xff] }
 0xc80   :  { %13964 = vmatprep.subr.bf16.mxu1 %v15602_v3  ;;  %8760 = vmatprep.subr.bf16.mxu0 %v20936_v12  ;;  %20957 = vst [vmem:[#allocation19_spill] sm:$0xff] %v19773_v14  ;;  %20958 = vst [vmem:[#allocation14_spill] sm:$0xff] %v19780_v37  ;;  %v19787_v3 = vld [vmem:[%s20749_s9 + $0x120] sm:$0xff]  ;;  %v19808_v38 = vld [vmem:[%s20749_s9 + $0x108] sm:$0xff] }
 0xc81   :  { %20959 = vst [vmem:[#allocation21_spill] sm:$0xff] %v19787_v3  ;;  %20962 = vst [vmem:[#allocation24_spill] sm:$0xff] %v19808_v38 }
 0xc82   :  { %8692 = vmatmul.mubr.bf16.gmra.mxu1 %v8089_v23 }
 0xc83   :  { %13965 = vmatpush3.bf16.msra.mxu1 %v15603_v52  ;;  %8761 = vmatpush1.bf16.msra.mxu0 %v15604_v13  ;;  %v19815_v52 = vld [vmem:[%s20749_s9 + $0x100] sm:$0xff] }
 0xc84   :  { %8732 = vmatprep.mubr.bf16.mxu1 %v8084_v33  ;;  %13966 = vmatprep.subr.bf16.mxu1 %v15605_v57  ;;  %v19623_v33 = vld [vmem:[%s20749_s9 + $0x48] sm:$0xff]  ;;  %20963 = vst [vmem:[#allocation25_spill] sm:$0xff] %v19815_v52 }
 0xc85   :  { %8762 = vmatprep.subr.bf16.mxu0 %v20936_v12 }
 0xc87   :  { %13967 = vmatpush3.bf16.msra.mxu1 %v15606_v59  ;;  %8763 = vmatpush1.bf16.msra.mxu0 %v15607_v8 }
 0xc88   :  { %13968 = vmatprep.subr.bf16.mxu1 %v15608_v22  ;;  %8778 = vmatprep.subr.bf16.mxu0 %v20936_v12 }
 0xc8b   :  { %13969 = vmatpush3.bf16.msra.mxu1 %v15609_v10  ;;  %8779 = vmatpush2.bf16.msra.mxu0 %v15610_v11 }
 0xc8c   :  { %13970 = vmatprep.subr.bf16.mxu1 %v15611_v46  ;;  %14319 = vmatprep.subr.mxu0 %v20902_v0 }
 0xc8e   :  { %8781 = vmatmul.mubr.bf16.vlgmr.msra.gmra.mxu0 %v8085_v39  ;;  %v19740_v39 = vld [vmem:[%s20749_s9 + $0x158] sm:$0xff] }
 0xc8f   :  { %13971 = vmatpush3.bf16.msra.mxu1 %v15612_v32  ;;  %13456 = vmatprep.mubr.msk.bf16.mxu0 %vm780_vm4, %v8090_v62  ;;  %v19766_v62 = vld [vmem:[%s20749_s9 + $0x138] sm:$0xff] }
 0xc90   :  { %13972 = vmatprep.subr.bf16.mxu1 %v15613_v2  ;;  %14320 = vmatpush3.msra.mxu0 %v19740_v39  ;;  %20956 = vst [vmem:[#allocation18_spill] sm:$0xff] %v19766_v62 }
 0xc91   :  { %14321 = vmatprep.subr.mxu0 %v20902_v0 }
 0xc92   :  { %14322 = vmatpush3.msra.mxu0 %v19745_v56 }
 0xc93   :  { %13973 = vmatpush3.bf16.msra.mxu1 %v15614_v44  ;;  %14323 = vmatprep.subr.mxu0 %v20902_v0 }
 0xc94   :  { %13974 = vmatprep.subr.bf16.mxu1 %v15615_v26  ;;  %14324 = vmatpush3.msra.mxu0 %v19752_v19 }
 0xc95   :  { %14325 = vmatprep.subr.mxu0 %v20902_v0 }
 0xc96   :  { %8789 = vmatmul.mubr.bf16.gmra.mxu0 %v8089_v23  ;;  %v19801_v23 = vld [vmem:[%s20749_s9 + $0x110] sm:$0xff] }
 0xc97   :  { %13975 = vmatpush3.bf16.msra.mxu1 %v15616_v20  ;;  %14326 = vmatpush3.msra.mxu0 %v19759_v34  ;;  %20961 = vst [vmem:[#allocation17_spill] sm:$0xff] %v19801_v23 }
 0xc98   :  { %13988 = vmatprep.subr.mxu1 %v19547_v1  ;;  %14327 = vmatprep.subr.mxu0 %v20902_v0 }
 0xc99   :  { %14328 = vmatpush3.msra.mxu0 %v19766_v62  ;;  %14343 = vmatprep.mubr.msk.f32.mxu0 %vm15798_vm11, %v20902_v0 }
 0xc9a   :  { %8733 = vmatmul.mubr.bf16.vlgmr.msra.gmra.mxu1 %v19450_v35  ;;  %v19635_v35 = vld [vmem:[%s20749_s9 + $0x40] sm:$0xff]  ;;  %14329 = vmatprep.subr.mxu0 %v20902_v0 }
 0xc9b   :  { %8740 = vmatprep.mubr.bf16.mxu1 %v19453_v50  ;;  %13989 = vmatpush3.msra.mxu1 %v19552_v53  ;;  %v19653_v50 = vld [vmem:[%s20749_s9 + $0xb0] sm:$0xff] }
 0xc9c   :  { %13990 = vmatprep.subr.mxu1 %v19559_v16  ;;  %14330 = vmatpush3.msra.mxu0 %v19773_v14 }
 0xc9d   :  { %13991 = vmatpush3.msra.mxu1 %v19564_v21  ;;  %14331 = vmatprep.subr.mxu0 %v20902_v0 }
 0xc9e   :  { %13992 = vmatprep.subr.mxu1 %v19571_v30  ;;  %14332 = vmatpush3.msra.mxu0 %v19780_v37 }
 0xc9f   :  { %13993 = vmatpush3.msra.mxu1 %v19576_v55  ;;  %14333 = vmatprep.subr.mxu0 %v20902_v0 }
 0xca0   :  { %13994 = vmatprep.subr.mxu1 %v19581_v60  ;;  %14334 = vmatpush3.msra.mxu0 %v19787_v3 }
 0xca1   :  { %13995 = vmatpush3.msra.mxu1 %v19587_v27  ;;  %14335 = vmatprep.subr.mxu0 %v20902_v0 }
 0xca2   :  { %8741 = vmatmul.mubr.bf16.gmra.mxu1 %v19463_v41  ;;  %13996 = vmatprep.subr.mxu1 %v19593_v48  ;;  %v19683_v41 = vld [vmem:[%s20749_s9 + $0x20] sm:$0xff] }
 0xca3   :  { %13997 = vmatpush3.msra.mxu1 %v19599_v28  ;;  %14336 = vmatpush3.msra.mxu0 %v19794_v61 }
 0xca4   :  { %13998 = vmatprep.subr.mxu1 %v19605_v9  ;;  %14337 = vmatprep.subr.mxu0 %v20902_v0 }
 0xca5   :  { %13999 = vmatpush3.msra.mxu1 %v19611_v7  ;;  %14338 = vmatpush3.msra.mxu0 %v19801_v23 }
 0xca6   :  { %14000 = vmatprep.subr.mxu1 %v19617_v17  ;;  %14339 = vmatprep.subr.mxu0 %v20902_v0 }
 0xca7   :  { %14001 = vmatpush3.msra.mxu1 %v19623_v33  ;;  %14340 = vmatpush3.msra.mxu0 %v19808_v38 }
 0xca8   :  { %14002 = vmatprep.subr.mxu1 %v19629_v15  ;;  %14341 = vmatprep.subr.mxu0 %v20902_v0 }
 0xca9   :  { %14003 = vmatpush3.msra.mxu1 %v19635_v35  ;;  %14342 = vmatpush3.msra.mxu0 %v19815_v52 }
 0xcaa   :  { %14004 = vmatprep.subr.mxu1 %v19641_v49  ;;  %14346 = vmatprep.subr.mxu0 %v20902_v0 }
 0xcab   :  { %14005 = vmatpush3.msra.mxu1 %v19647_v51 }
 0xcac   :  { %14006 = vmatprep.subr.mxu1 %v19653_v50 }
 0xcad   :  { %14007 = vmatpush3.msra.mxu1 %v19659_v24 }
 0xcae   :  { %14008 = vmatprep.subr.mxu1 %v19665_v31 }
 0xcaf   :  { %14009 = vmatpush3.msra.mxu1 %v19671_v43 }
 0xcb0   :  { %14010 = vmatprep.subr.mxu1 %v19677_v5 }
 0xcb1   :  { %14011 = vmatpush3.msra.mxu1 %v19683_v41 }
 0xcb2   :  { %14012 = vmatprep.subr.mxu1 %v19689_v58 }
 0xcb3   :  { %14013 = vmatpush3.msra.mxu1 %v19695_v4 }
 0xcb4   :  { %14014 = vmatprep.subr.mxu1 %v19701_v54 }
 0xcb5   :  { %14015 = vmatpush3.msra.mxu1 %v19709_v63 }
 0xcb6   :  { %14016 = vmatprep.subr.mxu1 %v19714_v45 }
 0xcb7   :  { %14017 = vmatpush3.msra.mxu1 %v19719_v40 }
 0xcb8   :  { %14018 = vmatprep.subr.mxu1 %v19725_v47 }
 0xcb9   :  { %14019 = vmatpush3.msra.mxu1 %v19733_v42 }
 0xcba   :  { %14036 = vmatprep.subr.mxu1 %v19547_v1 }
 0xd2a   :  { %v8632_v13 = vpop.f32.mrf.mxu0 }
 0xd2c   :  { %v8634_v57 = vpop.f32.mrf.mxu0 }
 0xd2e   :  { %v8636_v59 = vpop.f32.mrf.mxu0 }
 0xd30   :  { %v8638_v8 = vpop.f32.mrf.mxu0 }
 0xd32   :  { %v8642_v22 = vpop.f32.mrf.mxu0 }
 0xd34   :  { %v8644_v10 = vpop.f32.mrf.mxu0 }
 0xd36   :  { %v8646_v11 = vpop.f32.mrf.mxu0 }
 0xd38   :  { %v8647_v46 = vpop.f32.mrf.mxu0 }
 0xd39   :  { %v8802_v46 = vld [vmem:[#allocation3 + $0x30] sm:$0x3f] }
 0xd3a   :  { %v8683_v32 = vpop.f32.mrf.mxu1 }
 0xd3b   :  { %v8684_v2 = vadd.f32 %v8683_v32, %v8632_v13 }
 0xd3c   :  { %v8685_v44 = vpop.f32.mrf.mxu1 }
 0xd3d   :  { %v19824_v26 = vadd.f32 %v8684_v2, %v19433_v29  ;;  %v8686_v20 = vadd.f32 %v8685_v44, %v8634_v57  ;;  %v8803_v57 = vld [vmem:[#allocation3 + $0x38] sm:$0x3f] }
 0xd3e   :  { %v8687_v1 = vpop.f32.mrf.mxu1 }
 0xd3f   :  { %v19827_v25 = vadd.f32 %v8686_v20, %v19436_v18  ;;  %v8688_v12 = vadd.f32 %v8687_v1, %v8636_v59 }
 0xd40   :  { %v8689_v52 = vpop.f32.mrf.mxu1 }
 0xd41   :  { %20964 = vst [vmem:[#allocation20_spill] sm:$0xff] %v19827_v25  ;;  %v19830_v38 = vadd.f32 %v8688_v12, %v19439_v6  ;;  %v8690_v23 = vadd.f32 %v8689_v52, %v8638_v8 }
 0xd42   :  { %v8693_v61 = vpop.f32.mrf.mxu1 }
 0xd43   :  { %v19833_v11 = vadd.f32 %v8690_v23, %v19442_v36  ;;  %v8694_v13 = vadd.f32 %v8693_v61, %v8642_v22  ;;  %v8832_v12 = vadd.f32 %v19830_v38, %v19824_v26  ;;  %v8862_v22 = vmul.f32 %v19827_v25, %v19827_v25 }
 0xd44   :  { %v8695_v32 = vpop.f32.mrf.mxu1 }
 0xd45   :  { %20965 = vst [vmem:[#allocation27_spill] sm:$0xff] %v19833_v11  ;;  %v8811_v29 = vadd.f32 %v8802_v46, %v8694_v13  ;;  %v8696_v2 = vadd.f32 %v8695_v32, %v8644_v10  ;;  %v8865_v6 = vmul.f32 %v19833_v11, %v19833_v11  ;;  %v8841_v52 = vadd.f32 %v19833_v11, %v19827_v25 }
 0xd46   :  { %v8697_v44 = vpop.f32.mrf.mxu1 }
 0xd47   :  { %8820 = vst [vmem:[#allocation3 + $0x30] sm:$0x3f] %v8811_v29  ;;  %v8812_v18 = vadd.f32 %v8803_v57, %v8696_v2  ;;  %v8879_v2 = vadd.f32 %v8865_v6, %v8862_v22 }
 0xd48   :  { %v8698_v20 = vpop.f32.mrf.mxu1 }
 0xd49   :  { %8821 = vst [vmem:[#allocation3 + $0x38] sm:$0x3f] %v8812_v18 }
 0xd4e   :  { %v8782_v59 = vpop.f32.mrf.mxu0  ;;  %v19835_v1 = vld [vmem:[#allocation3 + $0x30] sm:$0x3f] }
 0xd4f   :  { %v8833_v36 = vsel %vm199_vm0, %v19835_v1, 0.0 }
 0xd50   :  { %v8784_v61 = vpop.f32.mrf.mxu0  ;;  %v19843_v23 = vld [vmem:[#allocation3 + $0x38] sm:$0x3f]  ;;  %v8834_v8 = vadd.f32 %v8833_v36, %v8832_v12 }
 0xd51   :  { %20966 = vst [vmem:[#allocation28_spill] sm:$0xff] %v19843_v23  ;;  %v8842_v10 = vsel %vm199_vm0, %v19843_v23, 0.0  ;;  %v8868_v13 = vmul.f32 %v19843_v23, %v19843_v23 }
 0xd52   :  { %v8785_v46 = vpop.f32.mrf.mxu0  ;;  %v8843_v32 = vadd.f32 %v8842_v10, %v8841_v52  ;;  %v8835_v29 = vrot.slane %v8834_v8, 4 }
 0xd53   :  { %v8880_v57 = vsel %vm199_vm0, %v8868_v13, 0.0 }
 0xd54   :  { %v8787_v44 = vpop.f32.mrf.mxu0  ;;  %v8844_v18 = vrot.slane %v8843_v32, 4  ;;  %v8836_v20 = vadd.f32 %v8835_v29, %v8834_v8  ;;  %v8881_v61 = vadd.f32 %v8880_v57, %v8879_v2 }
 0xd56   :  { %v8790_v12 = vpop.f32.mrf.mxu0  ;;  %v8845_v36 = vadd.f32 %v8844_v18, %v8843_v32  ;;  %v8837_v11 = vrot.slane %v8836_v20, 2  ;;  %v8882_v25 = vrot.slane %v8881_v61, 4  ;;  %v8798_v18 = vld [vmem:[#allocation3 + $0x10] sm:$0xff] }
 0xd58   :  { %v8792_v3 = vpop.f32.mrf.mxu0  ;;  %v8846_v37 = vrot.slane %v8845_v36, 2  ;;  %v8838_v14 = vadd.f32 %v8837_v11, %v8836_v20  ;;  %v8883_v62 = vadd.f32 %v8882_v25, %v8881_v61  ;;  %v8867_v25 = vmul.f32 %v19835_v1, %v19835_v1 }
 0xd59   :  { %v8864_v20 = vmul.f32 %v19830_v38, %v19830_v38 }
 0xd5a   :  { %v13976_v34 = vpop.f32.mrf.mxu1  ;;  %v8793_v23 = vpop.f32.mrf.mxu0  ;;  %v8847_v19 = vadd.f32 %v8846_v37, %v8845_v36  ;;  %v8884_v52 = vrot.slane %v8883_v62, 2  ;;  %v8839_v10 = vrot.slane %v8838_v14, 1 }
 0xd5c   :  { %v13977_v6 = vpop.f32.mrf.mxu1  ;;  %v8794_v22 = vpop.f32.mrf.mxu0  ;;  %v8848_v13 = vrot.slane %v8847_v19, 1  ;;  %v8885_v44 = vadd.f32 %v8884_v52, %v8883_v62  ;;  %v8840_v57 = vadd.f32 %v8839_v10, %v8838_v14  ;;  %v8804_v10 = vld [vmem:[#allocation3 + $0x40] sm:$0x3f] }
 0xd5d   :  { %v13978_v56 = vadd.f32 %v13977_v6, %v13976_v34  ;;  %v8801_v34 = vld [vmem:[#allocation3 + $0x28] sm:$0xff] }
 0xd5e   :  { %v13979_v8 = vpop.f32.mrf.mxu1  ;;  %v8849_v29 = vadd.f32 %v8848_v13, %v8847_v19  ;;  %v8886_v2 = vrot.slane %v8885_v44, 1  ;;  %v8861_v19 = vmul.f32 %v19824_v26, %v19824_v26 }
 0xd5f   :  { %v8783_v32 = vadd.f32 %v13978_v56, %v8782_v59  ;;  %v8871_v59 = vsel %vm199_vm0, %v8867_v25, 0.0  ;;  %v20975_v25 = vld [vmem:[#allocation17_spill] sm:$0xff]  ;;  %vm11955_vm0 = vcmask 9216  }
 0xd60   :  { %v13980_v3 = vpop.f32.mrf.mxu1  ;;  %9010 = vmatprep.mubr.f32.mxu1 %v8849_v29  ;;  %v8887_v11 = vadd.f32 %v8886_v2, %v8885_v44  ;;  %v20971_v2 = vld [vmem:[#allocation19_spill] sm:$0xff] }
 0xd61   :  { %v8807_v37 = vadd.f32 %v8798_v18, %v8783_v32  ;;  %v13981_v23 = vadd.f32 %v13980_v3, %v13979_v8  ;;  %9011 = vmatmul.mubr.f32.vlgmr.msra.gmra.mxu1 %v8840_v57  ;;  %v20972_v32 = vld [vmem:[#allocation14_spill] sm:$0xff]  ;;  %v20973_v18 = vld [vmem:[#allocation21_spill] sm:$0xff] }
 0xd62   :  { %v13982_v62 = vpop.f32.mrf.mxu1  ;;  %14037 = vmatpush3.msra.mxu1 %v19552_v53  ;;  %9155 = vmatprep.mubr.f32.mxu1 %v8887_v11  ;;  %v8870_v53 = vadd.f32 %v8864_v20, %v8861_v19  ;;  %v20974_v3 = vld [vmem:[#allocation22_spill] sm:$0xff]  ;;  %v20977_v20 = vld [vmem:[#allocation25_spill] sm:$0xff] }
 0xd63   :  { %8816 = vst.msk [vmem:[#allocation3 + $0x10] sm:$0xff] %vm5374_vm9, %v8807_v37  ;;  %v8786_v56 = vadd.f32 %v13981_v23, %v8785_v46  ;;  %14038 = vmatprep.subr.mxu1 %v19559_v16  ;;  %v20976_v37 = vld [vmem:[#allocation24_spill] sm:$0xff]  ;;  %v19960_v19 = vld [vmem:[%s20750_s10 + $0x38] sm:$0xff] }
 0xd64   :  { %v13983_v14 = vpop.f32.mrf.mxu1  ;;  %14039 = vmatpush3.msra.mxu1 %v19564_v21  ;;  %v8872_v46 = vadd.f32 %v8871_v59, %v8870_v53  ;;  %v9253_v59 = vld [vmem:[%s20750_s10 + $0x58] sm:$0xff]  ;;  %v9243_v53 = vld [vmem:[%s20750_s10 + $0x8] sm:$0xff] }
 0xd65   :  { %v8810_v61 = vadd.f32 %v8801_v34, %v8786_v56  ;;  %v13984_v36 = vadd.f32 %v13983_v14, %v13982_v62  ;;  %14040 = vmatprep.subr.mxu1 %v19571_v30  ;;  %v19950_v62 = vld [vmem:[%s20750_s10 + $0x50] sm:$0xff]  ;;  %v19955_v56 = vld [vmem:[%s20750_s10 + $0x48] sm:$0xff]  ;;  %v19972_v14 = vld [vmem:[%s20750_s10 + $0x20] sm:$0xff] }
 0xd66   :  { %v13985_v52 = vpop.f32.mrf.mxu1  ;;  %14041 = vmatpush3.msra.mxu1 %v19576_v55  ;;  %v8873_v30 = vrot.slane %v8872_v46, 4  ;;  %v19966_v34 = vld [vmem:[%s20750_s10 + $0x30] sm:$0xff] }
 0xd67   :  { %8819 = vst.msk [vmem:[#allocation3 + $0x28] sm:$0xff] %vm5374_vm9, %v8810_v61  ;;  %v8791_v16 = vadd.f32 %v13984_v36, %v8790_v12  ;;  %14042 = vmatprep.subr.mxu1 %v19581_v60  ;;  %v19981_v61 = vld [vmem:[%s20750_s10 + $0x18] sm:$0xff]  ;;  %v9250_v36 = vld [vmem:[%s20750_s10 + $0x40] sm:$0xff] }
 0xd68   :  { %v13986_v6 = vpop.f32.mrf.mxu1  ;;  %14043 = vmatpush3.msra.mxu1 %v19587_v27  ;;  %v8874_v27 = vadd.f32 %v8873_v30, %v8872_v46  ;;  %v9242_v52 = vld [vmem:[%s20750_s10] sm:$0xff]  ;;  %v9244_v46 = vld [vmem:[%s20750_s10 + $0x10] sm:$0xff] }
 0xd69   :  { %v8813_v21 = vadd.f32 %v8804_v10, %v8791_v16  ;;  %14044 = vmatprep.subr.mxu1 %v19593_v48  ;;  %v9247_v16 = vld [vmem:[%s20750_s10 + $0x28] sm:$0xff] }
 0xd6a   :  { %14045 = vmatpush3.msra.mxu1 %v19599_v28  ;;  %v19877_v55 = vld [vmem:[#allocation3 + $0x10] sm:$0xff] }
 0xd6b   :  { %8822 = vst.msk [vmem:[#allocation3 + $0x40] sm:$0x3f] %vm5381_vm10, %v8813_v21  ;;  %14046 = vmatprep.subr.mxu1 %v19605_v9  ;;  %v8850_v28 = vsel %vm5374_vm9, %v19877_v55, 0.0 }
 0xd6c   :  { %14047 = vmatpush3.msra.mxu1 %v19611_v7 }
 0xd6d   :  { %14048 = vmatprep.subr.mxu1 %v19617_v17  ;;  %v8875_v17 = vrot.slane %v8874_v27, 2 }
 0xd6e   :  { %14049 = vmatpush3.msra.mxu1 %v19623_v33  ;;  %v19879_v60 = vld [vmem:[#allocation3 + $0x28] sm:$0xff] }
 0xd6f   :  { %14050 = vmatprep.subr.mxu1 %v19629_v15  ;;  %v8851_v48 = vsel %vm5374_vm9, %v19879_v60, 0.0 }
 0xd70   :  { %14051 = vmatpush3.msra.mxu1 %v19635_v35  ;;  %v8852_v7 = vadd.f32 %v8851_v48, %v8850_v28 }
 0xd71   :  { %14052 = vmatprep.subr.mxu1 %v19641_v49  ;;  %v8876_v49 = vadd.f32 %v8875_v17, %v8874_v27 }
 0xd72   :  { %14053 = vmatpush3.msra.mxu1 %v19647_v51  ;;  %v19889_v9 = vld [vmem:[#allocation3 + $0x40] sm:$0x3f]  ;;  %v8866_v51 = vmul.f32 %v19879_v60, %v19879_v60 }
 0xd73   :  { %14054 = vmatprep.subr.mxu1 %v19653_v50  ;;  %v8853_v33 = vsel %vm5381_vm10, %v19889_v9, 0.0 }
 0xd74   :  { %14055 = vmatpush3.msra.mxu1 %v19659_v24  ;;  %v8854_v15 = vadd.f32 %v8853_v33, %v8852_v7  ;;  %v8863_v24 = vmul.f32 %v19877_v55, %v19877_v55  ;;  %v8889_v12 = vsel %vm5374_vm9, %v8866_v51, 0.0 }
 0xd75   :  { %14056 = vmatprep.subr.mxu1 %v19665_v31  ;;  %v8869_v31 = vmul.f32 %v19889_v9, %v19889_v9 }
 0xd76   :  { %14057 = vmatpush3.msra.mxu1 %v19671_v43  ;;  %v8855_v35 = vrot.slane %v8854_v15, 4 }
 0xd77   :  { %14058 = vmatprep.subr.mxu1 %v19677_v5  ;;  %v8877_v5 = vrot.slane %v8876_v49, 1  ;;  %v8891_v22 = vsel %vm5381_vm10, %v8869_v31, 0.0 }
 0xd78   :  { %14059 = vmatpush3.msra.mxu1 %v19683_v41  ;;  %v8856_v50 = vadd.f32 %v8855_v35, %v8854_v15 }
 0xd79   :  { %14060 = vmatprep.subr.mxu1 %v19689_v58  ;;  %v8888_v58 = vsel %vm5374_vm9, %v8863_v24, 0.0 }
 0xd7a   :  { %14061 = vmatpush3.msra.mxu1 %v19695_v4  ;;  %v8857_v43 = vrot.slane %v8856_v50, 2  ;;  %v8890_v44 = vadd.f32 %v8889_v12, %v8888_v58  ;;  %v8878_v4 = vadd.f32 %v8877_v5, %v8876_v49  ;;  %v9235_v5 = vld [vmem:[%s20751_s11] sm:$0x1] }
 0xd7b   :  { %14062 = vmatprep.subr.mxu1 %v19701_v54  ;;  %v9239_v58 = vld [vmem:[%s20752_s12] sm:$0x1] }
 0xd7c   :  { %14063 = vmatpush3.msra.mxu1 %v19709_v63  ;;  %v8858_v41 = vadd.f32 %v8857_v43, %v8856_v50  ;;  %v8892_v8 = vadd.f32 %v8891_v22, %v8890_v44  ;;  %v20978_v44 = vmov 0  }
 0xd7d   :  { %14064 = vmatprep.subr.mxu1 %v19714_v45  ;;  %v20967_v45 = vld [vmem:[#allocation15_spill] sm:$0xff] }
 0xd7e   :  { %14065 = vmatpush3.msra.mxu1 %v19719_v40  ;;  %v8859_v13 = vrot.slane %v8858_v41, 1  ;;  %v8893_v63 = vrot.slane %v8892_v8, 4  ;;  %v20968_v40 = vld [vmem:[#allocation16_spill] sm:$0xff] }
 0xd7f   :  { %14066 = vmatprep.subr.mxu1 %v19725_v47 }
 0xd80   :  { %14067 = vmatpush3.msra.mxu1 %v19733_v42  ;;  %v8860_v54 = vadd.f32 %v8859_v13, %v8858_v41  ;;  %v8894_v47 = vadd.f32 %v8893_v63, %v8892_v8  ;;  %v20969_v42 = vld [vmem:[#allocation13_spill] sm:$0xff] }
 0xd81   :  { %9156 = vmatmul.mubr.f32.vlgmr.msra.gmra.mxu1 %v8878_v4  ;;  %9282 = vmatprep.subr.mxu1 %v19950_v62 }
 0xd82   :  { %14344 = vmatmul.mubr.msk.f32.vlgmr.msra.gmra.mxu0 %vm5374_vm9, %v8860_v54  ;;  %9322 = vmatprep.mubr.f32.mxu1 %v20902_v0  ;;  %v8895_v29 = vrot.slane %v8894_v47, 2 }
 0xd83   :  { %14347 = vmatpush3.msra.mxu0 %v19740_v39  ;;  %14370 = vmatprep.mubr.msk.f32.mxu0 %vm15798_vm11, %v20902_v0  ;;  %v20970_v39 = vld [vmem:[#allocation18_spill] sm:$0xff] }
 0xd84   :  { %14348 = vmatprep.subr.mxu0 %v20902_v0  ;;  %v8896_v57 = vadd.f32 %v8895_v29, %v8894_v47  ;;  %9283 = vmatpush1.msra.mxu1 %v19955_v56 }
 0xd85   :  { %14349 = vmatpush3.msra.mxu0 %v20967_v45  ;;  %9284 = vmatprep.subr.mxu1 %v19960_v19 }
 0xd86   :  { %14350 = vmatprep.subr.mxu0 %v20902_v0  ;;  %v8897_v11 = vrot.slane %v8896_v57, 1  ;;  %9285 = vmatpush1.msra.mxu1 %v19966_v34 }
 0xd87   :  { %14351 = vmatpush3.msra.mxu0 %v20968_v40  ;;  %9286 = vmatprep.subr.mxu1 %v19972_v14  ;;  %v20979_v40 = vld [vmem:[#allocation12_spill] sm:$0xff] }
 0xd88   :  { %14352 = vmatprep.subr.mxu0 %v20902_v0  ;;  %v8898_v23 = vadd.f32 %v8897_v11, %v8896_v57  ;;  %9287 = vmatpush1.msra.mxu1 %v19981_v61 }
 0xd89   :  { %14353 = vmatpush3.msra.mxu0 %v20969_v42  ;;  %9288 = vmatprep.subr.mxu1 %v9243_v53 }
 0xd8a   :  { %14354 = vmatprep.subr.mxu0 %v20902_v0  ;;  %9289 = vmatpush1.msra.mxu1 %v9242_v52 }
 0xd8b   :  { %14355 = vmatpush3.msra.mxu0 %v20970_v39  ;;  %14373 = vmatprep.subr.mxu1 %v20902_v0 }
 0xd8c   :  { %14356 = vmatprep.subr.mxu0 %v20902_v0 }
 0xd8d   :  { %14357 = vmatpush3.msra.mxu0 %v20971_v2 }
 0xd8e   :  { %14358 = vmatprep.subr.mxu0 %v20902_v0 }
 0xd8f   :  { %14359 = vmatpush3.msra.mxu0 %v20972_v32 }
 0xd90   :  { %14360 = vmatprep.subr.mxu0 %v20902_v0 }
 0xd91   :  { %14361 = vmatpush3.msra.mxu0 %v20973_v18 }
 0xd92   :  { %14362 = vmatprep.subr.mxu0 %v20902_v0 }
 0xd93   :  { %14363 = vmatpush3.msra.mxu0 %v20974_v3 }
 0xd94   :  { %14364 = vmatprep.subr.mxu0 %v20902_v0 }
 0xd95   :  { %14365 = vmatpush3.msra.mxu0 %v20975_v25 }
 0xd96   :  { %14366 = vmatprep.subr.mxu0 %v20902_v0 }
 0xd97   :  { %14367 = vmatpush3.msra.mxu0 %v20976_v37 }
 0xd98   :  { %14368 = vmatprep.subr.mxu0 %v20902_v0 }
 0xd99   :  { %14369 = vmatpush3.msra.mxu0 %v20977_v20 }
 0xd9a   :  { %14371 = vmatmul.mubr.msk.f32.vlgmr.msra.gmra.mxu0 %vm5374_vm9, %v8898_v23  ;;  %14384 = vmatprep.subr.mxu0 %v20902_v0 }
 0xd9b   :  { %14392 = vmatprep.mubr.msk.f32.mxu0 %vm15798_vm11, %v20902_v0  ;;  %14385 = vmatpush3.msra.mxu0 %v9253_v59 }
 0xd9c   :  { %14386 = vmatprep.subr.mxu0 %v20902_v0 }
 0xd9d   :  { %14387 = vmatpush3.msra.mxu0 %v9250_v36 }
 0xd9e   :  { %14388 = vmatprep.subr.mxu0 %v20902_v0 }
 0xd9f   :  { %14389 = vmatpush3.msra.mxu0 %v9247_v16 }
 0xda0   :  { %14390 = vmatprep.subr.mxu0 %v20902_v0 }
 0xda1   :  { %14391 = vmatpush3.msra.mxu0 %v9244_v46 }
 0xda2   :  { %14395 = vmatprep.subr.bf16.mxu0 %v20902_v0 }
 0xe21   :  { %v14020_v21 = vpop.f32.mrf.mxu1 }
 0xe23   :  { %v14021_v30 = vpop.f32.mrf.mxu1 }
 0xe24   :  { %v14022_v48 = vadd.f32 %v14021_v30, %v14020_v21 }
 0xe41   :  { %v14068_v27 = vpop.f32.mrf.mxu1 }
 0xe42   :  { %v9082_v10 = vpop.f32.mrf.mxu0 }
 0xe43   :  { %v9083_v28 = vadd.f32 %v14022_v48, %v9082_v10  ;;  %v14069_v7 = vpop.f32.mrf.mxu1 }
 0xe44   :  { %v14345_v6 = vpop.f32.mrf.mxu0  ;;  %v14070_v33 = vadd.f32 %v14069_v7, %v14068_v27 }
 0xe45   :  { %v9087_v17 = vmul.f32 0.004132231, %v9083_v28 }
 0xe47   :  { %v9232_v51 = vmul.f32 %v9087_v17, %v9087_v17 }
 0xe5a   :  { %v9227_v15 = vpop.f32.mrf.mxu0 }
 0xe5b   :  { %v9228_v35 = vadd.f32 %v14070_v33, %v9227_v15 }
 0xe5c   :  { %v14372_v49 = vpop.f32.mrf.mxu0 }
 0xe5d   :  { %v9231_v50 = vmul.f32 0.004132231, %v9228_v35 }
 0xe5f   :  { %v9233_v24 = vsub.f32 %v9231_v50, %v9232_v51 }
 0xe61   :  { %v9234_v31 = vmax.f32 %v9233_v24, 0.0 }
 0xe63   :  { %v9236_v43 = vadd.f32 1e-05, %v9234_v31  ;;  %v15618_v31 = vld [vmem:[%s20754_s14 + $0xa0] sm:$0xff]  }
 0xe65   :  { %15729 = vrsqrt.f32 %v9236_v43  ;;  %v15623_v43 = vld [vmem:[%s20754_s14 + $0x78] sm:$0xff]  }
 0xe72   :  { %v15730_v12 = vpop.eup %15729 }
 0xe73   :  { %v9238_v41 = vmul.f32 %v15730_v12, %v9235_v5  ;;  %v15619_v12 = vld [vmem:[%s20754_s14 + $0x98] sm:$0xff]  }
 0xe75   :  { %13459 = vmatmul.mubr.msk.f32.vlgmr.msra.gmra.mxu1 %vm9254_vm12, %v9238_v41  ;;  %v9240_v22 = vmul.f32 %v9238_v41, %v9087_v17 }
 0xe76   :  { %14374 = vmatpush3.msra.mxu1 %v9253_v59  ;;  %14381 = vmatprep.mubr.msk.f32.mxu1 %vm15798_vm11, %v20902_v0 }
 0xe77   :  { %14375 = vmatprep.subr.mxu1 %v20902_v0  ;;  %v9241_v13 = vsub.f32 %v9239_v58, %v9240_v22  ;;  %v15625_v58 = vld [vmem:[%s20754_s14 + $0x70] sm:$0xff]  }
 0xe78   :  { %14376 = vmatpush3.msra.mxu1 %v9250_v36  ;;  %v15620_v22 = vld [vmem:[%s20754_s14 + $0x90] sm:$0xff]  }
 0xe79   :  { %14377 = vmatprep.subr.mxu1 %v20902_v0  ;;  %14393 = vmatmul.mubr.msk.f32.vlgmr.msra.gmra.mxu0 %vm9254_vm12, %v9241_v13 }
 0xe7a   :  { %14378 = vmatpush3.msra.mxu1 %v9247_v16  ;;  %14399 = vmatprep.mubr.msk.bf16.mxu0 %vm15798_vm11, %v20902_v0 }
 0xe7b   :  { %14379 = vmatprep.subr.mxu1 %v20902_v0 }
 0xe7c   :  { %14380 = vmatpush3.msra.mxu1 %v9244_v46 }
 0xe7d   :  { %14382 = vmatmul.mubr.msk.f32.vlgmr.msra.gmra.mxu1 %vm9254_vm12, %v9238_v41  ;;  %9426 = vmatprep.subr.mxu1 %v19950_v62  ;;  %v15624_v41 = vld [vmem:[%s20754_s14 + $0x38] sm:$0xff]  }
 0xe7e   :  { %9427 = vmatpush1.msra.mxu1 %v19955_v56  ;;  %9466 = vmatprep.mubr.f32.mxu1 %v20902_v0 }
 0xe7f   :  { %9428 = vmatprep.subr.mxu1 %v19960_v19 }
 0xe80   :  { %9429 = vmatpush1.msra.mxu1 %v19966_v34 }
 0xe81   :  { %9430 = vmatprep.subr.mxu1 %v19972_v14 }
 0xe82   :  { %9431 = vmatpush1.msra.mxu1 %v19981_v61  ;;  %v20981_v61 = vld [vmem:[#allocation27_spill] sm:$0xff] }
 0xe83   :  { %9432 = vmatprep.subr.mxu1 %v9243_v53  ;;  %v20982_v53 = vld [vmem:[#allocation28_spill] sm:$0xff] }
 0xe84   :  { %9433 = vmatpush1.msra.mxu1 %v9242_v52 }
 0xe85   :  { %13461 = vmatmul.mubr.msk.f32.vlgmr.msra.gmra.mxu1 %vm9254_vm12, %v9241_v13  ;;  %v15626_v13 = vld [vmem:[%s20754_s14 + $0x30] sm:$0xff]  }
 0xe86   :  { %9647 = vmatprep.mubr.bf16.mxu1 %v20978_v44 }
 0xf35   :  { %v9324_v4 = vpop.f32.mrf.mxu1 }
 0xf36   :  { %v9546_v57 = vrot.slane %v9324_v4, %v20979_v40  ;;  %v15627_v4 = vld [vmem:[%s20754_s14 + $0x68] sm:$0xff]  }
 0xf37   :  { %v9326_v8 = vpop.f32.mrf.mxu1 }
 0xf38   :  { %v9550_v3 = vrot.slane %v9326_v8, %v20979_v40  ;;  %v9561_v20 = vmul.f32 %v9546_v57, %v19835_v1  ;;  %v9555_v1 = vmul.f32 %v9546_v57, %v19824_v26  ;;  %v9558_v46 = vmul.f32 %v9546_v57, %v19830_v38  ;;  %v9600_v38 = vld [vmem:[%s20753_s13] sm:$0xf]  ;;  %v15617_v26 = vld [vmem:[%s20754_s14 + $0xa8] sm:$0xff]  }
 0xf39   :  { %v9539_v54 = vpop.f32.mrf.mxu0  ;;  %v15628_v8 = vld [vmem:[%s20754_s14 + $0x28] sm:$0xff]  }
 0xf3a   :  { %v9575_v39 = vrot.slane %v9539_v54, %v20979_v40  ;;  %v9559_v36 = vmul.f32 %v9550_v3, %v20981_v61  ;;  %v9562_v52 = vmul.f32 %v9550_v3, %v20982_v53  ;;  %v15621_v54 = vld [vmem:[%s20754_s14 + $0x88] sm:$0xff]   ;;  %v15648_v61 = vld [vmem:[%s20754_s14 + $0xe0] sm:$0xff]  }
 0xf3b   :  { %v14394_v63 = vpop.f32.mrf.mxu0  ;;  %v15636_v57 = vld [vmem:[%s20754_s14 + $0x8] sm:$0xff]  }
 0xf3c   :  { %v15629_v63 = vld [vmem:[%s20754_s14 + $0x60] sm:$0xff]  }
 0xf3d   :  { %v9395_v45 = vpop.f32.mrf.mxu1 }
 0xf3e   :  { %v9554_v47 = vrot.slane %v9395_v45, %v20979_v40  ;;  %v15622_v45 = vld [vmem:[%s20754_s14 + $0x80] sm:$0xff]  }
 0xf3f   :  { %v14383_v42 = vpop.f32.mrf.mxu1 }
 0xf40   :  { %v9557_v29 = vmul.f32 %v9554_v47, %v19877_v55  ;;  %v9560_v2 = vmul.f32 %v9554_v47, %v19879_v60  ;;  %v9563_v32 = vmul.f32 %v9554_v47, %v19889_v9  ;;  %v20980_v55 = vld [vmem:[#allocation20_spill] sm:$0xff]  ;;  %v15630_v47 = vld [vmem:[%s20754_s14 + $0x20] sm:$0xff]   ;;  %v15631_v42 = vld [vmem:[%s20754_s14 + $0x58] sm:$0xff]  }
 0xf41   :  { %v9556_v19 = vmul.f32 %v9550_v3, %v20980_v55  ;;  %v15638_v3 = vld [vmem:[%s20754_s14] sm:$0xff]  }
 0xf42   :  { %v9584_v18 = vadd.f32 %v9575_v39, %v9563_v32  ;;  %v9578_v11 = vadd.f32 %v9575_v39, %v9557_v29  ;;  %v9581_v25 = vadd.f32 %v9575_v39, %v9560_v2  ;;  %v15632_v39 = vld [vmem:[%s20754_s14 + $0x18] sm:$0xff]   ;;  %v15633_v29 = vld [vmem:[%s20754_s14 + $0x50] sm:$0xff]   ;;  %v15635_v32 = vld [vmem:[%s20754_s14 + $0x48] sm:$0xff]  }
 0xf43   :  { %v15634_v2 = vld [vmem:[%s20754_s14 + $0x10] sm:$0xff]   ;;  %v13489_v55 = vld [vmem:[%s20753_s13 + $0x4] sm:$0xf] }
 0xf44   :  { %v9593_v37 = vmax.f32 %v9584_v18, 0.0  ;;  %v9587_v34 = vmax.f32 %v9578_v11, 0.0  ;;  %v9590_v9 = vmax.f32 %v9581_v25, 0.0  ;;  %v15637_v18 = vld [vmem:[%s20754_s14 + $0x40] sm:$0xff]  }
 0xf45   :  { %v9468_v23 = vpop.f32.mrf.mxu1 }
 0xf46   :  { %v9567_v62 = vrot.slane %v9468_v23, %v20979_v40  ;;  %v9599_v56 = vpack.c.bf16 %v9593_v37, %v9593_v37  ;;  %v20051_v27 = vpack.c.bf16 %v9590_v9, %v9587_v34 }
 0xf47   :  { %v9470_v60 = vpop.f32.mrf.mxu1 }
 0xf48   :  { %v9582_v14 = vadd.f32 %v9567_v62, %v9561_v20  ;;  %v9571_v59 = vrot.slane %v9470_v60, %v20979_v40  ;;  %v20045_v16 = vsel %vm9605_vm13, %v9599_v56, 0  ;;  %v9576_v48 = vadd.f32 %v9567_v62, %v9555_v1  ;;  %v15645_v20 = vld [vmem:[%s20754_s14 + $0x128] sm:$0xff]   ;;  %v15647_v60 = vld [vmem:[%s20754_s14 + $0x120] sm:$0xff]   ;;  %v15651_v1 = vld [vmem:[%s20754_s14 + $0x110] sm:$0xff]  }
 0xf49   :  { %14396 = vmatpush3.bf16.msra.mxu0 %v20045_v16  ;;  %v9579_v28 = vadd.f32 %v9567_v62, %v9558_v46  ;;  %v15639_v46 = vld [vmem:[%s20754_s14 + $0x158] sm:$0xff]  }
 0xf4a   :  { %v9591_v10 = vmax.f32 %v9582_v14, 0.0  ;;  %v9577_v6 = vadd.f32 %v9571_v59, %v9556_v19  ;;  %v9580_v21 = vadd.f32 %v9571_v59, %v9559_v36  ;;  %v9583_v30 = vadd.f32 %v9571_v59, %v9562_v52  ;;  %14397 = vmatprep.subr.bf16.mxu0 %v20902_v0  ;;  %v15646_v19 = vld [vmem:[%s20754_s14 + $0xe8] sm:$0xff]   ;;  %v15649_v36 = vld [vmem:[%s20754_s14 + $0x118] sm:$0xff]  }
 0xf4b   :  { %v9585_v49 = vmax.f32 %v9576_v48, 0.0  ;;  %v9588_v51 = vmax.f32 %v9579_v28, 0.0  ;;  %v15650_v52 = vld [vmem:[%s20754_s14 + $0xd8] sm:$0xff]   ;;  %v15641_v48 = vld [vmem:[%s20754_s14 + $0x148] sm:$0xff]   ;;  %v15642_v28 = vld [vmem:[%s20754_s14 + $0x140] sm:$0xff]  }
 0xf4c   :  { %v9597_v7 = vpack.c.bf16 %v9591_v10, %v9591_v10  ;;  %v9586_v17 = vmax.f32 %v9577_v6, 0.0  ;;  %v9589_v33 = vmax.f32 %v9580_v21, 0.0  ;;  %v9592_v15 = vmax.f32 %v9583_v30, 0.0  ;;  %v15652_v10 = vld [vmem:[%s20754_s14 + $0xd0] sm:$0xff]   ;;  %v15653_v6 = vld [vmem:[%s20754_s14 + $0x108] sm:$0xff]  }
 0xf4d   :  { %14398 = vmatpush3.bf16.msra.mxu0 %v20051_v27  ;;  %v20080_v5 = vpack.c.bf16 %v9588_v51, %v9585_v49  ;;  %v15640_v21 = vld [vmem:[%s20754_s14 + $0x150] sm:$0xff]   ;;  %v15654_v30 = vld [vmem:[%s20754_s14 + $0xc8] sm:$0xff]  }
 0xf4e   :  { %v20060_v35 = vpack.c.bf16 %v9592_v15, %v9592_v15  ;;  %14403 = vmatprep.subr.bf16.mxu0 %v20902_v0  ;;  %v20063_v50 = vpack.c.bf16 %v9589_v33, %v9586_v17  ;;  %v20069_v24 = vsel %vm9605_vm13, %v9597_v7, 0  ;;  %v15643_v7 = vld [vmem:[%s20754_s14 + $0x138] sm:$0xff]   ;;  %v15644_v17 = vld [vmem:[%s20754_s14 + $0x130] sm:$0xff]   ;;  %v15655_v33 = vld [vmem:[%s20754_s14 + $0x100] sm:$0xff]  }
 0xf4f   :  { %v15656_v15 = vld [vmem:[%s20754_s14 + $0xc0] sm:$0xff]   ;;  %v15659_v49 = vld [vmem:[%s20754_s14 + $0xf0] sm:$0xff]  }
 0xf50   :  { %13463 = vmatprep.subr.msk.bf16.mxu1 %vm9605_vm13, %v20060_v35  ;;  %14400 = vmatmul.mubr.msk.bf16.vlgmr.msra.gmra.mxu0 %vm9601_vm14, %v9600_v38  ;;  %v15660_v51 = vld [vmem:[%s20754_s14 + $0xb0] sm:$0xff]  }
 0xf51   :  { %9628 = vmatpush1.bf16.msra.mxu1 %v20069_v24  ;;  %14404 = vmatpush3.bf16.msra.mxu0 %v15617_v26  ;;  %v15658_v26 = vld [vmem:[%s20754_s14 + $0xb8] sm:$0xff]  }
 0xf52   :  { %9629 = vmatprep.subr.bf16.mxu1 %v20063_v50  ;;  %14405 = vmatprep.subr.bf16.mxu0 %v20902_v0 }
 0xf53   :  { %14415 = vmatprep.mubr.msk.bf16.mxu0 %vm15798_vm11, %v20902_v0 }
 0xf55   :  { %9630 = vmatpush1.bf16.msra.mxu1 %v20080_v5  ;;  %14406 = vmatpush3.bf16.msra.mxu0 %v15618_v31 }
 0xf56   :  { %14407 = vmatprep.subr.bf16.mxu0 %v20902_v0  ;;  %14097 = vmatprep.subr.bf16.mxu1 %v15623_v43 }
 0xf58   :  { %13464 = vmatmul.mubr.msk.bf16.vlgmr.msra.gmra.mxu1 %vm9601_vm14, %v9600_v38  ;;  %v15657_v38 = vld [vmem:[%s20754_s14 + $0xf8] sm:$0xff]  }
 0xf59   :  { %14408 = vmatpush3.bf16.msra.mxu0 %v15619_v12  ;;  %14098 = vmatpush3.bf16.msra.mxu1 %v15624_v41 }
 0xf5a   :  { %14409 = vmatprep.subr.bf16.mxu0 %v20902_v0  ;;  %14099 = vmatprep.subr.bf16.mxu1 %v15625_v58 }
 0xf5d   :  { %14410 = vmatpush3.bf16.msra.mxu0 %v15620_v22  ;;  %14100 = vmatpush3.bf16.msra.mxu1 %v15626_v13 }
 0xf5e   :  { %14411 = vmatprep.subr.bf16.mxu0 %v20902_v0  ;;  %14101 = vmatprep.subr.bf16.mxu1 %v15627_v4 }
 0xf61   :  { %14412 = vmatpush3.bf16.msra.mxu0 %v15621_v54  ;;  %14102 = vmatpush3.bf16.msra.mxu1 %v15628_v8 }
 0xf62   :  { %14413 = vmatprep.subr.bf16.mxu0 %v20902_v0  ;;  %14103 = vmatprep.subr.bf16.mxu1 %v15629_v63 }
 0xf65   :  { %14414 = vmatpush3.bf16.msra.mxu0 %v15622_v45  ;;  %14104 = vmatpush3.bf16.msra.mxu1 %v15630_v47 }
 0xf66   :  { %13490 = vmatprep.subr.msk.bf16.mxu0 %vm9605_vm13, %v20060_v35  ;;  %14105 = vmatprep.subr.bf16.mxu1 %v15631_v42 }
 0xf69   :  { %14106 = vmatpush3.bf16.msra.mxu1 %v15632_v39 }
 0xf6a   :  { %14107 = vmatprep.subr.bf16.mxu1 %v15633_v29 }
 0xf6d   :  { %14108 = vmatpush3.bf16.msra.mxu1 %v15634_v2 }
 0xf6e   :  { %14109 = vmatprep.subr.bf16.mxu1 %v15635_v32  ;;  %v13560_v32 = vld [vmem:[%s20753_s13 + $0x8] sm:$0xf] }
 0xf71   :  { %14110 = vmatpush3.bf16.msra.mxu1 %v15636_v57  ;;  %v15661_v57 = vld [vmem:[%s20754_s14 + $0x208] sm:$0xff]  }
 0xf72   :  { %14111 = vmatprep.subr.bf16.mxu1 %v15637_v18 }
 0xf75   :  { %14112 = vmatpush3.bf16.msra.mxu1 %v15638_v3 }
 0xf76   :  { %14419 = vmatprep.subr.bf16.mxu1 %v20902_v0 }
0x1010   :  { %v9690_v11 = vpop.f32.mrf.mxu0 }
0x1011   :  { %v9698_v25 = vpack.c.bf16 %v9690_v11, %v9690_v11 }
0x1012   :  { %v14401_v37 = vpop.f32.mrf.mxu0 }
0x1013   :  { %14416 = vmatmul.mubr.msk.bf16.vlgmr.msra.gmra.mxu0 %vm5374_vm9, %v9698_v25  ;;  %v15662_v25 = vld [vmem:[%s20754_s14 + $0x200] sm:$0xff]   ;;  %v15667_v37 = vld [vmem:[%s20754_s14 + $0x1d8] sm:$0xff]  }
0x1014   :  { %9977 = vmatpush1.bf16.msra.mxu0 %v20069_v24  ;;  %9996 = vmatprep.mubr.bf16.mxu0 %v20978_v44  ;;  %v9693_v23 = vpop.f32.mrf.mxu0 }
0x1015   :  { %9978 = vmatprep.subr.bf16.mxu0 %v20063_v50 }
0x1016   :  { %v14402_v62 = vpop.f32.mrf.mxu0 }
0x1017   :  { %v15668_v62 = vld [vmem:[%s20754_s14 + $0x198] sm:$0xff]  }
0x1018   :  { %9979 = vmatpush1.bf16.msra.mxu0 %v20080_v5  ;;  %v9649_v56 = vpop.f32.mrf.mxu1 }
0x1019   :  { %14129 = vmatprep.subr.bf16.mxu0 %v15645_v20  ;;  %v9696_v14 = vpack.c.bf16 %v9649_v56, %v9649_v56  ;;  %v15663_v20 = vld [vmem:[%s20754_s14 + $0x1f8] sm:$0xff]   ;;  %v15669_v56 = vld [vmem:[%s20754_s14 + $0x1d0] sm:$0xff]  }
0x101a   :  { %v9651_v34 = vpop.f32.mrf.mxu1 }
0x101b   :  { %v9697_v9 = vpack.c.bf16 %v9651_v34, %v9651_v34  ;;  %13491 = vmatmul.mubr.msk.bf16.vlgmr.msra.gmra.mxu0 %vm9601_vm14, %v13489_v55  ;;  %v15665_v34 = vld [vmem:[%s20754_s14 + $0x1e8] sm:$0xff]  }
0x101c   :  { %v9653_v59 = vpop.f32.mrf.mxu1  ;;  %14130 = vmatpush3.bf16.msra.mxu0 %v15646_v19  ;;  %v15670_v19 = vld [vmem:[%s20754_s14 + $0x190] sm:$0xff]  }
0x101d   :  { %9910 = vmatprep.mubr.bf16.mxu1 %v9697_v9  ;;  %14131 = vmatprep.subr.bf16.mxu0 %v15647_v60  ;;  %v15671_v60 = vld [vmem:[%s20754_s14 + $0x1c8] sm:$0xff]   ;;  %v15673_v59 = vld [vmem:[%s20754_s14 + $0x1c0] sm:$0xff]  }
0x101e   :  { %v9654_v53 = vpop.f32.mrf.mxu1  ;;  %9911 = vmatmul.mubr.bf16.vlgmr.msra.gmra.mxu1 %v9696_v14  ;;  %v15672_v9 = vld [vmem:[%s20754_s14 + $0x188] sm:$0xff]   ;;  %v15666_v14 = vld [vmem:[%s20754_s14 + $0x1e0] sm:$0xff]  }
0x101f   :  { %14420 = vmatpush3.bf16.msra.mxu1 %v20045_v16  ;;  %14423 = vmatprep.mubr.msk.bf16.mxu1 %vm15798_vm11, %v20902_v0  ;;  %v15676_v53 = vld [vmem:[%s20754_s14 + $0x178] sm:$0xff]  }
0x1020   :  { %14421 = vmatprep.subr.bf16.mxu1 %v20902_v0  ;;  %14132 = vmatpush3.bf16.msra.mxu0 %v15648_v61  ;;  %v15674_v61 = vld [vmem:[%s20754_s14 + $0x180] sm:$0xff]  }
0x1021   :  { %14133 = vmatprep.subr.bf16.mxu0 %v15649_v36  ;;  %v15675_v36 = vld [vmem:[%s20754_s14 + $0x1b8] sm:$0xff]  }
0x1023   :  { %14422 = vmatpush3.bf16.msra.mxu1 %v20051_v27 }
0x1024   :  { %14427 = vmatprep.subr.bf16.mxu1 %v20902_v0  ;;  %14134 = vmatpush3.bf16.msra.mxu0 %v15650_v52  ;;  %v15677_v52 = vld [vmem:[%s20754_s14 + $0x1b0] sm:$0xff]  }
0x1025   :  { %14135 = vmatprep.subr.bf16.mxu0 %v15651_v1  ;;  %v15678_v1 = vld [vmem:[%s20754_s14 + $0x170] sm:$0xff]  }
0x1026   :  { %14424 = vmatmul.mubr.msk.bf16.vlgmr.msra.gmra.mxu1 %vm9601_vm14, %v13489_v55  ;;  %v15664_v55 = vld [vmem:[%s20754_s14 + $0x1f0] sm:$0xff]  }
0x1027   :  { %14428 = vmatpush3.bf16.msra.mxu1 %v15639_v46  ;;  %14439 = vmatprep.mubr.msk.bf16.mxu1 %vm15798_vm11, %v20902_v0  ;;  %v15679_v46 = vld [vmem:[%s20754_s14 + $0x1a8] sm:$0xff]  }
0x1028   :  { %14429 = vmatprep.subr.bf16.mxu1 %v20902_v0  ;;  %14136 = vmatpush3.bf16.msra.mxu0 %v15652_v10  ;;  %v15680_v10 = vld [vmem:[%s20754_s14 + $0x168] sm:$0xff]  }
0x1029   :  { %14137 = vmatprep.subr.bf16.mxu0 %v15653_v6  ;;  %v15681_v6 = vld [vmem:[%s20754_s14 + $0x1a0] sm:$0xff]  }
0x102b   :  { %14430 = vmatpush3.bf16.msra.mxu1 %v15640_v21  ;;  %v15682_v21 = vld [vmem:[%s20754_s14 + $0x160] sm:$0xff]  }
0x102c   :  { %14431 = vmatprep.subr.bf16.mxu1 %v20902_v0  ;;  %14138 = vmatpush3.bf16.msra.mxu0 %v15654_v30 }
0x102d   :  { %14139 = vmatprep.subr.bf16.mxu0 %v15655_v33 }
0x102f   :  { %14432 = vmatpush3.bf16.msra.mxu1 %v15641_v48 }
0x1030   :  { %14433 = vmatprep.subr.bf16.mxu1 %v20902_v0  ;;  %14140 = vmatpush3.bf16.msra.mxu0 %v15656_v15 }
0x1031   :  { %14141 = vmatprep.subr.bf16.mxu0 %v15657_v38 }
0x1033   :  { %14434 = vmatpush3.bf16.msra.mxu1 %v15642_v28 }
0x1034   :  { %14435 = vmatprep.subr.bf16.mxu1 %v20902_v0  ;;  %14142 = vmatpush3.bf16.msra.mxu0 %v15658_v26 }
0x1035   :  { %14143 = vmatprep.subr.bf16.mxu0 %v15659_v49 }
0x1037   :  { %14436 = vmatpush3.bf16.msra.mxu1 %v15643_v7 }
0x1038   :  { %14437 = vmatprep.subr.bf16.mxu1 %v20902_v0  ;;  %14144 = vmatpush3.bf16.msra.mxu0 %v15660_v51 }
0x1039   :  { %14443 = vmatprep.subr.bf16.mxu0 %v20902_v0 }
0x103b   :  { %14438 = vmatpush3.bf16.msra.mxu1 %v15644_v17 }
0x103c   :  { %13561 = vmatprep.subr.msk.bf16.mxu1 %vm9605_vm13, %v20060_v35 }
0x10d3   :  { %v9952_v31 = vpop.f32.mrf.mxu0 }
0x10d5   :  { %v14417_v43 = vpop.f32.mrf.mxu0 }
0x10d7   :  { %v9955_v12 = vpop.f32.mrf.mxu0 }
0x10d9   :  { %v14418_v41 = vpop.f32.mrf.mxu0 }
0x10da   :  { %v15689_v41 = vld [vmem:[%s20754_s14 + $0x288] sm:$0xff]  }
0x10db   :  { %v9998_v58 = vpop.f32.mrf.mxu0 }
0x10dc   :  { %v10045_v22 = vpack.c.bf16 %v9998_v58, %v9998_v58 }
0x10dd   :  { %v10000_v13 = vpop.f32.mrf.mxu0 }
0x10de   :  { %v10046_v4 = vpack.c.bf16 %v10000_v13, %v10000_v13  ;;  %v14113_v54 = vpop.f32.mrf.mxu1 }
0x10df   :  { %v10002_v8 = vpop.f32.mrf.mxu0 }
0x10e0   :  { %v14114_v63 = vpop.f32.mrf.mxu1  ;;  %10260 = vmatprep.mubr.bf16.mxu0 %v10046_v4  ;;  %v13631_v4 = vld [vmem:[%s20753_s13 + $0xc] sm:$0xf]  ;;  %v15691_v8 = vld [vmem:[%s20754_s14 + $0x280] sm:$0xff]  }
0x10e1   :  { %v14115_v45 = vadd.f32 %v14114_v63, %v14113_v54  ;;  %10261 = vmatmul.mubr.bf16.vlgmr.msra.gmra.mxu0 %v10045_v22  ;;  %v10003_v47 = vpop.f32.mrf.mxu0  ;;  %v15690_v54 = vld [vmem:[%s20754_s14 + $0x248] sm:$0xff]  }
0x10e2   :  { %14444 = vmatpush3.bf16.msra.mxu0 %v20045_v16  ;;  %v14116_v42 = vpop.f32.mrf.mxu1  ;;  %14447 = vmatprep.mubr.msk.bf16.mxu0 %vm15798_vm11, %v20902_v0 }
0x10e3   :  { %v20245_v39 = vadd.f32 %v14115_v45, %v9952_v31  ;;  %14445 = vmatprep.subr.bf16.mxu0 %v20902_v0 }
0x10e4   :  { %v14117_v29 = vpop.f32.mrf.mxu1 }
0x10e5   :  { %v15693_v29 = vld [vmem:[%s20754_s14 + $0x278] sm:$0xff]  }
0x10e6   :  { %14446 = vmatpush3.bf16.msra.mxu0 %v20051_v27  ;;  %v10039_v2 = vpop.f32.mrf.mxu1 }
0x10e7   :  { %v10047_v18 = vpack.c.bf16 %v10039_v2, %v10039_v2  ;;  %14451 = vmatprep.subr.bf16.mxu0 %v20902_v0 }
0x10e8   :  { %v14425_v3 = vpop.f32.mrf.mxu1 }
0x10e9   :  { %14440 = vmatmul.mubr.msk.bf16.vlgmr.msra.gmra.mxu1 %vm5374_vm9, %v10047_v18  ;;  %14448 = vmatmul.mubr.msk.bf16.vlgmr.msra.gmra.mxu0 %vm9601_vm14, %v13560_v32  ;;  %v15683_v18 = vld [vmem:[%s20754_s14 + $0x2b8] sm:$0xff]   ;;  %v15696_v3 = vld [vmem:[%s20754_s14 + $0x230] sm:$0xff]  }
0x10ea   :  { %10329 = vmatpush1.bf16.msra.mxu1 %v20069_v24  ;;  %14452 = vmatpush3.bf16.msra.mxu0 %v15661_v57  ;;  %v10042_v11 = vpop.f32.mrf.mxu1  ;;  %v15695_v57 = vld [vmem:[%s20754_s14 + $0x270] sm:$0xff]  }
0x10eb   :  { %10330 = vmatprep.subr.bf16.mxu1 %v20063_v50  ;;  %14453 = vmatprep.subr.bf16.mxu0 %v20902_v0  ;;  %v15697_v11 = vld [vmem:[%s20754_s14 + $0x268] sm:$0xff]  }
0x10ec   :  { %v14426_v23 = vpop.f32.mrf.mxu1  ;;  %10348 = vmatprep.mubr.bf16.mxu1 %v20978_v44  ;;  %14463 = vmatprep.mubr.msk.bf16.mxu0 %vm15798_vm11, %v20902_v0 }
0x10ed   :  { %v15685_v23 = vld [vmem:[%s20754_s14 + $0x2a8] sm:$0xff]  }
0x10ee   :  { %10331 = vmatpush1.bf16.msra.mxu1 %v20080_v5  ;;  %14454 = vmatpush3.bf16.msra.mxu0 %v15662_v25  ;;  %v15684_v25 = vld [vmem:[%s20754_s14 + $0x2b0] sm:$0xff]  }
0x10ef   :  { %14455 = vmatprep.subr.bf16.mxu0 %v20902_v0  ;;  %14161 = vmatprep.subr.bf16.mxu1 %v15667_v37  ;;  %v15698_v37 = vld [vmem:[%s20754_s14 + $0x228] sm:$0xff]  }
0x10f1   :  { %13562 = vmatmul.mubr.msk.bf16.vlgmr.msra.gmra.mxu1 %vm9601_vm14, %v13560_v32  ;;  %v15694_v32 = vld [vmem:[%s20754_s14 + $0x238] sm:$0xff]  }
0x10f2   :  { %14456 = vmatpush3.bf16.msra.mxu0 %v15663_v20  ;;  %14162 = vmatpush3.bf16.msra.mxu1 %v15668_v62  ;;  %v15686_v20 = vld [vmem:[%s20754_s14 + $0x2a0] sm:$0xff]   ;;  %v15687_v62 = vld [vmem:[%s20754_s14 + $0x298] sm:$0xff]  }
0x10f3   :  { %14457 = vmatprep.subr.bf16.mxu0 %v20902_v0  ;;  %14163 = vmatprep.subr.bf16.mxu1 %v15669_v56  ;;  %v15688_v56 = vld [vmem:[%s20754_s14 + $0x290] sm:$0xff]  }
0x10f6   :  { %14458 = vmatpush3.bf16.msra.mxu0 %v15664_v55  ;;  %14164 = vmatpush3.bf16.msra.mxu1 %v15670_v19  ;;  %v15699_v55 = vld [vmem:[%s20754_s14 + $0x260] sm:$0xff]  }
0x10f7   :  { %14459 = vmatprep.subr.bf16.mxu0 %v20902_v0  ;;  %14165 = vmatprep.subr.bf16.mxu1 %v15671_v60  ;;  %v15700_v19 = vld [vmem:[%s20754_s14 + $0x220] sm:$0xff]   ;;  %v15701_v60 = vld [vmem:[%s20754_s14 + $0x258] sm:$0xff]  }
0x10fa   :  { %14460 = vmatpush3.bf16.msra.mxu0 %v15665_v34  ;;  %14166 = vmatpush3.bf16.msra.mxu1 %v15672_v9  ;;  %v15702_v34 = vld [vmem:[%s20754_s14 + $0x218] sm:$0xff]   ;;  %v15704_v9 = vld [vmem:[%s20754_s14 + $0x210] sm:$0xff]  }
0x10fb   :  { %14461 = vmatprep.subr.bf16.mxu0 %v20902_v0  ;;  %14167 = vmatprep.subr.bf16.mxu1 %v15673_v59 }
0x10fe   :  { %14462 = vmatpush3.bf16.msra.mxu0 %v15666_v14  ;;  %14168 = vmatpush3.bf16.msra.mxu1 %v15674_v61 }
0x10ff   :  { %13632 = vmatprep.subr.msk.bf16.mxu0 %vm9605_vm13, %v20060_v35  ;;  %14169 = vmatprep.subr.bf16.mxu1 %v15675_v36 }
0x1102   :  { %14170 = vmatpush3.bf16.msra.mxu1 %v15676_v53 }
0x1103   :  { %14171 = vmatprep.subr.bf16.mxu1 %v15677_v52 }
0x1106   :  { %14172 = vmatpush3.bf16.msra.mxu1 %v15678_v1 }
0x1107   :  { %14173 = vmatprep.subr.bf16.mxu1 %v15679_v46 }
0x110a   :  { %14174 = vmatpush3.bf16.msra.mxu1 %v15680_v10 }
0x110b   :  { %14175 = vmatprep.subr.bf16.mxu1 %v15681_v6 }
0x110e   :  { %14176 = vmatpush3.bf16.msra.mxu1 %v15682_v21 }
0x110f   :  { %14467 = vmatprep.subr.bf16.mxu1 %v20902_v0 }
0x11a1   :  { %v14145_v30 = vpop.f32.mrf.mxu0 }
0x11a3   :  { %v14146_v48 = vpop.f32.mrf.mxu0 }
0x11a4   :  { %v14147_v28 = vadd.f32 %v14146_v48, %v14145_v30 }
0x11a5   :  { %v14148_v7 = vpop.f32.mrf.mxu0 }
0x11a7   :  { %v14149_v17 = vpop.f32.mrf.mxu0 }
0x11a9   :  { %v10302_v33 = vpop.f32.mrf.mxu1  ;;  %v10391_v15 = vpop.f32.mrf.mxu0 }
0x11aa   :  { %v10303_v38 = vadd.f32 %v14147_v28, %v10302_v33  ;;  %v10399_v26 = vpack.c.bf16 %v10391_v15, %v10391_v15 }
0x11ab   :  { %v14441_v49 = vpop.f32.mrf.mxu1  ;;  %v14449_v51 = vpop.f32.mrf.mxu0 }
0x11ac   :  { %v20337_v31 = vadd.f32 %v10303_v38, %v20245_v39  ;;  %14464 = vmatmul.mubr.msk.bf16.vlgmr.msra.gmra.mxu0 %vm5374_vm9, %v10399_v26  ;;  %v15692_v39 = vld [vmem:[%s20754_s14 + $0x240] sm:$0xff]   ;;  %v13702_v38 = vld [vmem:[%s20753_s13 + $0x10] sm:$0xf]  ;;  %v15705_v51 = vld [vmem:[%s20754_s14 + $0x338] sm:$0xff]  }
0x11ad   :  { %10681 = vmatpush1.bf16.msra.mxu0 %v20069_v24  ;;  %v10305_v43 = vpop.f32.mrf.mxu1  ;;  %10700 = vmatprep.mubr.bf16.mxu0 %v20978_v44  ;;  %v10394_v12 = vpop.f32.mrf.mxu0 }
0x11ae   :  { %10682 = vmatprep.subr.bf16.mxu0 %v20063_v50  ;;  %v15711_v12 = vld [vmem:[%s20754_s14 + $0x2e8] sm:$0xff]  }
0x11af   :  { %v14442_v58 = vpop.f32.mrf.mxu1  ;;  %v14450_v22 = vpop.f32.mrf.mxu0 }
0x11b0   :  { %v15714_v58 = vld [vmem:[%s20754_s14 + $0x2e0] sm:$0xff]   ;;  %v15715_v22 = vld [vmem:[%s20754_s14 + $0x358] sm:$0xff]  }
0x11b1   :  { %10683 = vmatpush1.bf16.msra.mxu0 %v20080_v5  ;;  %v10350_v13 = vpop.f32.mrf.mxu1 }
0x11b2   :  { %14193 = vmatprep.subr.bf16.mxu0 %v15689_v41  ;;  %v10397_v47 = vpack.c.bf16 %v10350_v13, %v10350_v13  ;;  %v15713_v41 = vld [vmem:[%s20754_s14 + $0x320] sm:$0xff]   ;;  %v15716_v13 = vld [vmem:[%s20754_s14 + $0x318] sm:$0xff]  }
0x11b3   :  { %v10352_v63 = vpop.f32.mrf.mxu1 }
0x11b4   :  { %v10398_v45 = vpack.c.bf16 %v10352_v63, %v10352_v63  ;;  %13633 = vmatmul.mubr.msk.bf16.vlgmr.msra.gmra.mxu0 %vm9601_vm14, %v13631_v4  ;;  %v15720_v63 = vld [vmem:[%s20754_s14 + $0x2d0] sm:$0xff]  }
0x11b5   :  { %v10354_v42 = vpop.f32.mrf.mxu1  ;;  %14194 = vmatpush3.bf16.msra.mxu0 %v15690_v54  ;;  %v15718_v54 = vld [vmem:[%s20754_s14 + $0x350] sm:$0xff]  }
0x11b6   :  { %10612 = vmatprep.mubr.bf16.mxu1 %v10398_v45  ;;  %14195 = vmatprep.subr.bf16.mxu0 %v15691_v8  ;;  %v15719_v8 = vld [vmem:[%s20754_s14 + $0x310] sm:$0xff]   ;;  %v15721_v45 = vld [vmem:[%s20754_s14 + $0x348] sm:$0xff]  }
0x11b7   :  { %v10355_v2 = vpop.f32.mrf.mxu1  ;;  %10613 = vmatmul.mubr.bf16.vlgmr.msra.gmra.mxu1 %v10397_v47  ;;  %v15722_v47 = vld [vmem:[%s20754_s14 + $0x308] sm:$0xff]  }
0x11b8   :  { %14468 = vmatpush3.bf16.msra.mxu1 %v20045_v16  ;;  %14471 = vmatprep.mubr.msk.bf16.mxu1 %vm15798_vm11, %v20902_v0  ;;  %v15723_v42 = vld [vmem:[%s20754_s14 + $0x2c8] sm:$0xff]   ;;  %v15726_v2 = vld [vmem:[%s20754_s14 + $0x2c0] sm:$0xff]  }
0x11b9   :  { %14469 = vmatprep.subr.bf16.mxu1 %v20902_v0  ;;  %14196 = vmatpush3.bf16.msra.mxu0 %v15692_v39  ;;  %v15724_v39 = vld [vmem:[%s20754_s14 + $0x340] sm:$0xff]  }
0x11ba   :  { %14197 = vmatprep.subr.bf16.mxu0 %v15693_v29  ;;  %v15725_v29 = vld [vmem:[%s20754_s14 + $0x300] sm:$0xff]  }
0x11bc   :  { %14470 = vmatpush3.bf16.msra.mxu1 %v20051_v27 }
0x11bd   :  { %14475 = vmatprep.subr.bf16.mxu1 %v20902_v0  ;;  %14198 = vmatpush3.bf16.msra.mxu0 %v15694_v32 }
0x11be   :  { %14199 = vmatprep.subr.bf16.mxu0 %v15695_v57 }
0x11bf   :  { %14472 = vmatmul.mubr.msk.bf16.vlgmr.msra.gmra.mxu1 %vm9601_vm14, %v13631_v4  ;;  %v15717_v4 = vld [vmem:[%s20754_s14 + $0x2d8] sm:$0xff]  }
0x11c0   :  { %14476 = vmatpush3.bf16.msra.mxu1 %v15683_v18  ;;  %14487 = vmatprep.mubr.msk.bf16.mxu1 %vm15798_vm11, %v20902_v0 }
0x11c1   :  { %14477 = vmatprep.subr.bf16.mxu1 %v20902_v0  ;;  %14200 = vmatpush3.bf16.msra.mxu0 %v15696_v3 }
0x11c2   :  { %14201 = vmatprep.subr.bf16.mxu0 %v15697_v11 }
0x11c4   :  { %14478 = vmatpush3.bf16.msra.mxu1 %v15684_v25 }
0x11c5   :  { %14479 = vmatprep.subr.bf16.mxu1 %v20902_v0  ;;  %14202 = vmatpush3.bf16.msra.mxu0 %v15698_v37 }
0x11c6   :  { %14203 = vmatprep.subr.bf16.mxu0 %v15699_v55 }
0x11c8   :  { %14480 = vmatpush3.bf16.msra.mxu1 %v15685_v23 }
0x11c9   :  { %14481 = vmatprep.subr.bf16.mxu1 %v20902_v0  ;;  %14204 = vmatpush3.bf16.msra.mxu0 %v15700_v19 }
0x11ca   :  { %14205 = vmatprep.subr.bf16.mxu0 %v15701_v60  ;;  %v11395_v60 = vld [vmem:[%s20755_s15 + $0x70] sm:$0xff] }
0x11cc   :  { %14482 = vmatpush3.bf16.msra.mxu1 %v15686_v20 }
0x11cd   :  { %14483 = vmatprep.subr.bf16.mxu1 %v20902_v0  ;;  %14206 = vmatpush3.bf16.msra.mxu0 %v15702_v34 }
0x11d0   :  { %14484 = vmatpush3.bf16.msra.mxu1 %v15687_v62  ;;  %v11396_v62 = vld [vmem:[%s20755_s15 + $0x78] sm:$0xff] }
0x11d1   :  { %14485 = vmatprep.subr.bf16.mxu1 %v20902_v0 }
0x11d4   :  { %14486 = vmatpush3.bf16.msra.mxu1 %v15688_v56 }
0x11d5   :  { %13703 = vmatprep.subr.msk.bf16.mxu1 %vm9605_vm13, %v20060_v35  ;;  %v15703_v35 = vld [vmem:[%s20754_s14 + $0x250] sm:$0xff]  }
0x11d6   :  { %14207 = vmatprep.subr.bf16.mxu0 %v15703_v35 }
0x11d7   :  { %14208 = vmatpush3.bf16.msra.mxu0 %v15704_v9  ;;  %v11394_v9 = vld [vmem:[%s20755_s15 + $0x68] sm:$0xff] }
0x11d8   :  { %14491 = vmatprep.subr.bf16.mxu0 %v20902_v0 }
0x126c   :  { %v10654_v14 = vpop.f32.mrf.mxu0 }
0x126e   :  { %v14465_v59 = vpop.f32.mrf.mxu0 }
0x1270   :  { %v10657_v61 = vpop.f32.mrf.mxu0 }
0x1271   :  { %v11393_v61 = vld [vmem:[%s20755_s15 + $0x60] sm:$0xff] }
0x1272   :  { %v14466_v36 = vpop.f32.mrf.mxu0 }
0x1274   :  { %v10702_v53 = vpop.f32.mrf.mxu0 }
0x1275   :  { %v10749_v52 = vpack.c.bf16 %v10702_v53, %v10702_v53 }
0x1276   :  { %v10704_v1 = vpop.f32.mrf.mxu0 }
0x1277   :  { %v10750_v46 = vpack.c.bf16 %v10704_v1, %v10704_v1  ;;  %v14177_v10 = vpop.f32.mrf.mxu1 }
0x1278   :  { %v10706_v6 = vpop.f32.mrf.mxu0 }
0x1279   :  { %v14178_v21 = vpop.f32.mrf.mxu1  ;;  %10964 = vmatprep.mubr.bf16.mxu0 %v10750_v46  ;;  %v11392_v6 = vld [vmem:[%s20755_s15 + $0x58] sm:$0xff] }
0x127a   :  { %v14179_v30 = vadd.f32 %v14178_v21, %v14177_v10  ;;  %10965 = vmatmul.mubr.bf16.vlgmr.msra.gmra.mxu0 %v10749_v52  ;;  %v10707_v48 = vpop.f32.mrf.mxu0  ;;  %v11391_v21 = vld [vmem:[%s20755_s15 + $0x50] sm:$0xff] }
0x127b   :  { %14492 = vmatpush3.bf16.msra.mxu0 %v20045_v16  ;;  %v14180_v28 = vpop.f32.mrf.mxu1  ;;  %14495 = vmatprep.mubr.msk.bf16.mxu0 %vm15798_vm11, %v20902_v0  ;;  %v15709_v16 = vld [vmem:[%s20754_s14 + $0x368] sm:$0xff]   ;;  %v11389_v48 = vld [vmem:[%s20755_s15 + $0x40] sm:$0xff] }
0x127c   :  { %v10655_v7 = vadd.f32 %v14179_v30, %v10654_v14  ;;  %14493 = vmatprep.subr.bf16.mxu0 %v20902_v0  ;;  %v11390_v30 = vld [vmem:[%s20755_s15 + $0x48] sm:$0xff]  ;;  %v11388_v28 = vld [vmem:[%s20755_s15 + $0x38] sm:$0xff] }
0x127d   :  { %v14181_v17 = vpop.f32.mrf.mxu1 }
0x127e   :  { %v20436_v33 = vadd.f32 %v10655_v7, %v20337_v31  ;;  %v15712_v31 = vld [vmem:[%s20754_s14 + $0x360] sm:$0xff]   ;;  %v11387_v7 = vld [vmem:[%s20755_s15 + $0x30] sm:$0xff]  ;;  %v11386_v17 = vld [vmem:[%s20755_s15 + $0x28] sm:$0xff] }
0x127f   :  { %14494 = vmatpush3.bf16.msra.mxu0 %v20051_v27  ;;  %v10743_v15 = vpop.f32.mrf.mxu1 }
0x1280   :  { %v10751_v26 = vpack.c.bf16 %v10743_v15, %v10743_v15  ;;  %14499 = vmatprep.subr.bf16.mxu0 %v20902_v0  ;;  %v11384_v15 = vld [vmem:[%s20755_s15 + $0x18] sm:$0xff] }
0x1281   :  { %v14473_v49 = vpop.f32.mrf.mxu1 }
0x1282   :  { %14488 = vmatmul.mubr.msk.bf16.vlgmr.msra.gmra.mxu1 %vm5374_vm9, %v10751_v26  ;;  %14496 = vmatmul.mubr.msk.bf16.vlgmr.msra.gmra.mxu0 %vm9601_vm14, %v13702_v38  ;;  %v11382_v26 = vld [vmem:[%s20755_s15 + $0x8] sm:$0xff] }
0x1283   :  { %11033 = vmatpush1.bf16.msra.mxu1 %v20069_v24  ;;  %v10746_v27 = vpop.f32.mrf.mxu1  ;;  %11052 = vmatprep.mubr.bf16.mxu1 %v20978_v44  ;;  %v15706_v44 = vld [vmem:[%s20754_s14 + $0x2f8] sm:$0xff]   ;;  %v15708_v24 = vld [vmem:[%s20754_s14 + $0x2f0] sm:$0xff]  }
0x1284   :  { %11034 = vmatprep.subr.bf16.mxu1 %v20063_v50  ;;  %14500 = vmatpush3.bf16.msra.mxu0 %v15709_v16  ;;  %v15707_v50 = vld [vmem:[%s20754_s14 + $0x330] sm:$0xff]   ;;  %v11381_v16 = vld [vmem:[%s20755_s15] sm:$0xff] }
0x1285   :  { %v14474_v43 = vpop.f32.mrf.mxu1  ;;  %14501 = vmatprep.subr.bf16.mxu0 %v20902_v0  ;;  %14511 = vmatprep.mubr.msk.bf16.mxu0 %vm15798_vm11, %v20902_v0 }
0x1287   :  { %11035 = vmatpush1.bf16.msra.mxu1 %v20080_v5  ;;  %v15710_v5 = vld [vmem:[%s20754_s14 + $0x328] sm:$0xff]  }
0x1288   :  { %14225 = vmatprep.subr.bf16.mxu1 %v15705_v51  ;;  %14502 = vmatpush3.bf16.msra.mxu0 %v15712_v31 }
0x1289   :  { %14503 = vmatprep.subr.bf16.mxu0 %v20902_v0 }
0x128a   :  { %13704 = vmatmul.mubr.msk.bf16.vlgmr.msra.gmra.mxu1 %vm9601_vm14, %v13702_v38  ;;  %v11383_v38 = vld [vmem:[%s20755_s15 + $0x10] sm:$0xff] }
0x128b   :  { %14226 = vmatpush3.bf16.msra.mxu1 %v15706_v44 }
0x128c   :  { %14227 = vmatprep.subr.bf16.mxu1 %v15707_v50  ;;  %14504 = vmatpush3.bf16.msra.mxu0 %v15715_v22 }
0x128d   :  { %14505 = vmatprep.subr.bf16.mxu0 %v20902_v0 }
0x128f   :  { %14228 = vmatpush3.bf16.msra.mxu1 %v15708_v24 }
0x1290   :  { %14229 = vmatprep.subr.bf16.mxu1 %v15710_v5  ;;  %14506 = vmatpush3.bf16.msra.mxu0 %v15718_v54 }
0x1291   :  { %14507 = vmatprep.subr.bf16.mxu0 %v20902_v0 }
0x1293   :  { %14230 = vmatpush3.bf16.msra.mxu1 %v15711_v12 }
0x1294   :  { %14231 = vmatprep.subr.bf16.mxu1 %v15713_v41  ;;  %14508 = vmatpush3.bf16.msra.mxu0 %v15721_v45 }
0x1295   :  { %14509 = vmatprep.subr.bf16.mxu0 %v20902_v0 }
0x1297   :  { %14232 = vmatpush3.bf16.msra.mxu1 %v15714_v58 }
0x1298   :  { %14233 = vmatprep.subr.bf16.mxu1 %v15716_v13  ;;  %14510 = vmatpush3.bf16.msra.mxu0 %v15724_v39 }
0x1299   :  { %14515 = vmatprep.subr.mxu0 %v20902_v0 }
0x129b   :  { %14234 = vmatpush3.bf16.msra.mxu1 %v15717_v4 }
0x129c   :  { %14235 = vmatprep.subr.bf16.mxu1 %v15719_v8 }
0x129f   :  { %14236 = vmatpush3.bf16.msra.mxu1 %v15720_v63 }
0x12a0   :  { %14237 = vmatprep.subr.bf16.mxu1 %v15722_v47 }
0x12a3   :  { %14238 = vmatpush3.bf16.msra.mxu1 %v15723_v42 }
0x12a4   :  { %14239 = vmatprep.subr.bf16.mxu1 %v15725_v29 }
0x12a7   :  { %14240 = vmatpush3.bf16.msra.mxu1 %v15726_v2 }
0x12a8   :  { %14550 = vmatprep.subr.mxu1 %v20902_v0 }
0x133a   :  { %v14209_v32 = vpop.f32.mrf.mxu0 }
0x133c   :  { %v14210_v57 = vpop.f32.mrf.mxu0 }
0x133d   :  { %v14211_v18 = vadd.f32 %v14210_v57, %v14209_v32  ;;  %v11553_v32 = vld [vmem:[%s20756_s16 + $0x18] sm:$0xff]  ;;  %v11552_v57 = vld [vmem:[%s20756_s16 + $0x10] sm:$0xff] }
0x133e   :  { %v14212_v3 = vpop.f32.mrf.mxu0 }
0x133f   :  { %v11550_v3 = vld [vmem:[%s20756_s16] sm:$0xff] }
0x1340   :  { %v14213_v11 = vpop.f32.mrf.mxu0 }
0x1342   :  { %v11006_v25 = vpop.f32.mrf.mxu1  ;;  %v11095_v37 = vpop.f32.mrf.mxu0 }
0x1343   :  { %v11007_v23 = vadd.f32 %v14211_v18, %v11006_v25  ;;  %v11103_v20 = vpack.c.bf16 %v11095_v37, %v11095_v37  ;;  %v11551_v18 = vld [vmem:[%s20756_s16 + $0x8] sm:$0xff] }
0x1344   :  { %v14489_v56 = vpop.f32.mrf.mxu1  ;;  %v14497_v55 = vpop.f32.mrf.mxu0 }
0x1345   :  { %v20529_v19 = vadd.f32 %v11007_v23, %v20436_v33  ;;  %14512 = vmatmul.mubr.msk.bf16.vlgmr.msra.gmra.mxu0 %vm5374_vm9, %v11103_v20  ;;  %v11385_v33 = vld [vmem:[%s20755_s15 + $0x20] sm:$0xff] }
0x1346   :  { %v11009_v34 = vpop.f32.mrf.mxu1  ;;  %v11098_v35 = vpop.f32.mrf.mxu0  ;;  %14516 = vmatpush3.msra.mxu0 %v11396_v62  ;;  %14547 = vmatprep.mubr.msk.f32.mxu0 %vm15798_vm11, %v20902_v0 }
0x1347   :  { %14517 = vmatprep.subr.mxu0 %v20902_v0  ;;  %v11543_v34 = vld [vmem:[%s20757_s17] sm:$0x1] }
0x1348   :  { %v14490_v14 = vpop.f32.mrf.mxu1  ;;  %v14498_v59 = vpop.f32.mrf.mxu0  ;;  %14518 = vmatpush3.msra.mxu0 %v11395_v60 }
0x1349   :  { %14519 = vmatprep.subr.mxu0 %v20902_v0  ;;  %v11726_v14 = vld [vmem:[%s20759_s19 + $0x78] sm:$0xff]  ;;  %v11547_v59 = vld [vmem:[%s20758_s18] sm:$0x1] }
0x134a   :  { %v11054_v36 = vpop.f32.mrf.mxu1  ;;  %14520 = vmatpush3.msra.mxu0 %v11394_v9 }
0x134b   :  { %14521 = vmatprep.subr.mxu0 %v20902_v0  ;;  %v11101_v1 = vpack.c.bf16 %v11054_v36, %v11054_v36  ;;  %v11725_v36 = vld [vmem:[%s20759_s19 + $0x70] sm:$0xff] }
0x134c   :  { %v11056_v53 = vpop.f32.mrf.mxu1  ;;  %14522 = vmatpush3.msra.mxu0 %v11393_v61 }
0x134d   :  { %v11102_v52 = vpack.c.bf16 %v11056_v53, %v11056_v53  ;;  %14523 = vmatprep.subr.mxu0 %v20902_v0 }
0x134e   :  { %v11058_v46 = vpop.f32.mrf.mxu1  ;;  %14524 = vmatpush3.msra.mxu0 %v11392_v6 }
0x134f   :  { %11316 = vmatprep.mubr.bf16.mxu1 %v11102_v52  ;;  %14525 = vmatprep.subr.mxu0 %v20902_v0  ;;  %v11724_v52 = vld [vmem:[%s20759_s19 + $0x68] sm:$0xff]  ;;  %v11722_v46 = vld [vmem:[%s20759_s19 + $0x58] sm:$0xff] }
0x1350   :  { %v11059_v10 = vpop.f32.mrf.mxu1  ;;  %11317 = vmatmul.mubr.bf16.vlgmr.msra.gmra.mxu1 %v11101_v1  ;;  %14526 = vmatpush3.msra.mxu0 %v11391_v21  ;;  %v11723_v1 = vld [vmem:[%s20759_s19 + $0x60] sm:$0xff] }
0x1351   :  { %14551 = vmatpush3.msra.mxu1 %v11396_v62  ;;  %14582 = vmatprep.mubr.msk.f32.mxu1 %vm15798_vm11, %v20902_v0  ;;  %v11721_v10 = vld [vmem:[%s20759_s19 + $0x50] sm:$0xff] }
0x1352   :  { %14552 = vmatprep.subr.mxu1 %v20902_v0  ;;  %14527 = vmatprep.subr.mxu0 %v20902_v0 }
0x1353   :  { %14553 = vmatpush3.msra.mxu1 %v11395_v60  ;;  %14528 = vmatpush3.msra.mxu0 %v11390_v30 }
0x1354   :  { %14554 = vmatprep.subr.mxu1 %v20902_v0  ;;  %14529 = vmatprep.subr.mxu0 %v20902_v0 }
0x1355   :  { %14555 = vmatpush3.msra.mxu1 %v11394_v9  ;;  %14530 = vmatpush3.msra.mxu0 %v11389_v48 }
0x1356   :  { %14556 = vmatprep.subr.mxu1 %v20902_v0  ;;  %14531 = vmatprep.subr.mxu0 %v20902_v0 }
0x1357   :  { %14557 = vmatpush3.msra.mxu1 %v11393_v61  ;;  %14532 = vmatpush3.msra.mxu0 %v11388_v28 }
0x1358   :  { %14558 = vmatprep.subr.mxu1 %v20902_v0  ;;  %14533 = vmatprep.subr.mxu0 %v20902_v0 }
0x1359   :  { %14559 = vmatpush3.msra.mxu1 %v11392_v6  ;;  %14534 = vmatpush3.msra.mxu0 %v11387_v7  ;;  %v11720_v6 = vld [vmem:[%s20759_s19 + $0x48] sm:$0xff] }
0x135a   :  { %14560 = vmatprep.subr.mxu1 %v20902_v0  ;;  %14535 = vmatprep.subr.mxu0 %v20902_v0 }
0x135b   :  { %14561 = vmatpush3.msra.mxu1 %v11391_v21  ;;  %14536 = vmatpush3.msra.mxu0 %v11386_v17  ;;  %v11719_v21 = vld [vmem:[%s20759_s19 + $0x40] sm:$0xff] }
0x135c   :  { %14562 = vmatprep.subr.mxu1 %v20902_v0  ;;  %14537 = vmatprep.subr.mxu0 %v20902_v0 }
0x135d   :  { %14563 = vmatpush3.msra.mxu1 %v11390_v30  ;;  %14538 = vmatpush3.msra.mxu0 %v11385_v33  ;;  %v11718_v30 = vld [vmem:[%s20759_s19 + $0x38] sm:$0xff] }
0x135e   :  { %14564 = vmatprep.subr.mxu1 %v20902_v0  ;;  %14539 = vmatprep.subr.mxu0 %v20902_v0 }
0x135f   :  { %14565 = vmatpush3.msra.mxu1 %v11389_v48  ;;  %14540 = vmatpush3.msra.mxu0 %v11384_v15  ;;  %v11717_v48 = vld [vmem:[%s20759_s19 + $0x30] sm:$0xff] }
0x1360   :  { %14566 = vmatprep.subr.mxu1 %v20902_v0  ;;  %14541 = vmatprep.subr.mxu0 %v20902_v0 }
0x1361   :  { %14567 = vmatpush3.msra.mxu1 %v11388_v28  ;;  %14542 = vmatpush3.msra.mxu0 %v11383_v38  ;;  %v11716_v28 = vld [vmem:[%s20759_s19 + $0x28] sm:$0xff] }
0x1362   :  { %14568 = vmatprep.subr.mxu1 %v20902_v0  ;;  %14543 = vmatprep.subr.mxu0 %v20902_v0 }
0x1363   :  { %14569 = vmatpush3.msra.mxu1 %v11387_v7  ;;  %14544 = vmatpush3.msra.mxu0 %v11382_v26  ;;  %v11715_v7 = vld [vmem:[%s20759_s19 + $0x20] sm:$0xff] }
0x1364   :  { %14570 = vmatprep.subr.mxu1 %v20902_v0  ;;  %14545 = vmatprep.subr.mxu0 %v20902_v0 }
0x1365   :  { %14571 = vmatpush3.msra.mxu1 %v11386_v17  ;;  %14546 = vmatpush3.msra.mxu0 %v11381_v16  ;;  %v11714_v17 = vld [vmem:[%s20759_s19 + $0x18] sm:$0xff] }
0x1366   :  { %14572 = vmatprep.subr.mxu1 %v20902_v0  ;;  %14585 = vmatprep.subr.mxu0 %v20902_v0 }
0x1367   :  { %14573 = vmatpush3.msra.mxu1 %v11385_v33  ;;  %v11713_v33 = vld [vmem:[%s20759_s19 + $0x10] sm:$0xff] }
0x1368   :  { %14574 = vmatprep.subr.mxu1 %v20902_v0 }
0x1369   :  { %14575 = vmatpush3.msra.mxu1 %v11384_v15  ;;  %v11712_v15 = vld [vmem:[%s20759_s19 + $0x8] sm:$0xff] }
0x136a   :  { %14576 = vmatprep.subr.mxu1 %v20902_v0 }
0x136b   :  { %14577 = vmatpush3.msra.mxu1 %v11383_v38  ;;  %v11711_v38 = vld [vmem:[%s20759_s19] sm:$0xff] }
0x136c   :  { %14578 = vmatprep.subr.mxu1 %v20902_v0 }
0x136d   :  { %14579 = vmatpush3.msra.mxu1 %v11382_v26 }
0x136e   :  { %14580 = vmatprep.subr.mxu1 %v20902_v0 }
0x136f   :  { %14581 = vmatpush3.msra.mxu1 %v11381_v16 }
0x1370   :  { %14596 = vmatprep.subr.mxu1 %v20902_v0 }
0x1405   :  { %v11358_v49 = vpop.f32.mrf.mxu0 }
0x1407   :  { %v14513_v27 = vpop.f32.mrf.mxu0 }
0x1409   :  { %v11361_v51 = vpop.f32.mrf.mxu0 }
0x140b   :  { %v14514_v31 = vpop.f32.mrf.mxu0 }
0x1410   :  { %v14241_v43 = vpop.f32.mrf.mxu1 }
0x1412   :  { %v14242_v44 = vpop.f32.mrf.mxu1 }
0x1413   :  { %v14243_v50 = vadd.f32 %v14242_v44, %v14241_v43 }
0x1414   :  { %v14244_v24 = vpop.f32.mrf.mxu1 }
0x1415   :  { %v11359_v5 = vadd.f32 %v14243_v50, %v11358_v49  ;;  %v11799_v24 = vld [vmem:[%s20761_s21] sm:$0xff] }
0x1416   :  { %v14245_v12 = vpop.f32.mrf.mxu1 }
0x1417   :  { %v20614_v41 = vadd.f32 %v11359_v5, %v20529_v19  ;;  %v11797_v5 = vld [vmem:[%s20760_s20] sm:$0xff]  ;;  %s15799_s20 = smov [#allocation5]  }
0x1418   :  { %s11963_s15 = sshll.u32 %s15799_s20, 4  ;;  %s11964_s15 = int_to_ptr.vmem [resolvable:$true] %s11963_s15 }
0x1419   :  { %v11368_v58 = vrot.slane %v20614_v41, 4  ;;  %v11374_v22 = vmul.f32 %v20614_v41, %v20614_v41  ;;  %s15774_s4 = scalar_lea.vmem %s11964_s15, 32  ;;  %p15779_p1 = scmp.lt.s32.totalorder %s11964_s15, %s11964_s15 }
0x141a   :  { %p15775_p0 = scmp.ne.s32.totalorder %s11964_s15, %s15774_s4  ;;  %p15780_p2 = scmp.lt.s32.totalorder %s15774_s4, %s15774_s4 }
0x141b   :  { %v11369_v13 = vadd.f32 %v11368_v58, %v20614_v41  ;;  %v11375_v4 = vrot.slane %v11374_v22, 4 }
0x141c   :  { %p15781_p3 = por %p15780_p2, %p15779_p1 }
0x141d   :  { %v11370_v54 = vrot.slane %v11369_v13, 2  ;;  %v11376_v8 = vadd.f32 %v11375_v4, %v11374_v22  ;;  %v13776_v4 = vld [vmem:[%s20763_s23] ss:$0 sm:$0xff] }
0x141e   :  { %p15782_p4 = pnand %p15781_p3, %p15775_p0 }
0x141f   :  { %v11371_v63 = vadd.f32 %v11370_v54, %v11369_v13  ;;  %v11377_v45 = vrot.slane %v11376_v8, 2 }
0x1421   :  { %v11372_v47 = vrot.slane %v11371_v63, 1  ;;  %v11378_v42 = vadd.f32 %v11377_v45, %v11376_v8 }
0x1423   :  { %v11373_v39 = vadd.f32 %v11372_v47, %v11371_v63  ;;  %v11379_v29 = vrot.slane %v11378_v42, 1 }
0x1425   :  { %14548 = vmatmul.mubr.f32.vlgmr.msra.gmra.mxu0 %v11373_v39  ;;  %v11380_v2 = vadd.f32 %v11379_v29, %v11378_v42 }
0x1426   :  { %14593 = vmatprep.mubr.msk.f32.mxu0 %vm15798_vm11, %v20902_v0  ;;  %14586 = vmatpush3.msra.mxu0 %v11553_v32 }
0x1427   :  { %14583 = vmatmul.mubr.f32.vlgmr.msra.gmra.mxu1 %v11380_v2  ;;  %14587 = vmatprep.subr.mxu0 %v20902_v0 }
0x1428   :  { %14604 = vmatprep.mubr.msk.f32.mxu1 %vm15798_vm11, %v20902_v0  ;;  %14597 = vmatpush3.msra.mxu1 %v11553_v32 }
0x1429   :  { %14598 = vmatprep.subr.mxu1 %v20902_v0  ;;  %14588 = vmatpush3.msra.mxu0 %v11552_v57 }
0x142a   :  { %14599 = vmatpush3.msra.mxu1 %v11552_v57  ;;  %14589 = vmatprep.subr.mxu0 %v20902_v0 }
0x142b   :  { %14600 = vmatprep.subr.mxu1 %v20902_v0  ;;  %14590 = vmatpush3.msra.mxu0 %v11551_v18 }
0x142c   :  { %14601 = vmatpush3.msra.mxu1 %v11551_v18  ;;  %14591 = vmatprep.subr.mxu0 %v20902_v0 }
0x142d   :  { %14602 = vmatprep.subr.mxu1 %v20902_v0  ;;  %14592 = vmatpush3.msra.mxu0 %v11550_v3 }
0x142e   :  { %14603 = vmatpush3.msra.mxu1 %v11550_v3  ;;  %14607 = vmatprep.subr.mxu0 %v20902_v0 }
0x142f   :  { %14642 = vmatprep.subr.mxu1 %v20902_v0 }
0x14e5   :  { %v11463_v11 = vpop.f32.mrf.mxu0 }
0x14e6   :  { %v11468_v25 = vmul.f32 0.03125, %v11463_v11 }
0x14e7   :  { %v14549_v37 = vpop.f32.mrf.mxu0  ;;  %v11535_v23 = vpop.f32.mrf.mxu1 }
0x14e8   :  { %v11540_v20 = vmul.f32 %v11468_v25, %v11468_v25  ;;  %v11539_v62 = vmul.f32 0.03125, %v11535_v23 }
0x14e9   :  { %v14584_v56 = vpop.f32.mrf.mxu1 }
0x14ea   :  { %v11541_v55 = vsub.f32 %v11539_v62, %v11540_v20 }
0x14ec   :  { %v11542_v19 = vmax.f32 %v11541_v55, 0.0 }
0x14ee   :  { %v11544_v60 = vadd.f32 1e-05, %v11542_v19 }
0x14f0   :  { %15731 = vrsqrt.f32 %v11544_v60 }
0x14fd   :  { %v15732_v35 = vpop.eup %15731 }
0x14fe   :  { %v11546_v9 = vmul.f32 %v15732_v35, %v11543_v34 }
0x1500   :  { %14594 = vmatmul.mubr.msk.f32.vlgmr.msra.gmra.mxu0 %vm9254_vm12, %v11546_v9  ;;  %v11548_v61 = vmul.f32 %v11546_v9, %v11468_v25 }
0x1501   :  { %14608 = vmatpush3.msra.mxu0 %v11726_v14  ;;  %14639 = vmatprep.mubr.msk.f32.mxu0 %vm15798_vm11, %v20902_v0 }
0x1502   :  { %v11549_v53 = vsub.f32 %v11547_v59, %v11548_v61  ;;  %14609 = vmatprep.subr.mxu0 %v20902_v0 }
0x1503   :  { %14610 = vmatpush3.msra.mxu0 %v11725_v36 }
0x1504   :  { %14605 = vmatmul.mubr.msk.f32.vlgmr.msra.gmra.mxu1 %vm9254_vm12, %v11549_v53  ;;  %14611 = vmatprep.subr.mxu0 %v20902_v0 }
0x1505   :  { %14612 = vmatpush3.msra.mxu0 %v11724_v52  ;;  %14644 = vmatprep.mubr.msk.f32.mxu1 %vm15798_vm11, %v20902_v0 }
0x1506   :  { %14613 = vmatprep.subr.mxu0 %v20902_v0  ;;  %14643 = vmatpush3.msra.mxu1 %v11799_v24 }
0x1507   :  { %14614 = vmatpush3.msra.mxu0 %v11723_v1  ;;  %14647 = vmatprep.subr.mxu1 %v20902_v0 }
0x1508   :  { %14615 = vmatprep.subr.mxu0 %v20902_v0 }
0x1509   :  { %14616 = vmatpush3.msra.mxu0 %v11722_v46 }
0x150a   :  { %14617 = vmatprep.subr.mxu0 %v20902_v0 }
0x150b   :  { %14618 = vmatpush3.msra.mxu0 %v11721_v10 }
0x150c   :  { %14619 = vmatprep.subr.mxu0 %v20902_v0 }
0x150d   :  { %14620 = vmatpush3.msra.mxu0 %v11720_v6 }
0x150e   :  { %14621 = vmatprep.subr.mxu0 %v20902_v0 }
0x150f   :  { %14622 = vmatpush3.msra.mxu0 %v11719_v21 }
0x1510   :  { %14623 = vmatprep.subr.mxu0 %v20902_v0 }
0x1511   :  { %14624 = vmatpush3.msra.mxu0 %v11718_v30 }
0x1512   :  { %14625 = vmatprep.subr.mxu0 %v20902_v0 }
0x1513   :  { %14626 = vmatpush3.msra.mxu0 %v11717_v48 }
0x1514   :  { %14627 = vmatprep.subr.mxu0 %v20902_v0 }
0x1515   :  { %14628 = vmatpush3.msra.mxu0 %v11716_v28 }
0x1516   :  { %14629 = vmatprep.subr.mxu0 %v20902_v0 }
0x1517   :  { %14630 = vmatpush3.msra.mxu0 %v11715_v7 }
0x1518   :  { %14631 = vmatprep.subr.mxu0 %v20902_v0 }
0x1519   :  { %14632 = vmatpush3.msra.mxu0 %v11714_v17 }
0x151a   :  { %14633 = vmatprep.subr.mxu0 %v20902_v0 }
0x151b   :  { %14634 = vmatpush3.msra.mxu0 %v11713_v33 }
0x151c   :  { %14635 = vmatprep.subr.mxu0 %v20902_v0 }
0x151d   :  { %14636 = vmatpush3.msra.mxu0 %v11712_v15 }
0x151e   :  { %14637 = vmatprep.subr.mxu0 %v20902_v0 }
0x151f   :  { %14638 = vmatpush3.msra.mxu0 %v11711_v38 }
0x15c0   :  { %v11623_v26 = vpop.f32.mrf.mxu0 }
0x15c1   :  { %v11703_v16 = vrot.slane %v11623_v26, %v20979_v40 }
0x15c2   :  { %v14595_v49 = vpop.f32.mrf.mxu0 }
0x15c3   :  { %v11704_v51 = vmul.f32 %v11703_v16, %v20614_v41 }
0x15c4   :  { %v11696_v27 = vpop.f32.mrf.mxu1 }
0x15c5   :  { %v11708_v31 = vrot.slane %v11696_v27, %v20979_v40  ;;  %v11874_v40 = vld [vmem:[%s20762_s22] sm:$0x3] }
0x15c6   :  { %v14606_v43 = vpop.f32.mrf.mxu1 }
0x15c7   :  { %v11709_v44 = vadd.f32 %v11708_v31, %v11704_v51 }
0x15c9   :  { %v11710_v50 = vmax.f32 %v11709_v44, 0.0 }
0x15cb   :  { %14640 = vmatmul.mubr.f32.vlgmr.msra.gmra.mxu0 %v11710_v50 }
0x168b   :  { %v11793_v12 = vpop.f32.mrf.mxu0 }
0x168c   :  { %v11798_v41 = vmul.f32 %v11797_v5, %v11793_v12 }
0x168d   :  { %v14641_v58 = vpop.f32.mrf.mxu0 }
0x168e   :  { %14645 = vmatmul.mubr.msk.f32.vlgmr.msra.gmra.mxu1 %vm11800_vm15, %v11798_v41 }
0x168f   :  { %14649 = vmatprep.mubr.msk.f32.mxu1 %vm15798_vm11, %v20902_v0 }
0x174e   :  { %v11870_v22 = vpop.f32.mrf.mxu1 }
0x174f   :  { %14648 = vmatpush3.msra.mxu1 %v11870_v22 }
0x1750   :  { %v14646_v13 = vpop.f32.mrf.mxu1  ;;  %14650 = vmatmul.mubr.msk.f32.vlgmr.msra.gmra.mxu1 %vm11800_vm15, %v11874_v40 }
0x1810   :  { %v11951_v54 = vpop.f32.mrf.mxu1 }
0x1811   :  { %v11952_v8 = vadd.f32 %v13776_v4, %v11951_v54 }
0x1812   :  { %v14651_v63 = vpop.f32.mrf.mxu1 }
0x1813   :  { %11956 = vst.msk [vmem:[#allocation5] sm:$0x3] %vm11955_vm0, %v11952_v8 }
0x1814   :  { %15785 = shalt.err (!%p15782_p4)
}
0x1815   :  { %11966 = dma.vmem_to_hbm [thread:$0]  %s11964_s15, 32, %s20764_s24, [#allocation6]  }
0x1816   :  { %15794 = dma.done.wait [#allocation6], 32  }
0x1817   :  { %15795 = vsyncadd [#allocation6], 4294967264 }
0x1818   :  { %11970 = vsyncpa [#allocation6], 1 }

</bundles_post_ra>
